<compile_context>
chip_gen: v5e
topology: v5e:2x2
jax: 0.10.0
libtpu: 0.0.40
codegen_flags: <defaults>
</compile_context>

<pallas_src>
import functools

import jax
import jax.numpy as jnp
from jax.experimental import pallas as pl
from jax.experimental.pallas import tpu as pltpu


def _vae_kernel(
    x_ref, eps_ref,
    w1_ref, b1_ref,        # encoder: input_dim -> 768
    w2_ref, b2_ref,        # encoder: 768 -> 512
    wh_ref, bh_ref,        # fused mu|logvar head: 512 -> 2*latent_dim
    wd1_ref, bd1_ref,      # decoder: latent_dim -> 512
    wd2_ref, bd2_ref,      # decoder: 512 -> 768
    wd3_ref, bd3_ref,      # decoder: 768 -> input_dim
    recon_ref, mulv_ref,
    *, latent_dim,
):
    cdt = jnp.bfloat16  # MXU-native operand dtype; accumulation stays f32

    def linear(a, w_ref, b_ref):
        return (
            jnp.dot(a.astype(cdt), w_ref[...], preferred_element_type=jnp.float32)
            + b_ref[...]
        )

    x = x_ref[...]

    # ---- encoder ----
    h = jnp.maximum(linear(x, w1_ref, b1_ref), 0.0)   # ReLU
    h = jnp.maximum(linear(h, w2_ref, b2_ref), 0.0)   # ReLU

    # ---- fused latent heads (lane-dense [tb, 2*latent_dim]) ----
    mulv = linear(h, wh_ref, bh_ref)
    mu = mulv[:, :latent_dim]
    logvar = mulv[:, latent_dim:]

    # ---- reparameterize: z = mu + eps * exp(0.5 * logvar) ----
    z = mu + eps_ref[...] * jnp.exp(0.5 * logvar)

    # ---- decoder ----
    d = jnp.maximum(linear(z, wd1_ref, bd1_ref), 0.0)  # ReLU
    d = jnp.maximum(linear(d, wd2_ref, bd2_ref), 0.0)  # ReLU
    d = linear(d, wd3_ref, bd3_ref)

    recon_ref[...] = jax.nn.sigmoid(d).astype(recon_ref.dtype)
    mulv_ref[...] = mulv.astype(mulv_ref.dtype)


@functools.partial(jax.jit, static_argnames=("input_dim", "latent_dim", "block_b"))
def vae_forward(x, eps, params, *, input_dim, latent_dim, block_b=128):
    """Full VAE forward in one batch-tiled Pallas kernel.

    x:      [B, input_dim] float32
    eps:    [B, latent_dim] float32 (explicit torch.randn_like noise)
    params: (w1,b1, w2,b2, wh,bh, wd1,bd1, wd2,bd2, wd3,bd3); weights [in,out]
            in bf16, biases [1,out] in f32; wh/bh are the fused mu|logvar head.
    Returns (recon [B, input_dim], mu [B, latent_dim], logvar [B, latent_dim]).
    """
    B = x.shape[0]
    tb = block_b
    b_pad = pl.cdiv(B, tb) * tb
    if b_pad != B:
        x = jnp.pad(x, ((0, b_pad - B), (0, 0)))
        eps = jnp.pad(eps, ((0, b_pad - B), (0, 0)))

    def const_spec(shape):
        # Weights/biases: full block, same block index every grid step ->
        # DMA'd once, resident in VMEM across the whole batch loop.
        return pl.BlockSpec(shape, lambda i: (0,) * len(shape))

    weight_specs = [const_spec(p.shape) for p in params]
    kernel = functools.partial(_vae_kernel, latent_dim=latent_dim)

    recon, mulv = pl.pallas_call(
        kernel,
        grid=(b_pad // tb,),
        out_shape=(
            jax.ShapeDtypeStruct((b_pad, input_dim), jnp.float32),
            jax.ShapeDtypeStruct((b_pad, 2 * latent_dim), jnp.float32),
        ),
        in_specs=[
            pl.BlockSpec((tb, input_dim), lambda i: (i, 0)),
            pl.BlockSpec((tb, latent_dim), lambda i: (i, 0)),
            *weight_specs,
        ],
        out_specs=(
            pl.BlockSpec((tb, input_dim), lambda i: (i, 0)),
            pl.BlockSpec((tb, 2 * latent_dim), lambda i: (i, 0)),
        ),
        compiler_params=pltpu.CompilerParams(
            dimension_semantics=("parallel",),      # megacore sharding on v7x
            vmem_limit_bytes=32 * 1024 * 1024,      # fits v7x's 64 MiB VMEM
        ),
    )(x, eps, *params)

    recon = recon[:B]
    mu = mulv[:B, :latent_dim]
    logvar = mulv[:B, latent_dim:]
    return recon, mu, logvar


def init_linear(key, fan_in, fan_out):
    """nn.Linear-style init U(-1/sqrt(fan_in), 1/sqrt(fan_in)).

    Weight returned as [in, out] in bf16 (halves HBM weight traffic); bias as
    [1, out] in f32 (tiny, added to the f32 accumulator).
    """
    kw, kb = jax.random.split(key)
    bound = 1.0 / jnp.sqrt(jnp.float32(fan_in))
    w = jax.random.uniform(kw, (fan_in, fan_out), jnp.float32, -bound, bound)
    b = jax.random.uniform(kb, (1, fan_out), jnp.float32, -bound, bound)
    return w.astype(jnp.bfloat16), b


def make_params(key, input_dim, latent_dim):
    keys = jax.random.split(key, 7)
    w1, b1 = init_linear(keys[0], input_dim, 768)      # encoder layer 1
    w2, b2 = init_linear(keys[1], 768, 512)            # encoder layer 2
    wmu, bmu = init_linear(keys[2], 512, latent_dim)   # fc_mu
    wlv, blv = init_linear(keys[3], 512, latent_dim)   # fc_logvar
    wd1, bd1 = init_linear(keys[4], latent_dim, 512)   # decoder layer 1
    wd2, bd2 = init_linear(keys[5], 512, 768)          # decoder layer 2
    wd3, bd3 = init_linear(keys[6], 768, input_dim)    # decoder layer 3
    # Fuse the mu/logvar heads into one lane-dense [512, 2*latent_dim] matmul.
    wh = jnp.concatenate([wmu, wlv], axis=1)
    bh = jnp.concatenate([bmu, blv], axis=1)
    return (w1, b1, w2, b2, wh, bh, wd1, bd1, wd2, bd2, wd3, bd3)


if __name__ == "__main__":
    input_dim = 256
    latent_dim = 64
    batch = 256  # two 128-row grid tiles -> exercises the batch-tiled pipeline

    root = jax.random.PRNGKey(0)
    k_params, k_x, k_eps = jax.random.split(root, 3)

    params = make_params(k_params, input_dim, latent_dim)
    x = jax.random.uniform(k_x, (batch, input_dim), jnp.float32)   # "image" in [0,1)
    eps = jax.random.normal(k_eps, (batch, latent_dim), jnp.float32)

    recon, mu, logvar = vae_forward(
        x, eps, params, input_dim=input_dim, latent_dim=latent_dim
    )
    jax.block_until_ready((recon, mu, logvar))

    # Plain-JAX reference with the same bf16-operand / f32-accumulate semantics.
    def ref_forward(x, eps, params):
        (w1, b1, w2, b2, wh, bh, wd1, bd1, wd2, bd2, wd3, bd3) = params

        def lin(a, w, b):
            return jnp.dot(a.astype(jnp.bfloat16), w,
                           preferred_element_type=jnp.float32) + b

        h = jax.nn.relu(lin(x, w1, b1))
        h = jax.nn.relu(lin(h, w2, b2))
        mulv = lin(h, wh, bh)
        mu_r = mulv[:, :latent_dim]
        lv_r = mulv[:, latent_dim:]
        z = mu_r + eps * jnp.exp(0.5 * lv_r)
        d = jax.nn.relu(lin(z, wd1, bd1))
        d = jax.nn.relu(lin(d, wd2, bd2))
        return jax.nn.sigmoid(lin(d, wd3, bd3)), mu_r, lv_r

    r_ref, mu_r, lv_r = ref_forward(x, eps, params)
    assert recon.shape == (batch, input_dim)
    assert mu.shape == (batch, latent_dim) and logvar.shape == (batch, latent_dim)
    assert jnp.allclose(recon, r_ref, atol=2e-3), "recon mismatch"
    assert jnp.allclose(mu, mu_r, atol=2e-3), "mu mismatch"
    assert jnp.allclose(logvar, lv_r, atol=2e-3), "logvar mismatch"

    print("KERNEL_OK")
</pallas_src>

<mosaic_0001>
module attributes {stable_mosaic.version = 11 : i64} {
  func.func @_vae_kernel(%arg0: i32, %arg1: memref<128x256xf32, #tpu.memory_space<vmem>>, %arg2: memref<128x64xf32, #tpu.memory_space<vmem>>, %arg3: memref<256x768xbf16, #tpu.memory_space<vmem>>, %arg4: memref<1x768xf32, #tpu.memory_space<vmem>>, %arg5: memref<768x512xbf16, #tpu.memory_space<vmem>>, %arg6: memref<1x512xf32, #tpu.memory_space<vmem>>, %arg7: memref<512x128xbf16, #tpu.memory_space<vmem>>, %arg8: memref<1x128xf32, #tpu.memory_space<vmem>>, %arg9: memref<64x512xbf16, #tpu.memory_space<vmem>>, %arg10: memref<1x512xf32, #tpu.memory_space<vmem>>, %arg11: memref<512x768xbf16, #tpu.memory_space<vmem>>, %arg12: memref<1x768xf32, #tpu.memory_space<vmem>>, %arg13: memref<768x256xbf16, #tpu.memory_space<vmem>>, %arg14: memref<1x256xf32, #tpu.memory_space<vmem>>, %arg15: memref<128x256xf32, #tpu.memory_space<vmem>>, %arg16: memref<128x128xf32, #tpu.memory_space<vmem>>) attributes {dimension_semantics = [#tpu.dimension_semantics<parallel>], iteration_bounds = array<i64: 2>, scalar_prefetch = 0 : i64, scratch_operands = 0 : i64, tpu.core_type = #tpu.core_type<tc>, window_params = [{transform_indices = @transform_0, window_bounds = array<i64: 128, 256>}, {transform_indices = @transform_1, window_bounds = array<i64: 128, 64>}, {pipeline_mode = #tpu.pipeline_mode<synchronous>, transform_indices = @transform_2, window_bounds = array<i64: 256, 768>}, {pipeline_mode = #tpu.pipeline_mode<synchronous>, transform_indices = @transform_3, window_bounds = array<i64: 1, 768>}, {pipeline_mode = #tpu.pipeline_mode<synchronous>, transform_indices = @transform_4, window_bounds = array<i64: 768, 512>}, {pipeline_mode = #tpu.pipeline_mode<synchronous>, transform_indices = @transform_5, window_bounds = array<i64: 1, 512>}, {pipeline_mode = #tpu.pipeline_mode<synchronous>, transform_indices = @transform_6, window_bounds = array<i64: 512, 128>}, {pipeline_mode = #tpu.pipeline_mode<synchronous>, transform_indices = @transform_7, window_bounds = array<i64: 1, 128>}, {pipeline_mode = #tpu.pipeline_mode<synchronous>, transform_indices = @transform_8, window_bounds = array<i64: 64, 512>}, {pipeline_mode = #tpu.pipeline_mode<synchronous>, transform_indices = @transform_9, window_bounds = array<i64: 1, 512>}, {pipeline_mode = #tpu.pipeline_mode<synchronous>, transform_indices = @transform_10, window_bounds = array<i64: 512, 768>}, {pipeline_mode = #tpu.pipeline_mode<synchronous>, transform_indices = @transform_11, window_bounds = array<i64: 1, 768>}, {pipeline_mode = #tpu.pipeline_mode<synchronous>, transform_indices = @transform_12, window_bounds = array<i64: 768, 256>}, {pipeline_mode = #tpu.pipeline_mode<synchronous>, transform_indices = @transform_13, window_bounds = array<i64: 1, 256>}, {transform_indices = @transform_14, window_bounds = array<i64: 128, 256>}, {transform_indices = @transform_15, window_bounds = array<i64: 128, 128>}]} {
    %c0 = arith.constant 0 : index
    %c0_0 = arith.constant 0 : index
    %0 = vector.load %arg1[%c0, %c0_0] : memref<128x256xf32, #tpu.memory_space<vmem>>, vector<128x256xf32>
    %1 = arith.truncf %0 : vector<128x256xf32> to vector<128x256xbf16>
    %c0_1 = arith.constant 0 : index
    %c0_2 = arith.constant 0 : index
    %2 = vector.load %arg3[%c0_1, %c0_2] : memref<256x768xbf16, #tpu.memory_space<vmem>>, vector<256x768xbf16>
    %cst = arith.constant dense<0.000000e+00> : vector<128x768xf32>
    %3 = tpu.matmul %1, %2, %cst {dimension_numbers = #tpu.dot_dimension_numbers<[1], [0], [0], [1], [0, 0, 1, 1], [], []>} : vector<128x256xbf16>, vector<256x768xbf16>, vector<128x768xf32> -> vector<128x768xf32>
    %c0_3 = arith.constant 0 : index
    %c0_4 = arith.constant 0 : index
    %4 = vector.load %arg4[%c0_3, %c0_4] : memref<1x768xf32, #tpu.memory_space<vmem>>, vector<1x768xf32>
    %5 = vector.broadcast %4 : vector<1x768xf32> to vector<128x768xf32>
    %6 = arith.addf %3, %5 : vector<128x768xf32>
    %cst_5 = arith.constant 0.000000e+00 : f32
    %7 = vector.broadcast %cst_5 : f32 to vector<128x768xf32>
    %8 = arith.maximumf %6, %7 : vector<128x768xf32>
    %9 = arith.truncf %8 : vector<128x768xf32> to vector<128x768xbf16>
    %c0_6 = arith.constant 0 : index
    %c0_7 = arith.constant 0 : index
    %10 = vector.load %arg5[%c0_6, %c0_7] : memref<768x512xbf16, #tpu.memory_space<vmem>>, vector<768x512xbf16>
    %cst_8 = arith.constant dense<0.000000e+00> : vector<128x512xf32>
    %11 = tpu.matmul %9, %10, %cst_8 {dimension_numbers = #tpu.dot_dimension_numbers<[1], [0], [0], [1], [0, 0, 1, 1], [], []>} : vector<128x768xbf16>, vector<768x512xbf16>, vector<128x512xf32> -> vector<128x512xf32>
    %c0_9 = arith.constant 0 : index
    %c0_10 = arith.constant 0 : index
    %12 = vector.load %arg6[%c0_9, %c0_10] : memref<1x512xf32, #tpu.memory_space<vmem>>, vector<1x512xf32>
    %13 = vector.broadcast %12 : vector<1x512xf32> to vector<128x512xf32>
    %14 = arith.addf %11, %13 : vector<128x512xf32>
    %cst_11 = arith.constant 0.000000e+00 : f32
    %15 = vector.broadcast %cst_11 : f32 to vector<128x512xf32>
    %16 = arith.maximumf %14, %15 : vector<128x512xf32>
    %17 = arith.truncf %16 : vector<128x512xf32> to vector<128x512xbf16>
    %c0_12 = arith.constant 0 : index
    %c0_13 = arith.constant 0 : index
    %18 = vector.load %arg7[%c0_12, %c0_13] : memref<512x128xbf16, #tpu.memory_space<vmem>>, vector<512x128xbf16>
    %cst_14 = arith.constant dense<0.000000e+00> : vector<128x128xf32>
    %19 = tpu.matmul %17, %18, %cst_14 {dimension_numbers = #tpu.dot_dimension_numbers<[1], [0], [0], [1], [0, 0, 1, 1], [], []>} : vector<128x512xbf16>, vector<512x128xbf16>, vector<128x128xf32> -> vector<128x128xf32>
    %c0_15 = arith.constant 0 : index
    %c0_16 = arith.constant 0 : index
    %20 = vector.load %arg8[%c0_15, %c0_16] : memref<1x128xf32, #tpu.memory_space<vmem>>, vector<1x128xf32>
    %21 = vector.broadcast %20 : vector<1x128xf32> to vector<128x128xf32>
    %22 = arith.addf %19, %21 : vector<128x128xf32>
    %23 = vector.extract_strided_slice %22 {offsets = [0, 0], sizes = [128, 64], strides = [1, 1]} : vector<128x128xf32> to vector<128x64xf32>
    %24 = vector.extract_strided_slice %22 {offsets = [0, 64], sizes = [128, 64], strides = [1, 1]} : vector<128x128xf32> to vector<128x64xf32>
    %c0_17 = arith.constant 0 : index
    %c0_18 = arith.constant 0 : index
    %25 = vector.load %arg2[%c0_17, %c0_18] : memref<128x64xf32, #tpu.memory_space<vmem>>, vector<128x64xf32>
    %cst_19 = arith.constant 5.000000e-01 : f32
    %26 = vector.broadcast %cst_19 : f32 to vector<128x64xf32>
    %27 = arith.mulf %26, %24 : vector<128x64xf32>
    %28 = math.exp %27 : vector<128x64xf32>
    %29 = arith.mulf %25, %28 : vector<128x64xf32>
    %30 = arith.addf %23, %29 : vector<128x64xf32>
    %31 = arith.truncf %30 : vector<128x64xf32> to vector<128x64xbf16>
    %c0_20 = arith.constant 0 : index
    %c0_21 = arith.constant 0 : index
    %32 = vector.load %arg9[%c0_20, %c0_21] : memref<64x512xbf16, #tpu.memory_space<vmem>>, vector<64x512xbf16>
    %cst_22 = arith.constant dense<0.000000e+00> : vector<128x512xf32>
    %33 = tpu.matmul %31, %32, %cst_22 {dimension_numbers = #tpu.dot_dimension_numbers<[1], [0], [0], [1], [0, 0, 1, 1], [], []>} : vector<128x64xbf16>, vector<64x512xbf16>, vector<128x512xf32> -> vector<128x512xf32>
    %c0_23 = arith.constant 0 : index
    %c0_24 = arith.constant 0 : index
    %34 = vector.load %arg10[%c0_23, %c0_24] : memref<1x512xf32, #tpu.memory_space<vmem>>, vector<1x512xf32>
    %35 = vector.broadcast %34 : vector<1x512xf32> to vector<128x512xf32>
    %36 = arith.addf %33, %35 : vector<128x512xf32>
    %cst_25 = arith.constant 0.000000e+00 : f32
    %37 = vector.broadcast %cst_25 : f32 to vector<128x512xf32>
    %38 = arith.maximumf %36, %37 : vector<128x512xf32>
    %39 = arith.truncf %38 : vector<128x512xf32> to vector<128x512xbf16>
    %c0_26 = arith.constant 0 : index
    %c0_27 = arith.constant 0 : index
    %40 = vector.load %arg11[%c0_26, %c0_27] : memref<512x768xbf16, #tpu.memory_space<vmem>>, vector<512x768xbf16>
    %cst_28 = arith.constant dense<0.000000e+00> : vector<128x768xf32>
    %41 = tpu.matmul %39, %40, %cst_28 {dimension_numbers = #tpu.dot_dimension_numbers<[1], [0], [0], [1], [0, 0, 1, 1], [], []>} : vector<128x512xbf16>, vector<512x768xbf16>, vector<128x768xf32> -> vector<128x768xf32>
    %c0_29 = arith.constant 0 : index
    %c0_30 = arith.constant 0 : index
    %42 = vector.load %arg12[%c0_29, %c0_30] : memref<1x768xf32, #tpu.memory_space<vmem>>, vector<1x768xf32>
    %43 = vector.broadcast %42 : vector<1x768xf32> to vector<128x768xf32>
    %44 = arith.addf %41, %43 : vector<128x768xf32>
    %cst_31 = arith.constant 0.000000e+00 : f32
    %45 = vector.broadcast %cst_31 : f32 to vector<128x768xf32>
    %46 = arith.maximumf %44, %45 : vector<128x768xf32>
    %47 = arith.truncf %46 : vector<128x768xf32> to vector<128x768xbf16>
    %c0_32 = arith.constant 0 : index
    %c0_33 = arith.constant 0 : index
    %48 = vector.load %arg13[%c0_32, %c0_33] : memref<768x256xbf16, #tpu.memory_space<vmem>>, vector<768x256xbf16>
    %cst_34 = arith.constant dense<0.000000e+00> : vector<128x256xf32>
    %49 = tpu.matmul %47, %48, %cst_34 {dimension_numbers = #tpu.dot_dimension_numbers<[1], [0], [0], [1], [0, 0, 1, 1], [], []>} : vector<128x768xbf16>, vector<768x256xbf16>, vector<128x256xf32> -> vector<128x256xf32>
    %c0_35 = arith.constant 0 : index
    %c0_36 = arith.constant 0 : index
    %50 = vector.load %arg14[%c0_35, %c0_36] : memref<1x256xf32, #tpu.memory_space<vmem>>, vector<1x256xf32>
    %51 = vector.broadcast %50 : vector<1x256xf32> to vector<128x256xf32>
    %52 = arith.addf %49, %51 : vector<128x256xf32>
    %53 = arith.negf %52 : vector<128x256xf32>
    %54 = math.exp %53 : vector<128x256xf32>
    %cst_37 = arith.constant 1.000000e+00 : f32
    %55 = vector.broadcast %cst_37 : f32 to vector<128x256xf32>
    %56 = arith.addf %55, %54 : vector<128x256xf32>
    %57 = arith.divf %55, %56 : vector<128x256xf32>
    %c0_38 = arith.constant 0 : index
    %c0_39 = arith.constant 0 : index
    %58 = vector.load %arg15[%c0_38, %c0_39] : memref<128x256xf32, #tpu.memory_space<vmem>>, vector<128x256xf32>
    tpu.vector_store %arg15[%c0_38, %c0_39], %57 {strides = array<i32>} : memref<128x256xf32, #tpu.memory_space<vmem>>, vector<128x256xf32>,
    %c0_40 = arith.constant 0 : index
    %c0_41 = arith.constant 0 : index
    %59 = vector.load %arg16[%c0_40, %c0_41] : memref<128x128xf32, #tpu.memory_space<vmem>>, vector<128x128xf32>
    tpu.vector_store %arg16[%c0_40, %c0_41], %22 {strides = array<i32>} : memref<128x128xf32, #tpu.memory_space<vmem>>, vector<128x128xf32>,
    return
  }
  func.func @transform_0(%arg0: i32) -> (i32, i32) {
    %c0_i32 = arith.constant 0 : i32
    %c0_i32_0 = arith.constant 0 : i32
    return %arg0, %c0_i32 : i32, i32
  }
  func.func @transform_1(%arg0: i32) -> (i32, i32) {
    %c0_i32 = arith.constant 0 : i32
    %c0_i32_0 = arith.constant 0 : i32
    return %arg0, %c0_i32 : i32, i32
  }
  func.func @transform_2(%arg0: i32) -> (i32, i32) {
    %c0_i32 = arith.constant 0 : i32
    %c0_i32_0 = arith.constant 0 : i32
    %c0_i32_1 = arith.constant 0 : i32
    return %c0_i32, %c0_i32_0 : i32, i32
  }
  func.func @transform_3(%arg0: i32) -> (i32, i32) {
    %c0_i32 = arith.constant 0 : i32
    %c0_i32_0 = arith.constant 0 : i32
    %c0_i32_1 = arith.constant 0 : i32
    return %c0_i32, %c0_i32_0 : i32, i32
  }
  func.func @transform_4(%arg0: i32) -> (i32, i32) {
    %c0_i32 = arith.constant 0 : i32
    %c0_i32_0 = arith.constant 0 : i32
    %c0_i32_1 = arith.constant 0 : i32
    return %c0_i32, %c0_i32_0 : i32, i32
  }
  func.func @transform_5(%arg0: i32) -> (i32, i32) {
    %c0_i32 = arith.constant 0 : i32
    %c0_i32_0 = arith.constant 0 : i32
    %c0_i32_1 = arith.constant 0 : i32
    return %c0_i32, %c0_i32_0 : i32, i32
  }
  func.func @transform_6(%arg0: i32) -> (i32, i32) {
    %c0_i32 = arith.constant 0 : i32
    %c0_i32_0 = arith.constant 0 : i32
    %c0_i32_1 = arith.constant 0 : i32
    return %c0_i32, %c0_i32_0 : i32, i32
  }
  func.func @transform_7(%arg0: i32) -> (i32, i32) {
    %c0_i32 = arith.constant 0 : i32
    %c0_i32_0 = arith.constant 0 : i32
    %c0_i32_1 = arith.constant 0 : i32
    return %c0_i32, %c0_i32_0 : i32, i32
  }
  func.func @transform_8(%arg0: i32) -> (i32, i32) {
    %c0_i32 = arith.constant 0 : i32
    %c0_i32_0 = arith.constant 0 : i32
    %c0_i32_1 = arith.constant 0 : i32
    return %c0_i32, %c0_i32_0 : i32, i32
  }
  func.func @transform_9(%arg0: i32) -> (i32, i32) {
    %c0_i32 = arith.constant 0 : i32
    %c0_i32_0 = arith.constant 0 : i32
    %c0_i32_1 = arith.constant 0 : i32
    return %c0_i32, %c0_i32_0 : i32, i32
  }
  func.func @transform_10(%arg0: i32) -> (i32, i32) {
    %c0_i32 = arith.constant 0 : i32
    %c0_i32_0 = arith.constant 0 : i32
    %c0_i32_1 = arith.constant 0 : i32
    return %c0_i32, %c0_i32_0 : i32, i32
  }
  func.func @transform_11(%arg0: i32) -> (i32, i32) {
    %c0_i32 = arith.constant 0 : i32
    %c0_i32_0 = arith.constant 0 : i32
    %c0_i32_1 = arith.constant 0 : i32
    return %c0_i32, %c0_i32_0 : i32, i32
  }
  func.func @transform_12(%arg0: i32) -> (i32, i32) {
    %c0_i32 = arith.constant 0 : i32
    %c0_i32_0 = arith.constant 0 : i32
    %c0_i32_1 = arith.constant 0 : i32
    return %c0_i32, %c0_i32_0 : i32, i32
  }
  func.func @transform_13(%arg0: i32) -> (i32, i32) {
    %c0_i32 = arith.constant 0 : i32
    %c0_i32_0 = arith.constant 0 : i32
    %c0_i32_1 = arith.constant 0 : i32
    return %c0_i32, %c0_i32_0 : i32, i32
  }
  func.func @transform_14(%arg0: i32) -> (i32, i32) {
    %c0_i32 = arith.constant 0 : i32
    %c0_i32_0 = arith.constant 0 : i32
    return %arg0, %c0_i32 : i32, i32
  }
  func.func @transform_15(%arg0: i32) -> (i32, i32) {
    %c0_i32 = arith.constant 0 : i32
    %c0_i32_0 = arith.constant 0 : i32
    return %arg0, %c0_i32 : i32, i32
  }
}

</mosaic_0001>

<bundles_post_ra>
// kernel: vae_forward.1
= control target key start
LH: loop header
LB: loop body
LE: loop exit
PB: predicated region body
PF: predicated region fallthrough
CT: control target
= control target key end

     0   :  { %s16375_s0 = inlined_call_operand.hbm [shape: f32[256,256], index: 0, kind: input, shape index: {}]   ;;  %s16376_s1 = inlined_call_operand.vmem [shape: f32[256,64], index: 1, kind: input, shape index: {}]   ;;  %s16377_s2 = inlined_call_operand.hbm [shape: bf16[256,768], index: 2, kind: input, shape index: {}]   ;;  %s16378_s3 = inlined_call_operand.hbm [shape: f32[1,768], index: 3, kind: input, shape index: {}]   ;;  %s16379_s4 = inlined_call_operand.hbm [shape: bf16[768,512], index: 4, kind: input, shape index: {}]   ;;  %s16380_s5 = inlined_call_operand.hbm [shape: f32[1,512], index: 5, kind: input, shape index: {}]   ;;  %s16381_s6 = inlined_call_operand.vmem [shape: bf16[512,128], index: 6, kind: input, shape index: {}]   ;;  %s16382_s7 = inlined_call_operand.vmem [shape: f32[1,128], index: 7, kind: input, shape index: {}]   ;;  %s16383_s8 = inlined_call_operand.vmem [shape: bf16[64,512], index: 8, kind: input, shape index: {}]   ;;  %s16384_s9 = inlined_call_operand.hbm [shape: f32[1,512], index: 9, kind: input, shape index: {}]   ;;  %s16385_s10 = inlined_call_operand.hbm [shape: bf16[512,768], index: 10, kind: input, shape index: {}]   ;;  %s16386_s11 = inlined_call_operand.vmem [shape: f32[1,768], index: 11, kind: input, shape index: {}]   ;;  %s16387_s12 = inlined_call_operand.hbm [shape: bf16[768,256], index: 12, kind: input, shape index: {}]   ;;  %s16388_s13 = inlined_call_operand.vmem [shape: f32[1,256], index: 13, kind: input, shape index: {}]   ;;  %s16389_s14 = inlined_call_operand.hbm [shape: f32[256,256], index: 14, kind: output, shape index: {0}]   ;;  %s16390_s15 = inlined_call_operand.vmem [shape: f32[256,128], index: 15, kind: output, shape index: {1}]  }
   0x1   :  { %16477 = sst [smem:[#allocation57_spill]] %s16376_s1 }
   0x2   :  { %16478 = sst [smem:[#allocation58_spill]] %s16377_s2 }
   0x3   :  { %16479 = sst [smem:[#allocation59_spill]] %s16378_s3 }
   0x4   :  { %16480 = sst [smem:[#allocation60_spill]] %s16379_s4 }
   0x5   :  { %16481 = sst [smem:[#allocation61_spill]] %s16380_s5 }
   0x6   :  { %16482 = sst [smem:[#allocation62_spill]] %s16386_s11 }
   0x7   :  { %16483 = sst [smem:[#allocation63_spill]] %s16388_s13 }
   0x8   :  { %16484 = sst [smem:[#allocation64_spill]] %s16389_s14 }
   0x9   :  { %16485 = sst [smem:[#allocation65_spill]] %s16390_s15 }
   0xa   :  { %21 = vsyncpa [#allocation3], 0 }
   0xb   :  { %23 = vsyncpa [#allocation3 + $0x1], 0 }
   0xc   :  { %24 = vsyncpa [#allocation6], 0 }
   0xd   :  { %25 = vsyncpa [#allocation9], 0 }
   0xe   :  { %26 = vsyncpa [#allocation12], 0 }
   0xf   :  { %27 = vsyncpa [#allocation15], 0 }
  0x10   :  { %28 = vsyncpa [#allocation4], 0 }
  0x11   :  { %30 = vsyncpa [#allocation4 + $0x1], 0  ;;  %s13964_s18 = smov 0   ;;  %s13966_s19 = smov 0  }
  0x12   :  { %s13968_s20 = smov 0   ;;  %s13970_s21 = smov 0  }
  0x13 LB: > { %s16486_s2 = sld [smem:[#allocation58_spill]]  ;;  %s13988_s25 = sadd.s32 4294967295, %s13866_s21   ;;  %s13866_s21 = sphi %s13970_s21, %s16649_s21   ;;  %s13862_s20 = sphi %s13968_s20, %s16648_s20   ;;  %s13858_s19 = sphi %s13966_s19, %s16647_s19   ;;  %s13854_s18 = sphi %s13964_s18, %s16646_s18  }
  0x14   : > { %p10032_p0 = scmp.ge.s32.totalorder %s13866_s21, 1  ;;  %p57_p1 = scmp.eq.s32.totalorder %s13988_s25, 0 }
  0x15   : > { %p397_p2 = scmp.lt.s32.totalorder %s13866_s21, 3  ;;  %s13868_s27 = smov [#allocation5]  }
  0x16   : > { %s410_s28 = sshll.u32 %s13868_s27, 4  ;;  %s16488_s4 = sld [smem:[#allocation60_spill]]  ;;  %s411_s28 = int_to_ptr.vmem [resolvable:$true] %s410_s28 }
  0x17   : > { %p13993_p3 = pnand %p10032_p0, %p397_p2  ;;  %s13869_s22 = smov [#allocation8]  }
  0x18   : > { %s436_s23 = sshll.u32 %s13869_s22, 4  ;;  %s16393_s27 = smov 384   ;;  %s437_s23 = int_to_ptr.vmem [resolvable:$true] %s436_s23 }
  0x19   : > { %s408_s24 = sshll.u32 %s16486_s2, 4  ;;  %p13285_p4 = pneg %p13993_p3  ;;  %s409_s24 = int_to_ptr.hbm [resolvable:$true] %s408_s24 }
  0x1a   : > { %s16394_s2 = smov 24   ;;  %s16395_s29 = smov 256  }
  0x1b   : > { %p14005_p6 = pnand %p13285_p4, %p57_p1  ;;  %s16396_s30 = smov 16  }
  0x1c   : > { %s434_s16 = sshll.u32 %s16488_s4, 4  ;;  %s470_s22 = sshll.u32 %s16384_s9, 4  ;;  %s435_s16 = int_to_ptr.hbm [resolvable:$true] %s434_s16  ;;  %s471_s22 = int_to_ptr.hbm [resolvable:$true] %s470_s22 }
  0x1d   : > { %13288 = dma.hbm_to_vmem [thread:$0]  (!%p14005_p6), %s409_s24, 12288, %s411_s28, [#allocation6], %s16393_s27, %s16393_s27, %s16394_s2  }
  0x1e   : > { %13294 = dma.hbm_to_vmem [thread:$0]  (!%p14005_p6), %s435_s16, 24576, %s437_s23, [#allocation9], %s16395_s29, %s16395_s29, %s16396_s30  }
  0x1f   : > { %s13874_s13 = smov [#allocation11]   ;;  %s16490_s3 = sld [smem:[#allocation59_spill]] }
  0x20   : > { %s472_s11 = sshll.u32 %s13874_s13, 4  ;;  %s13875_s27 = smov [#allocation7]   ;;  %s473_s11 = int_to_ptr.vmem [resolvable:$true] %s472_s11 }
  0x21   : > { %13300 = dma.hbm_to_vmem [thread:$0]  (!%p14005_p6), %s471_s22, 64, %s473_s11, [#allocation12]  }
  0x22   : > { %s425_s2 = sshll.u32 %s13875_s27, 4  ;;  %s16491_s5 = sld [smem:[#allocation61_spill]]  ;;  %s426_s2 = int_to_ptr.vmem [resolvable:$true] %s425_s2 }
  0x23   : > { %s481_s23 = sshll.u32 %s16385_s10, 4  ;;  %s13876_s1 = smov [#allocation10]   ;;  %s482_s23 = int_to_ptr.hbm [resolvable:$true] %s481_s23 }
  0x24   : > { %s451_s24 = sshll.u32 %s13876_s1, 4  ;;  %s13877_s11 = smov [#allocation13]   ;;  %s452_s24 = int_to_ptr.vmem [resolvable:$true] %s451_s24 }
  0x25   : > { %s423_s28 = sshll.u32 %s16490_s3, 4  ;;  %s483_s15 = sshll.u32 %s13877_s11, 4  ;;  %s424_s28 = int_to_ptr.hbm [resolvable:$true] %s423_s28  ;;  %s484_s15 = int_to_ptr.vmem [resolvable:$true] %s483_s15 }
  0x26   : > { %13291 = dma.hbm_to_vmem [thread:$0]  (!%p14005_p6), %s424_s28, 96, %s426_s2, [#allocation6]  }
  0x27   : > { %s498_s22 = sshll.u32 %s16387_s12, 4  ;;  %s16492_s28 = smov 24   ;;  %s499_s22 = int_to_ptr.hbm [resolvable:$true] %s498_s22 }
  0x28   : > { %s449_s4 = sshll.u32 %s16491_s5, 4  ;;  %s16493_s16 = smov 384   ;;  %s450_s4 = int_to_ptr.hbm [resolvable:$true] %s449_s4 }
  0x29   : > { %13297 = dma.hbm_to_vmem [thread:$0]  (!%p14005_p6), %s450_s4, 64, %s452_s24, [#allocation9]  }
  0x2a   : > { %13303 = dma.hbm_to_vmem [thread:$0]  (!%p14005_p6), %s482_s23, 24576, %s484_s15, [#allocation12], %s16493_s16, %s16493_s16, %s16492_s28  }
  0x2b   : > { %s13878_s4 = smov [#allocation14]   ;;  %s13879_s14 = smov 128  }
  0x2c   : > { %s500_s13 = sshll.u32 %s13878_s4, 4  ;;  %s13880_s1 = smov 8   ;;  %s501_s13 = int_to_ptr.vmem [resolvable:$true] %s500_s13 }
  0x2d   : > { %13306 = dma.hbm_to_vmem [thread:$0]  (!%p14005_p6), %s499_s22, 12288, %s501_s13, [#allocation15], %s13879_s14, %s13879_s14, %s13880_s1  }
  0x2e   : > { %s10031_s24 = sadd.s32 4294967294, %s13866_s21   ;;  %s14049_s11 = sadd.s32 1, %s13866_s21  }
  0x2f   : > { %s43_s2 = sadd.s32 1, %s13862_s20  ;;  %s40_s27 = ssub.s32 %s13866_s21, %s14049_s11 }
  0x30   : > { %p50_p7 = scmp.ne.s32.totalorder %s13862_s20, %s13858_s19  ;;  %p41_p8 = scmp.eq.s32.totalorder %s40_s27, 0 }
  0x31   : > { %p51_p9 = scmp.eq.s32.totalorder %s13866_s21, 0  ;;  %p56_p10 = scmp.ne.s32.totalorder %s13858_s19, %s13854_s18 }
  0x32   : > { %p358_p11 = scmp.eq.s32.totalorder %s13988_s25, 1  ;;  %p364_p0 = scmp.eq.s32.totalorder %s10031_s24, 1 }
  0x33   : > { %s14061_s23 = scalar_select %p41_p8, %s13862_s20, %s43_s2  }
  0x34   : > { %p14065_p12 = por %p57_p1, %p56_p10  ;;  %p14069_p13 = por %p358_p11, %p50_p7 }
  0x35   : > { %p52_p2 = por %p51_p9, %p50_p7  ;;  %s517_s22 = sand.u32 1, %s13862_s20  }
  0x36   : > { %p14074_p4 = por %p364_p0, %p56_p10  ;;  %p13322_p6 = scmp.lt.s32.totalorder %s13866_s21, 2 }
  0x37   : > { %s10041_s16 = sshll.u32 %s517_s22, 8  ;;  %s12626_s4 = sshll.u32 %s13866_s21, 8 }
  0x38   : > { %s527_s1 = scalar_lea.hbm %s16375_s0, %s12626_s4  ;;  %s521_s27 = scalar_lea.vmem [#allocation2], %s10041_s16 }
  0x39   : > { %s528_s2 = sshll.u32 %s527_s1, 4  ;;  %s530_s29 = sshll.u32 %s521_s27, 4  ;;  %s529_s2 = int_to_ptr.hbm [resolvable:$true] %s528_s2  ;;  %s531_s29 = int_to_ptr.vmem [resolvable:$true] %s530_s29 }
  0x3a   : > { %p14083_p8 = pnand %p13322_p6, %p52_p2  ;;  %s518_s30 = scalar_lea.sflag [#allocation3], %s517_s22 }
  0x3b   : > { %s13754_s3 = sshra.s32 %s529_s2, 4  ;;  %s13761_s16 = scalar_lea.hbm %s16375_s0, 512  ;;  %s13755_s3 = int_to_ptr.hbm [resolvable:$true] %s13754_s3 }
  0x3c   : > { %s13756_s5 = scalar_lea.hbm %s13755_s3, 256  ;;  %p13758_p9 = pneg %p14083_p8 }
  0x3d   : > { %p13757_p7 = scmp.ne.s32.totalorder %s13755_s3, %s13756_s5  ;;  %p13762_p0 = scmp.lt.s32.totalorder %s13755_s3, %s16375_s0 }
  0x3e   : > { %p13763_p2 = scmp.lt.s32.totalorder %s13761_s16, %s13756_s5 }
  0x3f   : > { %p13759_p10 = pnand %p13758_p9, %p13757_p7 }
  0x40   : > { %p13764_p6 = por %p13763_p2, %p13762_p0 }
  0x41   : > { %p13760_p11 = pneg %p13759_p10 }
  0x43   : > { %p13765_p5 = pnand %p13764_p6, %p13760_p11 }
  0x45   : > { %13768 = shalt.err (!%p13765_p5)
}
  0x46   : > { %s16498_s22 = smov 16   ;;  %s16499_s27 = smov 256  }
  0x47   : > { %13310 = dma.hbm_to_vmem [thread:$0]  (!%p14083_p8), %s529_s2, 4096, %s531_s29, %s518_s30, %s16499_s27, %s16499_s27, %s16498_s22  }
  0x48   : > { %551 = sbr.rel (%p13993_p3) target bundleno = 3030 (0xbd6), region = 76 }
  0x4d   : > { %s14103_s4 = sand.u32 1, %s13858_s19  }
  0x4e   : > { %s10046_s3 = sshll.u32 %s14103_s4, 8  ;;  %s554_s5 = scalar_lea.sflag [#allocation3], %s14103_s4 }
  0x4f   : > { %s14109_s13 = scalar_lea.vmem [#allocation2], %s10046_s3 }
  0x50   : > { %13829 = dma.done.wait (%p14065_p12), %s554_s5, 4096  }
  0x51   : > { %13831 = vsyncadd (%p14065_p12), %s554_s5, 4294963200 }
  0x52   : > { %13833 = dma.done.wait (%p57_p1), [#allocation6], 12384  }
  0x53   : > { %13835 = vsyncadd (%p57_p1), [#allocation6], 4294954912 }
  0x54   : > { %13837 = dma.done.wait (%p57_p1), [#allocation9], 24640  }
  0x55   : > { %13839 = vsyncadd (%p57_p1), [#allocation9], 4294942656 }
  0x56   : > { %13841 = dma.done.wait (%p57_p1), [#allocation12], 24640  }
  0x57   : > { %13843 = vsyncadd (%p57_p1), [#allocation12], 4294942656 }
  0x58   : > { %13845 = dma.done.wait (%p57_p1), [#allocation15], 12288  }
  0x59   : > { %13847 = vsyncadd (%p57_p1), [#allocation15], 4294955008  ;;  %v10229_v0 = vld [vmem:[#allocation5 + $0x150] sm:$0xf]  ;;  %v12672_v1 = vld [vmem:[#allocation5 + $0x164] sm:$0xf0] }
  0x5a   : > { %v10421_v2 = vld [vmem:[#allocation5 + $0x2d0] sm:$0xf]  ;;  %v10230_v3 = vor.u32 %v12672_v1, %v10229_v0  ;;  %v12720_v4 = vld [vmem:[#allocation5 + $0x2e4] sm:$0xf0]  ;;  %v12669_v5 = vld [vmem:[#allocation5 + $0x154] sm:$0xf] }
  0x5b   : > { %v10231_v6 = vld [vmem:[#allocation5 + $0x168] sm:$0xf0]  ;;  %v10422_v7 = vor.u32 %v12720_v4, %v10421_v2  ;;  %v12717_v9 = vld [vmem:[#allocation5 + $0x2d4] sm:$0xf]  ;;  %v10205_v11 = vld [vmem:[#allocation5 + $0x120] sm:$0xf] }
  0x5c   : > { %v10234_v8 = vor.u32 %v12669_v5, %v10231_v6  ;;  %v10423_v10 = vld [vmem:[#allocation5 + $0x2e8] sm:$0xf0]  ;;  %1303 = vmatpush.bf16.msra.mxu0 %v10230_v3  ;;  %v12666_v13 = vld [vmem:[#allocation5 + $0x134] sm:$0xf0]  ;;  %v10397_v14 = vld [vmem:[#allocation5 + $0x2a0] sm:$0xf] }
  0x5d   : > { %v10426_v12 = vor.u32 %v12717_v9, %v10423_v10  ;;  %v12714_v15 = vld [vmem:[#allocation5 + $0x2b4] sm:$0xf0]  ;;  %1352 = vmatpush.bf16.msra.mxu1 %v10422_v7  ;;  %v10206_v16 = vor.u32 %v12666_v13, %v10205_v11  ;;  %v12663_v18 = vld [vmem:[#allocation5 + $0x124] sm:$0xf]  ;;  %v10207_v19 = vld [vmem:[#allocation5 + $0x138] sm:$0xf0] }
  0x5e   : > { %1401 = vmatpush.bf16.msra.mxu2 %v10234_v8  ;;  %v10398_v17 = vor.u32 %v12714_v15, %v10397_v14  ;;  %v12711_v20 = vld [vmem:[#allocation5 + $0x2a4] sm:$0xf]  ;;  %v10210_v21 = vor.u32 %v12663_v18, %v10207_v19  ;;  %v10399_v22 = vld [vmem:[#allocation5 + $0x2b8] sm:$0xf0]  ;;  %v10181_v23 = vld [vmem:[#allocation5 + $0xf0] sm:$0xf] }
  0x5f   : > { %1450 = vmatpush.bf16.msra.mxu3 %v10426_v12  ;;  %v12660_v24 = vld [vmem:[#allocation5 + $0x104] sm:$0xf0]  ;;  %v10402_v25 = vor.u32 %v12711_v20, %v10399_v22  ;;  %v10373_v26 = vld [vmem:[#allocation5 + $0x270] sm:$0xf]  ;;  %v12657_v28 = vld [vmem:[#allocation5 + $0xf4] sm:$0xf] }
  0x60   : > { %v12708_v27 = vld [vmem:[#allocation5 + $0x284] sm:$0xf0]  ;;  %1304 = vmatpush.bf16.msra.mxu0 %v10206_v16  ;;  %v10182_v29 = vor.u32 %v12660_v24, %v10181_v23  ;;  %v10183_v30 = vld [vmem:[#allocation5 + $0x108] sm:$0xf0]  ;;  %v12705_v31 = vld [vmem:[#allocation5 + $0x274] sm:$0xf] }
  0x61   : > { %v10375_v32 = vld [vmem:[#allocation5 + $0x288] sm:$0xf0]  ;;  %1353 = vmatpush.bf16.msra.mxu1 %v10398_v17  ;;  %v10374_v33 = vor.u32 %v12708_v27, %v10373_v26  ;;  %v10186_v34 = vor.u32 %v12657_v28, %v10183_v30  ;;  %v10157_v35 = vld [vmem:[#allocation5 + $0xc0] sm:$0xf]  ;;  %v12654_v36 = vld [vmem:[#allocation5 + $0xd4] sm:$0xf0] }
  0x62   : > { %1402 = vmatpush.bf16.msra.mxu2 %v10210_v21  ;;  %v10349_v37 = vld [vmem:[#allocation5 + $0x240] sm:$0xf]  ;;  %v10378_v38 = vor.u32 %v12705_v31, %v10375_v32  ;;  %v12702_v39 = vld [vmem:[#allocation5 + $0x254] sm:$0xf0]  ;;  %v12651_v40 = vld [vmem:[#allocation5 + $0xc4] sm:$0xf]  ;;  %v10158_v44 = vor.u32 %v12654_v36, %v10157_v35 }
  0x63   : > { %1451 = vmatpush.bf16.msra.mxu3 %v10402_v25  ;;  %v10159_v41 = vld [vmem:[#allocation5 + $0xd8] sm:$0xf0]  ;;  %v12699_v42 = vld [vmem:[#allocation5 + $0x244] sm:$0xf]  ;;  %v10350_v45 = vor.u32 %v12702_v39, %v10349_v37  ;;  %v10133_v47 = vld [vmem:[#allocation5 + $0x90] sm:$0xf] }
  0x64   : > { %v10351_v43 = vld [vmem:[#allocation5 + $0x258] sm:$0xf0]  ;;  %1305 = vmatpush.bf16.msra.mxu0 %v10182_v29  ;;  %v10162_v46 = vor.u32 %v12651_v40, %v10159_v41  ;;  %v12648_v48 = vld [vmem:[#allocation5 + $0xa4] sm:$0xf0]  ;;  %v10325_v49 = vld [vmem:[#allocation5 + $0x210] sm:$0xf] }
  0x65   : > { %1354 = vmatpush.bf16.msra.mxu1 %v10374_v33  ;;  %v10354_v50 = vor.u32 %v12699_v42, %v10351_v43  ;;  %v12696_v51 = vld [vmem:[#allocation5 + $0x224] sm:$0xf0]  ;;  %v12645_v52 = vld [vmem:[#allocation5 + $0x94] sm:$0xf]  ;;  %v10135_v53 = vld [vmem:[#allocation5 + $0xa8] sm:$0xf0]  ;;  %v10134_v56 = vor.u32 %v12648_v48, %v10133_v47 }
  0x66   : > { %1403 = vmatpush.bf16.msra.mxu2 %v10186_v34  ;;  %v12693_v54 = vld [vmem:[#allocation5 + $0x214] sm:$0xf]  ;;  %v10327_v55 = vld [vmem:[#allocation5 + $0x228] sm:$0xf0]  ;;  %v10326_v57 = vor.u32 %v12696_v51, %v10325_v49  ;;  %v10138_v58 = vor.u32 %v12645_v52, %v10135_v53  ;;  %v10109_v59 = vld [vmem:[#allocation5 + $0x60] sm:$0xf] }
  0x67   : > { %1452 = vmatpush.bf16.msra.mxu3 %v10378_v38  ;;  %v12642_v60 = vld [vmem:[#allocation5 + $0x74] sm:$0xf0]  ;;  %v10301_v61 = vld [vmem:[#allocation5 + $0x1e0] sm:$0xf]  ;;  %v10330_v62 = vor.u32 %v12693_v54, %v10327_v55  ;;  %v12639_v0 = vld [vmem:[#allocation5 + $0x64] sm:$0xf] }
  0x68   : > { %1306 = vmatpush.bf16.msra.mxu0 %v10158_v44  ;;  %v12690_v63 = vld [vmem:[#allocation5 + $0x1f4] sm:$0xf0]  ;;  %v10111_v1 = vld [vmem:[#allocation5 + $0x78] sm:$0xf0]  ;;  %v12687_v2 = vld [vmem:[#allocation5 + $0x1e4] sm:$0xf]  ;;  %v10110_v4 = vor.u32 %v12642_v60, %v10109_v59 }
  0x69   : > { %1355 = vmatpush.bf16.msra.mxu1 %v10350_v45  ;;  %v10303_v3 = vld [vmem:[#allocation5 + $0x1f8] sm:$0xf0]  ;;  %v10302_v5 = vor.u32 %v12690_v63, %v10301_v61  ;;  %v10114_v6 = vor.u32 %v12639_v0, %v10111_v1  ;;  %v10085_v7 = vld [vmem:[#allocation5 + $0x30] sm:$0xf]  ;;  %v12636_v8 = vld [vmem:[#allocation5 + $0x44] sm:$0xf0] }
  0x6a   : > { %1404 = vmatpush.bf16.msra.mxu2 %v10162_v46  ;;  %v10277_v9 = vld [vmem:[#allocation5 + $0x1b0] sm:$0xf]  ;;  %v10306_v10 = vor.u32 %v12687_v2, %v10303_v3  ;;  %v12684_v11 = vld [vmem:[#allocation5 + $0x1c4] sm:$0xf0]  ;;  %v12633_v12 = vld [vmem:[#allocation5 + $0x34] sm:$0xf]  ;;  %v10086_v16 = vor.u32 %v12636_v8, %v10085_v7 }
  0x6b   : > { %1453 = vmatpush.bf16.msra.mxu3 %v10354_v50  ;;  %v10087_v13 = vld [vmem:[#allocation5 + $0x48] sm:$0xf0]  ;;  %v12681_v14 = vld [vmem:[#allocation5 + $0x1b4] sm:$0xf]  ;;  %v10061_v17 = vld [vmem:[#allocation5] sm:$0xf]  ;;  %v10278_v19 = vor.u32 %v12684_v11, %v10277_v9 }
  0x6c   : > { %1307 = vmatpush.bf16.msra.mxu0 %v10134_v56  ;;  %v10279_v15 = vld [vmem:[#allocation5 + $0x1c8] sm:$0xf0]  ;;  %v12630_v18 = vld [vmem:[#allocation5 + $0x14] sm:$0xf0]  ;;  %v10090_v20 = vor.u32 %v12633_v12, %v10087_v13  ;;  %v10253_v21 = vld [vmem:[#allocation5 + $0x180] sm:$0xf] }
  0x6d   : > { %1356 = vmatpush.bf16.msra.mxu1 %v10326_v57  ;;  %v12678_v22 = vld [vmem:[#allocation5 + $0x194] sm:$0xf0]  ;;  %v12627_v23 = vld [vmem:[#allocation5 + $0x4] sm:$0xf]  ;;  %v10282_v24 = vor.u32 %v12681_v14, %v10279_v15  ;;  %v10063_v25 = vld [vmem:[#allocation5 + $0x18] sm:$0xf0]  ;;  %v10062_v31 = vor.u32 %v12630_v18, %v10061_v17 }
  0x6e   : > { %1405 = vmatpush.bf16.msra.mxu2 %v10138_v58  ;;  %v12675_v26 = vld [vmem:[#allocation5 + $0x184] sm:$0xf]  ;;  %v10255_v27 = vld [vmem:[#allocation5 + $0x198] sm:$0xf0]  ;;  %v10239_v30 = vld [vmem:[#allocation5 + $0x170] sm:$0xf0]  ;;  %v10254_v35 = vor.u32 %v12678_v22, %v10253_v21  ;;  %v10066_v36 = vor.u32 %v12627_v23, %v10063_v25 }
  0x6f   : > { %1454 = vmatpush.bf16.msra.mxu3 %v10330_v62  ;;  %v665_v28 = vld [vmem:[%s14109_s13] sm:$0xff]  ;;  %v12670_v29 = vld [vmem:[#allocation5 + $0x15c] sm:$0xf]  ;;  %v667_v32 = vld [vmem:[%s14109_s13 + $0x10] sm:$0xff]  ;;  %v10258_v40 = vor.u32 %v12675_v26, %v10255_v27  ;;  %s10055_s17 = sshll.u32 %s13988_s25, 4  ;;  %s16588_s22 = sld [smem:[#allocation65_spill]] }
  0x70   : > { %1308 = vmatpush.bf16.msra.mxu0 %v10110_v4  ;;  %v12718_v33 = vld [vmem:[#allocation5 + $0x2dc] sm:$0xf]  ;;  %v10431_v34 = vld [vmem:[#allocation5 + $0x2f0] sm:$0xf0]  ;;  %v666_v37 = vld [vmem:[%s14109_s13 + $0x8] sm:$0xff]  ;;  %v10242_v41 = vor.u32 %v12670_v29, %v10239_v30  ;;  %v14135_v45 = vpack.c.bf16 %v667_v32, %v665_v28  ;;  %p652_p1 = scmp.lt.s32.totalorder %s10055_s17, 31 }
  0x71   : > { %1357 = vmatpush.bf16.msra.mxu1 %v10302_v5  ;;  %v668_v38 = vld [vmem:[%s14109_s13 + $0x18] sm:$0xff]  ;;  %v12673_v42 = vld [vmem:[#allocation5 + $0x16c] sm:$0xf0]  ;;  %v10434_v46 = vor.u32 %v12718_v33, %v10431_v34  ;;  %v12664_v47 = vld [vmem:[#allocation5 + $0x12c] sm:$0xf]  ;;  %s13881_s5 = smov 64  }
  0x72   : > { %1406 = vmatpush.bf16.msra.mxu2 %v10114_v6  ;;  %v10237_v39 = vld [vmem:[#allocation5 + $0x158] sm:$0xf]  ;;  %v12721_v44 = vld [vmem:[#allocation5 + $0x2ec] sm:$0xf0]  ;;  %v10215_v48 = vld [vmem:[#allocation5 + $0x140] sm:$0xf0]  ;;  %v14137_v49 = vpack.c.bf16 %v668_v38, %v666_v37 }
  0x73   : > { %1455 = vmatpush.bf16.msra.mxu3 %v10306_v10  ;;  %v10429_v43 = vld [vmem:[#allocation5 + $0x2d8] sm:$0xf]  ;;  %v12712_v50 = vld [vmem:[#allocation5 + $0x2ac] sm:$0xf]  ;;  %v10407_v51 = vld [vmem:[#allocation5 + $0x2c0] sm:$0xf0]  ;;  %v10238_v52 = vor.u32 %v12673_v42, %v10237_v39  ;;  %v10218_v54 = vor.u32 %v12664_v47, %v10215_v48 }
  0x74   : > { %1309 = vmatpush.bf16.msra.mxu0 %v10086_v16  ;;  %v10430_v53 = vor.u32 %v12721_v44, %v10429_v43  ;;  %v10213_v55 = vld [vmem:[#allocation5 + $0x128] sm:$0xf]  ;;  %v12667_v56 = vld [vmem:[#allocation5 + $0x13c] sm:$0xf0]  ;;  %v10410_v57 = vor.u32 %v12712_v50, %v10407_v51  ;;  %v12658_v61 = vld [vmem:[#allocation5 + $0xfc] sm:$0xf] }
  0x75   : > { %1358 = vmatpush.bf16.msra.mxu1 %v10278_v19  ;;  %v10405_v58 = vld [vmem:[#allocation5 + $0x2a8] sm:$0xf]  ;;  %v12715_v59 = vld [vmem:[#allocation5 + $0x2bc] sm:$0xf0]  ;;  %v10214_v60 = vor.u32 %v12667_v56, %v10213_v55  ;;  %v10191_v62 = vld [vmem:[#allocation5 + $0x110] sm:$0xf0] }
  0x76   : > { %1407 = vmatpush.bf16.msra.mxu2 %v10090_v20  ;;  %v10189_v63 = vld [vmem:[#allocation5 + $0xf8] sm:$0xf]  ;;  %v10406_v0 = vor.u32 %v12715_v59, %v10405_v58  ;;  %v10194_v1 = vor.u32 %v12658_v61, %v10191_v62  ;;  %v12661_v2 = vld [vmem:[#allocation5 + $0x10c] sm:$0xf0]  ;;  %v12706_v3 = vld [vmem:[#allocation5 + $0x27c] sm:$0xf] }
  0x77   : > { %1456 = vmatpush.bf16.msra.mxu3 %v10282_v24  ;;  %v10383_v4 = vld [vmem:[#allocation5 + $0x290] sm:$0xf0]  ;;  %v10381_v6 = vld [vmem:[#allocation5 + $0x278] sm:$0xf]  ;;  %v12709_v7 = vld [vmem:[#allocation5 + $0x28c] sm:$0xf0]  ;;  %v10190_v8 = vor.u32 %v12661_v2, %v10189_v63 }
  0x78   : > { %1310 = vmatpush.bf16.msra.mxu0 %v10062_v31  ;;  %v10386_v5 = vor.u32 %v12706_v3, %v10383_v4  ;;  %v10382_v9 = vor.u32 %v12709_v7, %v10381_v6  ;;  %v669_v10 = vld [vmem:[%s14109_s13 + $0x20] sm:$0xff]  ;;  %v671_v11 = vld [vmem:[%s14109_s13 + $0x30] sm:$0xff]  ;;  %v670_v12 = vld [vmem:[%s14109_s13 + $0x28] sm:$0xff]  ;;  %s16651_s17 = smov (!%p652_p1, %s10055_s17), 31  ;;  %s16589_s16 = sld [smem:[#allocation57_spill]]  ;;  %vm5199_vm0 = vcmask 523264  }
  0x79   : > { %1359 = vmatpush.bf16.msra.mxu1 %v10254_v35  ;;  %v672_v13 = vld [vmem:[%s14109_s13 + $0x38] sm:$0xff]  ;;  %v14147_v14 = vpack.c.bf16 %v671_v11, %v669_v10  ;;  %v12652_v16 = vld [vmem:[#allocation5 + $0xcc] sm:$0xf]  ;;  %v10167_v17 = vld [vmem:[#allocation5 + $0xe0] sm:$0xf0]  ;;  %s10056_s29 = sshll.u32 %s16651_s17, 3 }
  0x7a   : > { %1408 = vmatpush.bf16.msra.mxu2 %v10066_v36  ;;  %v14149_v15 = vpack.c.bf16 %v672_v13, %v670_v12  ;;  %v10165_v18 = vld [vmem:[#allocation5 + $0xc8] sm:$0xf]  ;;  %v10170_v19 = vor.u32 %v12652_v16, %v10167_v17  ;;  %v12655_v20 = vld [vmem:[#allocation5 + $0xdc] sm:$0xf0]  ;;  %v12700_v21 = vld [vmem:[#allocation5 + $0x24c] sm:$0xf]  ;;  %s15184_s27 = scalar_lea.vmem %s16588_s22, %s10056_s29 }
  0x7b   : > { %1457 = vmatpush.bf16.msra.mxu3 %v10258_v40  ;;  %1311 = vmatmul.bf16.vlgmr.msra.gmra.mxu0 %v14135_v45  ;;  %v10359_v22 = vld [vmem:[#allocation5 + $0x260] sm:$0xf0]  ;;  %v10166_v23 = vor.u32 %v12655_v20, %v10165_v18  ;;  %v10357_v25 = vld [vmem:[#allocation5 + $0x248] sm:$0xf]  ;;  %v12703_v26 = vld [vmem:[#allocation5 + $0x25c] sm:$0xf0] }
  0x7c   : > { %1360 = vmatmul.bf16.vlgmr.msra.gmra.mxu1 %v14137_v49  ;;  %1499 = vmatpush.bf16.msrb.mxu0 %v10238_v52  ;;  %v10362_v24 = vor.u32 %v12700_v21, %v10359_v22  ;;  %v10358_v27 = vor.u32 %v12703_v26, %v10357_v25  ;;  %v673_v28 = vld [vmem:[%s14109_s13 + $0x40] sm:$0xff]  ;;  %v675_v29 = vld [vmem:[%s14109_s13 + $0x50] sm:$0xff]  ;;  %v674_v30 = vld [vmem:[%s14109_s13 + $0x48] sm:$0xff]  ;;  %s16637_s2 = sld [smem:[#allocation63_spill]]  ;;  %s16140_s24 = scalar_lea.vmem [#allocation16], %s10046_s3 }
  0x7d   : > { %1409 = vmatmul.bf16.vlgmr.msra.gmra.mxu2 %v14135_v45  ;;  %1548 = vmatpush.bf16.msrb.mxu1 %v10430_v53  ;;  %v676_v31 = vld [vmem:[%s14109_s13 + $0x58] sm:$0xff]  ;;  %v14159_v32 = vpack.c.bf16 %v675_v29, %v673_v28  ;;  %v10143_v35 = vld [vmem:[#allocation5 + $0xb0] sm:$0xf0]  ;;  %v12649_v38 = vld [vmem:[#allocation5 + $0xac] sm:$0xf0]  ;;  %s13252_s3 = sshll.u32 %s13988_s25, 8 }
  0x7e   : > { %1597 = vmatpush.bf16.msrb.mxu2 %v10242_v41  ;;  %1458 = vmatmul.bf16.vlgmr.msra.gmra.mxu3 %v14137_v49  ;;  %v14161_v33 = vpack.c.bf16 %v676_v31, %v674_v30  ;;  %v12646_v34 = vld [vmem:[#allocation5 + $0x9c] sm:$0xf]  ;;  %v10141_v36 = vld [vmem:[#allocation5 + $0x98] sm:$0xf]  ;;  %v10335_v40 = vld [vmem:[#allocation5 + $0x230] sm:$0xf0]  ;;  %s15373_s14 = scalar_lea.vmem %s16589_s16, %s10056_s29 }
  0x7f   : > { %1646 = vmatpush.bf16.msrb.mxu3 %v10434_v46  ;;  %v10146_v37 = vor.u32 %v12646_v34, %v10143_v35  ;;  %v12694_v39 = vld [vmem:[#allocation5 + $0x21c] sm:$0xf]  ;;  %v10142_v41 = vor.u32 %v12649_v38, %v10141_v36  ;;  %v10333_v43 = vld [vmem:[#allocation5 + $0x218] sm:$0xf]  ;;  %v12697_v44 = vld [vmem:[#allocation5 + $0x22c] sm:$0xf0] }
  0x80   : > { %1500 = vmatpush.bf16.msrb.mxu0 %v10214_v60  ;;  %v10338_v42 = vor.u32 %v12694_v39, %v10335_v40  ;;  %v10334_v46 = vor.u32 %v12697_v44, %v10333_v43  ;;  %v677_v47 = vld [vmem:[%s14109_s13 + $0x60] sm:$0xff]  ;;  %v679_v48 = vld [vmem:[%s14109_s13 + $0x70] sm:$0xff]  ;;  %v678_v50 = vld [vmem:[%s14109_s13 + $0x68] sm:$0xff]  ;;  %s16644_s17 = sld [smem:[#allocation64_spill]]  ;;  %s9847_s25 = sshll.u32 %s16140_s24, 4  ;;  %s9848_s25 = int_to_ptr.vmem [resolvable:$true] %s9847_s25 }
  0x81   : > { %1549 = vmatpush.bf16.msrb.mxu1 %v10406_v0  ;;  %v680_v51 = vld [vmem:[%s14109_s13 + $0x78] sm:$0xff]  ;;  %v14171_v52 = vpack.c.bf16 %v679_v48, %v677_v47  ;;  %v10119_v55 = vld [vmem:[#allocation5 + $0x80] sm:$0xf0]  ;;  %v10117_v56 = vld [vmem:[#allocation5 + $0x68] sm:$0xf]  ;;  %s9829_s1 = scalar_lea.sflag [#allocation4], %s14103_s4 }
  0x82   : > { %1598 = vmatpush.bf16.msrb.mxu2 %v10218_v54  ;;  %v14173_v53 = vpack.c.bf16 %v680_v51, %v678_v50  ;;  %v12640_v54 = vld [vmem:[#allocation5 + $0x6c] sm:$0xf]  ;;  %v12643_v58 = vld [vmem:[#allocation5 + $0x7c] sm:$0xf0]  ;;  %v10311_v60 = vld [vmem:[#allocation5 + $0x200] sm:$0xf0] }
  0x83   : > { %1647 = vmatpush.bf16.msrb.mxu3 %v10410_v57  ;;  %v10122_v57 = vor.u32 %v12640_v54, %v10119_v55  ;;  %v12688_v59 = vld [vmem:[#allocation5 + $0x1ec] sm:$0xf]  ;;  %v10118_v61 = vor.u32 %v12643_v58, %v10117_v56  ;;  %v10309_v63 = vld [vmem:[#allocation5 + $0x1e8] sm:$0xf]  ;;  %v12691_v0 = vld [vmem:[#allocation5 + $0x1fc] sm:$0xf0] }
  0x84   : > { %1501 = vmatpush.bf16.msrb.mxu0 %v10190_v8  ;;  %v10314_v62 = vor.u32 %v12688_v59, %v10311_v60  ;;  %v681_v2 = vld [vmem:[%s14109_s13 + $0x80] sm:$0xff]  ;;  %v683_v3 = vld [vmem:[%s14109_s13 + $0x90] sm:$0xff]  ;;  %v682_v4 = vld [vmem:[%s14109_s13 + $0x88] sm:$0xff] }
  0x85   : > { %1550 = vmatpush.bf16.msrb.mxu1 %v10382_v9  ;;  %v14183_v6 = vpack.c.bf16 %v683_v3, %v681_v2  ;;  %v12634_v8 = vld [vmem:[#allocation5 + $0x3c] sm:$0xf]  ;;  %v10095_v9 = vld [vmem:[#allocation5 + $0x50] sm:$0xf0]  ;;  %v10093_v10 = vld [vmem:[#allocation5 + $0x38] sm:$0xf] }
  0x86   : > { %1599 = vmatpush.bf16.msrb.mxu2 %v10194_v1  ;;  %v10310_v1 = vor.u32 %v12691_v0, %v10309_v63  ;;  %v10098_v11 = vor.u32 %v12634_v8, %v10095_v9  ;;  %v12637_v12 = vld [vmem:[#allocation5 + $0x4c] sm:$0xf0]  ;;  %v12682_v13 = vld [vmem:[#allocation5 + $0x1bc] sm:$0xf]  ;;  %v10287_v16 = vld [vmem:[#allocation5 + $0x1d0] sm:$0xf0]  ;;  %s9846_s29 = scalar_lea.hbm %s16644_s17, %s13252_s3 }
  0x87   : > { %1648 = vmatpush.bf16.msrb.mxu3 %v10386_v5  ;;  %v684_v5 = vld [vmem:[%s14109_s13 + $0x98] sm:$0xff]  ;;  %v10094_v17 = vor.u32 %v12637_v12, %v10093_v10  ;;  %v10290_v18 = vor.u32 %v12682_v13, %v10287_v16  ;;  %v12685_v20 = vld [vmem:[#allocation5 + $0x1cc] sm:$0xf0]  ;;  %v685_v22 = vld [vmem:[%s14109_s13 + $0xa0] sm:$0xff] }
  0x88   : > { %1502 = vmatpush.bf16.msrb.mxu0 %v10166_v23  ;;  %v14185_v7 = vpack.c.bf16 %v684_v5, %v682_v4  ;;  %v687_v23 = vld [vmem:[%s14109_s13 + $0xb0] sm:$0xff]  ;;  %v688_v25 = vld [vmem:[%s14109_s13 + $0xb8] sm:$0xff]  ;;  %v12628_v28 = vld [vmem:[#allocation5 + $0xc] sm:$0xf] }
  0x89   : > { %1551 = vmatpush.bf16.msrb.mxu1 %v10358_v27  ;;  %v14195_v26 = vpack.c.bf16 %v687_v23, %v685_v22  ;;  %v10071_v29 = vld [vmem:[#allocation5 + $0x20] sm:$0xf0]  ;;  %v10069_v30 = vld [vmem:[#allocation5 + $0x8] sm:$0xf]  ;;  %v12631_v34 = vld [vmem:[#allocation5 + $0x1c] sm:$0xf0] }
  0x8a   : > { %1600 = vmatpush.bf16.msrb.mxu2 %v10170_v19  ;;  %v10285_v19 = vld [vmem:[#allocation5 + $0x1b8] sm:$0xf]  ;;  %v10074_v31 = vor.u32 %v12628_v28, %v10071_v29  ;;  %v12676_v35 = vld [vmem:[#allocation5 + $0x18c] sm:$0xf]  ;;  %v10263_v36 = vld [vmem:[#allocation5 + $0x1a0] sm:$0xf0] }
  0x8b   : > { %1316 = vmatmul.bf16.gmra.mxu0 %v14147_v14  ;;  %1649 = vmatpush.bf16.msrb.mxu3 %v10362_v24  ;;  %v10286_v21 = vor.u32 %v12685_v20, %v10285_v19  ;;  %v686_v24 = vld [vmem:[%s14109_s13 + $0xa8] sm:$0xff]  ;;  %v10266_v38 = vor.u32 %v12676_v35, %v10263_v36  ;;  %v12679_v40 = vld [vmem:[#allocation5 + $0x19c] sm:$0xf0]  ;;  %v691_v43 = vld [vmem:[%s14109_s13 + $0xd0] sm:$0xff] }
  0x8c   : > { %1365 = vmatmul.bf16.gmra.mxu1 %v14149_v15  ;;  %1503 = vmatpush.bf16.msrb.mxu0 %v10142_v41  ;;  %v14197_v27 = vpack.c.bf16 %v688_v25, %v686_v24  ;;  %v10261_v39 = vld [vmem:[#allocation5 + $0x188] sm:$0xf]  ;;  %v12671_v50 = vld [vmem:[#allocation5 + $0x164] sm:$0xf]  ;;  %v10247_v51 = vld [vmem:[#allocation5 + $0x178] sm:$0xf0] }
  0x8d   : > { %1414 = vmatmul.bf16.gmra.mxu2 %v14147_v14  ;;  %1552 = vmatpush.bf16.msrb.mxu1 %v10334_v46  ;;  %v10262_v41 = vor.u32 %v12679_v40, %v10261_v39  ;;  %v690_v44 = vld [vmem:[%s14109_s13 + $0xc8] sm:$0xff]  ;;  %v692_v46 = vld [vmem:[%s14109_s13 + $0xd8] sm:$0xff]  ;;  %v10245_v54 = vld [vmem:[#allocation5 + $0x160] sm:$0xf]  ;;  %v10250_v55 = vor.u32 %v12671_v50, %v10247_v51 }
  0x8e   : > { %1463 = vmatmul.bf16.gmra.mxu3 %v14149_v15  ;;  %1601 = vmatpush.bf16.msrb.mxu2 %v10146_v37  ;;  %v10070_v37 = vor.u32 %v12631_v34, %v10069_v30  ;;  %v14209_v48 = vpack.c.bf16 %v692_v46, %v690_v44  ;;  %v12674_v56 = vld [vmem:[#allocation5 + $0x174] sm:$0xf0]  ;;  %v10439_v58 = vld [vmem:[#allocation5 + $0x2f8] sm:$0xf0]  ;;  %v10437_v63 = vld [vmem:[#allocation5 + $0x2e0] sm:$0xf] }
  0x8f   : > { %1650 = vmatpush.bf16.msrb.mxu3 %v10338_v42  ;;  %v689_v42 = vld [vmem:[%s14109_s13 + $0xc0] sm:$0xff]  ;;  %v10246_v59 = vor.u32 %v12674_v56, %v10245_v54  ;;  %v12722_v0 = vld [vmem:[#allocation5 + $0x2f4] sm:$0xf0]  ;;  %v12665_v8 = vld [vmem:[#allocation5 + $0x134] sm:$0xf] }
  0x90   : > { %1504 = vmatpush.bf16.msrb.mxu0 %v10118_v61  ;;  %v14207_v47 = vpack.c.bf16 %v691_v43, %v689_v42  ;;  %v693_v61 = vld [vmem:[%s14109_s13 + $0xe0] sm:$0xff]  ;;  %v696_v2 = vld [vmem:[%s14109_s13 + $0xf8] sm:$0xff]  ;;  %v10438_v3 = vor.u32 %v12722_v0, %v10437_v63  ;;  %v10223_v9 = vld [vmem:[#allocation5 + $0x148] sm:$0xf0] }
  0x91   : > { %1553 = vmatpush.bf16.msrb.mxu1 %v10310_v1  ;;  %v694_v1 = vld [vmem:[%s14109_s13 + $0xe8] sm:$0xff]  ;;  %v10221_v10 = vld [vmem:[#allocation5 + $0x130] sm:$0xf]  ;;  %v12713_v13 = vld [vmem:[#allocation5 + $0x2b4] sm:$0xf] }
  0x92   : > { %1602 = vmatpush.bf16.msrb.mxu2 %v10122_v57  ;;  %v12719_v57 = vld [vmem:[#allocation5 + $0x2e4] sm:$0xf]  ;;  %v14221_v5 = vpack.c.bf16 %v696_v2, %v694_v1  ;;  %v12668_v12 = vld [vmem:[#allocation5 + $0x144] sm:$0xf0]  ;;  %v10415_v16 = vld [vmem:[#allocation5 + $0x2c8] sm:$0xf0] }
  0x93   : > { %1651 = vmatpush.bf16.msrb.mxu3 %v10314_v62  ;;  %v10442_v60 = vor.u32 %v12719_v57, %v10439_v58  ;;  %v695_v62 = vld [vmem:[%s14109_s13 + $0xf0] sm:$0xff]  ;;  %v14227_v19 = vld [vmem:[#allocation7] sm:$0x3f]  ;;  %v10199_v34 = vld [vmem:[#allocation5 + $0x118] sm:$0xf0] }
  0x94   : > { %1505 = vmatpush.bf16.msrb.mxu0 %v10094_v17  ;;  %v14219_v4 = vpack.c.bf16 %v695_v62, %v693_v61  ;;  %v10222_v17 = vor.u32 %v12668_v12, %v10221_v10  ;;  %v10413_v20 = vld [vmem:[#allocation5 + $0x2b0] sm:$0xf]  ;;  %v14230_v22 = vperm.slane %v14227_v19, 0  ;;  %v14237_v30 = vperm.slane %v14227_v19, 1  ;;  %v10197_v35 = vld [vmem:[#allocation5 + $0x100] sm:$0xf] }
  0x95   : > { %1554 = vmatpush.bf16.msrb.mxu1 %v10286_v21  ;;  %v12716_v21 = vld [vmem:[#allocation5 + $0x2c4] sm:$0xf0]  ;;  %v12707_v39 = vld [vmem:[#allocation5 + $0x284] sm:$0xf]  ;;  %v10391_v40 = vld [vmem:[#allocation5 + $0x298] sm:$0xf0] }
  0x96   : > { %1603 = vmatpush.bf16.msrb.mxu2 %v10098_v11  ;;  %v10226_v11 = vor.u32 %v12665_v8, %v10223_v9  ;;  %v10414_v23 = vor.u32 %v12716_v21, %v10413_v20  ;;  %v10394_v46 = vor.u32 %v12707_v39, %v10391_v40  ;;  %v10389_v56 = vld [vmem:[#allocation5 + $0x280] sm:$0xf]  ;;  %v12710_v57 = vld [vmem:[#allocation5 + $0x294] sm:$0xf0]  ;;  %v12656_v21 = vld [vmem:[#allocation5 + $0xe4] sm:$0xf0] }
  0x97   : > { %1652 = vmatpush.bf16.msrb.mxu3 %v10290_v18  ;;  %v10418_v18 = vor.u32 %v12713_v13, %v10415_v16  ;;  %v12653_v13 = vld [vmem:[#allocation5 + $0xd4] sm:$0xf]  ;;  %v10175_v16 = vld [vmem:[#allocation5 + $0xe8] sm:$0xf0]  ;;  %v10365_v39 = vld [vmem:[#allocation5 + $0x250] sm:$0xf] }
  0x98   : > { %1506 = vmatpush.bf16.msrb.mxu0 %v10070_v37  ;;  %v10178_v20 = vor.u32 %v12653_v13, %v10175_v16  ;;  %v12704_v40 = vld [vmem:[#allocation5 + $0x264] sm:$0xf0] }
  0x99   : > { %1555 = vmatpush.bf16.msrb.mxu1 %v10262_v41 }
  0x9a   : > { %1604 = vmatpush.bf16.msrb.mxu2 %v10074_v31  ;;  %v12659_v31 = vld [vmem:[#allocation5 + $0x104] sm:$0xf] }
  0x9b   : > { %1321 = vmatmul.bf16.gmra.mxu0 %v14159_v32  ;;  %1653 = vmatpush.bf16.msrb.mxu3 %v10266_v38  ;;  %v10202_v37 = vor.u32 %v12659_v31, %v10199_v34  ;;  %v12662_v38 = vld [vmem:[#allocation5 + $0x114] sm:$0xf0] }
  0x9c   : > { %1370 = vmatmul.bf16.gmra.mxu1 %v14161_v33  ;;  %1695 = vmatpush.bf16.msra.mxu0 %v10246_v59  ;;  %v10198_v44 = vor.u32 %v12662_v38, %v10197_v35 }
  0x9d   : > { %1419 = vmatmul.bf16.gmra.mxu2 %v14159_v32  ;;  %1744 = vmatpush.bf16.msra.mxu1 %v10438_v3 }
  0x9e   : > { %1468 = vmatmul.bf16.gmra.mxu3 %v14161_v33  ;;  %1793 = vmatpush.bf16.msra.mxu2 %v10250_v55 }
  0x9f   : > { %1842 = vmatpush.bf16.msra.mxu3 %v10442_v60  ;;  %v10390_v60 = vor.u32 %v12710_v57, %v10389_v56 }
  0xa0   : > { %1696 = vmatpush.bf16.msra.mxu0 %v10222_v17  ;;  %v10173_v17 = vld [vmem:[#allocation5 + $0xd0] sm:$0xf] }
  0xa1   : > { %1745 = vmatpush.bf16.msra.mxu1 %v10414_v23  ;;  %v12701_v23 = vld [vmem:[#allocation5 + $0x254] sm:$0xf]  ;;  %v10174_v31 = vor.u32 %v12656_v21, %v10173_v17 }
  0xa2   : > { %1794 = vmatpush.bf16.msra.mxu2 %v10226_v11 }
  0xa3   : > { %1843 = vmatpush.bf16.msra.mxu3 %v10418_v18 }
  0xa4   : > { %1697 = vmatpush.bf16.msra.mxu0 %v10198_v44 }
  0xa5   : > { %1746 = vmatpush.bf16.msra.mxu1 %v10390_v60 }
  0xa6   : > { %1795 = vmatpush.bf16.msra.mxu2 %v10202_v37 }
  0xa7   : > { %1844 = vmatpush.bf16.msra.mxu3 %v10394_v46 }
  0xa8   : > { %1698 = vmatpush.bf16.msra.mxu0 %v10174_v31 }
  0xaa   : > { %1796 = vmatpush.bf16.msra.mxu2 %v10178_v20 }
  0xab   : > { %1326 = vmatmul.bf16.gmra.mxu0 %v14171_v52 }
  0xac   : > { %1375 = vmatmul.bf16.gmra.mxu1 %v14173_v53 }
  0xad   : > { %1424 = vmatmul.bf16.gmra.mxu2 %v14171_v52 }
  0xae   : > { %1473 = vmatmul.bf16.gmra.mxu3 %v14173_v53 }
  0xbb   : > { %1331 = vmatmul.bf16.gmra.mxu0 %v14183_v6 }
  0xbc   : > { %1380 = vmatmul.bf16.gmra.mxu1 %v14185_v7 }
  0xbd   : > { %1429 = vmatmul.bf16.gmra.mxu2 %v14183_v6 }
  0xbe   : > { %1478 = vmatmul.bf16.gmra.mxu3 %v14185_v7 }
  0xcb   : > { %1336 = vmatmul.bf16.gmra.mxu0 %v14195_v26 }
  0xcc   : > { %1385 = vmatmul.bf16.gmra.mxu1 %v14197_v27 }
  0xcd   : > { %1434 = vmatmul.bf16.gmra.mxu2 %v14195_v26 }
  0xce   : > { %1483 = vmatmul.bf16.gmra.mxu3 %v14197_v27 }
  0xdb   : > { %1341 = vmatmul.bf16.gmra.mxu0 %v14207_v47 }
  0xdc   : > { %1390 = vmatmul.bf16.gmra.mxu1 %v14209_v48 }
  0xdd   : > { %1439 = vmatmul.bf16.gmra.mxu2 %v14207_v47 }
  0xde   : > { %1488 = vmatmul.bf16.gmra.mxu3 %v14209_v48 }
  0xeb   : > { %1346 = vmatmul.bf16.gmra.mxu0 %v14219_v4 }
  0xec   : > { %1395 = vmatmul.bf16.gmra.mxu1 %v14221_v5 }
  0xed   : > { %1444 = vmatmul.bf16.gmra.mxu2 %v14219_v4 }
  0xee   : > { %1493 = vmatmul.bf16.gmra.mxu3 %v14221_v5 }
  0xf8   : > { %v1312_v24 = vpop.f32.mrf.mxu0 }
  0xf9   : > { %v1313_v25 = vadd.f32 %v1312_v24, %v14230_v22  ;;  %v1361_v28 = vpop.f32.mrf.mxu1  ;;  %v10367_v24 = vld [vmem:[#allocation5 + $0x268] sm:$0xf0] }
  0xfa   : > { %v10370_v34 = vor.u32 %v12701_v23, %v10367_v24 }
  0xfb   : > { %v1362_v29 = vadd.f32 %v1361_v28, %v1313_v25  ;;  %1507 = vmatmul.bf16.vlgmr.msrb.gmra.mxu0 %v14135_v45 }
  0xfc   : > { %1556 = vmatmul.bf16.vlgmr.msrb.gmra.mxu1 %v14137_v49  ;;  %1845 = vmatpush.bf16.msra.mxu3 %v10370_v34 }
  0xfd   : > { %1605 = vmatmul.bf16.vlgmr.msrb.gmra.mxu2 %v14135_v45  ;;  %v1891_v58 = vmax.f32 %v1362_v29, 0.0 }
  0xfe   : > { %1654 = vmatmul.bf16.vlgmr.msrb.gmra.mxu3 %v14137_v49 }
 0x100   : > { %v1410_v36 = vpop.f32.mrf.mxu2  ;;  %v1314_v43 = vpop.f32.mrf.mxu0 }
 0x101   : > { %v1411_v41 = vadd.f32 %v1410_v36, %v14237_v30  ;;  %v1459_v42 = vpop.f32.mrf.mxu3  ;;  %v1315_v50 = vadd.f32 %v1314_v43, %v14230_v22  ;;  %v1363_v51 = vpop.f32.mrf.mxu1  ;;  %v10366_v43 = vor.u32 %v12704_v40, %v10365_v39 }
 0x103   : > { %v1460_v54 = vadd.f32 %v1459_v42, %v1411_v41  ;;  %v1364_v55 = vadd.f32 %v1363_v51, %v1315_v50  ;;  %1747 = vmatpush.bf16.msra.mxu1 %v10366_v43 }
 0x105   : > { %v1897_v59 = vmax.f32 %v1364_v55, 0.0  ;;  %v1892_v10 = vmax.f32 %v1460_v54, 0.0 }
 0x107   : > { %v14242_v61 = vpack.c.bf16 %v1897_v59, %v1891_v58 }
 0x108   : > { %v1412_v62 = vpop.f32.mrf.mxu2  ;;  %v1317_v1 = vpop.f32.mrf.mxu0 }
 0x109   : > { %16500 = vst [vmem:[#allocation23_spill] sm:$0xff] %v14242_v61  ;;  %v1413_v63 = vadd.f32 %v1412_v62, %v14237_v30  ;;  %v1461_v0 = vpop.f32.mrf.mxu3  ;;  %v1318_v2 = vadd.f32 %v1317_v1, %v14230_v22  ;;  %v1366_v3 = vpop.f32.mrf.mxu1  ;;  %v10149_v1 = vld [vmem:[#allocation5 + $0xa0] sm:$0xf] }
 0x10b   : > { %v1462_v8 = vadd.f32 %v1461_v0, %v1413_v63  ;;  %v1367_v9 = vadd.f32 %v1366_v3, %v1318_v2  ;;  %1512 = vmatmul.bf16.gmra.mxu0 %v14147_v14  ;;  %v12647_v63 = vld [vmem:[#allocation5 + $0xa4] sm:$0xf]  ;;  %v10151_v0 = vld [vmem:[#allocation5 + $0xb8] sm:$0xf0] }
 0x10c   : > { %1561 = vmatmul.bf16.gmra.mxu1 %v14149_v15  ;;  %v10154_v3 = vor.u32 %v12647_v63, %v10151_v0  ;;  %v10319_v63 = vld [vmem:[#allocation5 + $0x208] sm:$0xf0] }
 0x10d   : > { %v1898_v11 = vmax.f32 %v1462_v8, 0.0  ;;  %1610 = vmatmul.bf16.gmra.mxu2 %v14147_v14  ;;  %v1903_v41 = vmax.f32 %v1367_v9, 0.0  ;;  %v12650_v8 = vld [vmem:[#allocation5 + $0xb4] sm:$0xf0]  ;;  %v12695_v9 = vld [vmem:[#allocation5 + $0x224] sm:$0xf] }
 0x10e   : > { %1659 = vmatmul.bf16.gmra.mxu3 %v14149_v15  ;;  %v10150_v17 = vor.u32 %v12650_v8, %v10149_v1  ;;  %1797 = vmatpush.bf16.msra.mxu2 %v10154_v3 }
 0x10f   : > { %v14250_v12 = vpack.c.bf16 %v1898_v11, %v1892_v10  ;;  %v10343_v10 = vld [vmem:[#allocation5 + $0x238] sm:$0xf0] }
 0x110   : > { %v1415_v18 = vpop.f32.mrf.mxu2  ;;  %v1319_v29 = vpop.f32.mrf.mxu0  ;;  %1699 = vmatpush.bf16.msra.mxu0 %v10150_v17  ;;  %v12692_v17 = vld [vmem:[#allocation5 + $0x204] sm:$0xf0] }
 0x111   : > { %16501 = vst [vmem:[#allocation24_spill] sm:$0xff] %v14250_v12  ;;  %v1416_v25 = vadd.f32 %v1415_v18, %v14237_v30  ;;  %v1464_v28 = vpop.f32.mrf.mxu3  ;;  %v1320_v35 = vadd.f32 %v1319_v29, %v14230_v22  ;;  %v1368_v36 = vpop.f32.mrf.mxu1  ;;  %v10346_v18 = vor.u32 %v12695_v9, %v10343_v10 }
 0x113   : > { %v1465_v37 = vadd.f32 %v1464_v28, %v1416_v25  ;;  %v1369_v38 = vadd.f32 %v1368_v36, %v1320_v35  ;;  %1846 = vmatpush.bf16.msra.mxu3 %v10346_v18  ;;  %v10341_v25 = vld [vmem:[#allocation5 + $0x220] sm:$0xf]  ;;  %v12698_v28 = vld [vmem:[#allocation5 + $0x234] sm:$0xf0] }
 0x114   : > { %v10342_v34 = vor.u32 %v12698_v28, %v10341_v25 }
 0x115   : > { %v1909_v42 = vmax.f32 %v1369_v38, 0.0  ;;  %v1904_v59 = vmax.f32 %v1465_v37, 0.0 }
 0x116   : > { %1748 = vmatpush.bf16.msra.mxu1 %v10342_v34 }
 0x117   : > { %v14254_v44 = vpack.c.bf16 %v1909_v42, %v1903_v41 }
 0x118   : > { %v1417_v46 = vpop.f32.mrf.mxu2  ;;  %v1322_v54 = vpop.f32.mrf.mxu0 }
 0x119   : > { %16502 = vst [vmem:[#allocation25_spill] sm:$0xff] %v14254_v44  ;;  %v1418_v50 = vadd.f32 %v1417_v46, %v14237_v30  ;;  %v1466_v51 = vpop.f32.mrf.mxu3  ;;  %v1323_v55 = vadd.f32 %v1322_v54, %v14230_v22  ;;  %v1371_v56 = vpop.f32.mrf.mxu1  ;;  %v12641_v54 = vld [vmem:[#allocation5 + $0x74] sm:$0xf] }
 0x11b   : > { %v1467_v57 = vadd.f32 %v1466_v51, %v1418_v50  ;;  %v1372_v58 = vadd.f32 %v1371_v56, %v1323_v55  ;;  %1517 = vmatmul.bf16.gmra.mxu0 %v14159_v32  ;;  %v10127_v55 = vld [vmem:[#allocation5 + $0x88] sm:$0xf0]  ;;  %v10125_v56 = vld [vmem:[#allocation5 + $0x70] sm:$0xf] }
 0x11c   : > { %1566 = vmatmul.bf16.gmra.mxu1 %v14161_v33 }
 0x11d   : > { %v1910_v60 = vmax.f32 %v1467_v57, 0.0  ;;  %1615 = vmatmul.bf16.gmra.mxu2 %v14159_v32  ;;  %v1915_v29 = vmax.f32 %v1372_v58, 0.0  ;;  %v10130_v58 = vor.u32 %v12641_v54, %v10127_v55  ;;  %v12638_v54 = vld [vmem:[#allocation5 + $0x54] sm:$0xf0]  ;;  %v12683_v55 = vld [vmem:[#allocation5 + $0x1c4] sm:$0xf] }
 0x11e   : > { %1664 = vmatmul.bf16.gmra.mxu3 %v14161_v33 }
 0x11f   : > { %v14262_v62 = vpack.c.bf16 %v1910_v60, %v1904_v59  ;;  %v12644_v59 = vld [vmem:[#allocation5 + $0x84] sm:$0xf0]  ;;  %v12689_v60 = vld [vmem:[#allocation5 + $0x1f4] sm:$0xf]  ;;  %1798 = vmatpush.bf16.msra.mxu2 %v10130_v58 }
 0x120   : > { %v1420_v2 = vpop.f32.mrf.mxu2  ;;  %v1324_v16 = vpop.f32.mrf.mxu0  ;;  %v10126_v3 = vor.u32 %v12644_v59, %v10125_v56  ;;  %v10322_v8 = vor.u32 %v12689_v60, %v10319_v63  ;;  %v10295_v56 = vld [vmem:[#allocation5 + $0x1d8] sm:$0xf0] }
 0x121   : > { %16503 = vst [vmem:[#allocation26_spill] sm:$0xff] %v14262_v62  ;;  %v1421_v11 = vadd.f32 %v1420_v2, %v14237_v30  ;;  %v1469_v13 = vpop.f32.mrf.mxu3  ;;  %v1325_v20 = vadd.f32 %v1324_v16, %v14230_v22  ;;  %v1373_v21 = vpop.f32.mrf.mxu1  ;;  %v10317_v16 = vld [vmem:[#allocation5 + $0x1f0] sm:$0xf]  ;;  %v10298_v63 = vor.u32 %v12683_v55, %v10295_v56 }
 0x122   : > { %1700 = vmatpush.bf16.msra.mxu0 %v10126_v3  ;;  %1847 = vmatpush.bf16.msra.mxu3 %v10322_v8  ;;  %v10293_v8 = vld [vmem:[#allocation5 + $0x1c0] sm:$0xf] }
 0x123   : > { %v1470_v23 = vadd.f32 %v1469_v13, %v1421_v11  ;;  %v1374_v24 = vadd.f32 %v1373_v21, %v1325_v20  ;;  %v10318_v21 = vor.u32 %v12692_v17, %v10317_v16 }
 0x125   : > { %v1921_v31 = vmax.f32 %v1374_v24, 0.0  ;;  %v1916_v46 = vmax.f32 %v1470_v23, 0.0  ;;  %1749 = vmatpush.bf16.msra.mxu1 %v10318_v21 }
 0x126   : > { %1848 = vmatpush.bf16.msra.mxu3 %v10298_v63 }
 0x127   : > { %v14266_v35 = vpack.c.bf16 %v1921_v31, %v1915_v29 }
 0x128   : > { %v1422_v36 = vpop.f32.mrf.mxu2  ;;  %v1327_v39 = vpop.f32.mrf.mxu0 }
 0x129   : > { %16504 = vst [vmem:[#allocation27_spill] sm:$0xff] %v14266_v35  ;;  %v1423_v37 = vadd.f32 %v1422_v36, %v14237_v30  ;;  %v1471_v38 = vpop.f32.mrf.mxu3  ;;  %v1328_v40 = vadd.f32 %v1327_v39, %v14230_v22  ;;  %v1376_v41 = vpop.f32.mrf.mxu1 }
 0x12b   : > { %v1472_v42 = vadd.f32 %v1471_v38, %v1423_v37  ;;  %v1377_v43 = vadd.f32 %v1376_v41, %v1328_v40  ;;  %1522 = vmatmul.bf16.gmra.mxu0 %v14171_v52  ;;  %v12635_v41 = vld [vmem:[#allocation5 + $0x44] sm:$0xf] }
 0x12c   : > { %1571 = vmatmul.bf16.gmra.mxu1 %v14173_v53 }
 0x12d   : > { %v1922_v50 = vmax.f32 %v1472_v42, 0.0  ;;  %1620 = vmatmul.bf16.gmra.mxu2 %v14171_v52  ;;  %v1927_v18 = vmax.f32 %v1377_v43, 0.0  ;;  %v10103_v42 = vld [vmem:[#allocation5 + $0x58] sm:$0xf0]  ;;  %v10101_v43 = vld [vmem:[#allocation5 + $0x40] sm:$0xf] }
 0x12e   : > { %1669 = vmatmul.bf16.gmra.mxu3 %v14173_v53  ;;  %v10102_v60 = vor.u32 %v12638_v54, %v10101_v43  ;;  %v12632_v43 = vld [vmem:[#allocation5 + $0x24] sm:$0xf0] }
 0x12f   : > { %v14274_v51 = vpack.c.bf16 %v1922_v50, %v1916_v46  ;;  %v10106_v50 = vor.u32 %v12635_v41, %v10103_v42 }
 0x130   : > { %v1425_v57 = vpop.f32.mrf.mxu2  ;;  %v1329_v2 = vpop.f32.mrf.mxu0  ;;  %1701 = vmatpush.bf16.msra.mxu0 %v10102_v60 }
 0x131   : > { %16505 = vst [vmem:[#allocation28_spill] sm:$0xff] %v14274_v51  ;;  %v1426_v0 = vadd.f32 %v1425_v57, %v14237_v30  ;;  %v1474_v1 = vpop.f32.mrf.mxu3  ;;  %v1330_v9 = vadd.f32 %v1329_v2, %v14230_v22  ;;  %v1378_v10 = vpop.f32.mrf.mxu1  ;;  %1799 = vmatpush.bf16.msra.mxu2 %v10106_v50  ;;  %v10271_v50 = vld [vmem:[#allocation5 + $0x1a8] sm:$0xf0] }
 0x133   : > { %v1475_v11 = vadd.f32 %v1474_v1, %v1426_v0  ;;  %v1379_v13 = vadd.f32 %v1378_v10, %v1330_v9  ;;  %v12686_v9 = vld [vmem:[#allocation5 + $0x1d4] sm:$0xf0] }
 0x135   : > { %v1933_v20 = vmax.f32 %v1379_v13, 0.0  ;;  %v1928_v38 = vmax.f32 %v1475_v11, 0.0  ;;  %v10294_v13 = vor.u32 %v12686_v9, %v10293_v8 }
 0x137   : > { %v14278_v23 = vpack.c.bf16 %v1933_v20, %v1927_v18  ;;  %1750 = vmatpush.bf16.msra.mxu1 %v10294_v13 }
 0x138   : > { %v1427_v24 = vpop.f32.mrf.mxu2  ;;  %v1332_v29 = vpop.f32.mrf.mxu0 }
 0x139   : > { %16506 = vst [vmem:[#allocation29_spill] sm:$0xff] %v14278_v23  ;;  %v1428_v25 = vadd.f32 %v1427_v24, %v14237_v30  ;;  %v1476_v28 = vpop.f32.mrf.mxu3  ;;  %v1333_v31 = vadd.f32 %v1332_v29, %v14230_v22  ;;  %v1381_v34 = vpop.f32.mrf.mxu1 }
 0x13b   : > { %v1477_v36 = vadd.f32 %v1476_v28, %v1428_v25  ;;  %v1382_v37 = vadd.f32 %v1381_v34, %v1333_v31  ;;  %1527 = vmatmul.bf16.gmra.mxu0 %v14183_v6 }
 0x13c   : > { %1576 = vmatmul.bf16.gmra.mxu1 %v14185_v7 }
 0x13d   : > { %v1934_v39 = vmax.f32 %v1477_v36, 0.0  ;;  %1625 = vmatmul.bf16.gmra.mxu2 %v14183_v6  ;;  %v1939_v10 = vmax.f32 %v1382_v37, 0.0  ;;  %v12629_v37 = vld [vmem:[#allocation5 + $0x14] sm:$0xf] }
 0x13e   : > { %1674 = vmatmul.bf16.gmra.mxu3 %v14185_v7 }
 0x13f   : > { %v14286_v40 = vpack.c.bf16 %v1934_v39, %v1928_v38  ;;  %v10079_v38 = vld [vmem:[#allocation5 + $0x28] sm:$0xf0]  ;;  %v10077_v39 = vld [vmem:[#allocation5 + $0x10] sm:$0xf] }
 0x140   : > { %v1430_v46 = vpop.f32.mrf.mxu2  ;;  %v1334_v59 = vpop.f32.mrf.mxu0  ;;  %v10082_v42 = vor.u32 %v12629_v37, %v10079_v38  ;;  %v12817_v37 = vld [vmem:[#allocation8 + $0x2ec] sm:$0xf0]  ;;  %v10557_v38 = vld [vmem:[#allocation8 + $0xe0] sm:$0xf] }
 0x141   : > { %16507 = vst [vmem:[#allocation30_spill] sm:$0xff] %v14286_v40  ;;  %v1431_v57 = vadd.f32 %v1430_v46, %v14237_v30  ;;  %v1479_v58 = vpop.f32.mrf.mxu3  ;;  %v1335_v0 = vadd.f32 %v1334_v59, %v14230_v22  ;;  %v1383_v1 = vpop.f32.mrf.mxu1  ;;  %v12677_v46 = vld [vmem:[#allocation5 + $0x194] sm:$0xf] }
 0x142   : > { %1800 = vmatpush.bf16.msra.mxu2 %v10082_v42  ;;  %v12753_v42 = vld [vmem:[#allocation8 + $0xec] sm:$0xf0] }
 0x143   : > { %v1480_v2 = vadd.f32 %v1479_v58, %v1431_v57  ;;  %v1384_v3 = vadd.f32 %v1383_v1, %v1335_v0  ;;  %v10078_v57 = vor.u32 %v12632_v43, %v10077_v39  ;;  %v10274_v58 = vor.u32 %v12677_v46, %v10271_v50  ;;  %v10269_v1 = vld [vmem:[#allocation5 + $0x190] sm:$0xf]  ;;  %v10941_v43 = vld [vmem:[#allocation8 + $0x3e0] sm:$0xf]  ;;  %v12849_v46 = vld [vmem:[#allocation8 + $0x3ec] sm:$0xf0] }
 0x145   : > { %v1945_v11 = vmax.f32 %v1384_v3, 0.0  ;;  %v1940_v31 = vmax.f32 %v1480_v2, 0.0  ;;  %1702 = vmatpush.bf16.msra.mxu0 %v10078_v57  ;;  %1849 = vmatpush.bf16.msra.mxu3 %v10274_v58  ;;  %v12680_v2 = vld [vmem:[#allocation5 + $0x1a4] sm:$0xf0]  ;;  %v10942_v57 = vor.u32 %v12849_v46, %v10941_v43  ;;  %v12749_v43 = vld [vmem:[#allocation8 + $0xcc] sm:$0xf0] }
 0x146   : > { %v10270_v9 = vor.u32 %v12680_v2, %v10269_v1  ;;  %v12785_v1 = vld [vmem:[#allocation8 + $0x1ec] sm:$0xf0]  ;;  %v10925_v46 = vld [vmem:[#allocation8 + $0x3c0] sm:$0xf] }
 0x147   : > { %v14290_v16 = vpack.c.bf16 %v1945_v11, %v1939_v10 }
 0x148   : > { %v1432_v17 = vpop.f32.mrf.mxu2  ;;  %v1337_v21 = vpop.f32.mrf.mxu0  ;;  %1751 = vmatpush.bf16.msra.mxu1 %v10270_v9 }
 0x149   : > { %16508 = vst [vmem:[#allocation31_spill] sm:$0xff] %v14290_v16  ;;  %v1433_v18 = vadd.f32 %v1432_v17, %v14237_v30  ;;  %v1481_v20 = vpop.f32.mrf.mxu3  ;;  %v1338_v24 = vadd.f32 %v1337_v21, %v14230_v22  ;;  %v1386_v25 = vpop.f32.mrf.mxu1  ;;  %3344 = vmatpush.bf16.msrb.mxu3 %v10942_v57 }
 0x14b   : > { %v1482_v28 = vadd.f32 %v1481_v20, %v1433_v18  ;;  %v1387_v29 = vadd.f32 %v1386_v25, %v1338_v24  ;;  %1532 = vmatmul.bf16.gmra.mxu0 %v14195_v26 }
 0x14c   : > { %1581 = vmatmul.bf16.gmra.mxu1 %v14197_v27 }
 0x14d   : > { %v1946_v34 = vmax.f32 %v1482_v28, 0.0  ;;  %1630 = vmatmul.bf16.gmra.mxu2 %v14195_v26  ;;  %v1951_v3 = vmax.f32 %v1387_v29, 0.0 }
 0x14e   : > { %1679 = vmatmul.bf16.gmra.mxu3 %v14197_v27 }
 0x14f   : > { %v14298_v36 = vpack.c.bf16 %v1946_v34, %v1940_v31  ;;  %v10813_v34 = vld [vmem:[#allocation8 + $0x2e0] sm:$0xf] }
 0x150   : > { %v1435_v41 = vpop.f32.mrf.mxu2  ;;  %v1339_v56 = vpop.f32.mrf.mxu0 }
 0x151   : > { %16509 = vst [vmem:[#allocation32_spill] sm:$0xff] %v14298_v36  ;;  %v1436_v54 = vadd.f32 %v1435_v41, %v14237_v30  ;;  %v1484_v55 = vpop.f32.mrf.mxu3  ;;  %v1340_v59 = vadd.f32 %v1339_v56, %v14230_v22  ;;  %v1388_v60 = vpop.f32.mrf.mxu1  ;;  %v10814_v41 = vor.u32 %v12817_v37, %v10813_v34  ;;  %v10558_v56 = vor.u32 %v12753_v42, %v10557_v38  ;;  %v10797_v37 = vld [vmem:[#allocation8 + $0x2c0] sm:$0xf]  ;;  %v12813_v38 = vld [vmem:[#allocation8 + $0x2cc] sm:$0xf0] }
 0x152   : > { %v10798_v42 = vor.u32 %v12813_v38, %v10797_v37 }
 0x153   : > { %v1485_v63 = vadd.f32 %v1484_v55, %v1436_v54  ;;  %v1389_v0 = vadd.f32 %v1388_v60, %v1340_v59  ;;  %3295 = vmatpush.bf16.msrb.mxu2 %v10814_v41  ;;  %3197 = vmatpush.bf16.msrb.mxu0 %v10558_v56 }
 0x155   : > { %v1957_v8 = vmax.f32 %v1389_v0, 0.0  ;;  %v1952_v28 = vmax.f32 %v1485_v63, 0.0  ;;  %v10685_v0 = vld [vmem:[#allocation8 + $0x1e0] sm:$0xf] }
 0x157   : > { %v14302_v10 = vpack.c.bf16 %v1957_v8, %v1951_v3  ;;  %v10686_v8 = vor.u32 %v12785_v1, %v10685_v0  ;;  %3296 = vmatpush.bf16.msrb.mxu2 %v10798_v42  ;;  %v10669_v1 = vld [vmem:[#allocation8 + $0x1c0] sm:$0xf]  ;;  %v12809_v42 = vld [vmem:[#allocation8 + $0x2ac] sm:$0xf0] }
 0x158   : > { %v1437_v11 = vpop.f32.mrf.mxu2  ;;  %v1342_v18 = vpop.f32.mrf.mxu0 }
 0x159   : > { %16510 = vst [vmem:[#allocation33_spill] sm:$0xff] %v14302_v10  ;;  %v1438_v13 = vadd.f32 %v1437_v11, %v14237_v30  ;;  %v1486_v17 = vpop.f32.mrf.mxu3  ;;  %v1343_v20 = vadd.f32 %v1342_v18, %v14230_v22  ;;  %v1391_v21 = vpop.f32.mrf.mxu1  ;;  %3246 = vmatpush.bf16.msrb.mxu1 %v10686_v8 }
 0x15b   : > { %v1487_v24 = vadd.f32 %v1486_v17, %v1438_v13  ;;  %v1392_v25 = vadd.f32 %v1391_v21, %v1343_v20  ;;  %1537 = vmatmul.bf16.gmra.mxu0 %v14207_v47 }
 0x15c   : > { %1586 = vmatmul.bf16.gmra.mxu1 %v14209_v48 }
 0x15d   : > { %v1958_v31 = vmax.f32 %v1487_v24, 0.0  ;;  %1635 = vmatmul.bf16.gmra.mxu2 %v14207_v47  ;;  %v1963_v2 = vmax.f32 %v1392_v25, 0.0 }
 0x15e   : > { %1684 = vmatmul.bf16.gmra.mxu3 %v14209_v48 }
 0x15f   : > { %v14310_v29 = vpack.c.bf16 %v1958_v31, %v1952_v28 }
 0x160   : > { %v1440_v39 = vpop.f32.mrf.mxu2  ;;  %v1344_v55 = vpop.f32.mrf.mxu0 }
 0x161   : > { %16511 = vst [vmem:[#allocation34_spill] sm:$0xff] %v14310_v29  ;;  %v1441_v50 = vadd.f32 %v1440_v39, %v14237_v30  ;;  %v1489_v54 = vpop.f32.mrf.mxu3  ;;  %v1345_v58 = vadd.f32 %v1344_v55, %v14230_v22  ;;  %v1393_v59 = vpop.f32.mrf.mxu1  ;;  %v10541_v39 = vld [vmem:[#allocation8 + $0xc0] sm:$0xf] }
 0x162   : > { %v10542_v57 = vor.u32 %v12749_v43, %v10541_v39  ;;  %v14337_v39 = vperm.slane %v14227_v19, 3  ;;  %v10525_v43 = vld [vmem:[#allocation8 + $0xa0] sm:$0xf] }
 0x163   : > { %v1490_v60 = vadd.f32 %v1489_v54, %v1441_v50  ;;  %v1394_v63 = vadd.f32 %v1393_v59, %v1345_v58  ;;  %v12845_v50 = vld [vmem:[#allocation8 + $0x3cc] sm:$0xf0] }
 0x164   : > { %v10926_v58 = vor.u32 %v12845_v50, %v10925_v46  ;;  %3198 = vmatpush.bf16.msrb.mxu0 %v10542_v57 }
 0x165   : > { %v1969_v3 = vmax.f32 %v1394_v63, 0.0  ;;  %v1964_v31 = vmax.f32 %v1490_v60, 0.0 }
 0x166   : > { %3345 = vmatpush.bf16.msrb.mxu3 %v10926_v58 }
 0x167   : > { %v14314_v9 = vpack.c.bf16 %v1969_v3, %v1963_v2  ;;  %v12781_v2 = vld [vmem:[#allocation8 + $0x1cc] sm:$0xf0] }
 0x168   : > { %v1442_v11 = vpop.f32.mrf.mxu2  ;;  %v1347_v18 = vpop.f32.mrf.mxu0 }
 0x169   : > { %16512 = vst [vmem:[#allocation35_spill] sm:$0xff] %v14314_v9  ;;  %v1443_v13 = vadd.f32 %v1442_v11, %v14237_v30  ;;  %v1491_v17 = vpop.f32.mrf.mxu3  ;;  %v1348_v20 = vadd.f32 %v1347_v18, %v14230_v22  ;;  %v1396_v21 = vpop.f32.mrf.mxu1  ;;  %v14327_v11 = vperm.slane %v14227_v19, 2 }
 0x16b   : > { %v1492_v24 = vadd.f32 %v1491_v17, %v1443_v13  ;;  %v1397_v28 = vadd.f32 %v1396_v21, %v1348_v20  ;;  %1542 = vmatmul.bf16.gmra.mxu0 %v14219_v4  ;;  %v10670_v13 = vor.u32 %v12781_v2, %v10669_v1  ;;  %v10653_v1 = vld [vmem:[#allocation8 + $0x1a0] sm:$0xf]  ;;  %v12777_v2 = vld [vmem:[#allocation8 + $0x1ac] sm:$0xf0] }
 0x16c   : > { %1591 = vmatmul.bf16.gmra.mxu1 %v14221_v5 }
 0x16d   : > { %v1970_v34 = vmax.f32 %v1492_v24, 0.0  ;;  %1640 = vmatmul.bf16.gmra.mxu2 %v14219_v4  ;;  %v1975_v3 = vmax.f32 %v1397_v28, 0.0  ;;  %3247 = vmatpush.bf16.msrb.mxu1 %v10670_v13  ;;  %v10654_v13 = vor.u32 %v12777_v2, %v10653_v1  ;;  %v10637_v1 = vld [vmem:[#allocation8 + $0x180] sm:$0xf]  ;;  %v12773_v2 = vld [vmem:[#allocation8 + $0x18c] sm:$0xf0] }
 0x16e   : > { %1689 = vmatmul.bf16.gmra.mxu3 %v14221_v5 }
 0x16f   : > { %v14322_v25 = vpack.c.bf16 %v1970_v34, %v1964_v31 }
 0x170   : > { %v1445_v41 = vpop.f32.mrf.mxu2  ;;  %v1349_v56 = vpop.f32.mrf.mxu0 }
 0x171   : > { %16513 = vst [vmem:[#allocation36_spill] sm:$0xff] %v14322_v25  ;;  %v1446_v54 = vadd.f32 %v1445_v41, %v14237_v30  ;;  %v1494_v55 = vpop.f32.mrf.mxu3  ;;  %v1350_v59 = vadd.f32 %v1349_v56, %v14230_v22  ;;  %v1398_v60 = vpop.f32.mrf.mxu1  ;;  %v10781_v41 = vld [vmem:[#allocation8 + $0x2a0] sm:$0xf]  ;;  %v12841_v56 = vld [vmem:[#allocation8 + $0x3ac] sm:$0xf0]  ;;  %3248 = vmatpush.bf16.msrb.mxu1 %v10654_v13  ;;  %v10638_v13 = vor.u32 %v12773_v2, %v10637_v1 }
 0x172   : > { %v10782_v50 = vor.u32 %v12809_v42, %v10781_v41  ;;  %v10621_v1 = vld [vmem:[#allocation8 + $0x160] sm:$0xf]  ;;  %v12769_v2 = vld [vmem:[#allocation8 + $0x16c] sm:$0xf0] }
 0x173   : > { %v1495_v63 = vadd.f32 %v1494_v55, %v1446_v54  ;;  %v1399_v0 = vadd.f32 %v1398_v60, %v1350_v59  ;;  %v12745_v54 = vld [vmem:[#allocation8 + $0xac] sm:$0xf0]  ;;  %v10909_v55 = vld [vmem:[#allocation8 + $0x3a0] sm:$0xf] }
 0x174   : > { %v10910_v60 = vor.u32 %v12841_v56, %v10909_v55  ;;  %3297 = vmatpush.bf16.msrb.mxu2 %v10782_v50  ;;  %v10509_v50 = vld [vmem:[#allocation8 + $0x80] sm:$0xf]  ;;  %v12741_v56 = vld [vmem:[#allocation8 + $0x8c] sm:$0xf0] }
 0x175   : > { %v1981_v8 = vmax.f32 %v1399_v0, 0.0  ;;  %v1976_v28 = vmax.f32 %v1495_v63, 0.0  ;;  %3249 = vmatpush.bf16.msrb.mxu1 %v10638_v13  ;;  %v10622_v13 = vor.u32 %v12769_v2, %v10621_v1  ;;  %v10605_v1 = vld [vmem:[#allocation8 + $0x140] sm:$0xf]  ;;  %v12765_v2 = vld [vmem:[#allocation8 + $0x14c] sm:$0xf0] }
 0x176   : > { %3346 = vmatpush.bf16.msrb.mxu3 %v10910_v60 }
 0x177   : > { %v14329_v17 = vpack.c.bf16 %v1981_v8, %v1975_v3 }
 0x178   : > { %v1447_v18 = vpop.f32.mrf.mxu2  ;;  %v1508_v21 = vpop.f32.mrf.mxu0 }
 0x179   : > { %16514 = vst [vmem:[#allocation37_spill] sm:$0xff] %v14329_v17  ;;  %v1448_v22 = vadd.f32 %v1447_v18, %v14237_v30  ;;  %v1496_v20 = vpop.f32.mrf.mxu3  ;;  %v1509_v24 = vadd.f32 %v1508_v21, %v14327_v11  ;;  %v1557_v31 = vpop.f32.mrf.mxu1  ;;  %3250 = vmatpush.bf16.msrb.mxu1 %v10622_v13  ;;  %v10606_v13 = vor.u32 %v12765_v2, %v10605_v1  ;;  %v10589_v1 = vld [vmem:[#allocation8 + $0x120] sm:$0xf]  ;;  %v12761_v2 = vld [vmem:[#allocation8 + $0x12c] sm:$0xf0] }
 0x17b   : > { %v1497_v34 = vadd.f32 %v1496_v20, %v1448_v22  ;;  %v1558_v37 = vadd.f32 %v1557_v31, %v1509_v24  ;;  %1703 = vmatmul.bf16.vlgmr.msra.gmra.mxu0 %v14135_v45 }
 0x17c   : > { %1752 = vmatmul.bf16.vlgmr.msra.gmra.mxu1 %v14137_v49 }
 0x17d   : > { %v1982_v38 = vmax.f32 %v1497_v34, 0.0  ;;  %1801 = vmatmul.bf16.vlgmr.msra.gmra.mxu2 %v14135_v45  ;;  %v10526_v45 = vor.u32 %v12745_v54, %v10525_v43  ;;  %v1893_v3 = vmax.f32 %v1558_v37, 0.0  ;;  %v10765_v43 = vld [vmem:[#allocation8 + $0x280] sm:$0xf]  ;;  %3251 = vmatpush.bf16.msrb.mxu1 %v10606_v13  ;;  %v10590_v13 = vor.u32 %v12761_v2, %v10589_v1  ;;  %v12757_v2 = vld [vmem:[#allocation8 + $0x10c] sm:$0xf0] }
 0x17e   : > { %1850 = vmatmul.bf16.vlgmr.msra.gmra.mxu3 %v14137_v49  ;;  %v10573_v1 = vld [vmem:[#allocation8 + $0x100] sm:$0xf] }
 0x17f   : > { %v14340_v30 = vpack.c.bf16 %v1982_v38, %v1976_v28  ;;  %3199 = vmatpush.bf16.msrb.mxu0 %v10526_v45 }
 0x180   : > { %v1606_v46 = vpop.f32.mrf.mxu2  ;;  %v1510_v59 = vpop.f32.mrf.mxu0 }
 0x181   : > { %16515 = vst [vmem:[#allocation38_spill] sm:$0xff] %v14340_v30  ;;  %v1607_v57 = vadd.f32 %v1606_v46, %v14337_v39  ;;  %v1655_v58 = vpop.f32.mrf.mxu3  ;;  %v1511_v19 = vadd.f32 %v1510_v59, %v14327_v11  ;;  %v1559_v63 = vpop.f32.mrf.mxu1  ;;  %v12805_v46 = vld [vmem:[#allocation8 + $0x28c] sm:$0xf0]  ;;  %3252 = vmatpush.bf16.msrb.mxu1 %v10590_v13  ;;  %v10574_v13 = vor.u32 %v12757_v2, %v10573_v1  ;;  %v11197_v1 = vld [vmem:[#allocation8 + $0x5e0] sm:$0xf] }
 0x182   : > { %v10766_v55 = vor.u32 %v12805_v46, %v10765_v43  ;;  %v12913_v2 = vld [vmem:[#allocation8 + $0x5ec] sm:$0xf0] }
 0x183   : > { %v1656_v49 = vadd.f32 %v1655_v58, %v1607_v57  ;;  %v1560_v0 = vadd.f32 %v1559_v63, %v1511_v19  ;;  %v10893_v57 = vld [vmem:[#allocation8 + $0x380] sm:$0xf]  ;;  %v12837_v58 = vld [vmem:[#allocation8 + $0x38c] sm:$0xf0]  ;;  %v10510_v19 = vor.u32 %v12741_v56, %v10509_v50 }
 0x184   : > { %v10894_v63 = vor.u32 %v12837_v58, %v10893_v57  ;;  %3298 = vmatpush.bf16.msrb.mxu2 %v10766_v55  ;;  %v10749_v50 = vld [vmem:[#allocation8 + $0x260] sm:$0xf]  ;;  %v12737_v58 = vld [vmem:[#allocation8 + $0x6c] sm:$0xf0] }
 0x185   : > { %v1899_v8 = vmax.f32 %v1560_v0, 0.0  ;;  %v1894_v41 = vmax.f32 %v1656_v49, 0.0  ;;  %3200 = vmatpush.bf16.msrb.mxu0 %v10510_v19  ;;  %v10493_v55 = vld [vmem:[#allocation8 + $0x60] sm:$0xf]  ;;  %3253 = vmatpush.bf16.msrb.mxu1 %v10574_v13  ;;  %v11198_v13 = vor.u32 %v12913_v2, %v11197_v1  ;;  %v12909_v2 = vld [vmem:[#allocation8 + $0x5cc] sm:$0xf0] }
 0x186   : > { %3347 = vmatpush.bf16.msrb.mxu3 %v10894_v63  ;;  %v11181_v1 = vld [vmem:[#allocation8 + $0x5c0] sm:$0xf] }
 0x187   : > { %v14344_v18 = vpack.c.bf16 %v1899_v8, %v1893_v3 }
 0x188   : > { %v1608_v22 = vpop.f32.mrf.mxu2  ;;  %v1513_v24 = vpop.f32.mrf.mxu0 }
 0x189   : > { %v1609_v20 = vadd.f32 %v1608_v22, %v14337_v39  ;;  %v1657_v21 = vpop.f32.mrf.mxu3  ;;  %v1514_v31 = vadd.f32 %v1513_v24, %v14327_v11  ;;  %v1562_v34 = vpop.f32.mrf.mxu1  ;;  %3442 = vmatpush.bf16.msra.mxu1 %v11198_v13  ;;  %v13540_v13 = vld [vmem:[#allocation7] sm:$0x3f] }
 0x18b   : > { %v1658_v28 = vadd.f32 %v1657_v21, %v1609_v20  ;;  %v1563_v38 = vadd.f32 %v1562_v34, %v1514_v31  ;;  %1708 = vmatmul.bf16.gmra.mxu0 %v14147_v14 }
 0x18c   : > { %1757 = vmatmul.bf16.gmra.mxu1 %v14149_v15 }
 0x18d   : > { %v1900_v42 = vmax.f32 %v1658_v28, 0.0  ;;  %1806 = vmatmul.bf16.gmra.mxu2 %v14147_v14  ;;  %v1905_v3 = vmax.f32 %v1563_v38, 0.0 }
 0x18e   : > { %1855 = vmatmul.bf16.gmra.mxu3 %v14149_v15 }
 0x18f   : > { %v14352_v37 = vpack.c.bf16 %v1900_v42, %v1894_v41 }
 0x190   : > { %v1611_v54 = vpop.f32.mrf.mxu2  ;;  %v1515_v60 = vpop.f32.mrf.mxu0 }
 0x191   : > { %16516 = vst [vmem:[#allocation39_spill] sm:$0xff] %v14352_v37  ;;  %v1612_v59 = vadd.f32 %v1611_v54, %v14337_v39  ;;  %v1660_v45 = vpop.f32.mrf.mxu3  ;;  %v1516_v14 = vadd.f32 %v1515_v60, %v14327_v11  ;;  %v1564_v49 = vpop.f32.mrf.mxu1  ;;  %v12801_v54 = vld [vmem:[#allocation8 + $0x26c] sm:$0xf0] }
 0x192   : > { %v10750_v57 = vor.u32 %v12801_v54, %v10749_v50 }
 0x193   : > { %v1661_v15 = vadd.f32 %v1660_v45, %v1612_v59  ;;  %v1565_v0 = vadd.f32 %v1564_v49, %v1516_v14  ;;  %v10877_v59 = vld [vmem:[#allocation8 + $0x360] sm:$0xf]  ;;  %v12833_v45 = vld [vmem:[#allocation8 + $0x36c] sm:$0xf0]  ;;  %v10494_v14 = vor.u32 %v12737_v58, %v10493_v55 }
 0x194   : > { %v10878_v49 = vor.u32 %v12833_v45, %v10877_v59  ;;  %3299 = vmatpush.bf16.msrb.mxu2 %v10750_v57  ;;  %v10733_v55 = vld [vmem:[#allocation8 + $0x240] sm:$0xf]  ;;  %v12733_v45 = vld [vmem:[#allocation8 + $0x4c] sm:$0xf0] }
 0x195   : > { %v1911_v8 = vmax.f32 %v1565_v0, 0.0  ;;  %v1906_v43 = vmax.f32 %v1661_v15, 0.0  ;;  %3201 = vmatpush.bf16.msrb.mxu0 %v10494_v14  ;;  %v10477_v57 = vld [vmem:[#allocation8 + $0x40] sm:$0xf] }
 0x196   : > { %3348 = vmatpush.bf16.msrb.mxu3 %v10878_v49 }
 0x197   : > { %v14356_v22 = vpack.c.bf16 %v1911_v8, %v1905_v3 }
 0x198   : > { %v1613_v20 = vpop.f32.mrf.mxu2  ;;  %v1518_v31 = vpop.f32.mrf.mxu0 }
 0x199   : > { %v1614_v21 = vadd.f32 %v1613_v20, %v14337_v39  ;;  %v1662_v24 = vpop.f32.mrf.mxu3  ;;  %v1519_v34 = vadd.f32 %v1518_v31, %v14327_v11  ;;  %v1567_v28 = vpop.f32.mrf.mxu1 }
 0x19b   : > { %v1663_v41 = vadd.f32 %v1662_v24, %v1614_v21  ;;  %v1568_v42 = vadd.f32 %v1567_v28, %v1519_v34  ;;  %1713 = vmatmul.bf16.gmra.mxu0 %v14159_v32 }
 0x19c   : > { %1762 = vmatmul.bf16.gmra.mxu1 %v14161_v33 }
 0x19d   : > { %v1912_v46 = vmax.f32 %v1663_v41, 0.0  ;;  %1811 = vmatmul.bf16.gmra.mxu2 %v14159_v32  ;;  %v1917_v3 = vmax.f32 %v1568_v42, 0.0 }
 0x19e   : > { %1860 = vmatmul.bf16.gmra.mxu3 %v14161_v33 }
 0x19f   : > { %v14364_v38 = vpack.c.bf16 %v1912_v46, %v1906_v43 }
 0x1a0   : > { %v1616_v56 = vpop.f32.mrf.mxu2  ;;  %v1520_v63 = vpop.f32.mrf.mxu0 }
 0x1a1   : > { %v1617_v60 = vadd.f32 %v1616_v56, %v14337_v39  ;;  %v1665_v19 = vpop.f32.mrf.mxu3  ;;  %v1521_v32 = vadd.f32 %v1520_v63, %v14327_v11  ;;  %v1569_v15 = vpop.f32.mrf.mxu1  ;;  %v12797_v56 = vld [vmem:[#allocation8 + $0x24c] sm:$0xf0] }
 0x1a2   : > { %v10734_v59 = vor.u32 %v12797_v56, %v10733_v55 }
 0x1a3   : > { %v1666_v33 = vadd.f32 %v1665_v19, %v1617_v60  ;;  %v1570_v0 = vadd.f32 %v1569_v15, %v1521_v32  ;;  %v10861_v60 = vld [vmem:[#allocation8 + $0x340] sm:$0xf]  ;;  %v12829_v19 = vld [vmem:[#allocation8 + $0x34c] sm:$0xf0]  ;;  %v10478_v32 = vor.u32 %v12733_v45, %v10477_v57 }
 0x1a4   : > { %v10862_v15 = vor.u32 %v12829_v19, %v10861_v60  ;;  %3300 = vmatpush.bf16.msrb.mxu2 %v10734_v59  ;;  %v10717_v57 = vld [vmem:[#allocation8 + $0x220] sm:$0xf]  ;;  %v12729_v19 = vld [vmem:[#allocation8 + $0x2c] sm:$0xf0] }
 0x1a5   : > { %v1923_v8 = vmax.f32 %v1570_v0, 0.0  ;;  %v1918_v50 = vmax.f32 %v1666_v33, 0.0  ;;  %3202 = vmatpush.bf16.msrb.mxu0 %v10478_v32  ;;  %v10461_v59 = vld [vmem:[#allocation8 + $0x20] sm:$0xf] }
 0x1a6   : > { %3349 = vmatpush.bf16.msrb.mxu3 %v10862_v15 }
 0x1a7   : > { %v14368_v20 = vpack.c.bf16 %v1923_v8, %v1917_v3 }
 0x1a8   : > { %v1618_v21 = vpop.f32.mrf.mxu2  ;;  %v1523_v34 = vpop.f32.mrf.mxu0 }
 0x1a9   : > { %v1619_v24 = vadd.f32 %v1618_v21, %v14337_v39  ;;  %v1667_v31 = vpop.f32.mrf.mxu3  ;;  %v1524_v28 = vadd.f32 %v1523_v34, %v14327_v11  ;;  %v1572_v41 = vpop.f32.mrf.mxu1 }
 0x1ab   : > { %v1668_v43 = vadd.f32 %v1667_v31, %v1619_v24  ;;  %v1573_v46 = vadd.f32 %v1572_v41, %v1524_v28  ;;  %1718 = vmatmul.bf16.gmra.mxu0 %v14171_v52 }
 0x1ac   : > { %1767 = vmatmul.bf16.gmra.mxu1 %v14173_v53 }
 0x1ad   : > { %v1924_v54 = vmax.f32 %v1668_v43, 0.0  ;;  %1816 = vmatmul.bf16.gmra.mxu2 %v14171_v52  ;;  %v1929_v3 = vmax.f32 %v1573_v46, 0.0 }
 0x1ae   : > { %1865 = vmatmul.bf16.gmra.mxu3 %v14173_v53 }
 0x1af   : > { %v14376_v42 = vpack.c.bf16 %v1924_v54, %v1918_v50 }
 0x1b0   : > { %v1621_v58 = vpop.f32.mrf.mxu2  ;;  %v1525_v49 = vpop.f32.mrf.mxu0 }
 0x1b1   : > { %16517 = vst [vmem:[#allocation40_spill] sm:$0xff] %v14376_v42  ;;  %v1622_v63 = vadd.f32 %v1621_v58, %v14337_v39  ;;  %v1670_v14 = vpop.f32.mrf.mxu3  ;;  %v1526_v52 = vadd.f32 %v1525_v49, %v14327_v11  ;;  %v1574_v33 = vpop.f32.mrf.mxu1  ;;  %v12793_v58 = vld [vmem:[#allocation8 + $0x22c] sm:$0xf0] }
 0x1b2   : > { %v10718_v60 = vor.u32 %v12793_v58, %v10717_v57 }
 0x1b3   : > { %v1671_v53 = vadd.f32 %v1670_v14, %v1622_v63  ;;  %v1575_v0 = vadd.f32 %v1574_v33, %v1526_v52  ;;  %v10845_v63 = vld [vmem:[#allocation8 + $0x320] sm:$0xf]  ;;  %v12825_v14 = vld [vmem:[#allocation8 + $0x32c] sm:$0xf0]  ;;  %v10462_v52 = vor.u32 %v12729_v19, %v10461_v59 }
 0x1b4   : > { %v10846_v33 = vor.u32 %v12825_v14, %v10845_v63  ;;  %3301 = vmatpush.bf16.msrb.mxu2 %v10718_v60  ;;  %v10701_v59 = vld [vmem:[#allocation8 + $0x200] sm:$0xf]  ;;  %v12725_v14 = vld [vmem:[#allocation8 + $0xc] sm:$0xf0] }
 0x1b5   : > { %v1935_v8 = vmax.f32 %v1575_v0, 0.0  ;;  %v1930_v55 = vmax.f32 %v1671_v53, 0.0  ;;  %3203 = vmatpush.bf16.msrb.mxu0 %v10462_v52  ;;  %v10445_v60 = vld [vmem:[#allocation8] sm:$0xf] }
 0x1b6   : > { %3350 = vmatpush.bf16.msrb.mxu3 %v10846_v33 }
 0x1b7   : > { %v14380_v21 = vpack.c.bf16 %v1935_v8, %v1929_v3 }
 0x1b8   : > { %v1623_v24 = vpop.f32.mrf.mxu2  ;;  %v1528_v28 = vpop.f32.mrf.mxu0 }
 0x1b9   : > { %v1624_v31 = vadd.f32 %v1623_v24, %v14337_v39  ;;  %v1672_v34 = vpop.f32.mrf.mxu3  ;;  %v1529_v41 = vadd.f32 %v1528_v28, %v14327_v11  ;;  %v1577_v43 = vpop.f32.mrf.mxu1 }
 0x1bb   : > { %v1673_v50 = vadd.f32 %v1672_v34, %v1624_v31  ;;  %v1578_v54 = vadd.f32 %v1577_v43, %v1529_v41  ;;  %1723 = vmatmul.bf16.gmra.mxu0 %v14183_v6 }
 0x1bc   : > { %1772 = vmatmul.bf16.gmra.mxu1 %v14185_v7 }
 0x1bd   : > { %v1936_v56 = vmax.f32 %v1673_v50, 0.0  ;;  %1821 = vmatmul.bf16.gmra.mxu2 %v14183_v6  ;;  %v1941_v3 = vmax.f32 %v1578_v54, 0.0 }
 0x1be   : > { %1870 = vmatmul.bf16.gmra.mxu3 %v14185_v7 }
 0x1bf   : > { %v14388_v46 = vpack.c.bf16 %v1936_v56, %v1930_v55 }
 0x1c0   : > { %v1626_v45 = vpop.f32.mrf.mxu2  ;;  %v1530_v15 = vpop.f32.mrf.mxu0 }
 0x1c1   : > { %v1627_v49 = vadd.f32 %v1626_v45, %v14337_v39  ;;  %v1675_v32 = vpop.f32.mrf.mxu3  ;;  %v1531_v6 = vadd.f32 %v1530_v15, %v14327_v11  ;;  %v1579_v53 = vpop.f32.mrf.mxu1  ;;  %v12789_v45 = vld [vmem:[#allocation8 + $0x20c] sm:$0xf0] }
 0x1c2   : > { %v10702_v63 = vor.u32 %v12789_v45, %v10701_v59 }
 0x1c3   : > { %v1676_v7 = vadd.f32 %v1675_v32, %v1627_v49  ;;  %v1580_v0 = vadd.f32 %v1579_v53, %v1531_v6  ;;  %v10829_v49 = vld [vmem:[#allocation8 + $0x300] sm:$0xf]  ;;  %v12821_v32 = vld [vmem:[#allocation8 + $0x30c] sm:$0xf0]  ;;  %v10446_v6 = vor.u32 %v12725_v14, %v10445_v60  ;;  %v12751_v60 = vld [vmem:[#allocation8 + $0xe4] sm:$0xf] }
 0x1c4   : > { %v10830_v53 = vor.u32 %v12821_v32, %v10829_v49  ;;  %3302 = vmatpush.bf16.msrb.mxu2 %v10702_v63  ;;  %v11069_v63 = vld [vmem:[#allocation8 + $0x4e0] sm:$0xf]  ;;  %v12881_v32 = vld [vmem:[#allocation8 + $0x4ec] sm:$0xf0] }
 0x1c5   : > { %v1947_v8 = vmax.f32 %v1580_v0, 0.0  ;;  %v1942_v57 = vmax.f32 %v1676_v7, 0.0  ;;  %3204 = vmatpush.bf16.msrb.mxu0 %v10446_v6 }
 0x1c6   : > { %3351 = vmatpush.bf16.msrb.mxu3 %v10830_v53 }
 0x1c7   : > { %v14392_v24 = vpack.c.bf16 %v1947_v8, %v1941_v3 }
 0x1c8   : > { %v1628_v31 = vpop.f32.mrf.mxu2  ;;  %v1533_v41 = vpop.f32.mrf.mxu0 }
 0x1c9   : > { %v1629_v34 = vadd.f32 %v1628_v31, %v14337_v39  ;;  %v1677_v28 = vpop.f32.mrf.mxu3  ;;  %v1534_v43 = vadd.f32 %v1533_v41, %v14327_v11  ;;  %v1582_v50 = vpop.f32.mrf.mxu1 }
 0x1cb   : > { %v1678_v55 = vadd.f32 %v1677_v28, %v1629_v34  ;;  %v1583_v56 = vadd.f32 %v1582_v50, %v1534_v43  ;;  %1728 = vmatmul.bf16.gmra.mxu0 %v14195_v26 }
 0x1cc   : > { %1777 = vmatmul.bf16.gmra.mxu1 %v14197_v27 }
 0x1cd   : > { %v1948_v58 = vmax.f32 %v1678_v55, 0.0  ;;  %1826 = vmatmul.bf16.gmra.mxu2 %v14195_v26  ;;  %v1953_v3 = vmax.f32 %v1583_v56, 0.0 }
 0x1ce   : > { %1875 = vmatmul.bf16.gmra.mxu3 %v14197_v27 }
 0x1cf   : > { %v14400_v54 = vpack.c.bf16 %v1948_v58, %v1942_v57 }
 0x1d0   : > { %v1631_v19 = vpop.f32.mrf.mxu2  ;;  %v1535_v33 = vpop.f32.mrf.mxu0 }
 0x1d1   : > { %v1632_v15 = vadd.f32 %v1631_v19, %v14337_v39  ;;  %v1680_v52 = vpop.f32.mrf.mxu3  ;;  %v1536_v26 = vadd.f32 %v1535_v33, %v14327_v11  ;;  %v1584_v7 = vpop.f32.mrf.mxu1  ;;  %v10559_v19 = vld [vmem:[#allocation8 + $0xf0] sm:$0xf0] }
 0x1d2   : > { %v10562_v49 = vor.u32 %v12751_v60, %v10559_v19 }
 0x1d3   : > { %v1681_v27 = vadd.f32 %v1680_v52, %v1632_v15  ;;  %v1585_v0 = vadd.f32 %v1584_v7, %v1536_v26  ;;  %v12783_v15 = vld [vmem:[#allocation8 + $0x1e4] sm:$0xf]  ;;  %v10687_v52 = vld [vmem:[#allocation8 + $0x1f0] sm:$0xf0]  ;;  %v11070_v26 = vor.u32 %v12881_v32, %v11069_v63 }
 0x1d4   : > { %v10690_v7 = vor.u32 %v12783_v15, %v10687_v52  ;;  %3491 = vmatpush.bf16.msra.mxu2 %v10562_v49  ;;  %v12747_v63 = vld [vmem:[#allocation8 + $0xc4] sm:$0xf]  ;;  %v11053_v49 = vld [vmem:[#allocation8 + $0x4c0] sm:$0xf]  ;;  %v12877_v52 = vld [vmem:[#allocation8 + $0x4cc] sm:$0xf0] }
 0x1d5   : > { %v1959_v8 = vmax.f32 %v1585_v0, 0.0  ;;  %v1954_v59 = vmax.f32 %v1681_v27, 0.0  ;;  %3393 = vmatpush.bf16.msra.mxu0 %v11070_v26 }
 0x1d6   : > { %3540 = vmatpush.bf16.msra.mxu3 %v10690_v7 }
 0x1d7   : > { %v14404_v31 = vpack.c.bf16 %v1959_v8, %v1953_v3 }
 0x1d8   : > { %v1633_v34 = vpop.f32.mrf.mxu2  ;;  %v1538_v43 = vpop.f32.mrf.mxu0 }
 0x1d9   : > { %16518 = vst [vmem:[#allocation41_spill] sm:$0xff] %v14404_v31  ;;  %v1634_v28 = vadd.f32 %v1633_v34, %v14337_v39  ;;  %v1682_v41 = vpop.f32.mrf.mxu3  ;;  %v1539_v50 = vadd.f32 %v1538_v43, %v14327_v11  ;;  %v1587_v55 = vpop.f32.mrf.mxu1 }
 0x1db   : > { %v1683_v57 = vadd.f32 %v1682_v41, %v1634_v28  ;;  %v1588_v58 = vadd.f32 %v1587_v55, %v1539_v50  ;;  %1733 = vmatmul.bf16.gmra.mxu0 %v14207_v47 }
 0x1dc   : > { %1782 = vmatmul.bf16.gmra.mxu1 %v14209_v48 }
 0x1dd   : > { %v1960_v45 = vmax.f32 %v1683_v57, 0.0  ;;  %1831 = vmatmul.bf16.gmra.mxu2 %v14207_v47  ;;  %v1965_v3 = vmax.f32 %v1588_v58, 0.0 }
 0x1de   : > { %1880 = vmatmul.bf16.gmra.mxu3 %v14209_v48 }
 0x1df   : > { %v14412_v56 = vpack.c.bf16 %v1960_v45, %v1954_v59 }
 0x1e0   : > { %v1636_v14 = vpop.f32.mrf.mxu2  ;;  %v1540_v53 = vpop.f32.mrf.mxu0 }
 0x1e1   : > { %16519 = vst [vmem:[#allocation42_spill] sm:$0xff] %v14412_v56  ;;  %v1637_v33 = vadd.f32 %v1636_v14, %v14337_v39  ;;  %v1685_v6 = vpop.f32.mrf.mxu3  ;;  %v1541_v47 = vadd.f32 %v1540_v53, %v14327_v11  ;;  %v1589_v27 = vpop.f32.mrf.mxu1  ;;  %v10543_v14 = vld [vmem:[#allocation8 + $0xd0] sm:$0xf0] }
 0x1e2   : > { %v10546_v15 = vor.u32 %v12747_v63, %v10543_v14 }
 0x1e3   : > { %v1686_v48 = vadd.f32 %v1685_v6, %v1637_v33  ;;  %v1590_v0 = vadd.f32 %v1589_v27, %v1541_v47  ;;  %v12779_v33 = vld [vmem:[#allocation8 + $0x1c4] sm:$0xf]  ;;  %v10671_v6 = vld [vmem:[#allocation8 + $0x1d0] sm:$0xf0]  ;;  %v11054_v47 = vor.u32 %v12877_v52, %v11053_v49  ;;  %v14437_v49 = vperm.slane %v13540_v13, 5 }
 0x1e4   : > { %v10674_v27 = vor.u32 %v12779_v33, %v10671_v6  ;;  %3492 = vmatpush.bf16.msra.mxu2 %v10546_v15  ;;  %v10527_v15 = vld [vmem:[#allocation8 + $0xb0] sm:$0xf0]  ;;  %v11037_v52 = vld [vmem:[#allocation8 + $0x4a0] sm:$0xf] }
 0x1e5   : > { %v1971_v8 = vmax.f32 %v1590_v0, 0.0  ;;  %v1966_v60 = vmax.f32 %v1686_v48, 0.0  ;;  %3394 = vmatpush.bf16.msra.mxu0 %v11054_v47 }
 0x1e6   : > { %3541 = vmatpush.bf16.msra.mxu3 %v10674_v27 }
 0x1e7   : > { %v14416_v34 = vpack.c.bf16 %v1971_v8, %v1965_v3 }
 0x1e8   : > { %v1638_v28 = vpop.f32.mrf.mxu2  ;;  %v1543_v50 = vpop.f32.mrf.mxu0 }
 0x1e9   : > { %16520 = vst [vmem:[#allocation43_spill] sm:$0xff] %v14416_v34  ;;  %v1639_v41 = vadd.f32 %v1638_v28, %v14337_v39  ;;  %v1687_v43 = vpop.f32.mrf.mxu3  ;;  %v1544_v55 = vadd.f32 %v1543_v50, %v14327_v11  ;;  %v1592_v57 = vpop.f32.mrf.mxu1  ;;  %v14428_v28 = vperm.slane %v13540_v13, 4  ;;  %v12905_v13 = vld [vmem:[#allocation8 + $0x5ac] sm:$0xf0] }
 0x1eb   : > { %v1688_v59 = vadd.f32 %v1687_v43, %v1639_v41  ;;  %v1593_v45 = vadd.f32 %v1592_v57, %v1544_v55  ;;  %1738 = vmatmul.bf16.gmra.mxu0 %v14219_v4  ;;  %v11182_v41 = vor.u32 %v12909_v2, %v11181_v1 }
 0x1ec   : > { %1787 = vmatmul.bf16.gmra.mxu1 %v14221_v5 }
 0x1ed   : > { %v1972_v19 = vmax.f32 %v1688_v59, 0.0  ;;  %1836 = vmatmul.bf16.gmra.mxu2 %v14219_v4  ;;  %v1977_v3 = vmax.f32 %v1593_v45, 0.0  ;;  %3443 = vmatpush.bf16.msra.mxu1 %v11182_v41 }
 0x1ee   : > { %1885 = vmatmul.bf16.gmra.mxu3 %v14221_v5 }
 0x1ef   : > { %v14424_v58 = vpack.c.bf16 %v1972_v19, %v1966_v60 }
 0x1f0   : > { %v1641_v32 = vpop.f32.mrf.mxu2  ;;  %v1545_v7 = vpop.f32.mrf.mxu0 }
 0x1f1   : > { %16521 = vst [vmem:[#allocation44_spill] sm:$0xff] %v14424_v58  ;;  %v1642_v53 = vadd.f32 %v1641_v32, %v14337_v39  ;;  %v1690_v26 = vpop.f32.mrf.mxu3  ;;  %v1546_v4 = vadd.f32 %v1545_v7, %v14327_v11  ;;  %v1594_v48 = vpop.f32.mrf.mxu1  ;;  %v12743_v32 = vld [vmem:[#allocation8 + $0xa4] sm:$0xf]  ;;  %v10655_v7 = vld [vmem:[#allocation8 + $0x1b0] sm:$0xf0] }
 0x1f2   : > { %v10530_v6 = vor.u32 %v12743_v32, %v10527_v15 }
 0x1f3   : > { %v1691_v5 = vadd.f32 %v1690_v26, %v1642_v53  ;;  %v1595_v0 = vadd.f32 %v1594_v48, %v1546_v4  ;;  %v12873_v53 = vld [vmem:[#allocation8 + $0x4ac] sm:$0xf0]  ;;  %v12775_v26 = vld [vmem:[#allocation8 + $0x1a4] sm:$0xf] }
 0x1f4   : > { %v11038_v48 = vor.u32 %v12873_v53, %v11037_v52  ;;  %3493 = vmatpush.bf16.msra.mxu2 %v10530_v6  ;;  %v12739_v6 = vld [vmem:[#allocation8 + $0x84] sm:$0xf]  ;;  %v10511_v53 = vld [vmem:[#allocation8 + $0x90] sm:$0xf0] }
 0x1f5   : > { %v1983_v8 = vmax.f32 %v1595_v0, 0.0  ;;  %v1978_v45 = vmax.f32 %v1691_v5, 0.0  ;;  %v10658_v5 = vor.u32 %v12775_v26, %v10655_v7  ;;  %v11021_v26 = vld [vmem:[#allocation8 + $0x480] sm:$0xf] }
 0x1f6   : > { %3395 = vmatpush.bf16.msra.mxu0 %v11038_v48  ;;  %v10639_v48 = vld [vmem:[#allocation8 + $0x190] sm:$0xf0] }
 0x1f7   : > { %v14430_v43 = vpack.c.bf16 %v1983_v8, %v1977_v3  ;;  %3542 = vmatpush.bf16.msra.mxu3 %v10658_v5  ;;  %v11165_v8 = vld [vmem:[#allocation8 + $0x5a0] sm:$0xf] }
 0x1f8   : > { %v1643_v50 = vpop.f32.mrf.mxu2  ;;  %v1704_v57 = vpop.f32.mrf.mxu0 }
 0x1f9   : > { %v1644_v11 = vadd.f32 %v1643_v50, %v14337_v39  ;;  %v1692_v55 = vpop.f32.mrf.mxu3  ;;  %v1705_v59 = vadd.f32 %v1704_v57, %v14428_v28  ;;  %v1753_v60 = vpop.f32.mrf.mxu1 }
 0x1fb   : > { %v1693_v19 = vadd.f32 %v1692_v55, %v1644_v11  ;;  %v1754_v63 = vadd.f32 %v1753_v60, %v1705_v59  ;;  %3205 = vmatmul.bf16.vlgmr.msrb.gmra.mxu0 %v14242_v61  ;;  %v11166_v11 = vor.u32 %v12905_v13, %v11165_v8 }
 0x1fc   : > { %3254 = vmatmul.bf16.vlgmr.msrb.gmra.mxu1 %v14250_v12 }
 0x1fd   : > { %v1984_v14 = vmax.f32 %v1693_v19, 0.0  ;;  %3303 = vmatmul.bf16.vlgmr.msrb.gmra.mxu2 %v14344_v18  ;;  %v1895_v41 = vmax.f32 %v1754_v63, 0.0  ;;  %3444 = vmatpush.bf16.msra.mxu1 %v11166_v11  ;;  %v11149_v11 = vld [vmem:[#allocation8 + $0x580] sm:$0xf] }
 0x1fe   : > { %3352 = vmatmul.bf16.vlgmr.msrb.gmra.mxu3 %v14352_v37 }
 0x1ff   : > { %v14440_v39 = vpack.c.bf16 %v1984_v14, %v1978_v45 }
 0x200   : > { %v1802_v33 = vpop.f32.mrf.mxu2  ;;  %v1706_v4 = vpop.f32.mrf.mxu0 }
 0x201   : > { %16522 = vst [vmem:[#allocation45_spill] sm:$0xff] %v14440_v39  ;;  %v1803_v47 = vadd.f32 %v1802_v33, %v14437_v49  ;;  %v1851_v27 = vpop.f32.mrf.mxu3  ;;  %v1707_v0 = vadd.f32 %v1706_v4, %v14428_v28  ;;  %v1755_v1 = vpop.f32.mrf.mxu1  ;;  %v12771_v4 = vld [vmem:[#allocation8 + $0x184] sm:$0xf] }
 0x203   : > { %v1852_v2 = vadd.f32 %v1851_v27, %v1803_v47  ;;  %v1756_v3 = vadd.f32 %v1755_v1, %v1707_v0  ;;  %v10514_v47 = vor.u32 %v12739_v6, %v10511_v53  ;;  %v12869_v27 = vld [vmem:[#allocation8 + $0x48c] sm:$0xf0] }
 0x205   : > { %v1901_v50 = vmax.f32 %v1756_v3, 0.0  ;;  %v1896_v52 = vmax.f32 %v1852_v2, 0.0  ;;  %v11022_v2 = vor.u32 %v12869_v27, %v11021_v26  ;;  %v10642_v3 = vor.u32 %v12771_v4, %v10639_v48  ;;  %3494 = vmatpush.bf16.msra.mxu2 %v10514_v47  ;;  %v12735_v4 = vld [vmem:[#allocation8 + $0x64] sm:$0xf]  ;;  %v10495_v48 = vld [vmem:[#allocation8 + $0x70] sm:$0xf0] }
 0x207   : > { %v14444_v55 = vpack.c.bf16 %v1901_v50, %v1895_v41  ;;  %3396 = vmatpush.bf16.msra.mxu0 %v11022_v2  ;;  %3543 = vmatpush.bf16.msra.mxu3 %v10642_v3  ;;  %v12865_v2 = vld [vmem:[#allocation8 + $0x46c] sm:$0xf0]  ;;  %v12767_v3 = vld [vmem:[#allocation8 + $0x164] sm:$0xf] }
 0x208   : > { %v1804_v57 = vpop.f32.mrf.mxu2  ;;  %v1709_v19 = vpop.f32.mrf.mxu0 }
 0x209   : > { %v1805_v59 = vadd.f32 %v1804_v57, %v14437_v49  ;;  %v1853_v60 = vpop.f32.mrf.mxu3  ;;  %v1710_v45 = vadd.f32 %v1709_v19, %v14428_v28  ;;  %v1758_v14 = vpop.f32.mrf.mxu1  ;;  %v12901_v57 = vld [vmem:[#allocation8 + $0x58c] sm:$0xf0] }
 0x20a   : > { %v11150_v19 = vor.u32 %v12901_v57, %v11149_v11 }
 0x20b   : > { %v1854_v32 = vadd.f32 %v1853_v60, %v1805_v59  ;;  %v1759_v15 = vadd.f32 %v1758_v14, %v1710_v45  ;;  %3210 = vmatmul.bf16.gmra.mxu0 %v14254_v44 }
 0x20c   : > { %3259 = vmatmul.bf16.gmra.mxu1 %v14262_v62 }
 0x20d   : > { %v1902_v33 = vmax.f32 %v1854_v32, 0.0  ;;  %3308 = vmatmul.bf16.gmra.mxu2 %v14356_v22  ;;  %v1907_v59 = vmax.f32 %v1759_v15, 0.0  ;;  %3445 = vmatpush.bf16.msra.mxu1 %v11150_v19 }
 0x20e   : > { %3357 = vmatmul.bf16.gmra.mxu3 %v14364_v38 }
 0x20f   : > { %v14452_v63 = vpack.c.bf16 %v1902_v33, %v1896_v52 }
 0x210   : > { %v1807_v7 = vpop.f32.mrf.mxu2  ;;  %v1711_v1 = vpop.f32.mrf.mxu0 }
 0x211   : > { %v1808_v5 = vadd.f32 %v1807_v7, %v14437_v49  ;;  %v1856_v0 = vpop.f32.mrf.mxu3  ;;  %v1712_v8 = vadd.f32 %v1711_v1, %v14428_v28  ;;  %v1760_v13 = vpop.f32.mrf.mxu1  ;;  %v10498_v1 = vor.u32 %v12735_v4, %v10495_v48 }
 0x213   : > { %v1857_v41 = vadd.f32 %v1856_v0, %v1808_v5  ;;  %v1761_v50 = vadd.f32 %v1760_v13, %v1712_v8  ;;  %v11005_v5 = vld [vmem:[#allocation8 + $0x460] sm:$0xf]  ;;  %v10623_v8 = vld [vmem:[#allocation8 + $0x170] sm:$0xf0]  ;;  %3495 = vmatpush.bf16.msra.mxu2 %v10498_v1 }
 0x214   : > { %v11006_v11 = vor.u32 %v12865_v2, %v11005_v5  ;;  %v10626_v57 = vor.u32 %v12767_v3, %v10623_v8 }
 0x215   : > { %v1913_v60 = vmax.f32 %v1761_v50, 0.0  ;;  %v1908_v47 = vmax.f32 %v1857_v41, 0.0 }
 0x216   : > { %3397 = vmatpush.bf16.msra.mxu0 %v11006_v11  ;;  %3544 = vmatpush.bf16.msra.mxu3 %v10626_v57 }
 0x217   : > { %v14456_v45 = vpack.c.bf16 %v1913_v60, %v1907_v59 }
 0x218   : > { %v1809_v14 = vpop.f32.mrf.mxu2  ;;  %v1714_v33 = vpop.f32.mrf.mxu0 }
 0x219   : > { %v1810_v32 = vadd.f32 %v1809_v14, %v14437_v49  ;;  %v1858_v52 = vpop.f32.mrf.mxu3  ;;  %v1715_v6 = vadd.f32 %v1714_v33, %v14428_v28  ;;  %v1763_v53 = vpop.f32.mrf.mxu1 }
 0x21b   : > { %v1859_v26 = vadd.f32 %v1858_v52, %v1810_v32  ;;  %v1764_v7 = vadd.f32 %v1763_v53, %v1715_v6  ;;  %3215 = vmatmul.bf16.gmra.mxu0 %v14266_v35  ;;  %v11133_v32 = vld [vmem:[#allocation8 + $0x560] sm:$0xf]  ;;  %v12897_v52 = vld [vmem:[#allocation8 + $0x56c] sm:$0xf0] }
 0x21c   : > { %3264 = vmatmul.bf16.gmra.mxu1 %v14274_v51  ;;  %v11134_v53 = vor.u32 %v12897_v52, %v11133_v32 }
 0x21d   : > { %v1914_v27 = vmax.f32 %v1859_v26, 0.0  ;;  %3313 = vmatmul.bf16.gmra.mxu2 %v14368_v20  ;;  %v1919_v33 = vmax.f32 %v1764_v7, 0.0 }
 0x21e   : > { %3362 = vmatmul.bf16.gmra.mxu3 %v14376_v42  ;;  %3446 = vmatpush.bf16.msra.mxu1 %v11134_v53 }
 0x21f   : > { %v14464_v15 = vpack.c.bf16 %v1914_v27, %v1908_v47 }
 0x220   : > { %v1812_v0 = vpop.f32.mrf.mxu2  ;;  %v1716_v50 = vpop.f32.mrf.mxu0 }
 0x221   : > { %v1813_v13 = vadd.f32 %v1812_v0, %v14437_v49  ;;  %v1861_v41 = vpop.f32.mrf.mxu3  ;;  %v1717_v59 = vadd.f32 %v1716_v50, %v14428_v28  ;;  %v1765_v60 = vpop.f32.mrf.mxu1  ;;  %v10989_v50 = vld [vmem:[#allocation8 + $0x440] sm:$0xf] }
 0x223   : > { %v1862_v19 = vadd.f32 %v1861_v41, %v1813_v13  ;;  %v1766_v14 = vadd.f32 %v1765_v60, %v1717_v59  ;;  %v12731_v13 = vld [vmem:[#allocation8 + $0x44] sm:$0xf]  ;;  %v10479_v41 = vld [vmem:[#allocation8 + $0x50] sm:$0xf0]  ;;  %v12861_v59 = vld [vmem:[#allocation8 + $0x44c] sm:$0xf0] }
 0x224   : > { %v10482_v57 = vor.u32 %v12731_v13, %v10479_v41  ;;  %v12763_v60 = vld [vmem:[#allocation8 + $0x144] sm:$0xf] }
 0x225   : > { %v1925_v6 = vmax.f32 %v1766_v14, 0.0  ;;  %v1920_v3 = vmax.f32 %v1862_v19, 0.0  ;;  %v10607_v14 = vld [vmem:[#allocation8 + $0x150] sm:$0xf0] }
 0x226   : > { %3496 = vmatpush.bf16.msra.mxu2 %v10482_v57 }
 0x227   : > { %v14468_v26 = vpack.c.bf16 %v1925_v6, %v1919_v33  ;;  %v10990_v33 = vor.u32 %v12861_v59, %v10989_v50  ;;  %v10610_v6 = vor.u32 %v12763_v60, %v10607_v14 }
 0x228   : > { %v1814_v47 = vpop.f32.mrf.mxu2  ;;  %v1719_v48 = vpop.f32.mrf.mxu0 }
 0x229   : > { %v1815_v27 = vadd.f32 %v1814_v47, %v14437_v49  ;;  %v1863_v4 = vpop.f32.mrf.mxu3  ;;  %v1720_v5 = vadd.f32 %v1719_v48, %v14428_v28  ;;  %v1768_v0 = vpop.f32.mrf.mxu1  ;;  %3398 = vmatpush.bf16.msra.mxu0 %v10990_v33  ;;  %3545 = vmatpush.bf16.msra.mxu3 %v10610_v6  ;;  %v11117_v48 = vld [vmem:[#allocation8 + $0x540] sm:$0xf]  ;;  %v10463_v33 = vld [vmem:[#allocation8 + $0x30] sm:$0xf0] }
 0x22a   : > { %v10973_v6 = vld [vmem:[#allocation8 + $0x420] sm:$0xf] }
 0x22b   : > { %v1864_v1 = vadd.f32 %v1863_v4, %v1815_v27  ;;  %v1769_v2 = vadd.f32 %v1768_v0, %v1720_v5  ;;  %3220 = vmatmul.bf16.gmra.mxu0 %v14278_v23  ;;  %v12893_v5 = vld [vmem:[#allocation8 + $0x54c] sm:$0xf0] }
 0x22c   : > { %3269 = vmatmul.bf16.gmra.mxu1 %v14286_v40 }
 0x22d   : > { %v1926_v8 = vmax.f32 %v1864_v1, 0.0  ;;  %3318 = vmatmul.bf16.gmra.mxu2 %v14380_v21  ;;  %v1931_v0 = vmax.f32 %v1769_v2, 0.0 }
 0x22e   : > { %3367 = vmatmul.bf16.gmra.mxu3 %v14388_v46 }
 0x22f   : > { %v14476_v7 = vpack.c.bf16 %v1926_v8, %v1920_v3  ;;  %v11118_v3 = vor.u32 %v12893_v5, %v11117_v48  ;;  %v12759_v48 = vld [vmem:[#allocation8 + $0x124] sm:$0xf]  ;;  %v10591_v5 = vld [vmem:[#allocation8 + $0x130] sm:$0xf0] }
 0x230   : > { %v1817_v11 = vpop.f32.mrf.mxu2  ;;  %v1721_v52 = vpop.f32.mrf.mxu0 }
 0x231   : > { %v1818_v32 = vadd.f32 %v1817_v11, %v14437_v49  ;;  %v1866_v19 = vpop.f32.mrf.mxu3  ;;  %v1722_v53 = vadd.f32 %v1721_v52, %v14428_v28  ;;  %v1770_v47 = vpop.f32.mrf.mxu1  ;;  %3447 = vmatpush.bf16.msra.mxu1 %v11118_v3  ;;  %v12727_v52 = vld [vmem:[#allocation8 + $0x24] sm:$0xf] }
 0x233   : > { %v1867_v27 = vadd.f32 %v1866_v19, %v1818_v32  ;;  %v1771_v4 = vadd.f32 %v1770_v47, %v1722_v53  ;;  %v10466_v47 = vor.u32 %v12727_v52, %v10463_v33 }
 0x235   : > { %v1937_v1 = vmax.f32 %v1771_v4, 0.0  ;;  %v1932_v32 = vmax.f32 %v1867_v27, 0.0  ;;  %v12857_v4 = vld [vmem:[#allocation8 + $0x42c] sm:$0xf0]  ;;  %3497 = vmatpush.bf16.msra.mxu2 %v10466_v47 }
 0x236   : > { %v10974_v3 = vor.u32 %v12857_v4, %v10973_v6 }
 0x237   : > { %v14480_v8 = vpack.c.bf16 %v1937_v1, %v1931_v0 }
 0x238   : > { %v1819_v13 = vpop.f32.mrf.mxu2  ;;  %v1724_v11 = vpop.f32.mrf.mxu0  ;;  %3399 = vmatpush.bf16.msra.mxu0 %v10974_v3 }
 0x239   : > { %v1820_v41 = vadd.f32 %v1819_v13, %v14437_v49  ;;  %v1868_v50 = vpop.f32.mrf.mxu3  ;;  %v1725_v59 = vadd.f32 %v1724_v11, %v14428_v28  ;;  %v1773_v57 = vpop.f32.mrf.mxu1  ;;  %v10594_v13 = vor.u32 %v12759_v48, %v10591_v5 }
 0x23b   : > { %v1869_v60 = vadd.f32 %v1868_v50, %v1820_v41  ;;  %v1774_v14 = vadd.f32 %v1773_v57, %v1725_v59  ;;  %3225 = vmatmul.bf16.gmra.mxu0 %v14290_v16  ;;  %3546 = vmatpush.bf16.msra.mxu3 %v10594_v13  ;;  %v11101_v57 = vld [vmem:[#allocation8 + $0x520] sm:$0xf]  ;;  %v12723_v13 = vld [vmem:[#allocation8 + $0x4] sm:$0xf] }
 0x23c   : > { %3274 = vmatmul.bf16.gmra.mxu1 %v14298_v36 }
 0x23d   : > { %v1938_v19 = vmax.f32 %v1869_v60, 0.0  ;;  %3323 = vmatmul.bf16.gmra.mxu2 %v14392_v24  ;;  %v12889_v60 = vld [vmem:[#allocation8 + $0x52c] sm:$0xf0] }
 0x23e   : > { %3372 = vmatmul.bf16.gmra.mxu3 %v14400_v54  ;;  %v11102_v52 = vor.u32 %v12889_v60, %v11101_v57  ;;  %v12853_v60 = vld [vmem:[#allocation8 + $0x40c] sm:$0xf0] }
 0x23f   : > { %v14488_v2 = vpack.c.bf16 %v1938_v19, %v1932_v32  ;;  %v1943_v32 = vmax.f32 %v1774_v14, 0.0 }
 0x240   : > { %v1822_v53 = vpop.f32.mrf.mxu2  ;;  %v1726_v1 = vpop.f32.mrf.mxu0  ;;  %3448 = vmatpush.bf16.msra.mxu1 %v11102_v52 }
 0x241   : > { %v1823_v0 = vadd.f32 %v1822_v53, %v14437_v49  ;;  %v1871_v27 = vpop.f32.mrf.mxu3  ;;  %v1727_v41 = vadd.f32 %v1726_v1, %v14428_v28  ;;  %v1775_v50 = vpop.f32.mrf.mxu1 }
 0x243   : > { %v1872_v11 = vadd.f32 %v1871_v27, %v1823_v0  ;;  %v1776_v59 = vadd.f32 %v1775_v50, %v1727_v41  ;;  %v10447_v41 = vld [vmem:[#allocation8 + $0x10] sm:$0xf0]  ;;  %v10957_v50 = vld [vmem:[#allocation8 + $0x400] sm:$0xf] }
 0x244   : > { %v10450_v57 = vor.u32 %v12723_v13, %v10447_v41 }
 0x245   : > { %v1949_v19 = vmax.f32 %v1776_v59, 0.0  ;;  %v1944_v1 = vmax.f32 %v1872_v11, 0.0 }
 0x246   : > { %3498 = vmatpush.bf16.msra.mxu2 %v10450_v57 }
 0x247   : > { %v14492_v33 = vpack.c.bf16 %v1949_v19, %v1943_v32  ;;  %v12755_v32 = vld [vmem:[#allocation8 + $0x104] sm:$0xf]  ;;  %v10575_v19 = vld [vmem:[#allocation8 + $0x110] sm:$0xf0] }
 0x248   : > { %v1824_v53 = vpop.f32.mrf.mxu2  ;;  %v1729_v48 = vpop.f32.mrf.mxu0 }
 0x249   : > { %v1825_v6 = vadd.f32 %v1824_v53, %v14437_v49  ;;  %v1873_v4 = vpop.f32.mrf.mxu3  ;;  %v1730_v5 = vadd.f32 %v1729_v48, %v14428_v28  ;;  %v1778_v47 = vpop.f32.mrf.mxu1 }
 0x24b   : > { %v1874_v0 = vadd.f32 %v1873_v4, %v1825_v6  ;;  %v1779_v27 = vadd.f32 %v1778_v47, %v1730_v5  ;;  %3230 = vmatmul.bf16.gmra.mxu0 %v14302_v10  ;;  %v10958_v6 = vor.u32 %v12853_v60, %v10957_v50  ;;  %v10578_v4 = vor.u32 %v12755_v32, %v10575_v19 }
 0x24c   : > { %3279 = vmatmul.bf16.gmra.mxu1 %v14310_v29 }
 0x24d   : > { %v1950_v3 = vmax.f32 %v1874_v0, 0.0  ;;  %3328 = vmatmul.bf16.gmra.mxu2 %v14404_v31  ;;  %3400 = vmatpush.bf16.msra.mxu0 %v10958_v6  ;;  %v1955_v13 = vmax.f32 %v1779_v27, 0.0  ;;  %v12879_v27 = vld [vmem:[#allocation8 + $0x4e4] sm:$0xf] }
 0x24e   : > { %3377 = vmatmul.bf16.gmra.mxu3 %v14412_v56 }
 0x24f   : > { %v14500_v14 = vpack.c.bf16 %v1950_v3, %v1944_v1  ;;  %3547 = vmatpush.bf16.msra.mxu3 %v10578_v4  ;;  %v11085_v1 = vld [vmem:[#allocation8 + $0x500] sm:$0xf]  ;;  %v12885_v3 = vld [vmem:[#allocation8 + $0x50c] sm:$0xf0]  ;;  %v11071_v4 = vld [vmem:[#allocation8 + $0x4f0] sm:$0xf0] }
 0x250   : > { %v1827_v59 = vpop.f32.mrf.mxu2  ;;  %v1731_v53 = vpop.f32.mrf.mxu0  ;;  %v11086_v56 = vor.u32 %v12885_v3, %v11085_v1  ;;  %v10815_v1 = vld [vmem:[#allocation8 + $0x2f0] sm:$0xf0]  ;;  %v12911_v3 = vld [vmem:[#allocation8 + $0x5e4] sm:$0xf] }
 0x251   : > { %v1828_v52 = vadd.f32 %v1827_v59, %v14437_v49  ;;  %v1876_v11 = vpop.f32.mrf.mxu3  ;;  %v1732_v48 = vadd.f32 %v1731_v53, %v14428_v28  ;;  %v1780_v5 = vpop.f32.mrf.mxu1 }
 0x252   : > { %3449 = vmatpush.bf16.msra.mxu1 %v11086_v56 }
 0x253   : > { %v1877_v47 = vadd.f32 %v1876_v11, %v1828_v52  ;;  %v1781_v0 = vadd.f32 %v1780_v5, %v1732_v48  ;;  %v12815_v48 = vld [vmem:[#allocation8 + $0x2e4] sm:$0xf] }
 0x255   : > { %v1961_v41 = vmax.f32 %v1781_v0, 0.0  ;;  %v1956_v53 = vmax.f32 %v1877_v47, 0.0  ;;  %v11074_v0 = vor.u32 %v12879_v27, %v11071_v4 }
 0x257   : > { %v14504_v31 = vpack.c.bf16 %v1961_v41, %v1955_v13  ;;  %v11199_v13 = vld [vmem:[#allocation8 + $0x5f0] sm:$0xf0]  ;;  %3687 = vmatpush.bf16.msrb.mxu2 %v11074_v0 }
 0x258   : > { %v1829_v59 = vpop.f32.mrf.mxu2  ;;  %v1734_v32 = vpop.f32.mrf.mxu0 }
 0x259   : > { %16523 = vst [vmem:[#allocation46_spill] sm:$0xff] %v14504_v31  ;;  %v1830_v50 = vadd.f32 %v1829_v59, %v14437_v49  ;;  %v1878_v60 = vpop.f32.mrf.mxu3  ;;  %v1735_v19 = vadd.f32 %v1734_v32, %v14428_v28  ;;  %v1783_v57 = vpop.f32.mrf.mxu1 }
 0x25b   : > { %v1879_v52 = vadd.f32 %v1878_v60, %v1830_v50  ;;  %v1784_v11 = vadd.f32 %v1783_v57, %v1735_v19  ;;  %3235 = vmatmul.bf16.gmra.mxu0 %v14314_v9  ;;  %v10818_v50 = vor.u32 %v12815_v48, %v10815_v1  ;;  %v11202_v60 = vor.u32 %v12911_v3, %v11199_v13 }
 0x25c   : > { %3284 = vmatmul.bf16.gmra.mxu1 %v14322_v25 }
 0x25d   : > { %v1962_v6 = vmax.f32 %v1879_v52, 0.0  ;;  %3333 = vmatmul.bf16.gmra.mxu2 %v14416_v34  ;;  %3589 = vmatpush.bf16.msrb.mxu0 %v10818_v50  ;;  %v12847_v52 = vld [vmem:[#allocation8 + $0x3e4] sm:$0xf]  ;;  %v1967_v4 = vmax.f32 %v1784_v11, 0.0  ;;  %v11055_v11 = vld [vmem:[#allocation8 + $0x4d0] sm:$0xf0] }
 0x25e   : > { %3382 = vmatmul.bf16.gmra.mxu3 %v14424_v58 }
 0x25f   : > { %v14512_v56 = vpack.c.bf16 %v1962_v6, %v1956_v53  ;;  %3736 = vmatpush.bf16.msrb.mxu3 %v11202_v60  ;;  %v10943_v53 = vld [vmem:[#allocation8 + $0x3f0] sm:$0xf0] }
 0x260   : > { %v1832_v5 = vpop.f32.mrf.mxu2  ;;  %v1736_v59 = vpop.f32.mrf.mxu0  ;;  %v10946_v27 = vor.u32 %v12847_v52, %v10943_v53  ;;  %v10799_v52 = vld [vmem:[#allocation8 + $0x2d0] sm:$0xf0]  ;;  %v12907_v53 = vld [vmem:[#allocation8 + $0x5c4] sm:$0xf] }
 0x261   : > { %16524 = vst [vmem:[#allocation47_spill] sm:$0xff] %v14512_v56  ;;  %v1833_v41 = vadd.f32 %v1832_v5, %v14437_v49  ;;  %v1881_v47 = vpop.f32.mrf.mxu3  ;;  %v1737_v32 = vadd.f32 %v1736_v59, %v14428_v28  ;;  %v1785_v19 = vpop.f32.mrf.mxu1 }
 0x262   : > { %3638 = vmatpush.bf16.msrb.mxu1 %v10946_v27 }
 0x263   : > { %v1882_v57 = vadd.f32 %v1881_v47, %v1833_v41  ;;  %v1786_v6 = vadd.f32 %v1785_v19, %v1737_v32  ;;  %v12811_v19 = vld [vmem:[#allocation8 + $0x2c4] sm:$0xf] }
 0x264   : > { %v10802_v27 = vor.u32 %v12811_v19, %v10799_v52 }
 0x265   : > { %v1973_v58 = vmax.f32 %v1786_v6, 0.0  ;;  %v1968_v59 = vmax.f32 %v1882_v57, 0.0 }
 0x266   : > { %3590 = vmatpush.bf16.msrb.mxu0 %v10802_v27 }
 0x267   : > { %v14516_v34 = vpack.c.bf16 %v1973_v58, %v1967_v4  ;;  %v12875_v58 = vld [vmem:[#allocation8 + $0x4c4] sm:$0xf]  ;;  %v11183_v4 = vld [vmem:[#allocation8 + $0x5d0] sm:$0xf0] }
 0x268   : > { %v1834_v5 = vpop.f32.mrf.mxu2  ;;  %v1739_v3 = vpop.f32.mrf.mxu0  ;;  %v11058_v32 = vor.u32 %v12875_v58, %v11055_v11 }
 0x269   : > { %16525 = vst [vmem:[#allocation48_spill] sm:$0xff] %v14516_v34  ;;  %v1835_v48 = vadd.f32 %v1834_v5, %v14437_v49  ;;  %v1883_v1 = vpop.f32.mrf.mxu3  ;;  %v1740_v13 = vadd.f32 %v1739_v3, %v14428_v28  ;;  %v1788_v0 = vpop.f32.mrf.mxu1 }
 0x26a   : > { %3688 = vmatpush.bf16.msrb.mxu2 %v11058_v32 }
 0x26b   : > { %v1884_v41 = vadd.f32 %v1883_v1, %v1835_v48  ;;  %v1789_v47 = vadd.f32 %v1788_v0, %v1740_v13  ;;  %3240 = vmatmul.bf16.gmra.mxu0 %v14329_v17  ;;  %v11186_v1 = vor.u32 %v12907_v53, %v11183_v4 }
 0x26c   : > { %3289 = vmatmul.bf16.gmra.mxu1 %v14340_v30 }
 0x26d   : > { %v1974_v50 = vmax.f32 %v1884_v41, 0.0  ;;  %3338 = vmatmul.bf16.gmra.mxu2 %v14430_v43  ;;  %v14528_v41 = vld [vmem:[#allocation10] sm:$0xf]  ;;  %3737 = vmatpush.bf16.msrb.mxu3 %v11186_v1  ;;  %v1979_v19 = vmax.f32 %v1789_v47, 0.0 }
 0x26e   : > { %3387 = vmatmul.bf16.gmra.mxu3 %v14440_v39 }
 0x26f   : > { %v14524_v60 = vpack.c.bf16 %v1974_v50, %v1968_v59  ;;  %v12843_v59 = vld [vmem:[#allocation8 + $0x3c4] sm:$0xf]  ;;  %v10927_v50 = vld [vmem:[#allocation8 + $0x3d0] sm:$0xf0] }
 0x270   : > { %v1837_v6 = vpop.f32.mrf.mxu2  ;;  %v1741_v48 = vpop.f32.mrf.mxu0  ;;  %v10930_v11 = vor.u32 %v12843_v59, %v10927_v50  ;;  %v11039_v59 = vld [vmem:[#allocation8 + $0x4b0] sm:$0xf0] }
 0x271   : > { %16526 = vst [vmem:[#allocation49_spill] sm:$0xff] %v14524_v60  ;;  %v1838_v57 = vadd.f32 %v1837_v6, %v14437_v49  ;;  %v1886_v5 = vpop.f32.mrf.mxu3  ;;  %v1742_v3 = vadd.f32 %v1741_v48, %v14428_v28  ;;  %v1790_v13 = vpop.f32.mrf.mxu1  ;;  %v14531_v6 = vperm.slane %v14528_v41, 0 }
 0x272   : > { %3639 = vmatpush.bf16.msrb.mxu1 %v10930_v11  ;;  %v10783_v11 = vld [vmem:[#allocation8 + $0x2b0] sm:$0xf0] }
 0x273   : > { %v1887_v0 = vadd.f32 %v1886_v5, %v1838_v57  ;;  %v1791_v58 = vadd.f32 %v1790_v13, %v1742_v3  ;;  %v12871_v13 = vld [vmem:[#allocation8 + $0x4a4] sm:$0xf] }
 0x275   : > { %v1985_v52 = vmax.f32 %v1791_v58, 0.0  ;;  %v1980_v47 = vmax.f32 %v1887_v0, 0.0  ;;  %v11042_v58 = vor.u32 %v12871_v13, %v11039_v59 }
 0x277   : > { %v14533_v32 = vpack.c.bf16 %v1985_v52, %v1979_v19  ;;  %v12903_v19 = vld [vmem:[#allocation8 + $0x5a4] sm:$0xf]  ;;  %v11167_v52 = vld [vmem:[#allocation8 + $0x5b0] sm:$0xf0]  ;;  %3689 = vmatpush.bf16.msrb.mxu2 %v11042_v58 }
 0x278   : > { %v1839_v53 = vpop.f32.mrf.mxu2  ;;  %v3206_v4 = vpop.f32.mrf.mxu0 }
 0x279   : > { %16527 = vst [vmem:[#allocation50_spill] sm:$0xff] %v14533_v32  ;;  %v1840_v28 = vadd.f32 %v1839_v53, %v14437_v49  ;;  %v1888_v27 = vpop.f32.mrf.mxu3  ;;  %v3207_v57 = vadd.f32 %v3206_v4, %v14531_v6  ;;  %v3255_v5 = vpop.f32.mrf.mxu1  ;;  %v12807_v49 = vld [vmem:[#allocation8 + $0x2a4] sm:$0xf] }
 0x27b   : > { %v1889_v48 = vadd.f32 %v1888_v27, %v1840_v28  ;;  %v3256_v1 = vadd.f32 %v3255_v5, %v3207_v57  ;;  %3401 = vmatmul.bf16.vlgmr.msra.gmra.mxu0 %v14444_v55  ;;  %v10786_v28 = vor.u32 %v12807_v49, %v10783_v11  ;;  %v11170_v27 = vor.u32 %v12903_v19, %v11167_v52 }
 0x27c   : > { %3450 = vmatmul.bf16.vlgmr.msra.gmra.mxu1 %v14452_v63 }
 0x27d   : > { %v1986_v3 = vmax.f32 %v1889_v48, 0.0  ;;  %3499 = vmatmul.bf16.vlgmr.msra.gmra.mxu2 %v14242_v61  ;;  %3591 = vmatpush.bf16.msrb.mxu0 %v10786_v28  ;;  %v11023_v28 = vld [vmem:[#allocation8 + $0x490] sm:$0xf0] }
 0x27e   : > { %3548 = vmatmul.bf16.vlgmr.msra.gmra.mxu3 %v14250_v12 }
 0x27f   : > { %v14541_v50 = vpack.c.bf16 %v1986_v3, %v1980_v47  ;;  %3738 = vmatpush.bf16.msrb.mxu3 %v11170_v27  ;;  %v12839_v47 = vld [vmem:[#allocation8 + $0x3a4] sm:$0xf]  ;;  %v10911_v3 = vld [vmem:[#allocation8 + $0x3b0] sm:$0xf0] }
 0x280   : > { %v3304_v53 = vpop.f32.mrf.mxu2  ;;  %v3208_v57 = vpop.f32.mrf.mxu0  ;;  %v10914_v59 = vor.u32 %v12839_v47, %v10911_v3  ;;  %v12803_v27 = vld [vmem:[#allocation8 + $0x284] sm:$0xf] }
 0x281   : > { %16528 = vst [vmem:[#allocation51_spill] sm:$0xff] %v14541_v50  ;;  %v3305_v0 = vadd.f32 %v3304_v53, %v3256_v1  ;;  %v3353_v4 = vpop.f32.mrf.mxu3  ;;  %v3209_v5 = vadd.f32 %v3208_v57, %v14531_v6  ;;  %v3257_v48 = vpop.f32.mrf.mxu1  ;;  %v12867_v53 = vld [vmem:[#allocation8 + $0x484] sm:$0xf]  ;;  %v11151_v57 = vld [vmem:[#allocation8 + $0x590] sm:$0xf0] }
 0x282   : > { %3640 = vmatpush.bf16.msrb.mxu1 %v10914_v59 }
 0x283   : > { %v14544_v12 = vadd.f32 %v3353_v4, %v3305_v0  ;;  %v3258_v13 = vadd.f32 %v3257_v48, %v3209_v5  ;;  %v10767_v0 = vld [vmem:[#allocation8 + $0x290] sm:$0xf0]  ;;  %v12899_v4 = vld [vmem:[#allocation8 + $0x584] sm:$0xf] }
 0x284   : > { %v10770_v48 = vor.u32 %v12803_v27, %v10767_v0 }
 0x286   : > { %3592 = vmatpush.bf16.msrb.mxu0 %v10770_v48  ;;  %v11007_v48 = vld [vmem:[#allocation8 + $0x470] sm:$0xf0] }
 0x288   : > { %v3306_v61 = vpop.f32.mrf.mxu2  ;;  %v3211_v11 = vpop.f32.mrf.mxu0 }
 0x289   : > { %v3307_v39 = vadd.f32 %v3306_v61, %v3258_v13  ;;  %v3355_v49 = vpop.f32.mrf.mxu3  ;;  %v3212_v1 = vadd.f32 %v3211_v11, %v14531_v6  ;;  %v3260_v19 = vpop.f32.mrf.mxu1  ;;  %v11026_v61 = vor.u32 %v12867_v53, %v11023_v28 }
 0x28b   : > { %v14547_v58 = vadd.f32 %v3355_v49, %v3307_v39  ;;  %v3261_v52 = vadd.f32 %v3260_v19, %v3212_v1  ;;  %3406 = vmatmul.bf16.gmra.mxu0 %v14456_v45  ;;  %v11154_v39 = vor.u32 %v12899_v4, %v11151_v57  ;;  %3690 = vmatpush.bf16.msrb.mxu2 %v11026_v61  ;;  %v12835_v1 = vld [vmem:[#allocation8 + $0x384] sm:$0xf]  ;;  %v10895_v19 = vld [vmem:[#allocation8 + $0x390] sm:$0xf0] }
 0x28c   : > { %3455 = vmatmul.bf16.gmra.mxu1 %v14464_v15  ;;  %v10898_v28 = vor.u32 %v12835_v1, %v10895_v19 }
 0x28d   : > { %3504 = vmatmul.bf16.gmra.mxu2 %v14254_v44  ;;  %3739 = vmatpush.bf16.msrb.mxu3 %v11154_v39  ;;  %v12799_v39 = vld [vmem:[#allocation8 + $0x264] sm:$0xf] }
 0x28e   : > { %3553 = vmatmul.bf16.gmra.mxu3 %v14262_v62  ;;  %3641 = vmatpush.bf16.msrb.mxu1 %v10898_v28 }
 0x290   : > { %v3309_v5 = vpop.f32.mrf.mxu2  ;;  %v3213_v13 = vpop.f32.mrf.mxu0 }
 0x291   : > { %v3310_v47 = vadd.f32 %v3309_v5, %v3261_v52  ;;  %v3358_v3 = vpop.f32.mrf.mxu3  ;;  %v3214_v59 = vadd.f32 %v3213_v13, %v14531_v6  ;;  %v3262_v49 = vpop.f32.mrf.mxu1  ;;  %v12863_v5 = vld [vmem:[#allocation8 + $0x464] sm:$0xf]  ;;  %v11135_v13 = vld [vmem:[#allocation8 + $0x570] sm:$0xf0] }
 0x293   : > { %v14554_v11 = vadd.f32 %v3358_v3, %v3310_v47  ;;  %v3263_v53 = vadd.f32 %v3262_v49, %v3214_v59  ;;  %v10751_v47 = vld [vmem:[#allocation8 + $0x270] sm:$0xf0]  ;;  %v12895_v3 = vld [vmem:[#allocation8 + $0x564] sm:$0xf] }
 0x294   : > { %v10754_v49 = vor.u32 %v12799_v39, %v10751_v47 }
 0x296   : > { %3593 = vmatpush.bf16.msrb.mxu0 %v10754_v49  ;;  %v10991_v49 = vld [vmem:[#allocation8 + $0x450] sm:$0xf0] }
 0x298   : > { %v3311_v62 = vpop.f32.mrf.mxu2  ;;  %v3216_v0 = vpop.f32.mrf.mxu0 }
 0x299   : > { %v3312_v44 = vadd.f32 %v3311_v62, %v3263_v53  ;;  %v3360_v27 = vpop.f32.mrf.mxu3  ;;  %v3217_v52 = vadd.f32 %v3216_v0, %v14531_v6  ;;  %v3265_v4 = vpop.f32.mrf.mxu1  ;;  %v11010_v62 = vor.u32 %v12863_v5, %v11007_v48 }
 0x29b   : > { %v14557_v61 = vadd.f32 %v3360_v27, %v3312_v44  ;;  %v3266_v57 = vadd.f32 %v3265_v4, %v3217_v52  ;;  %3411 = vmatmul.bf16.gmra.mxu0 %v14468_v26  ;;  %v11138_v44 = vor.u32 %v12895_v3, %v11135_v13  ;;  %3691 = vmatpush.bf16.msrb.mxu2 %v11010_v62  ;;  %v12831_v52 = vld [vmem:[#allocation8 + $0x364] sm:$0xf]  ;;  %v10879_v4 = vld [vmem:[#allocation8 + $0x370] sm:$0xf0] }
 0x29c   : > { %3460 = vmatmul.bf16.gmra.mxu1 %v14476_v7  ;;  %v10882_v48 = vor.u32 %v12831_v52, %v10879_v4 }
 0x29d   : > { %3509 = vmatmul.bf16.gmra.mxu2 %v14266_v35  ;;  %3740 = vmatpush.bf16.msrb.mxu3 %v11138_v44  ;;  %v12795_v44 = vld [vmem:[#allocation8 + $0x244] sm:$0xf] }
 0x29e   : > { %3558 = vmatmul.bf16.gmra.mxu3 %v14274_v51  ;;  %3642 = vmatpush.bf16.msrb.mxu1 %v10882_v48 }
 0x2a0   : > { %v3314_v59 = vpop.f32.mrf.mxu2  ;;  %v3218_v53 = vpop.f32.mrf.mxu0 }
 0x2a1   : > { %v3315_v1 = vadd.f32 %v3314_v59, %v3266_v57  ;;  %v3363_v19 = vpop.f32.mrf.mxu3  ;;  %v3219_v28 = vadd.f32 %v3218_v53, %v14531_v6  ;;  %v3267_v27 = vpop.f32.mrf.mxu1  ;;  %v12859_v59 = vld [vmem:[#allocation8 + $0x444] sm:$0xf]  ;;  %v11119_v53 = vld [vmem:[#allocation8 + $0x550] sm:$0xf0] }
 0x2a3   : > { %v14564_v0 = vadd.f32 %v3363_v19, %v3315_v1  ;;  %v3268_v5 = vadd.f32 %v3267_v27, %v3219_v28  ;;  %v10735_v1 = vld [vmem:[#allocation8 + $0x250] sm:$0xf0]  ;;  %v12891_v19 = vld [vmem:[#allocation8 + $0x544] sm:$0xf] }
 0x2a4   : > { %v10738_v27 = vor.u32 %v12795_v44, %v10735_v1 }
 0x2a6   : > { %3594 = vmatpush.bf16.msrb.mxu0 %v10738_v27  ;;  %v10975_v27 = vld [vmem:[#allocation8 + $0x430] sm:$0xf0] }
 0x2a8   : > { %v3316_v51 = vpop.f32.mrf.mxu2  ;;  %v3221_v47 = vpop.f32.mrf.mxu0 }
 0x2a9   : > { %v3317_v35 = vadd.f32 %v3316_v51, %v3268_v5  ;;  %v3365_v39 = vpop.f32.mrf.mxu3  ;;  %v3222_v57 = vadd.f32 %v3221_v47, %v14531_v6  ;;  %v3270_v3 = vpop.f32.mrf.mxu1  ;;  %v10994_v51 = vor.u32 %v12859_v59, %v10991_v49 }
 0x2ab   : > { %v14567_v62 = vadd.f32 %v3365_v39, %v3317_v35  ;;  %v3271_v13 = vadd.f32 %v3270_v3, %v3222_v57  ;;  %3416 = vmatmul.bf16.gmra.mxu0 %v14480_v8  ;;  %v11122_v35 = vor.u32 %v12891_v19, %v11119_v53  ;;  %3692 = vmatpush.bf16.msrb.mxu2 %v10994_v51  ;;  %v12827_v57 = vld [vmem:[#allocation8 + $0x344] sm:$0xf]  ;;  %v10863_v3 = vld [vmem:[#allocation8 + $0x350] sm:$0xf0] }
 0x2ac   : > { %3465 = vmatmul.bf16.gmra.mxu1 %v14488_v2  ;;  %v10866_v49 = vor.u32 %v12827_v57, %v10863_v3 }
 0x2ad   : > { %3514 = vmatmul.bf16.gmra.mxu2 %v14278_v23  ;;  %3741 = vmatpush.bf16.msrb.mxu3 %v11122_v35  ;;  %v12791_v35 = vld [vmem:[#allocation8 + $0x224] sm:$0xf] }
 0x2ae   : > { %3563 = vmatmul.bf16.gmra.mxu3 %v14286_v40  ;;  %3643 = vmatpush.bf16.msrb.mxu1 %v10866_v49 }
 0x2b0   : > { %v3319_v28 = vpop.f32.mrf.mxu2  ;;  %v3223_v5 = vpop.f32.mrf.mxu0 }
 0x2b1   : > { %v3320_v52 = vadd.f32 %v3319_v28, %v3271_v13  ;;  %v3368_v4 = vpop.f32.mrf.mxu3  ;;  %v3224_v48 = vadd.f32 %v3223_v5, %v14531_v6  ;;  %v3272_v39 = vpop.f32.mrf.mxu1  ;;  %v12855_v28 = vld [vmem:[#allocation8 + $0x424] sm:$0xf]  ;;  %v11103_v5 = vld [vmem:[#allocation8 + $0x530] sm:$0xf0] }
 0x2b3   : > { %v14574_v47 = vadd.f32 %v3368_v4, %v3320_v52  ;;  %v3273_v59 = vadd.f32 %v3272_v39, %v3224_v48  ;;  %v10719_v52 = vld [vmem:[#allocation8 + $0x230] sm:$0xf0]  ;;  %v12887_v4 = vld [vmem:[#allocation8 + $0x524] sm:$0xf] }
 0x2b4   : > { %v10722_v39 = vor.u32 %v12791_v35, %v10719_v52 }
 0x2b6   : > { %3595 = vmatpush.bf16.msrb.mxu0 %v10722_v39  ;;  %v10959_v39 = vld [vmem:[#allocation8 + $0x410] sm:$0xf0] }
 0x2b8   : > { %v3321_v40 = vpop.f32.mrf.mxu2  ;;  %v3226_v1 = vpop.f32.mrf.mxu0 }
 0x2b9   : > { %v3322_v23 = vadd.f32 %v3321_v40, %v3273_v59  ;;  %v3370_v44 = vpop.f32.mrf.mxu3  ;;  %v3227_v13 = vadd.f32 %v3226_v1, %v14531_v6  ;;  %v3275_v19 = vpop.f32.mrf.mxu1  ;;  %v10978_v40 = vor.u32 %v12855_v28, %v10975_v27 }
 0x2bb   : > { %v14577_v51 = vadd.f32 %v3370_v44, %v3322_v23  ;;  %v3276_v53 = vadd.f32 %v3275_v19, %v3227_v13  ;;  %3421 = vmatmul.bf16.gmra.mxu0 %v14492_v33  ;;  %v11106_v23 = vor.u32 %v12887_v4, %v11103_v5  ;;  %3693 = vmatpush.bf16.msrb.mxu2 %v10978_v40  ;;  %v12823_v13 = vld [vmem:[#allocation8 + $0x324] sm:$0xf]  ;;  %v10847_v19 = vld [vmem:[#allocation8 + $0x330] sm:$0xf0] }
 0x2bc   : > { %3470 = vmatmul.bf16.gmra.mxu1 %v14500_v14  ;;  %v10850_v27 = vor.u32 %v12823_v13, %v10847_v19 }
 0x2bd   : > { %3519 = vmatmul.bf16.gmra.mxu2 %v14290_v16  ;;  %3742 = vmatpush.bf16.msrb.mxu3 %v11106_v23  ;;  %v12787_v23 = vld [vmem:[#allocation8 + $0x204] sm:$0xf] }
 0x2be   : > { %3568 = vmatmul.bf16.gmra.mxu3 %v14298_v36  ;;  %3644 = vmatpush.bf16.msrb.mxu1 %v10850_v27 }
 0x2c0   : > { %v3324_v48 = vpop.f32.mrf.mxu2  ;;  %v3228_v59 = vpop.f32.mrf.mxu0 }
 0x2c1   : > { %v3325_v57 = vadd.f32 %v3324_v48, %v3276_v53  ;;  %v3373_v3 = vpop.f32.mrf.mxu3  ;;  %v3229_v49 = vadd.f32 %v3228_v59, %v14531_v6  ;;  %v3277_v44 = vpop.f32.mrf.mxu1  ;;  %v12851_v48 = vld [vmem:[#allocation8 + $0x404] sm:$0xf]  ;;  %v11087_v59 = vld [vmem:[#allocation8 + $0x510] sm:$0xf0] }
 0x2c3   : > { %v14584_v1 = vadd.f32 %v3373_v3, %v3325_v57  ;;  %v3278_v28 = vadd.f32 %v3277_v44, %v3229_v49  ;;  %v10703_v57 = vld [vmem:[#allocation8 + $0x210] sm:$0xf0]  ;;  %v12883_v3 = vld [vmem:[#allocation8 + $0x504] sm:$0xf] }
 0x2c4   : > { %v10706_v44 = vor.u32 %v12787_v23, %v10703_v57 }
 0x2c6   : > { %3596 = vmatpush.bf16.msrb.mxu0 %v10706_v44  ;;  %v12818_v44 = vld [vmem:[#allocation8 + $0x2f4] sm:$0xf0] }
 0x2c8   : > { %v3326_v36 = vpop.f32.mrf.mxu2  ;;  %v3231_v52 = vpop.f32.mrf.mxu0 }
 0x2c9   : > { %v3327_v16 = vadd.f32 %v3326_v36, %v3278_v28  ;;  %v3375_v35 = vpop.f32.mrf.mxu3  ;;  %v3232_v53 = vadd.f32 %v3231_v52, %v14531_v6  ;;  %v3280_v4 = vpop.f32.mrf.mxu1  ;;  %v10962_v36 = vor.u32 %v12851_v48, %v10959_v39 }
 0x2cb   : > { %v14587_v40 = vadd.f32 %v3375_v35, %v3327_v16  ;;  %v3281_v5 = vadd.f32 %v3280_v4, %v3232_v53  ;;  %3426 = vmatmul.bf16.gmra.mxu0 %v14504_v31  ;;  %v11090_v16 = vor.u32 %v12883_v3, %v11087_v59  ;;  %3694 = vmatpush.bf16.msrb.mxu2 %v10962_v36  ;;  %v12819_v53 = vld [vmem:[#allocation8 + $0x304] sm:$0xf]  ;;  %v10831_v4 = vld [vmem:[#allocation8 + $0x310] sm:$0xf0] }
 0x2cc   : > { %3475 = vmatmul.bf16.gmra.mxu1 %v14512_v56  ;;  %v10834_v39 = vor.u32 %v12819_v53, %v10831_v4 }
 0x2cd   : > { %3524 = vmatmul.bf16.gmra.mxu2 %v14302_v10  ;;  %3743 = vmatpush.bf16.msrb.mxu3 %v11090_v16  ;;  %v10565_v16 = vld [vmem:[#allocation8 + $0xe8] sm:$0xf] }
 0x2ce   : > { %3573 = vmatmul.bf16.gmra.mxu3 %v14310_v29  ;;  %3645 = vmatpush.bf16.msrb.mxu1 %v10834_v39 }
 0x2d0   : > { %v3329_v49 = vpop.f32.mrf.mxu2  ;;  %v3233_v28 = vpop.f32.mrf.mxu0 }
 0x2d1   : > { %v3330_v13 = vadd.f32 %v3329_v49, %v3281_v5  ;;  %v3378_v19 = vpop.f32.mrf.mxu3  ;;  %v3234_v27 = vadd.f32 %v3233_v28, %v14531_v6  ;;  %v3282_v35 = vpop.f32.mrf.mxu1  ;;  %v10821_v49 = vld [vmem:[#allocation8 + $0x2e8] sm:$0xf]  ;;  %v12850_v28 = vld [vmem:[#allocation8 + $0x3f4] sm:$0xf0] }
 0x2d3   : > { %v14594_v52 = vadd.f32 %v3378_v19, %v3330_v13  ;;  %v3283_v48 = vadd.f32 %v3282_v35, %v3234_v27  ;;  %v12754_v13 = vld [vmem:[#allocation8 + $0xf4] sm:$0xf0]  ;;  %v10949_v19 = vld [vmem:[#allocation8 + $0x3e8] sm:$0xf] }
 0x2d4   : > { %v10566_v35 = vor.u32 %v12754_v13, %v10565_v16 }
 0x2d6   : > { %3785 = vmatpush.bf16.msra.mxu0 %v10566_v35  ;;  %v12814_v35 = vld [vmem:[#allocation8 + $0x2d4] sm:$0xf0] }
 0x2d8   : > { %v3331_v29 = vpop.f32.mrf.mxu2  ;;  %v3236_v57 = vpop.f32.mrf.mxu0 }
 0x2d9   : > { %v3332_v10 = vadd.f32 %v3331_v29, %v3283_v48  ;;  %v3380_v23 = vpop.f32.mrf.mxu3  ;;  %v3237_v5 = vadd.f32 %v3236_v57, %v14531_v6  ;;  %v3285_v3 = vpop.f32.mrf.mxu1  ;;  %v10822_v29 = vor.u32 %v12818_v44, %v10821_v49 }
 0x2db   : > { %v14597_v36 = vadd.f32 %v3380_v23, %v3332_v10  ;;  %v3286_v59 = vadd.f32 %v3285_v3, %v3237_v5  ;;  %3431 = vmatmul.bf16.gmra.mxu0 %v14516_v34  ;;  %v10950_v10 = vor.u32 %v12850_v28, %v10949_v19  ;;  %3883 = vmatpush.bf16.msra.mxu2 %v10822_v29  ;;  %v10693_v5 = vld [vmem:[#allocation8 + $0x1e8] sm:$0xf]  ;;  %v12786_v3 = vld [vmem:[#allocation8 + $0x1f4] sm:$0xf0] }
 0x2dc   : > { %3480 = vmatmul.bf16.gmra.mxu1 %v14524_v60  ;;  %v10694_v44 = vor.u32 %v12786_v3, %v10693_v5 }
 0x2dd   : > { %3529 = vmatmul.bf16.gmra.mxu2 %v14314_v9  ;;  %3932 = vmatpush.bf16.msra.mxu3 %v10950_v10  ;;  %v10549_v10 = vld [vmem:[#allocation8 + $0xc8] sm:$0xf] }
 0x2de   : > { %3578 = vmatmul.bf16.gmra.mxu3 %v14322_v25  ;;  %3834 = vmatpush.bf16.msra.mxu1 %v10694_v44 }
 0x2e0   : > { %v3334_v27 = vpop.f32.mrf.mxu2  ;;  %v3238_v48 = vpop.f32.mrf.mxu0 }
 0x2e1   : > { %v3335_v53 = vadd.f32 %v3334_v27, %v3286_v59  ;;  %v3383_v4 = vpop.f32.mrf.mxu3  ;;  %v3239_v39 = vadd.f32 %v3238_v48, %v14531_v6  ;;  %v3287_v23 = vpop.f32.mrf.mxu1  ;;  %v10805_v27 = vld [vmem:[#allocation8 + $0x2c8] sm:$0xf]  ;;  %v12846_v48 = vld [vmem:[#allocation8 + $0x3d4] sm:$0xf0] }
 0x2e3   : > { %v14604_v57 = vadd.f32 %v3383_v4, %v3335_v53  ;;  %v3288_v49 = vadd.f32 %v3287_v23, %v3239_v39  ;;  %v12750_v53 = vld [vmem:[#allocation8 + $0xd4] sm:$0xf0]  ;;  %v10933_v4 = vld [vmem:[#allocation8 + $0x3c8] sm:$0xf] }
 0x2e4   : > { %v10550_v23 = vor.u32 %v12750_v53, %v10549_v10 }
 0x2e6   : > { %3786 = vmatpush.bf16.msra.mxu0 %v10550_v23 }
 0x2e8   : > { %v3336_v25 = vpop.f32.mrf.mxu2  ;;  %v3241_v13 = vpop.f32.mrf.mxu0 }
 0x2e9   : > { %v3337_v9 = vadd.f32 %v3336_v25, %v3288_v49  ;;  %v3385_v16 = vpop.f32.mrf.mxu3  ;;  %v3242_v59 = vadd.f32 %v3241_v13, %v14531_v6  ;;  %v3290_v19 = vpop.f32.mrf.mxu1  ;;  %v10806_v25 = vor.u32 %v12814_v35, %v10805_v27 }
 0x2eb   : > { %v14607_v29 = vadd.f32 %v3385_v16, %v3337_v9  ;;  %v3291_v28 = vadd.f32 %v3290_v19, %v3242_v59  ;;  %3436 = vmatmul.bf16.gmra.mxu0 %v14533_v32  ;;  %v10934_v9 = vor.u32 %v12846_v48, %v10933_v4  ;;  %3884 = vmatpush.bf16.msra.mxu2 %v10806_v25  ;;  %v10677_v59 = vld [vmem:[#allocation8 + $0x1c8] sm:$0xf]  ;;  %v12782_v19 = vld [vmem:[#allocation8 + $0x1d4] sm:$0xf0]  ;;  %v14623_v48 = vperm.slane %v14528_v41, 1 }
 0x2ec   : > { %3485 = vmatmul.bf16.gmra.mxu1 %v14541_v50  ;;  %v10678_v35 = vor.u32 %v12782_v19, %v10677_v59 }
 0x2ed   : > { %3534 = vmatmul.bf16.gmra.mxu2 %v14329_v17  ;;  %3933 = vmatpush.bf16.msra.mxu3 %v10934_v9  ;;  %v10533_v9 = vld [vmem:[#allocation8 + $0xa8] sm:$0xf] }
 0x2ee   : > { %3583 = vmatmul.bf16.gmra.mxu3 %v14340_v30  ;;  %3835 = vmatpush.bf16.msra.mxu1 %v10678_v35 }
 0x2f0   : > { %v3339_v39 = vpop.f32.mrf.mxu2  ;;  %v3243_v49 = vpop.f32.mrf.mxu0 }
 0x2f1   : > { %v3340_v5 = vadd.f32 %v3339_v39, %v3291_v28  ;;  %v3388_v3 = vpop.f32.mrf.mxu3  ;;  %v3244_v44 = vadd.f32 %v3243_v49, %v14531_v6  ;;  %v3292_v16 = vpop.f32.mrf.mxu1  ;;  %v12810_v39 = vld [vmem:[#allocation8 + $0x2b4] sm:$0xf0] }
 0x2f2   : > { %v12842_v49 = vld [vmem:[#allocation8 + $0x3b4] sm:$0xf0] }
 0x2f3   : > { %v14614_v13 = vadd.f32 %v3388_v3, %v3340_v5  ;;  %v3293_v27 = vadd.f32 %v3292_v16, %v3244_v44  ;;  %v10917_v5 = vld [vmem:[#allocation8 + $0x3a8] sm:$0xf] }
 0x2f4   : > { %v10918_v19 = vor.u32 %v12842_v49, %v10917_v5 }
 0x2f6   : > { %3934 = vmatpush.bf16.msra.mxu3 %v10918_v19  ;;  %v10517_v19 = vld [vmem:[#allocation8 + $0x88] sm:$0xf] }
 0x2f8   : > { %v3341_v30 = vpop.f32.mrf.mxu2  ;;  %v3402_v53 = vpop.f32.mrf.mxu0 }
 0x2f9   : > { %v3342_v17 = vadd.f32 %v3341_v30, %v3293_v27  ;;  %v3390_v10 = vpop.f32.mrf.mxu3  ;;  %v3403_v28 = vadd.f32 %v3402_v53, %v14544_v12  ;;  %v3451_v4 = vpop.f32.mrf.mxu1  ;;  %v10789_v30 = vld [vmem:[#allocation8 + $0x2a8] sm:$0xf]  ;;  %v12746_v12 = vld [vmem:[#allocation8 + $0xb4] sm:$0xf0] }
 0x2fa   : > { %v10790_v23 = vor.u32 %v12810_v39, %v10789_v30  ;;  %v10534_v3 = vor.u32 %v12746_v12, %v10533_v9  ;;  %v12778_v53 = vld [vmem:[#allocation8 + $0x1b4] sm:$0xf0] }
 0x2fb   : > { %v14617_v25 = vadd.f32 %v3390_v10, %v3342_v17  ;;  %v3452_v6 = vadd.f32 %v3451_v4, %v3403_v28  ;;  %3597 = vmatmul.bf16.vlgmr.msrb.gmra.mxu0 %v14344_v18  ;;  %v10661_v10 = vld [vmem:[#allocation8 + $0x1a8] sm:$0xf] }
 0x2fc   : > { %3646 = vmatmul.bf16.vlgmr.msrb.gmra.mxu1 %v14352_v37  ;;  %3885 = vmatpush.bf16.msra.mxu2 %v10790_v23  ;;  %v10662_v4 = vor.u32 %v12778_v53, %v10661_v10  ;;  %v12838_v53 = vld [vmem:[#allocation8 + $0x394] sm:$0xf0] }
 0x2fd   : > { %3695 = vmatmul.bf16.vlgmr.msrb.gmra.mxu2 %v14444_v55  ;;  %3787 = vmatpush.bf16.msra.mxu0 %v10534_v3  ;;  %v4373_v30 = vmax.f32 %v3452_v6, 0.0  ;;  %v10773_v6 = vld [vmem:[#allocation8 + $0x288] sm:$0xf] }
 0x2fe   : > { %3744 = vmatmul.bf16.vlgmr.msrb.gmra.mxu3 %v14452_v63  ;;  %3836 = vmatpush.bf16.msra.mxu1 %v10662_v4 }
 0x300   : > { %v3500_v17 = vpop.f32.mrf.mxu2  ;;  %v3404_v59 = vpop.f32.mrf.mxu0 }
 0x301   : > { %v3501_v44 = vadd.f32 %v3500_v17, %v14623_v48  ;;  %v3549_v16 = vpop.f32.mrf.mxu3  ;;  %v3405_v41 = vadd.f32 %v3404_v59, %v14547_v58  ;;  %v3453_v27 = vpop.f32.mrf.mxu1 }
 0x303   : > { %v14628_v35 = vadd.f32 %v3549_v16, %v3501_v44  ;;  %v3454_v28 = vadd.f32 %v3453_v27, %v3405_v41  ;;  %v12806_v16 = vld [vmem:[#allocation8 + $0x294] sm:$0xf0]  ;;  %v10901_v27 = vld [vmem:[#allocation8 + $0x388] sm:$0xf] }
 0x304   : > { %v10774_v59 = vor.u32 %v12806_v16, %v10773_v6  ;;  %v12742_v41 = vld [vmem:[#allocation8 + $0x94] sm:$0xf0] }
 0x305   : > { %v4377_v39 = vmax.f32 %v3454_v28, 0.0 }
 0x306   : > { %3886 = vmatpush.bf16.msra.mxu2 %v10774_v59 }
 0x307   : > { %v14630_v9 = vpack.c.bf16 %v4377_v39, %v4373_v30  ;;  %v10902_v39 = vor.u32 %v12838_v53, %v10901_v27 }
 0x308   : > { %v3502_v12 = vpop.f32.mrf.mxu2  ;;  %v3407_v17 = vpop.f32.mrf.mxu0 }
 0x309   : > { %16529 = vst [vmem:[#allocation52_spill] sm:$0xff] %v14630_v9  ;;  %v3503_v23 = vadd.f32 %v3502_v12, %v14623_v48  ;;  %v3551_v5 = vpop.f32.mrf.mxu3  ;;  %v3408_v58 = vadd.f32 %v3407_v17, %v14554_v11  ;;  %v3456_v3 = vpop.f32.mrf.mxu1  ;;  %v10518_v11 = vor.u32 %v12742_v41, %v10517_v19  ;;  %3935 = vmatpush.bf16.msra.mxu3 %v10902_v39  ;;  %v10645_v17 = vld [vmem:[#allocation8 + $0x188] sm:$0xf] }
 0x30b   : > { %v14634_v49 = vadd.f32 %v3551_v5, %v3503_v23  ;;  %v3457_v44 = vadd.f32 %v3456_v3, %v3408_v58  ;;  %3602 = vmatmul.bf16.gmra.mxu0 %v14356_v22  ;;  %v12774_v58 = vld [vmem:[#allocation8 + $0x194] sm:$0xf0] }
 0x30c   : > { %3651 = vmatmul.bf16.gmra.mxu1 %v14364_v38  ;;  %3788 = vmatpush.bf16.msra.mxu0 %v10518_v11  ;;  %v10646_v6 = vor.u32 %v12774_v58, %v10645_v17  ;;  %v10885_v17 = vld [vmem:[#allocation8 + $0x368] sm:$0xf] }
 0x30d   : > { %3700 = vmatmul.bf16.gmra.mxu2 %v14456_v45  ;;  %v4381_v16 = vmax.f32 %v3457_v44, 0.0  ;;  %v10757_v44 = vld [vmem:[#allocation8 + $0x268] sm:$0xf] }
 0x30e   : > { %3749 = vmatmul.bf16.gmra.mxu3 %v14464_v15  ;;  %3837 = vmatpush.bf16.msra.mxu1 %v10646_v6 }
 0x310   : > { %v3505_v10 = vpop.f32.mrf.mxu2  ;;  %v3409_v30 = vpop.f32.mrf.mxu0 }
 0x311   : > { %v3506_v28 = vadd.f32 %v3505_v10, %v14623_v48  ;;  %v3554_v4 = vpop.f32.mrf.mxu3  ;;  %v3410_v12 = vadd.f32 %v3409_v30, %v14557_v61  ;;  %v3458_v23 = vpop.f32.mrf.mxu1  ;;  %v12802_v30 = vld [vmem:[#allocation8 + $0x274] sm:$0xf0] }
 0x312   : > { %v10758_v39 = vor.u32 %v12802_v30, %v10757_v44 }
 0x313   : > { %v14642_v5 = vadd.f32 %v3554_v4, %v3506_v28  ;;  %v3459_v3 = vadd.f32 %v3458_v23, %v3410_v12  ;;  %v10501_v12 = vld [vmem:[#allocation8 + $0x68] sm:$0xf]  ;;  %v12738_v23 = vld [vmem:[#allocation8 + $0x74] sm:$0xf0] }
 0x314   : > { %3887 = vmatpush.bf16.msra.mxu2 %v10758_v39 }
 0x315   : > { %v4385_v19 = vmax.f32 %v3459_v3, 0.0  ;;  %v12834_v3 = vld [vmem:[#allocation8 + $0x374] sm:$0xf0] }
 0x317   : > { %v14644_v10 = vpack.c.bf16 %v4385_v19, %v4381_v16 }
 0x318   : > { %v3507_v41 = vpop.f32.mrf.mxu2  ;;  %v3412_v53 = vpop.f32.mrf.mxu0 }
 0x319   : > { %16530 = vst [vmem:[#allocation53_spill] sm:$0xff] %v14644_v10  ;;  %v3508_v59 = vadd.f32 %v3507_v41, %v14623_v48  ;;  %v3556_v27 = vpop.f32.mrf.mxu3  ;;  %v3413_v61 = vadd.f32 %v3412_v53, %v14564_v0  ;;  %v3461_v11 = vpop.f32.mrf.mxu1  ;;  %v10502_v0 = vor.u32 %v12738_v23, %v10501_v12  ;;  %v10886_v41 = vor.u32 %v12834_v3, %v10885_v17 }
 0x31b   : > { %v14648_v28 = vadd.f32 %v3556_v27, %v3508_v59  ;;  %v3462_v4 = vadd.f32 %v3461_v11, %v3413_v61  ;;  %3607 = vmatmul.bf16.gmra.mxu0 %v14368_v20  ;;  %3936 = vmatpush.bf16.msra.mxu3 %v10886_v41  ;;  %v10629_v61 = vld [vmem:[#allocation8 + $0x168] sm:$0xf]  ;;  %v12770_v11 = vld [vmem:[#allocation8 + $0x174] sm:$0xf0] }
 0x31c   : > { %3656 = vmatmul.bf16.gmra.mxu1 %v14376_v42  ;;  %3789 = vmatpush.bf16.msra.mxu0 %v10502_v0  ;;  %v10630_v30 = vor.u32 %v12770_v11, %v10629_v61  ;;  %v10485_v41 = vld [vmem:[#allocation8 + $0x48] sm:$0xf]  ;;  %v12830_v11 = vld [vmem:[#allocation8 + $0x354] sm:$0xf0] }
 0x31d   : > { %3705 = vmatmul.bf16.gmra.mxu2 %v14468_v26  ;;  %v4389_v10 = vmax.f32 %v3462_v4, 0.0  ;;  %v12798_v4 = vld [vmem:[#allocation8 + $0x254] sm:$0xf0] }
 0x31e   : > { %3754 = vmatmul.bf16.gmra.mxu3 %v14476_v7  ;;  %3838 = vmatpush.bf16.msra.mxu1 %v10630_v30 }
 0x320   : > { %v3510_v58 = vpop.f32.mrf.mxu2  ;;  %v3414_v19 = vpop.f32.mrf.mxu0 }
 0x321   : > { %v3511_v6 = vadd.f32 %v3510_v58, %v14623_v48  ;;  %v3559_v16 = vpop.f32.mrf.mxu3  ;;  %v3415_v59 = vadd.f32 %v3414_v19, %v14567_v62  ;;  %v3463_v27 = vpop.f32.mrf.mxu1 }
 0x323   : > { %v14656_v53 = vadd.f32 %v3559_v16, %v3511_v6  ;;  %v3464_v44 = vadd.f32 %v3463_v27, %v3415_v59  ;;  %v12734_v59 = vld [vmem:[#allocation8 + $0x54] sm:$0xf0]  ;;  %v10869_v27 = vld [vmem:[#allocation8 + $0x348] sm:$0xf] }
 0x325   : > { %v4393_v12 = vmax.f32 %v3464_v44, 0.0 }
 0x327   : > { %v14658_v58 = vpack.c.bf16 %v4393_v12, %v4389_v10  ;;  %v10741_v10 = vld [vmem:[#allocation8 + $0x248] sm:$0xf] }
 0x328   : > { %v3512_v23 = vpop.f32.mrf.mxu2  ;;  %v3417_v3 = vpop.f32.mrf.mxu0  ;;  %v10742_v19 = vor.u32 %v12798_v4, %v10741_v10 }
 0x329   : > { %16531 = vst [vmem:[#allocation54_spill] sm:$0xff] %v14658_v58  ;;  %v3513_v39 = vadd.f32 %v3512_v23, %v14623_v48  ;;  %v3561_v17 = vpop.f32.mrf.mxu3  ;;  %v3418_v62 = vadd.f32 %v3417_v3, %v14574_v47  ;;  %v3466_v0 = vpop.f32.mrf.mxu1  ;;  %v10486_v47 = vor.u32 %v12734_v59, %v10485_v41  ;;  %v10870_v23 = vor.u32 %v12830_v11, %v10869_v27 }
 0x32a   : > { %3888 = vmatpush.bf16.msra.mxu2 %v10742_v19 }
 0x32b   : > { %v14662_v6 = vadd.f32 %v3561_v17, %v3513_v39  ;;  %v3467_v16 = vadd.f32 %v3466_v0, %v3418_v62  ;;  %3612 = vmatmul.bf16.gmra.mxu0 %v14380_v21  ;;  %3937 = vmatpush.bf16.msra.mxu3 %v10870_v23  ;;  %v10613_v62 = vld [vmem:[#allocation8 + $0x148] sm:$0xf]  ;;  %v12766_v0 = vld [vmem:[#allocation8 + $0x154] sm:$0xf0] }
 0x32c   : > { %3661 = vmatmul.bf16.gmra.mxu1 %v14388_v46  ;;  %3790 = vmatpush.bf16.msra.mxu0 %v10486_v47  ;;  %v10614_v4 = vor.u32 %v12766_v0, %v10613_v62  ;;  %v10469_v23 = vld [vmem:[#allocation8 + $0x28] sm:$0xf]  ;;  %v12826_v0 = vld [vmem:[#allocation8 + $0x334] sm:$0xf0] }
 0x32d   : > { %3710 = vmatmul.bf16.gmra.mxu2 %v14480_v8  ;;  %v4397_v58 = vmax.f32 %v3467_v16, 0.0  ;;  %v12794_v16 = vld [vmem:[#allocation8 + $0x234] sm:$0xf0] }
 0x32e   : > { %3759 = vmatmul.bf16.gmra.mxu3 %v14488_v2  ;;  %3839 = vmatpush.bf16.msra.mxu1 %v10614_v4 }
 0x330   : > { %v3515_v61 = vpop.f32.mrf.mxu2  ;;  %v3419_v12 = vpop.f32.mrf.mxu0 }
 0x331   : > { %v3516_v44 = vadd.f32 %v3515_v61, %v14623_v48  ;;  %v3564_v30 = vpop.f32.mrf.mxu3  ;;  %v3420_v39 = vadd.f32 %v3419_v12, %v14577_v51  ;;  %v3468_v17 = vpop.f32.mrf.mxu1 }
 0x333   : > { %v14670_v3 = vadd.f32 %v3564_v30, %v3516_v44  ;;  %v3469_v10 = vadd.f32 %v3468_v17, %v3420_v39  ;;  %v12730_v39 = vld [vmem:[#allocation8 + $0x34] sm:$0xf0]  ;;  %v10853_v17 = vld [vmem:[#allocation8 + $0x328] sm:$0xf] }
 0x335   : > { %v4401_v41 = vmax.f32 %v3469_v10, 0.0 }
 0x337   : > { %v14672_v61 = vpack.c.bf16 %v4401_v41, %v4397_v58  ;;  %v10725_v58 = vld [vmem:[#allocation8 + $0x228] sm:$0xf] }
 0x338   : > { %v3517_v59 = vpop.f32.mrf.mxu2  ;;  %v3422_v11 = vpop.f32.mrf.mxu0  ;;  %v10726_v12 = vor.u32 %v12794_v16, %v10725_v58 }
 0x339   : > { %16532 = vst [vmem:[#allocation55_spill] sm:$0xff] %v14672_v61  ;;  %v3518_v19 = vadd.f32 %v3517_v59, %v14623_v48  ;;  %v3566_v27 = vpop.f32.mrf.mxu3  ;;  %v3423_v51 = vadd.f32 %v3422_v11, %v14584_v1  ;;  %v3471_v47 = vpop.f32.mrf.mxu1  ;;  %v10470_v1 = vor.u32 %v12730_v39, %v10469_v23  ;;  %v10854_v59 = vor.u32 %v12826_v0, %v10853_v17 }
 0x33a   : > { %3889 = vmatpush.bf16.msra.mxu2 %v10726_v12 }
 0x33b   : > { %v14676_v44 = vadd.f32 %v3566_v27, %v3518_v19  ;;  %v3472_v30 = vadd.f32 %v3471_v47, %v3423_v51  ;;  %3617 = vmatmul.bf16.gmra.mxu0 %v14392_v24  ;;  %3938 = vmatpush.bf16.msra.mxu3 %v10854_v59  ;;  %v10597_v51 = vld [vmem:[#allocation8 + $0x128] sm:$0xf]  ;;  %v12762_v47 = vld [vmem:[#allocation8 + $0x134] sm:$0xf0]  ;;  %v16535_v59 = vld [vmem:[#allocation42_spill] sm:$0xff] }
 0x33c   : > { %3666 = vmatmul.bf16.gmra.mxu1 %v14400_v54  ;;  %3791 = vmatpush.bf16.msra.mxu0 %v10470_v1  ;;  %v10598_v16 = vor.u32 %v12762_v47, %v10597_v51  ;;  %v12726_v51 = vld [vmem:[#allocation8 + $0x14] sm:$0xf0]  ;;  %v10837_v47 = vld [vmem:[#allocation8 + $0x308] sm:$0xf] }
 0x33d   : > { %3715 = vmatmul.bf16.gmra.mxu2 %v14492_v33  ;;  %v4405_v61 = vmax.f32 %v3472_v30, 0.0  ;;  %v12790_v30 = vld [vmem:[#allocation8 + $0x214] sm:$0xf0] }
 0x33e   : > { %3764 = vmatmul.bf16.gmra.mxu3 %v14500_v14  ;;  %3840 = vmatpush.bf16.msra.mxu1 %v10598_v16  ;;  %v12822_v16 = vld [vmem:[#allocation8 + $0x314] sm:$0xf0] }
 0x340   : > { %v3520_v62 = vpop.f32.mrf.mxu2  ;;  %v3424_v41 = vpop.f32.mrf.mxu0 }
 0x341   : > { %v3521_v10 = vadd.f32 %v3520_v62, %v14623_v48  ;;  %v3569_v4 = vpop.f32.mrf.mxu3  ;;  %v3425_v19 = vadd.f32 %v3424_v41, %v14587_v40  ;;  %v3473_v27 = vpop.f32.mrf.mxu1  ;;  %v16534_v41 = vld [vmem:[#allocation41_spill] sm:$0xff] }
 0x343   : > { %v14684_v11 = vadd.f32 %v3569_v4, %v3521_v10  ;;  %v3474_v58 = vadd.f32 %v3473_v27, %v3425_v19  ;;  %v10453_v27 = vld [vmem:[#allocation8 + $0x8] sm:$0xf] }
 0x345   : > { %v4409_v23 = vmax.f32 %v3474_v58, 0.0 }
 0x347   : > { %v14686_v62 = vpack.c.bf16 %v4409_v23, %v4405_v61  ;;  %v10709_v61 = vld [vmem:[#allocation8 + $0x208] sm:$0xf] }
 0x348   : > { %v3522_v39 = vpop.f32.mrf.mxu2  ;;  %v3427_v0 = vpop.f32.mrf.mxu0  ;;  %v10710_v19 = vor.u32 %v12790_v30, %v10709_v61  ;;  %v10581_v61 = vld [vmem:[#allocation8 + $0x108] sm:$0xf]  ;;  %v12758_v30 = vld [vmem:[#allocation8 + $0x114] sm:$0xf0] }
 0x349   : > { %16533 = vst [vmem:[#allocation56_spill] sm:$0xff] %v14686_v62  ;;  %v3523_v12 = vadd.f32 %v3522_v39, %v14623_v48  ;;  %v3571_v17 = vpop.f32.mrf.mxu3  ;;  %v3428_v40 = vadd.f32 %v3427_v0, %v14594_v52  ;;  %v3476_v1 = vpop.f32.mrf.mxu1  ;;  %v10454_v52 = vor.u32 %v12726_v51, %v10453_v27  ;;  %v10582_v9 = vor.u32 %v12758_v30, %v10581_v61  ;;  %v10695_v30 = vld [vmem:[#allocation8 + $0x1f8] sm:$0xf0] }
 0x34a   : > { %3890 = vmatpush.bf16.msra.mxu2 %v10710_v19 }
 0x34b   : > { %v14690_v10 = vadd.f32 %v3571_v17, %v3523_v12  ;;  %v3477_v4 = vadd.f32 %v3476_v1, %v3428_v40  ;;  %3622 = vmatmul.bf16.gmra.mxu0 %v16534_v41  ;;  %v10838_v17 = vor.u32 %v12822_v16, %v10837_v47  ;;  %3841 = vmatpush.bf16.msra.mxu1 %v10582_v9  ;;  %v10567_v9 = vld [vmem:[#allocation8 + $0xf8] sm:$0xf0] }
 0x34c   : > { %3671 = vmatmul.bf16.gmra.mxu1 %v16535_v59  ;;  %3792 = vmatpush.bf16.msra.mxu0 %v10454_v52 }
 0x34d   : > { %3720 = vmatmul.bf16.gmra.mxu2 %v14504_v31  ;;  %3939 = vmatpush.bf16.msra.mxu3 %v10838_v17  ;;  %v16538_v17 = vld [vmem:[#allocation44_spill] sm:$0xff] }
 0x34e   : > { %3769 = vmatmul.bf16.gmra.mxu3 %v14512_v56  ;;  %v4413_v56 = vmax.f32 %v3477_v4, 0.0  ;;  %v11077_v4 = vld [vmem:[#allocation8 + $0x4e8] sm:$0xf] }
 0x350   : > { %v3525_v58 = vpop.f32.mrf.mxu2  ;;  %v3429_v12 = vpop.f32.mrf.mxu0 }
 0x351   : > { %v3526_v23 = vadd.f32 %v3525_v58, %v14623_v48  ;;  %v3574_v39 = vpop.f32.mrf.mxu3  ;;  %v3430_v0 = vadd.f32 %v3429_v12, %v14597_v36  ;;  %v3478_v40 = vpop.f32.mrf.mxu1  ;;  %v16537_v12 = vld [vmem:[#allocation43_spill] sm:$0xff] }
 0x353   : > { %v14698_v1 = vadd.f32 %v3574_v39, %v3526_v23  ;;  %v3479_v62 = vadd.f32 %v3478_v40, %v3430_v0  ;;  %v12882_v0 = vld [vmem:[#allocation8 + $0x4f4] sm:$0xf0]  ;;  %v12784_v40 = vld [vmem:[#allocation8 + $0x1ec] sm:$0xf] }
 0x355   : > { %v4417_v27 = vmax.f32 %v3479_v62, 0.0 }
 0x357   : > { %v14700_v58 = vpack.c.bf16 %v4417_v27, %v4413_v56  ;;  %v12752_v56 = vld [vmem:[#allocation8 + $0xec] sm:$0xf] }
 0x358   : > { %v3527_v51 = vpop.f32.mrf.mxu2  ;;  %v3432_v16 = vpop.f32.mrf.mxu0  ;;  %v10570_v62 = vor.u32 %v12752_v56, %v10567_v9  ;;  %v11205_v9 = vld [vmem:[#allocation8 + $0x5e8] sm:$0xf] }
 0x359   : > { %16536 = vst [vmem:[#allocation41_spill] sm:$0xff] %v14700_v58  ;;  %v3528_v19 = vadd.f32 %v3527_v51, %v14623_v48  ;;  %v3576_v47 = vpop.f32.mrf.mxu3  ;;  %v3433_v36 = vadd.f32 %v3432_v16, %v14604_v57  ;;  %v3481_v52 = vpop.f32.mrf.mxu1  ;;  %v11078_v57 = vor.u32 %v12882_v0, %v11077_v4  ;;  %v12914_v58 = vld [vmem:[#allocation8 + $0x5f4] sm:$0xf0] }
 0x35a   : > { %4079 = vmatpush.bf16.msrb.mxu2 %v10570_v62  ;;  %v11206_v4 = vor.u32 %v12914_v58, %v11205_v9  ;;  %v11061_v58 = vld [vmem:[#allocation8 + $0x4c8] sm:$0xf] }
 0x35b   : > { %v14704_v23 = vadd.f32 %v3576_v47, %v3528_v19  ;;  %v3482_v39 = vadd.f32 %v3481_v52, %v3433_v36  ;;  %3627 = vmatmul.bf16.gmra.mxu0 %v16537_v12  ;;  %v10698_v47 = vor.u32 %v12784_v40, %v10695_v30 }
 0x35c   : > { %3676 = vmatmul.bf16.gmra.mxu1 %v16538_v17  ;;  %3981 = vmatpush.bf16.msrb.mxu0 %v11078_v57 }
 0x35d   : > { %3725 = vmatmul.bf16.gmra.mxu2 %v14516_v34  ;;  %4128 = vmatpush.bf16.msrb.mxu3 %v10698_v47 }
 0x35e   : > { %3774 = vmatmul.bf16.gmra.mxu3 %v14524_v60  ;;  %v4421_v60 = vmax.f32 %v3482_v39, 0.0  ;;  %4030 = vmatpush.bf16.msrb.mxu1 %v11206_v4 }
 0x360   : > { %v3530_v61 = vpop.f32.mrf.mxu2  ;;  %v3434_v19 = vpop.f32.mrf.mxu0 }
 0x361   : > { %v3531_v27 = vadd.f32 %v3530_v61, %v14623_v48  ;;  %v3579_v51 = vpop.f32.mrf.mxu3  ;;  %v3435_v16 = vadd.f32 %v3434_v19, %v14607_v29  ;;  %v3483_v36 = vpop.f32.mrf.mxu1  ;;  %v16540_v19 = vld [vmem:[#allocation45_spill] sm:$0xff] }
 0x363   : > { %v14712_v52 = vadd.f32 %v3579_v51, %v3531_v27  ;;  %v3484_v56 = vadd.f32 %v3483_v36, %v3435_v16  ;;  %v12878_v16 = vld [vmem:[#allocation8 + $0x4d4] sm:$0xf0]  ;;  %v12780_v36 = vld [vmem:[#allocation8 + $0x1cc] sm:$0xf] }
 0x365   : > { %v4425_v34 = vmax.f32 %v3484_v56, 0.0 }
 0x367   : > { %v14714_v61 = vpack.c.bf16 %v4425_v34, %v4421_v60  ;;  %v12748_v34 = vld [vmem:[#allocation8 + $0xcc] sm:$0xf]  ;;  %v10551_v60 = vld [vmem:[#allocation8 + $0xd8] sm:$0xf0] }
 0x368   : > { %v3532_v0 = vpop.f32.mrf.mxu2  ;;  %v3437_v30 = vpop.f32.mrf.mxu0  ;;  %v10554_v47 = vor.u32 %v12748_v34, %v10551_v60  ;;  %v12910_v34 = vld [vmem:[#allocation8 + $0x5d4] sm:$0xf0] }
 0x369   : > { %16539 = vst [vmem:[#allocation42_spill] sm:$0xff] %v14714_v61  ;;  %v3533_v62 = vadd.f32 %v3532_v0, %v14623_v48  ;;  %v3581_v40 = vpop.f32.mrf.mxu3  ;;  %v3438_v29 = vadd.f32 %v3437_v30, %v14614_v13  ;;  %v3486_v57 = vpop.f32.mrf.mxu1  ;;  %v10679_v13 = vld [vmem:[#allocation8 + $0x1d8] sm:$0xf0]  ;;  %v11062_v0 = vor.u32 %v12878_v16, %v11061_v58  ;;  %v11189_v61 = vld [vmem:[#allocation8 + $0x5c8] sm:$0xf] }
 0x36a   : > { %4080 = vmatpush.bf16.msrb.mxu2 %v10554_v47 }
 0x36b   : > { %v14718_v27 = vadd.f32 %v3581_v40, %v3533_v62  ;;  %v3487_v51 = vadd.f32 %v3486_v57, %v3438_v29  ;;  %3632 = vmatmul.bf16.gmra.mxu0 %v14430_v43  ;;  %v10682_v62 = vor.u32 %v12780_v36, %v10679_v13 }
 0x36c   : > { %3681 = vmatmul.bf16.gmra.mxu1 %v16540_v19  ;;  %3982 = vmatpush.bf16.msrb.mxu0 %v11062_v0  ;;  %v10663_v0 = vld [vmem:[#allocation8 + $0x1b8] sm:$0xf0] }
 0x36d   : > { %3730 = vmatmul.bf16.gmra.mxu2 %v14533_v32  ;;  %4129 = vmatpush.bf16.msrb.mxu3 %v10682_v62  ;;  %v4429_v60 = vmax.f32 %v3487_v51, 0.0  ;;  %v11190_v32 = vor.u32 %v12910_v34, %v11189_v61  ;;  %v11045_v61 = vld [vmem:[#allocation8 + $0x4a8] sm:$0xf]  ;;  %v12776_v51 = vld [vmem:[#allocation8 + $0x1ac] sm:$0xf] }
 0x36e   : > { %3779 = vmatmul.bf16.gmra.mxu3 %v14541_v50 }
 0x36f   : > { %4031 = vmatpush.bf16.msrb.mxu1 %v11190_v32  ;;  %v12744_v32 = vld [vmem:[#allocation8 + $0xac] sm:$0xf] }
 0x370   : > { %v3535_v39 = vpop.f32.mrf.mxu2  ;;  %v3439_v4 = vpop.f32.mrf.mxu0 }
 0x371   : > { %v3536_v56 = vadd.f32 %v3535_v39, %v14623_v48  ;;  %v3584_v9 = vpop.f32.mrf.mxu3  ;;  %v3440_v40 = vadd.f32 %v3439_v4, %v14617_v25  ;;  %v3488_v30 = vpop.f32.mrf.mxu1  ;;  %v16543_v4 = vld [vmem:[#allocation24_spill] sm:$0xff] }
 0x373   : > { %v14726_v29 = vadd.f32 %v3584_v9, %v3536_v56  ;;  %v3489_v57 = vadd.f32 %v3488_v30, %v3440_v40  ;;  %v16542_v9 = vld [vmem:[#allocation23_spill] sm:$0xff]  ;;  %v10666_v40 = vor.u32 %v12776_v51, %v10663_v0  ;;  %v16544_v0 = vld [vmem:[#allocation25_spill] sm:$0xff] }
 0x375   : > { %v4433_v50 = vmax.f32 %v3489_v57, 0.0  ;;  %4130 = vmatpush.bf16.msrb.mxu3 %v10666_v40  ;;  %v12740_v40 = vld [vmem:[#allocation8 + $0x8c] sm:$0xf] }
 0x377   : > { %v14728_v39 = vpack.c.bf16 %v4433_v50, %v4429_v60  ;;  %v10535_v50 = vld [vmem:[#allocation8 + $0xb8] sm:$0xf0] }
 0x378   : > { %v3537_v31 = vpop.f32.mrf.mxu2  ;;  %v3598_v25 = vpop.f32.mrf.mxu0 }
 0x379   : > { %16541 = vst [vmem:[#allocation43_spill] sm:$0xff] %v14728_v39  ;;  %v3538_v58 = vadd.f32 %v3537_v31, %v14623_v48  ;;  %v3586_v16 = vpop.f32.mrf.mxu3  ;;  %v3599_v47 = vadd.f32 %v3598_v25, %v14628_v35  ;;  %v3647_v36 = vpop.f32.mrf.mxu1  ;;  %v10538_v31 = vor.u32 %v12744_v32, %v10535_v50  ;;  %v12874_v48 = vld [vmem:[#allocation8 + $0x4b4] sm:$0xf0] }
 0x37a   : > { %v11046_v62 = vor.u32 %v12874_v48, %v11045_v61 }
 0x37b   : > { %v14732_v13 = vadd.f32 %v3586_v16, %v3538_v58  ;;  %v3648_v56 = vadd.f32 %v3647_v36, %v3599_v47  ;;  %3793 = vmatmul.bf16.vlgmr.msra.gmra.mxu0 %v16542_v9  ;;  %4081 = vmatpush.bf16.msrb.mxu2 %v10538_v31  ;;  %v11173_v47 = vld [vmem:[#allocation8 + $0x5a8] sm:$0xf]  ;;  %v12906_v36 = vld [vmem:[#allocation8 + $0x5b4] sm:$0xf0] }
 0x37c   : > { %3842 = vmatmul.bf16.vlgmr.msra.gmra.mxu1 %v16543_v4  ;;  %3983 = vmatpush.bf16.msrb.mxu0 %v11046_v62  ;;  %v11174_v32 = vor.u32 %v12906_v36, %v11173_v47  ;;  %v16545_v62 = vld [vmem:[#allocation26_spill] sm:$0xff] }
 0x37d   : > { %3891 = vmatmul.bf16.vlgmr.msra.gmra.mxu2 %v14344_v18 }
 0x37e   : > { %3940 = vmatmul.bf16.vlgmr.msra.gmra.mxu3 %v14352_v37  ;;  %4032 = vmatpush.bf16.msrb.mxu1 %v11174_v32 }
 0x380   : > { %v3696_v35 = vpop.f32.mrf.mxu2  ;;  %v3600_v34 = vpop.f32.mrf.mxu0 }
 0x381   : > { %v3697_v30 = vadd.f32 %v3696_v35, %v3648_v56  ;;  %v3745_v57 = vpop.f32.mrf.mxu3  ;;  %v3601_v60 = vadd.f32 %v3600_v34, %v14634_v49  ;;  %v3649_v58 = vpop.f32.mrf.mxu1 }
 0x383   : > { %v3746_v16 = vadd.f32 %v3745_v57, %v3697_v30  ;;  %v3650_v25 = vadd.f32 %v3649_v58, %v3601_v60  ;;  %v10519_v30 = vld [vmem:[#allocation8 + $0x98] sm:$0xf0]  ;;  %v11029_v57 = vld [vmem:[#allocation8 + $0x488] sm:$0xf]  ;;  %v12772_v58 = vld [vmem:[#allocation8 + $0x18c] sm:$0xf] }
 0x384   : > { %v10522_v60 = vor.u32 %v12740_v40, %v10519_v30 }
 0x385   : > { %v4374_v49 = vmax.f32 %v3746_v16, 0.0 }
 0x386   : > { %4082 = vmatpush.bf16.msrb.mxu2 %v10522_v60 }
 0x388   : > { %v3698_v50 = vpop.f32.mrf.mxu2  ;;  %v3603_v61 = vpop.f32.mrf.mxu0 }
 0x389   : > { %v3699_v39 = vadd.f32 %v3698_v50, %v3650_v25  ;;  %v3747_v37 = vpop.f32.mrf.mxu3  ;;  %v3604_v56 = vadd.f32 %v3603_v61, %v14642_v5  ;;  %v3652_v48 = vpop.f32.mrf.mxu1  ;;  %v12870_v5 = vld [vmem:[#allocation8 + $0x494] sm:$0xf0] }
 0x38a   : > { %v11030_v25 = vor.u32 %v12870_v5, %v11029_v57 }
 0x38b   : > { %v3748_v51 = vadd.f32 %v3747_v37, %v3699_v39  ;;  %v3653_v31 = vadd.f32 %v3652_v48, %v3604_v56  ;;  %3798 = vmatmul.bf16.gmra.mxu0 %v16544_v0  ;;  %v10647_v37 = vld [vmem:[#allocation8 + $0x198] sm:$0xf0] }
 0x38c   : > { %3847 = vmatmul.bf16.gmra.mxu1 %v16545_v62  ;;  %v10650_v47 = vor.u32 %v12772_v58, %v10647_v37  ;;  %3984 = vmatpush.bf16.msrb.mxu0 %v11030_v25  ;;  %v16547_v37 = vld [vmem:[#allocation27_spill] sm:$0xff]  ;;  %v16548_v25 = vld [vmem:[#allocation28_spill] sm:$0xff] }
 0x38d   : > { %v4378_v35 = vmax.f32 %v3748_v51, 0.0  ;;  %3896 = vmatmul.bf16.gmra.mxu2 %v14356_v22  ;;  %v11157_v51 = vld [vmem:[#allocation8 + $0x588] sm:$0xf] }
 0x38e   : > { %3945 = vmatmul.bf16.gmra.mxu3 %v14364_v38 }
 0x38f   : > { %v14744_v34 = vpack.c.bf16 %v4378_v35, %v4374_v49  ;;  %4131 = vmatpush.bf16.msrb.mxu3 %v10650_v47  ;;  %v12902_v49 = vld [vmem:[#allocation8 + $0x594] sm:$0xf0]  ;;  %v12736_v47 = vld [vmem:[#allocation8 + $0x6c] sm:$0xf] }
 0x390   : > { %v3701_v39 = vpop.f32.mrf.mxu2  ;;  %v3605_v32 = vpop.f32.mrf.mxu0  ;;  %v11158_v35 = vor.u32 %v12902_v49, %v11157_v51 }
 0x391   : > { %16546 = vst [vmem:[#allocation44_spill] sm:$0xff] %v14744_v34  ;;  %v3702_v16 = vadd.f32 %v3701_v39, %v3653_v31  ;;  %v3750_v36 = vpop.f32.mrf.mxu3  ;;  %v3606_v50 = vadd.f32 %v3605_v32, %v14648_v28  ;;  %v3654_v61 = vpop.f32.mrf.mxu1 }
 0x392   : > { %4033 = vmatpush.bf16.msrb.mxu1 %v11158_v35 }
 0x393   : > { %v3751_v56 = vadd.f32 %v3750_v36, %v3702_v16  ;;  %v3655_v48 = vadd.f32 %v3654_v61, %v3606_v50  ;;  %v10503_v16 = vld [vmem:[#allocation8 + $0x78] sm:$0xf0]  ;;  %v11013_v36 = vld [vmem:[#allocation8 + $0x468] sm:$0xf]  ;;  %v12866_v50 = vld [vmem:[#allocation8 + $0x474] sm:$0xf0] }
 0x394   : > { %v10506_v32 = vor.u32 %v12736_v47, %v10503_v16  ;;  %v12768_v61 = vld [vmem:[#allocation8 + $0x16c] sm:$0xf]  ;;  %v11014_v51 = vor.u32 %v12866_v50, %v11013_v36  ;;  %v12898_v47 = vld [vmem:[#allocation8 + $0x574] sm:$0xf0] }
 0x395   : > { %v4382_v28 = vmax.f32 %v3751_v56, 0.0 }
 0x396   : > { %4083 = vmatpush.bf16.msrb.mxu2 %v10506_v32  ;;  %3985 = vmatpush.bf16.msrb.mxu0 %v11014_v51  ;;  %v16551_v51 = vld [vmem:[#allocation30_spill] sm:$0xff] }
 0x398   : > { %v3703_v40 = vpop.f32.mrf.mxu2  ;;  %v3608_v57 = vpop.f32.mrf.mxu0 }
 0x399   : > { %v3704_v30 = vadd.f32 %v3703_v40, %v3655_v48  ;;  %v3752_v34 = vpop.f32.mrf.mxu3  ;;  %v3609_v31 = vadd.f32 %v3608_v57, %v14656_v53  ;;  %v3657_v5 = vpop.f32.mrf.mxu1  ;;  %v10631_v53 = vld [vmem:[#allocation8 + $0x178] sm:$0xf0] }
 0x39a   : > { %v10634_v49 = vor.u32 %v12768_v61, %v10631_v53  ;;  %v16550_v53 = vld [vmem:[#allocation29_spill] sm:$0xff] }
 0x39b   : > { %v3753_v58 = vadd.f32 %v3752_v34, %v3704_v30  ;;  %v3658_v60 = vadd.f32 %v3657_v5, %v3609_v31  ;;  %3803 = vmatmul.bf16.gmra.mxu0 %v16547_v37 }
 0x39c   : > { %3852 = vmatmul.bf16.gmra.mxu1 %v16548_v25  ;;  %4132 = vmatpush.bf16.msrb.mxu3 %v10634_v49  ;;  %v12732_v49 = vld [vmem:[#allocation8 + $0x4c] sm:$0xf] }
 0x39d   : > { %v4386_v39 = vmax.f32 %v3753_v58, 0.0  ;;  %3901 = vmatmul.bf16.gmra.mxu2 %v14368_v20  ;;  %v11141_v58 = vld [vmem:[#allocation8 + $0x568] sm:$0xf] }
 0x39e   : > { %3950 = vmatmul.bf16.gmra.mxu3 %v14376_v42  ;;  %v11142_v16 = vor.u32 %v12898_v47, %v11141_v58 }
 0x39f   : > { %v14752_v48 = vpack.c.bf16 %v4386_v39, %v4382_v28 }
 0x3a0   : > { %v3706_v34 = vpop.f32.mrf.mxu2  ;;  %v3610_v40 = vpop.f32.mrf.mxu0  ;;  %4034 = vmatpush.bf16.msrb.mxu1 %v11142_v16 }
 0x3a1   : > { %16549 = vst [vmem:[#allocation45_spill] sm:$0xff] %v14752_v48  ;;  %v3707_v56 = vadd.f32 %v3706_v34, %v3658_v60  ;;  %v3755_v35 = vpop.f32.mrf.mxu3  ;;  %v3611_v30 = vadd.f32 %v3610_v40, %v14662_v6  ;;  %v3659_v57 = vpop.f32.mrf.mxu1  ;;  %v12862_v40 = vld [vmem:[#allocation8 + $0x454] sm:$0xf0] }
 0x3a3   : > { %v3756_v31 = vadd.f32 %v3755_v35, %v3707_v56  ;;  %v3660_v5 = vadd.f32 %v3659_v57, %v3611_v30  ;;  %v10487_v56 = vld [vmem:[#allocation8 + $0x58] sm:$0xf0]  ;;  %v12764_v30 = vld [vmem:[#allocation8 + $0x14c] sm:$0xf] }
 0x3a4   : > { %v10490_v35 = vor.u32 %v12732_v49, %v10487_v56  ;;  %v12894_v49 = vld [vmem:[#allocation8 + $0x554] sm:$0xf0] }
 0x3a5   : > { %v4390_v6 = vmax.f32 %v3756_v31, 0.0 }
 0x3a6   : > { %4084 = vmatpush.bf16.msrb.mxu2 %v10490_v35 }
 0x3a8   : > { %v3708_v42 = vpop.f32.mrf.mxu2  ;;  %v3613_v36 = vpop.f32.mrf.mxu0 }
 0x3a9   : > { %v3709_v28 = vadd.f32 %v3708_v42, %v3660_v5  ;;  %v3757_v39 = vpop.f32.mrf.mxu3  ;;  %v3614_v60 = vadd.f32 %v3613_v36, %v14670_v3  ;;  %v3662_v50 = vpop.f32.mrf.mxu1  ;;  %v10997_v42 = vld [vmem:[#allocation8 + $0x448] sm:$0xf]  ;;  %v10615_v3 = vld [vmem:[#allocation8 + $0x158] sm:$0xf0] }
 0x3aa   : > { %v10998_v58 = vor.u32 %v12862_v40, %v10997_v42  ;;  %v10618_v47 = vor.u32 %v12764_v30, %v10615_v3  ;;  %v16553_v3 = vld [vmem:[#allocation31_spill] sm:$0xff] }
 0x3ab   : > { %v3758_v61 = vadd.f32 %v3757_v39, %v3709_v28  ;;  %v3663_v32 = vadd.f32 %v3662_v50, %v3614_v60  ;;  %3808 = vmatmul.bf16.gmra.mxu0 %v16550_v53 }
 0x3ac   : > { %3857 = vmatmul.bf16.gmra.mxu1 %v16551_v51  ;;  %3986 = vmatpush.bf16.msrb.mxu0 %v10998_v58  ;;  %v16554_v58 = vld [vmem:[#allocation32_spill] sm:$0xff] }
 0x3ad   : > { %v4394_v34 = vmax.f32 %v3758_v61, 0.0  ;;  %3906 = vmatmul.bf16.gmra.mxu2 %v14380_v21  ;;  %4133 = vmatpush.bf16.msrb.mxu3 %v10618_v47  ;;  %v11125_v61 = vld [vmem:[#allocation8 + $0x548] sm:$0xf]  ;;  %v12728_v47 = vld [vmem:[#allocation8 + $0x2c] sm:$0xf] }
 0x3ae   : > { %3955 = vmatmul.bf16.gmra.mxu3 %v14388_v46  ;;  %v11126_v56 = vor.u32 %v12894_v49, %v11125_v61 }
 0x3af   : > { %v14760_v57 = vpack.c.bf16 %v4394_v34, %v4390_v6 }
 0x3b0   : > { %v3711_v5 = vpop.f32.mrf.mxu2  ;;  %v3615_v28 = vpop.f32.mrf.mxu0  ;;  %4035 = vmatpush.bf16.msrb.mxu1 %v11126_v56 }
 0x3b1   : > { %16552 = vst [vmem:[#allocation23_spill] sm:$0xff] %v14760_v57  ;;  %v3712_v31 = vadd.f32 %v3711_v5, %v3663_v32  ;;  %v3760_v16 = vpop.f32.mrf.mxu3  ;;  %v3616_v39 = vadd.f32 %v3615_v28, %v14676_v44  ;;  %v3664_v36 = vpop.f32.mrf.mxu1  ;;  %v12858_v28 = vld [vmem:[#allocation8 + $0x434] sm:$0xf0] }
 0x3b3   : > { %v3761_v60 = vadd.f32 %v3760_v16, %v3712_v31  ;;  %v3665_v50 = vadd.f32 %v3664_v36, %v3616_v39  ;;  %v10471_v31 = vld [vmem:[#allocation8 + $0x38] sm:$0xf0]  ;;  %v12760_v39 = vld [vmem:[#allocation8 + $0x12c] sm:$0xf] }
 0x3b4   : > { %v10474_v16 = vor.u32 %v12728_v47, %v10471_v31  ;;  %v12890_v47 = vld [vmem:[#allocation8 + $0x534] sm:$0xf0] }
 0x3b5   : > { %v4398_v44 = vmax.f32 %v3761_v60, 0.0 }
 0x3b6   : > { %4085 = vmatpush.bf16.msrb.mxu2 %v10474_v16 }
 0x3b8   : > { %v3713_v48 = vpop.f32.mrf.mxu2  ;;  %v3618_v42 = vpop.f32.mrf.mxu0 }
 0x3b9   : > { %v3714_v6 = vadd.f32 %v3713_v48, %v3665_v50  ;;  %v3762_v34 = vpop.f32.mrf.mxu3  ;;  %v3619_v32 = vadd.f32 %v3618_v42, %v14684_v11  ;;  %v3667_v40 = vpop.f32.mrf.mxu1  ;;  %v10981_v48 = vld [vmem:[#allocation8 + $0x428] sm:$0xf]  ;;  %v10599_v11 = vld [vmem:[#allocation8 + $0x138] sm:$0xf0] }
 0x3ba   : > { %v10982_v61 = vor.u32 %v12858_v28, %v10981_v48  ;;  %v10602_v49 = vor.u32 %v12760_v39, %v10599_v11  ;;  %v16556_v11 = vld [vmem:[#allocation33_spill] sm:$0xff] }
 0x3bb   : > { %v3763_v30 = vadd.f32 %v3762_v34, %v3714_v6  ;;  %v3668_v35 = vadd.f32 %v3667_v40, %v3619_v32  ;;  %3813 = vmatmul.bf16.gmra.mxu0 %v16553_v3 }
 0x3bc   : > { %3862 = vmatmul.bf16.gmra.mxu1 %v16554_v58  ;;  %3987 = vmatpush.bf16.msrb.mxu0 %v10982_v61  ;;  %v16557_v61 = vld [vmem:[#allocation34_spill] sm:$0xff] }
 0x3bd   : > { %v4402_v5 = vmax.f32 %v3763_v30, 0.0  ;;  %3911 = vmatmul.bf16.gmra.mxu2 %v14392_v24  ;;  %4134 = vmatpush.bf16.msrb.mxu3 %v10602_v49  ;;  %v11109_v30 = vld [vmem:[#allocation8 + $0x528] sm:$0xf]  ;;  %v12724_v49 = vld [vmem:[#allocation8 + $0xc] sm:$0xf] }
 0x3be   : > { %3960 = vmatmul.bf16.gmra.mxu3 %v14400_v54  ;;  %v11110_v31 = vor.u32 %v12890_v47, %v11109_v30 }
 0x3bf   : > { %v14768_v36 = vpack.c.bf16 %v4402_v5, %v4398_v44 }
 0x3c0   : > { %v3716_v50 = vpop.f32.mrf.mxu2  ;;  %v3620_v6 = vpop.f32.mrf.mxu0  ;;  %4036 = vmatpush.bf16.msrb.mxu1 %v11110_v31 }
 0x3c1   : > { %16555 = vst [vmem:[#allocation24_spill] sm:$0xff] %v14768_v36  ;;  %v3717_v60 = vadd.f32 %v3716_v50, %v3668_v35  ;;  %v3765_v56 = vpop.f32.mrf.mxu3  ;;  %v3621_v34 = vadd.f32 %v3620_v6, %v14690_v10  ;;  %v3669_v42 = vpop.f32.mrf.mxu1  ;;  %v12854_v6 = vld [vmem:[#allocation8 + $0x414] sm:$0xf0] }
 0x3c3   : > { %v3766_v32 = vadd.f32 %v3765_v56, %v3717_v60  ;;  %v3670_v40 = vadd.f32 %v3669_v42, %v3621_v34  ;;  %v10455_v60 = vld [vmem:[#allocation8 + $0x18] sm:$0xf0]  ;;  %v12756_v34 = vld [vmem:[#allocation8 + $0x10c] sm:$0xf] }
 0x3c4   : > { %v10458_v56 = vor.u32 %v12724_v49, %v10455_v60  ;;  %v12886_v49 = vld [vmem:[#allocation8 + $0x514] sm:$0xf0] }
 0x3c5   : > { %v4406_v10 = vmax.f32 %v3766_v32, 0.0 }
 0x3c6   : > { %4086 = vmatpush.bf16.msrb.mxu2 %v10458_v56 }
 0x3c8   : > { %v3718_v57 = vpop.f32.mrf.mxu2  ;;  %v3623_v48 = vpop.f32.mrf.mxu0 }
 0x3c9   : > { %v3719_v44 = vadd.f32 %v3718_v57, %v3670_v40  ;;  %v3767_v5 = vpop.f32.mrf.mxu3  ;;  %v3624_v35 = vadd.f32 %v3623_v48, %v14698_v1  ;;  %v3672_v28 = vpop.f32.mrf.mxu1  ;;  %v10965_v57 = vld [vmem:[#allocation8 + $0x408] sm:$0xf]  ;;  %v10583_v1 = vld [vmem:[#allocation8 + $0x118] sm:$0xf0] }
 0x3ca   : > { %v10966_v30 = vor.u32 %v12854_v6, %v10965_v57  ;;  %v10586_v47 = vor.u32 %v12756_v34, %v10583_v1  ;;  %v16559_v1 = vld [vmem:[#allocation35_spill] sm:$0xff] }
 0x3cb   : > { %v3768_v39 = vadd.f32 %v3767_v5, %v3719_v44  ;;  %v3673_v16 = vadd.f32 %v3672_v28, %v3624_v35  ;;  %3818 = vmatmul.bf16.gmra.mxu0 %v16556_v11 }
 0x3cc   : > { %3867 = vmatmul.bf16.gmra.mxu1 %v16557_v61  ;;  %3988 = vmatpush.bf16.msrb.mxu0 %v10966_v30  ;;  %v16560_v30 = vld [vmem:[#allocation36_spill] sm:$0xff] }
 0x3cd   : > { %v4410_v50 = vmax.f32 %v3768_v39, 0.0  ;;  %3916 = vmatmul.bf16.gmra.mxu2 %v16534_v41  ;;  %4135 = vmatpush.bf16.msrb.mxu3 %v10586_v47  ;;  %v11093_v39 = vld [vmem:[#allocation8 + $0x508] sm:$0xf]  ;;  %v12880_v47 = vld [vmem:[#allocation8 + $0x4ec] sm:$0xf] }
 0x3ce   : > { %3965 = vmatmul.bf16.gmra.mxu3 %v16535_v59  ;;  %v11094_v60 = vor.u32 %v12886_v49, %v11093_v39 }
 0x3cf   : > { %v14776_v42 = vpack.c.bf16 %v4410_v50, %v4406_v10 }
 0x3d0   : > { %v3721_v40 = vpop.f32.mrf.mxu2  ;;  %v3625_v44 = vpop.f32.mrf.mxu0  ;;  %4037 = vmatpush.bf16.msrb.mxu1 %v11094_v60 }
 0x3d1   : > { %16558 = vst [vmem:[#allocation25_spill] sm:$0xff] %v14776_v42  ;;  %v3722_v32 = vadd.f32 %v3721_v40, %v3673_v16  ;;  %v3770_v31 = vpop.f32.mrf.mxu3  ;;  %v3626_v5 = vadd.f32 %v3625_v44, %v14704_v23  ;;  %v3674_v48 = vpop.f32.mrf.mxu1  ;;  %v10823_v44 = vld [vmem:[#allocation8 + $0x2f8] sm:$0xf0]  ;;  %v14795_v42 = vld [vmem:[#allocation10] sm:$0xf] }
 0x3d3   : > { %v3771_v35 = vadd.f32 %v3770_v31, %v3722_v32  ;;  %v3675_v28 = vadd.f32 %v3674_v48, %v3626_v5  ;;  %v11079_v32 = vld [vmem:[#allocation8 + $0x4f8] sm:$0xf0]  ;;  %v12912_v5 = vld [vmem:[#allocation8 + $0x5ec] sm:$0xf] }
 0x3d4   : > { %v11082_v31 = vor.u32 %v12880_v47, %v11079_v32 }
 0x3d5   : > { %v4414_v23 = vmax.f32 %v3771_v35, 0.0 }
 0x3d6   : > { %4275 = vmatpush.bf16.msra.mxu2 %v11082_v31 }
 0x3d8   : > { %v3723_v36 = vpop.f32.mrf.mxu2  ;;  %v3628_v57 = vpop.f32.mrf.mxu0 }
 0x3d9   : > { %v3724_v10 = vadd.f32 %v3723_v36, %v3675_v28  ;;  %v3772_v50 = vpop.f32.mrf.mxu3  ;;  %v3629_v16 = vadd.f32 %v3628_v57, %v14712_v52  ;;  %v3677_v6 = vpop.f32.mrf.mxu1  ;;  %v12816_v36 = vld [vmem:[#allocation8 + $0x2ec] sm:$0xf]  ;;  %v11207_v52 = vld [vmem:[#allocation8 + $0x5f8] sm:$0xf0] }
 0x3da   : > { %v10826_v39 = vor.u32 %v12816_v36, %v10823_v44  ;;  %v11210_v49 = vor.u32 %v12912_v5, %v11207_v52  ;;  %v16562_v52 = vld [vmem:[#allocation37_spill] sm:$0xff] }
 0x3db   : > { %v3773_v34 = vadd.f32 %v3772_v50, %v3724_v10  ;;  %v3678_v56 = vadd.f32 %v3677_v6, %v3629_v16  ;;  %3823 = vmatmul.bf16.gmra.mxu0 %v16559_v1  ;;  %v12848_v6 = vld [vmem:[#allocation8 + $0x3ec] sm:$0xf] }
 0x3dc   : > { %3872 = vmatmul.bf16.gmra.mxu1 %v16560_v30  ;;  %4177 = vmatpush.bf16.msra.mxu0 %v10826_v39  ;;  %v16563_v39 = vld [vmem:[#allocation38_spill] sm:$0xff] }
 0x3dd   : > { %v4418_v40 = vmax.f32 %v3773_v34, 0.0  ;;  %3921 = vmatmul.bf16.gmra.mxu2 %v16537_v12  ;;  %4324 = vmatpush.bf16.msra.mxu3 %v11210_v49  ;;  %v10951_v34 = vld [vmem:[#allocation8 + $0x3f8] sm:$0xf0]  ;;  %v12876_v49 = vld [vmem:[#allocation8 + $0x4cc] sm:$0xf] }
 0x3de   : > { %3970 = vmatmul.bf16.gmra.mxu3 %v16538_v17  ;;  %v10954_v32 = vor.u32 %v12848_v6, %v10951_v34 }
 0x3df   : > { %v14784_v48 = vpack.c.bf16 %v4418_v40, %v4414_v23 }
 0x3e0   : > { %v3726_v28 = vpop.f32.mrf.mxu2  ;;  %v3630_v10 = vpop.f32.mrf.mxu0  ;;  %4226 = vmatpush.bf16.msra.mxu1 %v10954_v32 }
 0x3e1   : > { %16561 = vst [vmem:[#allocation26_spill] sm:$0xff] %v14784_v48  ;;  %v3727_v35 = vadd.f32 %v3726_v28, %v3678_v56  ;;  %v3775_v60 = vpop.f32.mrf.mxu3  ;;  %v3631_v50 = vadd.f32 %v3630_v10, %v14718_v27  ;;  %v3679_v57 = vpop.f32.mrf.mxu1 }
 0x3e3   : > { %v3776_v16 = vadd.f32 %v3775_v60, %v3727_v35  ;;  %v3680_v47 = vadd.f32 %v3679_v57, %v3631_v50  ;;  %v11063_v35 = vld [vmem:[#allocation8 + $0x4d8] sm:$0xf0]  ;;  %v12812_v60 = vld [vmem:[#allocation8 + $0x2cc] sm:$0xf] }
 0x3e4   : > { %v11066_v10 = vor.u32 %v12876_v49, %v11063_v35  ;;  %v10807_v50 = vld [vmem:[#allocation8 + $0x2d8] sm:$0xf0]  ;;  %v12908_v57 = vld [vmem:[#allocation8 + $0x5cc] sm:$0xf] }
 0x3e5   : > { %v4422_v27 = vmax.f32 %v3776_v16, 0.0  ;;  %v10810_v34 = vor.u32 %v12812_v60, %v10807_v50 }
 0x3e6   : > { %4276 = vmatpush.bf16.msra.mxu2 %v11066_v10 }
 0x3e7   : > { %4178 = vmatpush.bf16.msra.mxu0 %v10810_v34 }
 0x3e8   : > { %v3728_v23 = vpop.f32.mrf.mxu2  ;;  %v3633_v36 = vpop.f32.mrf.mxu0 }
 0x3e9   : > { %v3729_v40 = vadd.f32 %v3728_v23, %v3680_v47  ;;  %v3777_v48 = vpop.f32.mrf.mxu3  ;;  %v3634_v56 = vadd.f32 %v3633_v36, %v14726_v29  ;;  %v3682_v44 = vpop.f32.mrf.mxu1  ;;  %v11191_v29 = vld [vmem:[#allocation8 + $0x5d8] sm:$0xf0] }
 0x3ea   : > { %v11194_v47 = vor.u32 %v12908_v57, %v11191_v29 }
 0x3eb   : > { %v3778_v5 = vadd.f32 %v3777_v48, %v3729_v40  ;;  %v3683_v31 = vadd.f32 %v3682_v44, %v3634_v56  ;;  %3828 = vmatmul.bf16.gmra.mxu0 %v16562_v52  ;;  %v12844_v44 = vld [vmem:[#allocation8 + $0x3cc] sm:$0xf] }
 0x3ec   : > { %3877 = vmatmul.bf16.gmra.mxu1 %v16563_v39  ;;  %4325 = vmatpush.bf16.msra.mxu3 %v11194_v47  ;;  %v12872_v47 = vld [vmem:[#allocation8 + $0x4ac] sm:$0xf] }
 0x3ed   : > { %v4426_v28 = vmax.f32 %v3778_v5, 0.0  ;;  %3926 = vmatmul.bf16.gmra.mxu2 %v14430_v43  ;;  %v10935_v5 = vld [vmem:[#allocation8 + $0x3d8] sm:$0xf0] }
 0x3ee   : > { %3975 = vmatmul.bf16.gmra.mxu3 %v16540_v19  ;;  %v10938_v35 = vor.u32 %v12844_v44, %v10935_v5  ;;  %v11175_v44 = vld [vmem:[#allocation8 + $0x5b8] sm:$0xf0] }
 0x3ef   : > { %v14792_v6 = vpack.c.bf16 %v4426_v28, %v4422_v27  ;;  %v14798_v27 = vperm.slane %v14795_v42, 2 }
 0x3f0   : > { %v3731_v48 = vpop.f32.mrf.mxu2  ;;  %v3635_v23 = vpop.f32.mrf.mxu0  ;;  %4227 = vmatpush.bf16.msra.mxu1 %v10938_v35 }
 0x3f1   : > { %v3732_v16 = vadd.f32 %v3731_v48, %v3683_v31  ;;  %v3780_v32 = vpop.f32.mrf.mxu3  ;;  %v3636_v40 = vadd.f32 %v3635_v23, %v14732_v13  ;;  %v3684_v36 = vpop.f32.mrf.mxu1 }
 0x3f3   : > { %v3781_v56 = vadd.f32 %v3780_v32, %v3732_v16  ;;  %v3685_v49 = vadd.f32 %v3684_v36, %v3636_v40  ;;  %v11047_v16 = vld [vmem:[#allocation8 + $0x4b8] sm:$0xf0]  ;;  %v12808_v32 = vld [vmem:[#allocation8 + $0x2ac] sm:$0xf] }
 0x3f4   : > { %v11050_v23 = vor.u32 %v12872_v47, %v11047_v16  ;;  %v10791_v40 = vld [vmem:[#allocation8 + $0x2b8] sm:$0xf0]  ;;  %v12904_v36 = vld [vmem:[#allocation8 + $0x5ac] sm:$0xf] }
 0x3f5   : > { %v4430_v48 = vmax.f32 %v3781_v56, 0.0  ;;  %v10794_v35 = vor.u32 %v12808_v32, %v10791_v40 }
 0x3f6   : > { %4277 = vmatpush.bf16.msra.mxu2 %v11050_v23 }
 0x3f7   : > { %4179 = vmatpush.bf16.msra.mxu0 %v10794_v35  ;;  %v12804_v35 = vld [vmem:[#allocation8 + $0x28c] sm:$0xf] }
 0x3f8   : > { %v3733_v31 = vpop.f32.mrf.mxu2  ;;  %v3794_v10 = vpop.f32.mrf.mxu0 }
 0x3f9   : > { %v3734_v28 = vadd.f32 %v3733_v31, %v3685_v49  ;;  %v3782_v60 = vpop.f32.mrf.mxu3  ;;  %v3795_v13 = vadd.f32 %v3794_v10, %v14798_v27  ;;  %v3843_v50 = vpop.f32.mrf.mxu1  ;;  %v11178_v31 = vor.u32 %v12904_v36, %v11175_v44  ;;  %v12868_v44 = vld [vmem:[#allocation8 + $0x48c] sm:$0xf] }
 0x3fb   : > { %v3783_v57 = vadd.f32 %v3782_v60, %v3734_v28  ;;  %v3844_v29 = vadd.f32 %v3843_v50, %v3795_v13  ;;  %3989 = vmatmul.bf16.vlgmr.msrb.gmra.mxu0 %v14444_v55  ;;  %4326 = vmatpush.bf16.msra.mxu3 %v11178_v31  ;;  %v12840_v13 = vld [vmem:[#allocation8 + $0x3ac] sm:$0xf]  ;;  %v10919_v50 = vld [vmem:[#allocation8 + $0x3b8] sm:$0xf0] }
 0x3fc   : > { %4038 = vmatmul.bf16.vlgmr.msrb.gmra.mxu1 %v14452_v63  ;;  %v10922_v47 = vor.u32 %v12840_v13, %v10919_v50 }
 0x3fd   : > { %v4434_v34 = vmax.f32 %v3783_v57, 0.0  ;;  %4087 = vmatmul.bf16.vlgmr.msrb.gmra.mxu2 %v16542_v9 }
 0x3fe   : > { %4136 = vmatmul.bf16.vlgmr.msrb.gmra.mxu3 %v16543_v4  ;;  %4228 = vmatpush.bf16.msra.mxu1 %v10922_v47 }
 0x3ff   : > { %v14805_v5 = vpack.c.bf16 %v4434_v34, %v4430_v48 }
 0x400   : > { %v3892_v49 = vpop.f32.mrf.mxu2  ;;  %v3796_v60 = vpop.f32.mrf.mxu0 }
 0x401   : > { %16564 = vst [vmem:[#allocation27_spill] sm:$0xff] %v14805_v5  ;;  %v3893_v56 = vadd.f32 %v3892_v49, %v3844_v29  ;;  %v3941_v28 = vpop.f32.mrf.mxu3  ;;  %v3797_v9 = vadd.f32 %v3796_v60, %v14798_v27  ;;  %v3845_v10 = vpop.f32.mrf.mxu1  ;;  %v11031_v49 = vld [vmem:[#allocation8 + $0x498] sm:$0xf0] }
 0x402   : > { %v11034_v31 = vor.u32 %v12868_v44, %v11031_v49  ;;  %v11159_v60 = vld [vmem:[#allocation8 + $0x598] sm:$0xf0] }
 0x403   : > { %v14808_v4 = vadd.f32 %v3941_v28, %v3893_v56  ;;  %v3846_v57 = vadd.f32 %v3845_v10, %v3797_v9  ;;  %v10775_v56 = vld [vmem:[#allocation8 + $0x298] sm:$0xf0]  ;;  %v12900_v28 = vld [vmem:[#allocation8 + $0x58c] sm:$0xf] }
 0x404   : > { %v10778_v10 = vor.u32 %v12804_v35, %v10775_v56  ;;  %v11162_v13 = vor.u32 %v12900_v28, %v11159_v60  ;;  %4278 = vmatpush.bf16.msra.mxu2 %v11034_v31  ;;  %v12864_v60 = vld [vmem:[#allocation8 + $0x46c] sm:$0xf] }
 0x406   : > { %4180 = vmatpush.bf16.msra.mxu0 %v10778_v10  ;;  %4327 = vmatpush.bf16.msra.mxu3 %v11162_v13  ;;  %v12800_v10 = vld [vmem:[#allocation8 + $0x26c] sm:$0xf] }
 0x408   : > { %v3894_v48 = vpop.f32.mrf.mxu2  ;;  %v3799_v32 = vpop.f32.mrf.mxu0 }
 0x409   : > { %v3895_v34 = vadd.f32 %v3894_v48, %v3846_v57  ;;  %v3943_v16 = vpop.f32.mrf.mxu3  ;;  %v3800_v29 = vadd.f32 %v3799_v32, %v14798_v27  ;;  %v3848_v40 = vpop.f32.mrf.mxu1 }
 0x40b   : > { %v14811_v23 = vadd.f32 %v3943_v16, %v3895_v34  ;;  %v3849_v36 = vadd.f32 %v3848_v40, %v3800_v29  ;;  %3994 = vmatmul.bf16.gmra.mxu0 %v14456_v45  ;;  %v10903_v16 = vld [vmem:[#allocation8 + $0x398] sm:$0xf0] }
 0x40c   : > { %4043 = vmatmul.bf16.gmra.mxu1 %v14464_v15 }
 0x40d   : > { %4092 = vmatmul.bf16.gmra.mxu2 %v16544_v0 }
 0x40e   : > { %4141 = vmatmul.bf16.gmra.mxu3 %v16545_v62  ;;  %v12836_v62 = vld [vmem:[#allocation8 + $0x38c] sm:$0xf] }
 0x40f   : > { %v10906_v29 = vor.u32 %v12836_v62, %v10903_v16 }
 0x410   : > { %v3897_v9 = vpop.f32.mrf.mxu2  ;;  %v3801_v47 = vpop.f32.mrf.mxu0 }
 0x411   : > { %v3898_v50 = vadd.f32 %v3897_v9, %v3849_v36  ;;  %v3946_v57 = vpop.f32.mrf.mxu3  ;;  %v3802_v48 = vadd.f32 %v3801_v47, %v14798_v27  ;;  %v3850_v34 = vpop.f32.mrf.mxu1  ;;  %4229 = vmatpush.bf16.msra.mxu1 %v10906_v29  ;;  %v11015_v9 = vld [vmem:[#allocation8 + $0x478] sm:$0xf0] }
 0x412   : > { %v11018_v13 = vor.u32 %v12864_v60, %v11015_v9  ;;  %v11143_v47 = vld [vmem:[#allocation8 + $0x578] sm:$0xf0] }
 0x413   : > { %v14818_v0 = vadd.f32 %v3946_v57, %v3898_v50  ;;  %v3851_v32 = vadd.f32 %v3850_v34, %v3802_v48  ;;  %v10759_v50 = vld [vmem:[#allocation8 + $0x278] sm:$0xf0]  ;;  %v12896_v57 = vld [vmem:[#allocation8 + $0x56c] sm:$0xf] }
 0x414   : > { %v10762_v34 = vor.u32 %v12800_v10, %v10759_v50  ;;  %v11146_v62 = vor.u32 %v12896_v57, %v11143_v47  ;;  %4279 = vmatpush.bf16.msra.mxu2 %v11018_v13  ;;  %v12860_v47 = vld [vmem:[#allocation8 + $0x44c] sm:$0xf] }
 0x416   : > { %4181 = vmatpush.bf16.msra.mxu0 %v10762_v34  ;;  %4328 = vmatpush.bf16.msra.mxu3 %v11146_v62  ;;  %v12796_v34 = vld [vmem:[#allocation8 + $0x24c] sm:$0xf] }
 0x418   : > { %v3899_v40 = vpop.f32.mrf.mxu2  ;;  %v3804_v35 = vpop.f32.mrf.mxu0 }
 0x419   : > { %v3900_v44 = vadd.f32 %v3899_v40, %v3851_v32  ;;  %v3948_v49 = vpop.f32.mrf.mxu3  ;;  %v3805_v36 = vadd.f32 %v3804_v35, %v14798_v27  ;;  %v3853_v56 = vpop.f32.mrf.mxu1 }
 0x41b   : > { %v14821_v31 = vadd.f32 %v3948_v49, %v3900_v44  ;;  %v3854_v28 = vadd.f32 %v3853_v56, %v3805_v36  ;;  %3999 = vmatmul.bf16.gmra.mxu0 %v14468_v26  ;;  %v10887_v49 = vld [vmem:[#allocation8 + $0x378] sm:$0xf0] }
 0x41c   : > { %4048 = vmatmul.bf16.gmra.mxu1 %v14476_v7 }
 0x41d   : > { %4097 = vmatmul.bf16.gmra.mxu2 %v16547_v37 }
 0x41e   : > { %4146 = vmatmul.bf16.gmra.mxu3 %v16548_v25  ;;  %v12832_v25 = vld [vmem:[#allocation8 + $0x36c] sm:$0xf] }
 0x41f   : > { %v10890_v36 = vor.u32 %v12832_v25, %v10887_v49 }
 0x420   : > { %v3902_v48 = vpop.f32.mrf.mxu2  ;;  %v3806_v29 = vpop.f32.mrf.mxu0 }
 0x421   : > { %v3903_v16 = vadd.f32 %v3902_v48, %v3854_v28  ;;  %v3951_v32 = vpop.f32.mrf.mxu3  ;;  %v3807_v40 = vadd.f32 %v3806_v29, %v14798_v27  ;;  %v3855_v44 = vpop.f32.mrf.mxu1  ;;  %4230 = vmatpush.bf16.msra.mxu1 %v10890_v36  ;;  %v10999_v48 = vld [vmem:[#allocation8 + $0x458] sm:$0xf0] }
 0x422   : > { %v11002_v62 = vor.u32 %v12860_v47, %v10999_v48  ;;  %v11127_v29 = vld [vmem:[#allocation8 + $0x558] sm:$0xf0] }
 0x423   : > { %v14828_v37 = vadd.f32 %v3951_v32, %v3903_v16  ;;  %v3856_v35 = vadd.f32 %v3855_v44, %v3807_v40  ;;  %v10743_v16 = vld [vmem:[#allocation8 + $0x258] sm:$0xf0]  ;;  %v12892_v32 = vld [vmem:[#allocation8 + $0x54c] sm:$0xf] }
 0x424   : > { %v10746_v44 = vor.u32 %v12796_v34, %v10743_v16  ;;  %v11130_v25 = vor.u32 %v12892_v32, %v11127_v29  ;;  %4280 = vmatpush.bf16.msra.mxu2 %v11002_v62  ;;  %v12856_v29 = vld [vmem:[#allocation8 + $0x42c] sm:$0xf] }
 0x426   : > { %4182 = vmatpush.bf16.msra.mxu0 %v10746_v44  ;;  %4329 = vmatpush.bf16.msra.mxu3 %v11130_v25  ;;  %v12792_v44 = vld [vmem:[#allocation8 + $0x22c] sm:$0xf] }
 0x428   : > { %v3904_v56 = vpop.f32.mrf.mxu2  ;;  %v3809_v10 = vpop.f32.mrf.mxu0 }
 0x429   : > { %v3905_v60 = vadd.f32 %v3904_v56, %v3856_v35  ;;  %v3953_v9 = vpop.f32.mrf.mxu3  ;;  %v3810_v28 = vadd.f32 %v3809_v10, %v14798_v27  ;;  %v3858_v50 = vpop.f32.mrf.mxu1 }
 0x42b   : > { %v14831_v13 = vadd.f32 %v3953_v9, %v3905_v60  ;;  %v3859_v57 = vadd.f32 %v3858_v50, %v3810_v28  ;;  %4004 = vmatmul.bf16.gmra.mxu0 %v14480_v8  ;;  %v10871_v9 = vld [vmem:[#allocation8 + $0x358] sm:$0xf0] }
 0x42c   : > { %4053 = vmatmul.bf16.gmra.mxu1 %v14488_v2 }
 0x42d   : > { %4102 = vmatmul.bf16.gmra.mxu2 %v16550_v53 }
 0x42e   : > { %4151 = vmatmul.bf16.gmra.mxu3 %v16551_v51  ;;  %v12828_v51 = vld [vmem:[#allocation8 + $0x34c] sm:$0xf] }
 0x42f   : > { %v10874_v28 = vor.u32 %v12828_v51, %v10871_v9 }
 0x430   : > { %v3907_v40 = vpop.f32.mrf.mxu2  ;;  %v3811_v36 = vpop.f32.mrf.mxu0 }
 0x431   : > { %v3908_v49 = vadd.f32 %v3907_v40, %v3859_v57  ;;  %v3956_v35 = vpop.f32.mrf.mxu3  ;;  %v3812_v56 = vadd.f32 %v3811_v36, %v14798_v27  ;;  %v3860_v60 = vpop.f32.mrf.mxu1  ;;  %4231 = vmatpush.bf16.msra.mxu1 %v10874_v28  ;;  %v10983_v40 = vld [vmem:[#allocation8 + $0x438] sm:$0xf0] }
 0x432   : > { %v10986_v25 = vor.u32 %v12856_v29, %v10983_v40  ;;  %v11111_v36 = vld [vmem:[#allocation8 + $0x538] sm:$0xf0] }
 0x433   : > { %v14838_v53 = vadd.f32 %v3956_v35, %v3908_v49  ;;  %v3861_v10 = vadd.f32 %v3860_v60, %v3812_v56  ;;  %v10727_v49 = vld [vmem:[#allocation8 + $0x238] sm:$0xf0]  ;;  %v12888_v35 = vld [vmem:[#allocation8 + $0x52c] sm:$0xf] }
 0x434   : > { %v10730_v60 = vor.u32 %v12792_v44, %v10727_v49  ;;  %v11114_v51 = vor.u32 %v12888_v35, %v11111_v36  ;;  %4281 = vmatpush.bf16.msra.mxu2 %v10986_v25  ;;  %v16565_v36 = vld [vmem:[#allocation46_spill] sm:$0xff] }
 0x436   : > { %4183 = vmatpush.bf16.msra.mxu0 %v10730_v60  ;;  %4330 = vmatpush.bf16.msra.mxu3 %v11114_v51  ;;  %v12852_v60 = vld [vmem:[#allocation8 + $0x40c] sm:$0xf]  ;;  %v10967_v51 = vld [vmem:[#allocation8 + $0x418] sm:$0xf0] }
 0x438   : > { %v3909_v50 = vpop.f32.mrf.mxu2  ;;  %v3814_v34 = vpop.f32.mrf.mxu0 }
 0x439   : > { %v3910_v47 = vadd.f32 %v3909_v50, %v3861_v10  ;;  %v3958_v48 = vpop.f32.mrf.mxu3  ;;  %v3815_v57 = vadd.f32 %v3814_v34, %v14798_v27  ;;  %v3863_v16 = vpop.f32.mrf.mxu1 }
 0x43b   : > { %v14841_v62 = vadd.f32 %v3958_v48, %v3910_v47  ;;  %v3864_v32 = vadd.f32 %v3863_v16, %v3815_v57  ;;  %4009 = vmatmul.bf16.gmra.mxu0 %v14492_v33  ;;  %v10855_v48 = vld [vmem:[#allocation8 + $0x338] sm:$0xf0] }
 0x43c   : > { %4058 = vmatmul.bf16.gmra.mxu1 %v14500_v14 }
 0x43d   : > { %4107 = vmatmul.bf16.gmra.mxu2 %v16553_v3 }
 0x43e   : > { %4156 = vmatmul.bf16.gmra.mxu3 %v16554_v58  ;;  %v12824_v58 = vld [vmem:[#allocation8 + $0x32c] sm:$0xf] }
 0x43f   : > { %v10858_v57 = vor.u32 %v12824_v58, %v10855_v48 }
 0x440   : > { %v3912_v56 = vpop.f32.mrf.mxu2  ;;  %v3816_v28 = vpop.f32.mrf.mxu0 }
 0x441   : > { %v3913_v9 = vadd.f32 %v3912_v56, %v3864_v32  ;;  %v3961_v10 = vpop.f32.mrf.mxu3  ;;  %v3817_v50 = vadd.f32 %v3816_v28, %v14798_v27  ;;  %v3865_v47 = vpop.f32.mrf.mxu1  ;;  %4232 = vmatpush.bf16.msra.mxu1 %v10858_v57  ;;  %v16566_v56 = vld [vmem:[#allocation47_spill] sm:$0xff]  ;;  %v10711_v28 = vld [vmem:[#allocation8 + $0x218] sm:$0xf0] }
 0x443   : > { %v14848_v3 = vadd.f32 %v3961_v10, %v3913_v9  ;;  %v3866_v34 = vadd.f32 %v3865_v47, %v3817_v50  ;;  %v12788_v9 = vld [vmem:[#allocation8 + $0x20c] sm:$0xf]  ;;  %v10970_v10 = vor.u32 %v12852_v60, %v10967_v51  ;;  %v11095_v47 = vld [vmem:[#allocation8 + $0x518] sm:$0xf0] }
 0x444   : > { %v12884_v50 = vld [vmem:[#allocation8 + $0x50c] sm:$0xf]  ;;  %v10714_v48 = vor.u32 %v12788_v9, %v10711_v28 }
 0x445   : > { %4282 = vmatpush.bf16.msra.mxu2 %v10970_v10 }
 0x446   : > { %4184 = vmatpush.bf16.msra.mxu0 %v10714_v48  ;;  %v16568_v48 = vld [vmem:[#allocation49_spill] sm:$0xff] }
 0x448   : > { %v3914_v16 = vpop.f32.mrf.mxu2  ;;  %v3819_v44 = vpop.f32.mrf.mxu0 }
 0x449   : > { %v3915_v29 = vadd.f32 %v3914_v16, %v3866_v34  ;;  %v3963_v40 = vpop.f32.mrf.mxu3  ;;  %v3820_v32 = vadd.f32 %v3819_v44, %v14798_v27  ;;  %v3868_v49 = vpop.f32.mrf.mxu1  ;;  %v11098_v34 = vor.u32 %v12884_v50, %v11095_v47 }
 0x44b   : > { %v14851_v25 = vadd.f32 %v3963_v40, %v3915_v29  ;;  %v3869_v35 = vadd.f32 %v3868_v49, %v3820_v32  ;;  %4014 = vmatmul.bf16.gmra.mxu0 %v16565_v36  ;;  %4331 = vmatpush.bf16.msra.mxu3 %v11098_v34  ;;  %v10839_v32 = vld [vmem:[#allocation8 + $0x318] sm:$0xf0] }
 0x44c   : > { %4063 = vmatmul.bf16.gmra.mxu1 %v16566_v56 }
 0x44d   : > { %4112 = vmatmul.bf16.gmra.mxu2 %v16556_v11 }
 0x44e   : > { %4161 = vmatmul.bf16.gmra.mxu3 %v16557_v61  ;;  %v12820_v61 = vld [vmem:[#allocation8 + $0x30c] sm:$0xf] }
 0x44f   : > { %v10842_v60 = vor.u32 %v12820_v61, %v10839_v32 }
 0x450   : > { %v3917_v58 = vpop.f32.mrf.mxu2  ;;  %v3821_v29 = vpop.f32.mrf.mxu0 }
 0x451   : > { %v3918_v57 = vadd.f32 %v3917_v58, %v3869_v35  ;;  %v3966_v16 = vpop.f32.mrf.mxu3  ;;  %v3822_v40 = vadd.f32 %v3821_v29, %v14798_v27  ;;  %v3870_v44 = vpop.f32.mrf.mxu1  ;;  %4233 = vmatpush.bf16.msra.mxu1 %v10842_v60  ;;  %v16567_v58 = vld [vmem:[#allocation48_spill] sm:$0xff] }
 0x453   : > { %v14858_v11 = vadd.f32 %v3966_v16, %v3918_v57  ;;  %v3871_v49 = vadd.f32 %v3870_v44, %v3822_v40 }
 0x458   : > { %v3919_v51 = vpop.f32.mrf.mxu2  ;;  %v3824_v28 = vpop.f32.mrf.mxu0 }
 0x459   : > { %v3920_v5 = vadd.f32 %v3919_v51, %v3871_v49  ;;  %v3968_v9 = vpop.f32.mrf.mxu3  ;;  %v3825_v35 = vadd.f32 %v3824_v28, %v14798_v27  ;;  %v3873_v50 = vpop.f32.mrf.mxu1 }
 0x45b   : > { %v14861_v10 = vadd.f32 %v3968_v9, %v3920_v5  ;;  %v3874_v47 = vadd.f32 %v3873_v50, %v3825_v35  ;;  %4019 = vmatmul.bf16.gmra.mxu0 %v16567_v58  ;;  %v16569_v35 = vld [vmem:[#allocation50_spill] sm:$0xff]  ;;  %v16570_v50 = vld [vmem:[#allocation51_spill] sm:$0xff] }
 0x45c   : > { %4068 = vmatmul.bf16.gmra.mxu1 %v16568_v48 }
 0x45d   : > { %4117 = vmatmul.bf16.gmra.mxu2 %v16559_v1 }
 0x45e   : > { %4166 = vmatmul.bf16.gmra.mxu3 %v16560_v30 }
 0x460   : > { %v3922_v34 = vpop.f32.mrf.mxu2  ;;  %v3826_v29 = vpop.f32.mrf.mxu0 }
 0x461   : > { %v3923_v57 = vadd.f32 %v3922_v34, %v3874_v47  ;;  %v3971_v16 = vpop.f32.mrf.mxu3  ;;  %v3827_v40 = vadd.f32 %v3826_v29, %v14798_v27  ;;  %v3875_v44 = vpop.f32.mrf.mxu1  ;;  %v12938_v47 = vld [vmem:[%s16381_s6 + $0xb8] sm:$0xff] }
 0x462   : > { %4827 = vmatpush.bf16.msrb.mxu2 %v12938_v47 }
 0x463   : > { %v14868_v61 = vadd.f32 %v3971_v16, %v3923_v57  ;;  %v3876_v5 = vadd.f32 %v3875_v44, %v3827_v40 }
 0x468   : > { %v3924_v32 = vpop.f32.mrf.mxu2  ;;  %v3829_v51 = vpop.f32.mrf.mxu0 }
 0x469   : > { %v3925_v49 = vadd.f32 %v3924_v32, %v3876_v5  ;;  %v3973_v60 = vpop.f32.mrf.mxu3  ;;  %v3830_v9 = vadd.f32 %v3829_v51, %v14798_v27  ;;  %v3878_v28 = vpop.f32.mrf.mxu1 }
 0x46b   : > { %v14871_v1 = vadd.f32 %v3973_v60, %v3925_v49  ;;  %v3879_v30 = vadd.f32 %v3878_v28, %v3830_v9  ;;  %4024 = vmatmul.bf16.gmra.mxu0 %v16569_v35  ;;  %v12930_v49 = vld [vmem:[%s16381_s6 + $0x78] sm:$0xff] }
 0x46c   : > { %4073 = vmatmul.bf16.gmra.mxu1 %v16570_v50 }
 0x46d   : > { %4122 = vmatmul.bf16.gmra.mxu2 %v16562_v52  ;;  %v12922_v52 = vld [vmem:[%s16381_s6 + $0x38] sm:$0xff]  ;;  %4778 = vmatpush.bf16.msrb.mxu1 %v12930_v49 }
 0x46e   : > { %4171 = vmatmul.bf16.gmra.mxu3 %v16563_v39  ;;  %v12946_v39 = vld [vmem:[%s16381_s6 + $0xf8] sm:$0xff]  ;;  %4729 = vmatpush.bf16.msrb.mxu0 %v12922_v52 }
 0x46f   : > { %4876 = vmatpush.bf16.msrb.mxu3 %v12946_v39 }
 0x470   : > { %v3927_v34 = vpop.f32.mrf.mxu2  ;;  %v3831_v29 = vpop.f32.mrf.mxu0 }
 0x471   : > { %v3928_v57 = vadd.f32 %v3927_v34, %v3879_v30  ;;  %v3976_v16 = vpop.f32.mrf.mxu3  ;;  %v3832_v40 = vadd.f32 %v3831_v29, %v14798_v27  ;;  %v3880_v44 = vpop.f32.mrf.mxu1  ;;  %v12937_v29 = vld [vmem:[%s16381_s6 + $0xb0] sm:$0xff] }
 0x472   : > { %4828 = vmatpush.bf16.msrb.mxu2 %v12937_v29 }
 0x473   : > { %v14881_v5 = vadd.f32 %v3976_v16, %v3928_v57  ;;  %v3881_v32 = vadd.f32 %v3880_v44, %v3832_v40  ;;  %v16571_v57 = vld [vmem:[#allocation39_spill] sm:$0xff]  ;;  %v14899_v16 = vperm.slane %v14795_v42, 3 }
 0x478   : > { %v3929_v60 = vpop.f32.mrf.mxu2  ;;  %v3990_v9 = vpop.f32.mrf.mxu0 }
 0x479   : > { %v3930_v27 = vadd.f32 %v3929_v60, %v3881_v32  ;;  %v3978_v51 = vpop.f32.mrf.mxu3  ;;  %v3991_v28 = vadd.f32 %v3990_v9, %v14808_v4  ;;  %v4039_v30 = vpop.f32.mrf.mxu1 }
 0x47b   : > { %v14893_v47 = vadd.f32 %v3978_v51, %v3930_v27  ;;  %v4040_v34 = vadd.f32 %v4039_v30, %v3991_v28  ;;  %4185 = vmatmul.bf16.vlgmr.msra.gmra.mxu0 %v14344_v18 }
 0x47c   : > { %4234 = vmatmul.bf16.vlgmr.msra.gmra.mxu1 %v16571_v57 }
 0x47d   : > { %4283 = vmatmul.bf16.vlgmr.msra.gmra.mxu2 %v14444_v55  ;;  %v12921_v55 = vld [vmem:[%s16381_s6 + $0x30] sm:$0xff]  ;;  %v4375_v49 = vmax.f32 %v4040_v34, 0.0  ;;  %v12936_v34 = vld [vmem:[%s16381_s6 + $0xa8] sm:$0xff] }
 0x47e   : > { %4332 = vmatmul.bf16.vlgmr.msra.gmra.mxu3 %v14452_v63  ;;  %v12945_v63 = vld [vmem:[%s16381_s6 + $0xf0] sm:$0xff]  ;;  %4730 = vmatpush.bf16.msrb.mxu0 %v12921_v55 }
 0x47f   : > { %4877 = vmatpush.bf16.msrb.mxu3 %v12945_v63  ;;  %4829 = vmatpush.bf16.msrb.mxu2 %v12936_v34  ;;  %v12935_v34 = vld [vmem:[%s16381_s6 + $0xa0] sm:$0xff] }
 0x480   : > { %v4088_v4 = vpop.f32.mrf.mxu2  ;;  %v3992_v52 = vpop.f32.mrf.mxu0 }
 0x481   : > { %v4089_v40 = vadd.f32 %v4088_v4, %v14899_v16  ;;  %v4137_v44 = vpop.f32.mrf.mxu3  ;;  %v3993_v18 = vadd.f32 %v3992_v52, %v14811_v23  ;;  %v4041_v39 = vpop.f32.mrf.mxu1  ;;  %v12929_v23 = vld [vmem:[%s16381_s6 + $0x70] sm:$0xff] }
 0x482   : > { %4779 = vmatpush.bf16.msrb.mxu1 %v12929_v23 }
 0x483   : > { %v14907_v32 = vadd.f32 %v4137_v44, %v4089_v40  ;;  %v4042_v42 = vadd.f32 %v4041_v39, %v3993_v18  ;;  %4830 = vmatpush.bf16.msrb.mxu2 %v12935_v34 }
 0x485   : > { %v4379_v60 = vmax.f32 %v4042_v42, 0.0 }
 0x487   : > { %v14918_v27 = vpack.c.bf16 %v4379_v60, %v4375_v49 }
 0x488   : > { %v4090_v51 = vpop.f32.mrf.mxu2  ;;  %v3995_v30 = vpop.f32.mrf.mxu0 }
 0x489   : > { %v4091_v9 = vadd.f32 %v4090_v51, %v14899_v16  ;;  %v4139_v28 = vpop.f32.mrf.mxu3  ;;  %v3996_v57 = vadd.f32 %v3995_v30, %v14818_v0  ;;  %v4044_v29 = vpop.f32.mrf.mxu1 }
 0x48b   : > { %v14922_v4 = vadd.f32 %v4139_v28, %v4091_v9  ;;  %v4045_v40 = vadd.f32 %v4044_v29, %v3996_v57  ;;  %4190 = vmatmul.bf16.gmra.mxu0 %v14356_v22 }
 0x48c   : > { %4239 = vmatmul.bf16.gmra.mxu1 %v14364_v38  ;;  %v12920_v38 = vld [vmem:[%s16381_s6 + $0x28] sm:$0xff] }
 0x48d   : > { %4288 = vmatmul.bf16.gmra.mxu2 %v14456_v45  ;;  %v12944_v45 = vld [vmem:[%s16381_s6 + $0xe8] sm:$0xff]  ;;  %4731 = vmatpush.bf16.msrb.mxu0 %v12920_v38  ;;  %v4383_v63 = vmax.f32 %v4045_v40, 0.0  ;;  %v16572_v40 = vld [vmem:[#allocation40_spill] sm:$0xff] }
 0x48e   : > { %4337 = vmatmul.bf16.gmra.mxu3 %v14464_v15 }
 0x48f   : > { %4878 = vmatpush.bf16.msrb.mxu3 %v12944_v45 }
 0x490   : > { %v4093_v44 = vpop.f32.mrf.mxu2  ;;  %v3997_v18 = vpop.f32.mrf.mxu0 }
 0x491   : > { %v4094_v0 = vadd.f32 %v4093_v44, %v14899_v16  ;;  %v4142_v52 = vpop.f32.mrf.mxu3  ;;  %v3998_v39 = vadd.f32 %v3997_v18, %v14821_v31  ;;  %v4046_v55 = vpop.f32.mrf.mxu1  ;;  %v12928_v31 = vld [vmem:[%s16381_s6 + $0x68] sm:$0xff] }
 0x492   : > { %4780 = vmatpush.bf16.msrb.mxu1 %v12928_v31 }
 0x493   : > { %v14933_v22 = vadd.f32 %v4142_v52, %v4094_v0  ;;  %v4047_v15 = vadd.f32 %v4046_v55, %v3998_v39 }
 0x495   : > { %v4387_v42 = vmax.f32 %v4047_v15, 0.0 }
 0x497   : > { %v14944_v60 = vpack.c.bf16 %v4387_v42, %v4383_v63 }
 0x498   : > { %v4095_v49 = vpop.f32.mrf.mxu2  ;;  %v4000_v9 = vpop.f32.mrf.mxu0 }
 0x499   : > { %v4096_v23 = vadd.f32 %v4095_v49, %v14899_v16  ;;  %v4144_v51 = vpop.f32.mrf.mxu3  ;;  %v4001_v28 = vadd.f32 %v4000_v9, %v14828_v37  ;;  %v4049_v30 = vpop.f32.mrf.mxu1 }
 0x49b   : > { %v14948_v57 = vadd.f32 %v4144_v51, %v4096_v23  ;;  %v4050_v29 = vadd.f32 %v4049_v30, %v4001_v28  ;;  %4195 = vmatmul.bf16.gmra.mxu0 %v14368_v20  ;;  %v12934_v30 = vld [vmem:[%s16381_s6 + $0x98] sm:$0xff] }
 0x49c   : > { %4244 = vmatmul.bf16.gmra.mxu1 %v16572_v40  ;;  %4831 = vmatpush.bf16.msrb.mxu2 %v12934_v30 }
 0x49d   : > { %4293 = vmatmul.bf16.gmra.mxu2 %v14468_v26  ;;  %v12919_v26 = vld [vmem:[%s16381_s6 + $0x20] sm:$0xff]  ;;  %v4391_v38 = vmax.f32 %v4050_v29, 0.0 }
 0x49e   : > { %4342 = vmatmul.bf16.gmra.mxu3 %v14476_v7  ;;  %v12943_v7 = vld [vmem:[%s16381_s6 + $0xe0] sm:$0xff]  ;;  %4732 = vmatpush.bf16.msrb.mxu0 %v12919_v26 }
 0x49f   : > { %4879 = vmatpush.bf16.msrb.mxu3 %v12943_v7 }
 0x4a0   : > { %v4098_v44 = vpop.f32.mrf.mxu2  ;;  %v4002_v52 = vpop.f32.mrf.mxu0 }
 0x4a1   : > { %v4099_v37 = vadd.f32 %v4098_v44, %v14899_v16  ;;  %v4147_v0 = vpop.f32.mrf.mxu3  ;;  %v4003_v18 = vadd.f32 %v4002_v52, %v14831_v13  ;;  %v4051_v39 = vpop.f32.mrf.mxu1  ;;  %v12927_v13 = vld [vmem:[%s16381_s6 + $0x60] sm:$0xff] }
 0x4a2   : > { %4781 = vmatpush.bf16.msrb.mxu1 %v12927_v13 }
 0x4a3   : > { %v14959_v20 = vadd.f32 %v4147_v0, %v4099_v37  ;;  %v4052_v55 = vadd.f32 %v4051_v39, %v4003_v18 }
 0x4a5   : > { %v4395_v45 = vmax.f32 %v4052_v55, 0.0 }
 0x4a7   : > { %v14970_v63 = vpack.c.bf16 %v4395_v45, %v4391_v38 }
 0x4a8   : > { %v4100_v15 = vpop.f32.mrf.mxu2  ;;  %v4005_v49 = vpop.f32.mrf.mxu0 }
 0x4a9   : > { %v4101_v42 = vadd.f32 %v4100_v15, %v14899_v16  ;;  %v4149_v31 = vpop.f32.mrf.mxu3  ;;  %v4006_v23 = vadd.f32 %v4005_v49, %v14838_v53  ;;  %v4054_v51 = vpop.f32.mrf.mxu1 }
 0x4ab   : > { %v14974_v9 = vadd.f32 %v4149_v31, %v4101_v42  ;;  %v4055_v28 = vadd.f32 %v4054_v51, %v4006_v23  ;;  %4200 = vmatmul.bf16.gmra.mxu0 %v14380_v21  ;;  %v12933_v42 = vld [vmem:[%s16381_s6 + $0x90] sm:$0xff] }
 0x4ac   : > { %4249 = vmatmul.bf16.gmra.mxu1 %v14388_v46  ;;  %v12918_v46 = vld [vmem:[%s16381_s6 + $0x18] sm:$0xff]  ;;  %4832 = vmatpush.bf16.msrb.mxu2 %v12933_v42 }
 0x4ad   : > { %4298 = vmatmul.bf16.gmra.mxu2 %v14480_v8  ;;  %v12942_v8 = vld [vmem:[%s16381_s6 + $0xd8] sm:$0xff]  ;;  %4733 = vmatpush.bf16.msrb.mxu0 %v12918_v46  ;;  %v4399_v0 = vmax.f32 %v4055_v28, 0.0 }
 0x4ae   : > { %4347 = vmatmul.bf16.gmra.mxu3 %v14488_v2 }
 0x4af   : > { %4880 = vmatpush.bf16.msrb.mxu3 %v12942_v8 }
 0x4b0   : > { %v4103_v29 = vpop.f32.mrf.mxu2  ;;  %v4007_v34 = vpop.f32.mrf.mxu0 }
 0x4b1   : > { %v4104_v53 = vadd.f32 %v4103_v29, %v14899_v16  ;;  %v4152_v40 = vpop.f32.mrf.mxu3  ;;  %v4008_v44 = vadd.f32 %v4007_v34, %v14841_v62  ;;  %v4056_v37 = vpop.f32.mrf.mxu1  ;;  %v12926_v62 = vld [vmem:[%s16381_s6 + $0x58] sm:$0xff] }
 0x4b2   : > { %4782 = vmatpush.bf16.msrb.mxu1 %v12926_v62 }
 0x4b3   : > { %v14985_v21 = vadd.f32 %v4152_v40, %v4104_v53  ;;  %v4057_v2 = vadd.f32 %v4056_v37, %v4008_v44 }
 0x4b5   : > { %v4403_v52 = vmax.f32 %v4057_v2, 0.0  ;;  %v12932_v2 = vld [vmem:[%s16381_s6 + $0x88] sm:$0xff] }
 0x4b6   : > { %4833 = vmatpush.bf16.msrb.mxu2 %v12932_v2 }
 0x4b7   : > { %v14996_v39 = vpack.c.bf16 %v4403_v52, %v4399_v0 }
 0x4b8   : > { %v4105_v18 = vpop.f32.mrf.mxu2  ;;  %v4010_v55 = vpop.f32.mrf.mxu0 }
 0x4b9   : > { %v4106_v26 = vadd.f32 %v4105_v18, %v14899_v16  ;;  %v4154_v7 = vpop.f32.mrf.mxu3  ;;  %v4011_v38 = vadd.f32 %v4010_v55, %v14848_v3  ;;  %v4059_v45 = vpop.f32.mrf.mxu1 }
 0x4bb   : > { %v15000_v13 = vadd.f32 %v4154_v7, %v4106_v26  ;;  %v4060_v15 = vadd.f32 %v4059_v45, %v4011_v38  ;;  %4205 = vmatmul.bf16.gmra.mxu0 %v14392_v24  ;;  %v12924_v7 = vld [vmem:[%s16381_s6 + $0x48] sm:$0xff] }
 0x4bc   : > { %4254 = vmatmul.bf16.gmra.mxu1 %v14400_v54  ;;  %v12917_v54 = vld [vmem:[%s16381_s6 + $0x10] sm:$0xff] }
 0x4bd   : > { %4303 = vmatmul.bf16.gmra.mxu2 %v14492_v33  ;;  %v12941_v33 = vld [vmem:[%s16381_s6 + $0xd0] sm:$0xff]  ;;  %4734 = vmatpush.bf16.msrb.mxu0 %v12917_v54  ;;  %v4407_v30 = vmax.f32 %v4060_v15, 0.0 }
 0x4be   : > { %4352 = vmatmul.bf16.gmra.mxu3 %v14500_v14 }
 0x4bf   : > { %4881 = vmatpush.bf16.msrb.mxu3 %v12941_v33 }
 0x4c0   : > { %v4108_v31 = vpop.f32.mrf.mxu2  ;;  %v4012_v23 = vpop.f32.mrf.mxu0 }
 0x4c1   : > { %v4109_v3 = vadd.f32 %v4108_v31, %v14899_v16  ;;  %v4157_v49 = vpop.f32.mrf.mxu3  ;;  %v4013_v51 = vadd.f32 %v4012_v23, %v14851_v25  ;;  %v4061_v28 = vpop.f32.mrf.mxu1  ;;  %v12925_v25 = vld [vmem:[%s16381_s6 + $0x50] sm:$0xff]  ;;  %v12915_v31 = vld [vmem:[%s16381_s6] sm:$0xff] }
 0x4c2   : > { %4783 = vmatpush.bf16.msrb.mxu1 %v12925_v25 }
 0x4c3   : > { %v15011_v24 = vadd.f32 %v4157_v49, %v4109_v3  ;;  %v4062_v14 = vadd.f32 %v4061_v28, %v4013_v51  ;;  %v12923_v3 = vld [vmem:[%s16381_s6 + $0x40] sm:$0xff] }
 0x4c4   : > { %v12931_v49 = vld [vmem:[%s16381_s6 + $0x80] sm:$0xff] }
 0x4c5   : > { %v4411_v29 = vmax.f32 %v4062_v14, 0.0  ;;  %4834 = vmatpush.bf16.msrb.mxu2 %v12931_v49 }
 0x4c6   : > { %4784 = vmatpush.bf16.msrb.mxu1 %v12924_v7 }
 0x4c7   : > { %v15024_v40 = vpack.c.bf16 %v4411_v29, %v4407_v30 }
 0x4c8   : > { %v15022_v53 = vpop.f32.mrf.mxu2  ;;  %v4015_v44 = vpop.f32.mrf.mxu0 }
 0x4c9   : > { %v15026_v34 = vpop.f32.mrf.mxu3  ;;  %v4016_v37 = vadd.f32 %v4015_v44, %v14858_v11  ;;  %v4064_v46 = vpop.f32.mrf.mxu1 }
 0x4ca   : > { %4785 = vmatpush.bf16.msrb.mxu1 %v12923_v3 }
 0x4cb   : > { %v4065_v8 = vadd.f32 %v4064_v46, %v4016_v37  ;;  %4210 = vmatmul.bf16.gmra.mxu0 %v16534_v41 }
 0x4cc   : > { %4259 = vmatmul.bf16.gmra.mxu1 %v16535_v59  ;;  %v12916_v59 = vld [vmem:[%s16381_s6 + $0x8] sm:$0xff] }
 0x4cd   : > { %4308 = vmatmul.bf16.gmra.mxu2 %v16565_v36  ;;  %v12940_v36 = vld [vmem:[%s16381_s6 + $0xc8] sm:$0xff]  ;;  %4735 = vmatpush.bf16.msrb.mxu0 %v12916_v59  ;;  %v4415_v55 = vmax.f32 %v4065_v8, 0.0 }
 0x4ce   : > { %4357 = vmatmul.bf16.gmra.mxu3 %v16566_v56 }
 0x4cf   : > { %4882 = vmatpush.bf16.msrb.mxu3 %v12940_v36 }
 0x4d0   : > { %v4113_v0 = vpop.f32.mrf.mxu2  ;;  %v4017_v11 = vpop.f32.mrf.mxu0 }
 0x4d1   : > { %v4114_v52 = vadd.f32 %v4113_v0, %v14899_v16  ;;  %v4162_v62 = vpop.f32.mrf.mxu3  ;;  %v4018_v18 = vadd.f32 %v4017_v11, %v14861_v10  ;;  %v4066_v26 = vpop.f32.mrf.mxu1  ;;  %4736 = vmatpush.bf16.msrb.mxu0 %v12915_v31 }
 0x4d3   : > { %v15038_v41 = vadd.f32 %v4162_v62, %v4114_v52  ;;  %v4067_v56 = vadd.f32 %v4066_v26, %v4018_v18 }
 0x4d5   : > { %v4419_v10 = vmax.f32 %v4067_v56, 0.0 }
 0x4d7   : > { %v15051_v45 = vpack.c.bf16 %v4419_v10, %v4415_v55  ;;  %v16573_v10 = vld [vmem:[#allocation52_spill] sm:$0xff] }
 0x4d8   : > { %v15049_v38 = vpop.f32.mrf.mxu2  ;;  %v4020_v42 = vpop.f32.mrf.mxu0 }
 0x4d9   : > { %v15053_v15 = vpop.f32.mrf.mxu3  ;;  %v4021_v23 = vadd.f32 %v4020_v42, %v14868_v61  ;;  %v4069_v51 = vpop.f32.mrf.mxu1  ;;  %v16574_v42 = vld [vmem:[#allocation44_spill] sm:$0xff] }
 0x4db   : > { %v4070_v28 = vadd.f32 %v4069_v51, %v4021_v23  ;;  %4215 = vmatmul.bf16.gmra.mxu0 %v16537_v12  ;;  %v12939_v12 = vld [vmem:[%s16381_s6 + $0xc0] sm:$0xff] }
 0x4dc   : > { %4264 = vmatmul.bf16.gmra.mxu1 %v16538_v17  ;;  %4883 = vmatpush.bf16.msrb.mxu3 %v12939_v12 }
 0x4dd   : > { %4313 = vmatmul.bf16.gmra.mxu2 %v16567_v58  ;;  %v4423_v17 = vmax.f32 %v4070_v28, 0.0 }
 0x4de   : > { %4362 = vmatmul.bf16.gmra.mxu3 %v16568_v48 }
 0x4e0   : > { %v4118_v54 = vpop.f32.mrf.mxu2  ;;  %v4022_v30 = vpop.f32.mrf.mxu0 }
 0x4e1   : > { %v4119_v33 = vadd.f32 %v4118_v54, %v14899_v16  ;;  %v4167_v14 = vpop.f32.mrf.mxu3  ;;  %v4023_v61 = vadd.f32 %v4022_v30, %v14871_v1  ;;  %v4071_v29 = vpop.f32.mrf.mxu1 }
 0x4e3   : > { %v15071_v25 = vadd.f32 %v4167_v14, %v4119_v33  ;;  %v4072_v44 = vadd.f32 %v4071_v29, %v4023_v61 }
 0x4e5   : > { %v4427_v37 = vmax.f32 %v4072_v44, 0.0 }
 0x4e7   : > { %v15078_v48 = vpack.c.bf16 %v4427_v37, %v4423_v17  ;;  %v16575_v37 = vld [vmem:[#allocation53_spill] sm:$0xff] }
 0x4e8   : > { %v15076_v58 = vpop.f32.mrf.mxu2  ;;  %v4025_v8 = vpop.f32.mrf.mxu0 }
 0x4e9   : > { %v15080_v46 = vpop.f32.mrf.mxu3  ;;  %v4026_v1 = vadd.f32 %v4025_v8, %v14881_v5  ;;  %v4074_v2 = vpop.f32.mrf.mxu1  ;;  %v16576_v8 = vld [vmem:[#allocation45_spill] sm:$0xff] }
 0x4eb   : > { %v4075_v0 = vadd.f32 %v4074_v2, %v4026_v1  ;;  %4220 = vmatmul.bf16.gmra.mxu0 %v14430_v43 }
 0x4ec   : > { %4269 = vmatmul.bf16.gmra.mxu1 %v16540_v19 }
 0x4ed   : > { %4318 = vmatmul.bf16.gmra.mxu2 %v16569_v35  ;;  %v4431_v56 = vmax.f32 %v4075_v0, 0.0 }
 0x4ee   : > { %4367 = vmatmul.bf16.gmra.mxu3 %v16570_v50 }
 0x4f0   : > { %v4123_v52 = vpop.f32.mrf.mxu2  ;;  %v4027_v18 = vpop.f32.mrf.mxu0 }
 0x4f1   : > { %v4124_v62 = vadd.f32 %v4123_v52, %v14899_v16  ;;  %v4172_v11 = vpop.f32.mrf.mxu3  ;;  %v4028_v26 = vadd.f32 %v4027_v18, %v14893_v47  ;;  %v4076_v59 = vpop.f32.mrf.mxu1 }
 0x4f3   : > { %v15089_v36 = vadd.f32 %v4172_v11, %v4124_v62  ;;  %v4077_v5 = vadd.f32 %v4076_v59, %v4028_v26 }
 0x4f5   : > { %v4435_v7 = vmax.f32 %v4077_v5, 0.0 }
 0x4f7   : > { %v15093_v19 = vpack.c.bf16 %v4435_v7, %v4431_v56 }
 0x4f8   : > { %v15091_v43 = vpop.f32.mrf.mxu2  ;;  %v4186_v50 = vpop.f32.mrf.mxu0 }
 0x4f9   : > { %v15095_v35 = vpop.f32.mrf.mxu3  ;;  %v4235_v55 = vpop.f32.mrf.mxu1  ;;  %v4187_v47 = vadd.f32 %v4186_v50, %v14907_v32 }
 0x4fb   : > { %4737 = vmatmul.bf16.vlgmr.msrb.gmra.mxu0 %v16573_v10  ;;  %v4236_v51 = vadd.f32 %v4235_v55, %v4187_v47 }
 0x4fc   : > { %4786 = vmatmul.bf16.vlgmr.msrb.gmra.mxu1 %v16574_v42  ;;  %v16577_v42 = vld [vmem:[#allocation54_spill] sm:$0xff] }
 0x4fd   : > { %4835 = vmatmul.bf16.vlgmr.msrb.gmra.mxu2 %v14918_v27 }
 0x500   : > { %v4284_v31 = vpop.f32.mrf.mxu2  ;;  %v4188_v49 = vpop.f32.mrf.mxu0 }
 0x501   : > { %v4333_v3 = vpop.f32.mrf.mxu3  ;;  %v4237_v23 = vpop.f32.mrf.mxu1  ;;  %v4189_v28 = vadd.f32 %v4188_v49, %v14922_v4  ;;  %v4285_v54 = vadd.f32 %v4284_v31, %v4236_v51  ;;  %v16578_v31 = vld [vmem:[#allocation23_spill] sm:$0xff] }
 0x503   : > { %v4238_v33 = vadd.f32 %v4237_v23, %v4189_v28  ;;  %v4334_v30 = vadd.f32 %v4333_v3, %v4285_v54 }
 0x505   : > { %v4376_v27 = vmax.f32 %v4334_v30, 0.0 }
 0x508   : > { %v4286_v14 = vpop.f32.mrf.mxu2  ;;  %v4191_v44 = vpop.f32.mrf.mxu0 }
 0x509   : > { %v4287_v61 = vadd.f32 %v4286_v14, %v4238_v33  ;;  %v4335_v29 = vpop.f32.mrf.mxu3  ;;  %v4240_v12 = vpop.f32.mrf.mxu1  ;;  %v4192_v4 = vadd.f32 %v4191_v44, %v14933_v22 }
 0x50b   : > { %v4336_v17 = vadd.f32 %v4335_v29, %v4287_v61  ;;  %4742 = vmatmul.bf16.gmra.mxu0 %v16575_v37  ;;  %v4241_v11 = vadd.f32 %v4240_v12, %v4192_v4 }
 0x50c   : > { %4791 = vmatmul.bf16.gmra.mxu1 %v16576_v8  ;;  %v16580_v8 = vld [vmem:[#allocation24_spill] sm:$0xff] }
 0x50d   : > { %v4380_v32 = vmax.f32 %v4336_v17, 0.0  ;;  %4840 = vmatmul.bf16.gmra.mxu2 %v14944_v60 }
 0x50f   : > { %v4440_v1 = vpack.c.bf16 %v4380_v32, %v4376_v27  ;;  %v16579_v27 = vld [vmem:[#allocation55_spill] sm:$0xff] }
 0x510   : > { %v4289_v2 = vpop.f32.mrf.mxu2  ;;  %v4193_v52 = vpop.f32.mrf.mxu0 }
 0x511   : > { %v4338_v0 = vpop.f32.mrf.mxu3  ;;  %4884 = vmatmul.bf16.vlgmr.msrb.gmra.mxu3 %v4440_v1  ;;  %v4242_v62 = vpop.f32.mrf.mxu1  ;;  %v4194_v18 = vadd.f32 %v4193_v52, %v14948_v57  ;;  %v4290_v26 = vadd.f32 %v4289_v2, %v4241_v11 }
 0x513   : > { %v4243_v59 = vadd.f32 %v4242_v62, %v4194_v18  ;;  %v4339_v56 = vadd.f32 %v4338_v0, %v4290_v26 }
 0x515   : > { %v4384_v22 = vmax.f32 %v4339_v56, 0.0 }
 0x518   : > { %v4291_v5 = vpop.f32.mrf.mxu2  ;;  %v4196_v55 = vpop.f32.mrf.mxu0 }
 0x519   : > { %v4292_v7 = vadd.f32 %v4291_v5, %v4243_v59  ;;  %v4340_v50 = vpop.f32.mrf.mxu3  ;;  %v4245_v10 = vpop.f32.mrf.mxu1  ;;  %v4197_v3 = vadd.f32 %v4196_v55, %v14959_v20 }
 0x51b   : > { %v4341_v60 = vadd.f32 %v4340_v50, %v4292_v7  ;;  %4747 = vmatmul.bf16.gmra.mxu0 %v16577_v42  ;;  %v4246_v54 = vadd.f32 %v4245_v10, %v4197_v3  ;;  %v16581_v10 = vld [vmem:[#allocation56_spill] sm:$0xff] }
 0x51c   : > { %4796 = vmatmul.bf16.gmra.mxu1 %v16578_v31 }
 0x51d   : > { %v4388_v47 = vmax.f32 %v4341_v60, 0.0  ;;  %4845 = vmatmul.bf16.gmra.mxu2 %v14970_v63 }
 0x51f   : > { %v4444_v57 = vpack.c.bf16 %v4388_v47, %v4384_v22  ;;  %v16582_v22 = vld [vmem:[#allocation25_spill] sm:$0xff] }
 0x520   : > { %v4294_v49 = vpop.f32.mrf.mxu2  ;;  %v4198_v51 = vpop.f32.mrf.mxu0 }
 0x521   : > { %v4343_v23 = vpop.f32.mrf.mxu3  ;;  %4889 = vmatmul.bf16.gmra.mxu3 %v4444_v57  ;;  %v4247_v28 = vpop.f32.mrf.mxu1  ;;  %v4199_v33 = vadd.f32 %v4198_v51, %v14974_v9  ;;  %v4295_v14 = vadd.f32 %v4294_v49, %v4246_v54 }
 0x523   : > { %v4248_v30 = vadd.f32 %v4247_v28, %v4199_v33  ;;  %v4344_v29 = vadd.f32 %v4343_v23, %v4295_v14 }
 0x525   : > { %v4392_v20 = vmax.f32 %v4344_v29, 0.0 }
 0x528   : > { %v4296_v61 = vpop.f32.mrf.mxu2  ;;  %v4201_v17 = vpop.f32.mrf.mxu0 }
 0x529   : > { %v4297_v44 = vadd.f32 %v4296_v61, %v4248_v30  ;;  %v4345_v12 = vpop.f32.mrf.mxu3  ;;  %v4250_v37 = vpop.f32.mrf.mxu1  ;;  %v4202_v1 = vadd.f32 %v4201_v17, %v14985_v21  ;;  %v4111_v21 = vadd.f32 %v15022_v53, %v14899_v16 }
 0x52b   : > { %v4346_v63 = vadd.f32 %v4345_v12, %v4297_v44  ;;  %4752 = vmatmul.bf16.gmra.mxu0 %v16579_v27  ;;  %v4251_v62 = vadd.f32 %v4250_v37, %v4202_v1  ;;  %v4160_v3 = vadd.f32 %v15026_v34, %v4111_v21  ;;  %v4116_v34 = vadd.f32 %v15049_v38, %v14899_v16  ;;  %v16584_v37 = vld [vmem:[#allocation26_spill] sm:$0xff] }
 0x52c   : > { %4801 = vmatmul.bf16.gmra.mxu1 %v16580_v8 }
 0x52d   : > { %v4396_v32 = vmax.f32 %v4346_v63, 0.0  ;;  %4850 = vmatmul.bf16.gmra.mxu2 %v14996_v39 }
 0x52f   : > { %v4448_v9 = vpack.c.bf16 %v4396_v32, %v4392_v20  ;;  %v4165_v32 = vadd.f32 %v15053_v15, %v4116_v34  ;;  %v4121_v15 = vadd.f32 %v15076_v58, %v14899_v16 }
 0x530   : > { %v4299_v4 = vpop.f32.mrf.mxu2  ;;  %v4203_v0 = vpop.f32.mrf.mxu0 }
 0x531   : > { %v4348_v2 = vpop.f32.mrf.mxu3  ;;  %4894 = vmatmul.bf16.gmra.mxu3 %v4448_v9  ;;  %v4252_v52 = vpop.f32.mrf.mxu1  ;;  %v4204_v11 = vadd.f32 %v4203_v0, %v15000_v13  ;;  %v4300_v18 = vadd.f32 %v4299_v4, %v4251_v62 }
 0x533   : > { %v4253_v26 = vadd.f32 %v4252_v52, %v4204_v11  ;;  %v4349_v5 = vadd.f32 %v4348_v2, %v4300_v18 }
 0x535   : > { %v4400_v60 = vmax.f32 %v4349_v5, 0.0 }
 0x538   : > { %v4301_v59 = vpop.f32.mrf.mxu2  ;;  %v4206_v50 = vpop.f32.mrf.mxu0 }
 0x539   : > { %v4302_v56 = vadd.f32 %v4301_v59, %v4253_v26  ;;  %v4350_v7 = vpop.f32.mrf.mxu3  ;;  %v4255_v55 = vpop.f32.mrf.mxu1  ;;  %v4207_v13 = vadd.f32 %v4206_v50, %v15011_v24  ;;  %v16583_v24 = vld [vmem:[#allocation41_spill] sm:$0xff] }
 0x53b   : > { %v4351_v39 = vadd.f32 %v4350_v7, %v4302_v56  ;;  %4757 = vmatmul.bf16.gmra.mxu0 %v16581_v10  ;;  %v4256_v51 = vadd.f32 %v4255_v55, %v4207_v13 }
 0x53c   : > { %4806 = vmatmul.bf16.gmra.mxu1 %v16582_v22 }
 0x53d   : > { %v4404_v42 = vmax.f32 %v4351_v39, 0.0  ;;  %4855 = vmatmul.bf16.gmra.mxu2 %v15024_v40  ;;  %v4170_v39 = vadd.f32 %v15080_v46, %v4121_v15  ;;  %v4126_v46 = vadd.f32 %v15091_v43, %v14899_v16 }
 0x53f   : > { %v4452_v47 = vpack.c.bf16 %v4404_v42, %v4400_v60 }
 0x540   : > { %v4304_v31 = vpop.f32.mrf.mxu2  ;;  %v4208_v49 = vpop.f32.mrf.mxu0 }
 0x541   : > { %v4353_v57 = vpop.f32.mrf.mxu3  ;;  %4899 = vmatmul.bf16.gmra.mxu3 %v4452_v47  ;;  %v4257_v23 = vpop.f32.mrf.mxu1  ;;  %v4209_v28 = vadd.f32 %v4208_v49, %v4160_v3  ;;  %v4305_v54 = vadd.f32 %v4304_v31, %v4256_v51 }
 0x543   : > { %v4258_v53 = vadd.f32 %v4257_v23, %v4209_v28  ;;  %v4354_v14 = vadd.f32 %v4353_v57, %v4305_v54  ;;  %v16587_v28 = vld [vmem:[#allocation27_spill] sm:$0xff] }
 0x545   : > { %v4408_v12 = vmax.f32 %v4354_v14, 0.0  ;;  %v4175_v14 = vadd.f32 %v15095_v35, %v4126_v46 }
 0x548   : > { %v4306_v33 = vpop.f32.mrf.mxu2  ;;  %v4211_v29 = vpop.f32.mrf.mxu0 }
 0x549   : > { %v4307_v30 = vadd.f32 %v4306_v33, %v4258_v53  ;;  %v4355_v61 = vpop.f32.mrf.mxu3  ;;  %v4260_v40 = vpop.f32.mrf.mxu1  ;;  %v4212_v63 = vadd.f32 %v4211_v29, %v15038_v41  ;;  %v16585_v41 = vld [vmem:[#allocation42_spill] sm:$0xff] }
 0x54b   : > { %v4356_v44 = vadd.f32 %v4355_v61, %v4307_v30  ;;  %4762 = vmatmul.bf16.gmra.mxu0 %v16583_v24  ;;  %v4261_v4 = vadd.f32 %v4260_v40, %v4212_v63 }
 0x54c   : > { %4811 = vmatmul.bf16.gmra.mxu1 %v16584_v37 }
 0x54d   : > { %v4412_v17 = vmax.f32 %v4356_v44, 0.0  ;;  %4860 = vmatmul.bf16.gmra.mxu2 %v15051_v45 }
 0x54f   : > { %v4456_v27 = vpack.c.bf16 %v4412_v17, %v4408_v12 }
 0x550   : > { %v4309_v20 = vpop.f32.mrf.mxu2  ;;  %v4213_v1 = vpop.f32.mrf.mxu0 }
 0x551   : > { %v4358_v8 = vpop.f32.mrf.mxu3  ;;  %4904 = vmatmul.bf16.gmra.mxu3 %v4456_v27  ;;  %v4262_v9 = vpop.f32.mrf.mxu1  ;;  %v4214_v2 = vadd.f32 %v4213_v1, %v4165_v32  ;;  %v4310_v0 = vadd.f32 %v4309_v20, %v4261_v4  ;;  %v11397_v1 = vld [vmem:[%s16383_s8 + $0x68] sm:$0xf] }
 0x553   : > { %v4263_v38 = vadd.f32 %v4262_v9, %v4214_v2  ;;  %v4359_v62 = vadd.f32 %v4358_v8, %v4310_v0  ;;  %v12962_v9 = vld [vmem:[%s16383_s8 + $0x74] sm:$0xf0]  ;;  %v15155_v0 = vld [vmem:[%s16382_s7] ss:$0 sm:$0xff] }
 0x554   : > { %v11398_v4 = vor.u32 %v12962_v9, %v11397_v1 }
 0x555   : > { %v4416_v5 = vmax.f32 %v4359_v62, 0.0  ;;  %v12960_v62 = vld [vmem:[%s16383_s8 + $0x6c] sm:$0xf] }
 0x556   : > { %5326 = vmatpush.bf16.msra.mxu2 %v11398_v4 }
 0x558   : > { %v4311_v52 = vpop.f32.mrf.mxu2  ;;  %v4216_v26 = vpop.f32.mrf.mxu0 }
 0x559   : > { %v4312_v11 = vadd.f32 %v4311_v52, %v4263_v38  ;;  %v4360_v18 = vpop.f32.mrf.mxu3  ;;  %v4265_v45 = vpop.f32.mrf.mxu1  ;;  %v4217_v7 = vadd.f32 %v4216_v26, %v15071_v25  ;;  %v16586_v25 = vld [vmem:[#allocation43_spill] sm:$0xff]  ;;  %v11389_v26 = vld [vmem:[%s16383_s8 + $0x60] sm:$0xf] }
 0x55b   : > { %v4361_v59 = vadd.f32 %v4360_v18, %v4312_v11  ;;  %4767 = vmatmul.bf16.gmra.mxu0 %v16585_v41  ;;  %v4266_v42 = vadd.f32 %v4265_v45, %v4217_v7  ;;  %v11399_v11 = vld [vmem:[%s16383_s8 + $0x78] sm:$0xf0]  ;;  %v12961_v45 = vld [vmem:[%s16383_s8 + $0x6c] sm:$0xf0] }
 0x55c   : > { %4816 = vmatmul.bf16.gmra.mxu1 %v14792_v6  ;;  %v11402_v18 = vor.u32 %v12960_v62, %v11399_v11  ;;  %v11390_v41 = vor.u32 %v12961_v45, %v11389_v26  ;;  %v12955_v26 = vld [vmem:[%s16383_s8 + $0x44] sm:$0xf]  ;;  %v11375_v45 = vld [vmem:[%s16383_s8 + $0x50] sm:$0xf0] }
 0x55d   : > { %v4420_v56 = vmax.f32 %v4361_v59, 0.0  ;;  %4865 = vmatmul.bf16.gmra.mxu2 %v15078_v48 }
 0x55e   : > { %5375 = vmatpush.bf16.msra.mxu3 %v11402_v18  ;;  %5228 = vmatpush.bf16.msra.mxu0 %v11390_v41  ;;  %v11378_v41 = vor.u32 %v12955_v26, %v11375_v45 }
 0x55f   : > { %v4460_v50 = vpack.c.bf16 %v4420_v56, %v4416_v5 }
 0x560   : > { %v4314_v55 = vpop.f32.mrf.mxu2  ;;  %v4218_v21 = vpop.f32.mrf.mxu0 }
 0x561   : > { %v4363_v10 = vpop.f32.mrf.mxu3  ;;  %4909 = vmatmul.bf16.gmra.mxu3 %v4460_v50  ;;  %v4267_v60 = vpop.f32.mrf.mxu1  ;;  %v4219_v22 = vadd.f32 %v4218_v21, %v4170_v39  ;;  %v4315_v13 = vadd.f32 %v4314_v55, %v4266_v42  ;;  %v12959_v55 = vld [vmem:[%s16383_s8 + $0x64] sm:$0xf]  ;;  %v11391_v39 = vld [vmem:[%s16383_s8 + $0x70] sm:$0xf0] }
 0x562   : > { %v11394_v21 = vor.u32 %v12959_v55, %v11391_v39 }
 0x563   : > { %v4268_v58 = vadd.f32 %v4267_v60, %v4219_v22  ;;  %v4364_v31 = vadd.f32 %v4363_v10, %v4315_v13 }
 0x564   : > { %5277 = vmatpush.bf16.msra.mxu1 %v11394_v21 }
 0x565   : > { %v4424_v23 = vmax.f32 %v4364_v31, 0.0 }
 0x568   : > { %v4316_v47 = vpop.f32.mrf.mxu2  ;;  %v4221_v57 = vpop.f32.mrf.mxu0  ;;  %5278 = vmatpush.bf16.msra.mxu1 %v11378_v41 }
 0x569   : > { %v4317_v3 = vadd.f32 %v4316_v47, %v4268_v58  ;;  %v4365_v6 = vpop.f32.mrf.mxu3  ;;  %v4270_v48 = vpop.f32.mrf.mxu1  ;;  %v4222_v54 = vadd.f32 %v4221_v57, %v15089_v36 }
 0x56b   : > { %v4366_v49 = vadd.f32 %v4365_v6, %v4317_v3  ;;  %4772 = vmatmul.bf16.gmra.mxu0 %v16586_v25  ;;  %v4271_v40 = vadd.f32 %v4270_v48, %v4222_v54 }
 0x56c   : > { %4821 = vmatmul.bf16.gmra.mxu1 %v16587_v28 }
 0x56d   : > { %v4428_v51 = vmax.f32 %v4366_v49, 0.0  ;;  %4870 = vmatmul.bf16.gmra.mxu2 %v15093_v19 }
 0x56f   : > { %v4464_v53 = vpack.c.bf16 %v4428_v51, %v4424_v23 }
 0x570   : > { %v4319_v33 = vpop.f32.mrf.mxu2  ;;  %v4223_v61 = vpop.f32.mrf.mxu0 }
 0x571   : > { %v4368_v30 = vpop.f32.mrf.mxu3  ;;  %4914 = vmatmul.bf16.gmra.mxu3 %v4464_v53  ;;  %v4272_v29 = vpop.f32.mrf.mxu1  ;;  %v4224_v44 = vadd.f32 %v4223_v61, %v4175_v14  ;;  %v4320_v24 = vadd.f32 %v4319_v33, %v4271_v40  ;;  %v12958_v61 = vld [vmem:[%s16383_s8 + $0x54] sm:$0xf0] }
 0x573   : > { %v4273_v16 = vadd.f32 %v4272_v29, %v4224_v44  ;;  %v4369_v34 = vadd.f32 %v4368_v30, %v4320_v24  ;;  %v11381_v30 = vld [vmem:[%s16383_s8 + $0x48] sm:$0xf] }
 0x574   : > { %v11382_v44 = vor.u32 %v12958_v61, %v11381_v30 }
 0x575   : > { %v4432_v63 = vmax.f32 %v4369_v34, 0.0 }
 0x576   : > { %5327 = vmatpush.bf16.msra.mxu2 %v11382_v44 }
 0x578   : > { %v4321_v43 = vpop.f32.mrf.mxu2  ;;  %v4738_v17 = vpop.f32.mrf.mxu0 }
 0x579   : > { %v4322_v12 = vadd.f32 %v4321_v43, %v4273_v16  ;;  %v4370_v19 = vpop.f32.mrf.mxu3  ;;  %v4787_v37 = vpop.f32.mrf.mxu1  ;;  %v4739_v59 = vadd.f32 %v15155_v0, %v4738_v17 }
 0x57b   : > { %v4371_v36 = vadd.f32 %v4370_v19, %v4322_v12  ;;  %v4788_v5 = vadd.f32 %v4787_v37, %v4739_v59  ;;  %v12956_v37 = vld [vmem:[%s16383_s8 + $0x4c] sm:$0xf] }
 0x57d   : > { %v4436_v27 = vmax.f32 %v4371_v36, 0.0  ;;  %v11383_v36 = vld [vmem:[%s16383_s8 + $0x58] sm:$0xf0] }
 0x57f   : > { %v4468_v20 = vpack.c.bf16 %v4436_v27, %v4432_v63  ;;  %v11386_v27 = vor.u32 %v12956_v37, %v11383_v36  ;;  %v12953_v37 = vld [vmem:[%s16383_s8 + $0x2c] sm:$0xf0] }
 0x580   : > { %v4836_v35 = vpop.f32.mrf.mxu2  ;;  %v4740_v32 = vpop.f32.mrf.mxu0 }
 0x581   : > { %4919 = vmatmul.bf16.gmra.mxu3 %v4468_v20  ;;  %v4789_v8 = vpop.f32.mrf.mxu1  ;;  %v4837_v50 = vadd.f32 %v4836_v35, %v4788_v5  ;;  %v4741_v60 = vadd.f32 %v15155_v0, %v4740_v32  ;;  %v11373_v20 = vld [vmem:[%s16383_s8 + $0x40] sm:$0xf]  ;;  %v12957_v35 = vld [vmem:[%s16383_s8 + $0x4c] sm:$0xf0] }
 0x582   : > { %v11374_v9 = vor.u32 %v12957_v35, %v11373_v20  ;;  %5376 = vmatpush.bf16.msra.mxu3 %v11386_v27 }
 0x583   : > { %v4790_v58 = vadd.f32 %v4789_v8, %v4741_v60 }
 0x584   : > { %5229 = vmatpush.bf16.msra.mxu0 %v11374_v9 }
 0x588   : > { %v4838_v2 = vpop.f32.mrf.mxu2  ;;  %v4743_v38 = vpop.f32.mrf.mxu0 }
 0x589   : > { %v4792_v52 = vpop.f32.mrf.mxu1  ;;  %v4839_v6 = vadd.f32 %v4838_v2, %v4790_v58  ;;  %v4744_v48 = vadd.f32 %v15155_v0, %v4743_v38 }
 0x58b   : > { %v4793_v51 = vadd.f32 %v4792_v52, %v4744_v48 }
 0x590   : > { %v4841_v15 = vpop.f32.mrf.mxu2  ;;  %v4745_v56 = vpop.f32.mrf.mxu0 }
 0x591   : > { %v4794_v7 = vpop.f32.mrf.mxu1  ;;  %v4842_v53 = vadd.f32 %v4841_v15, %v4793_v51  ;;  %v4746_v29 = vadd.f32 %v15155_v0, %v4745_v56  ;;  %v12954_v51 = vld [vmem:[%s16383_s8 + $0x34] sm:$0xf0] }
 0x593   : > { %v4795_v34 = vadd.f32 %v4794_v7, %v4746_v29 }
 0x594   : > { %v4885_v10 = vpop.f32.mrf.mxu3 }
 0x595   : > { %v15187_v42 = vadd.f32 %v4885_v10, %v4837_v50 }
 0x597   : > { %v4941_v22 = vmul.f32 0.5, %v15187_v42  ;;  %9812 = vst [vmem:[%s15184_s27] sm:$0xff] %v15187_v42 }
 0x598   : > { %v4843_v13 = vpop.f32.mrf.mxu2  ;;  %v4748_v31 = vpop.f32.mrf.mxu0 }
 0x599   : > { %v4957_v47 = vmul.f32 1.442695, %v4941_v22  ;;  %v4797_v3 = vpop.f32.mrf.mxu1  ;;  %v4844_v19 = vadd.f32 %v4843_v13, %v4795_v34  ;;  %v4749_v32 = vadd.f32 %v15155_v0, %v4748_v31 }
 0x59b   : > { %13380 = vpow2.f32 %v4957_v47  ;;  %v4798_v52 = vadd.f32 %v4797_v3, %v4749_v32 }
 0x59c   : > { %v4887_v57 = vpop.f32.mrf.mxu3 }
 0x59d   : > { %v15193_v49 = vadd.f32 %v4887_v57, %v4839_v6 }
 0x59f   : > { %v4942_v25 = vmul.f32 0.5, %v15193_v49  ;;  %9813 = vst [vmem:[%s15184_s27 + $0x8] sm:$0xff] %v15193_v49 }
 0x5a0   : > { %v4846_v46 = vpop.f32.mrf.mxu2  ;;  %v4750_v54 = vpop.f32.mrf.mxu0 }
 0x5a1   : > { %v13381_v23 = vpop.eup %13380  ;;  %v4959_v28 = vmul.f32 1.442695, %v4942_v25  ;;  %v4799_v33 = vpop.f32.mrf.mxu1  ;;  %v4847_v18 = vadd.f32 %v4846_v46, %v4798_v52  ;;  %v4751_v15 = vadd.f32 %v15155_v0, %v4750_v54 }
 0x5a2   : > { %5005 = vrot.lane.b32.xlu0 %v13381_v23, %s13881_s5  ;;  %v11365_v23 = vld [vmem:[%s16383_s8 + $0x28] sm:$0xf] }
 0x5a3   : > { %13382 = vpow2.f32 %v4959_v28  ;;  %v4800_v39 = vadd.f32 %v4799_v33, %v4751_v15 }
 0x5a4   : > { %v4890_v14 = vpop.f32.mrf.mxu3 }
 0x5a5   : > { %v15206_v40 = vadd.f32 %v4890_v14, %v4842_v53  ;;  %v11366_v53 = vor.u32 %v12954_v51, %v11365_v23 }
 0x5a7   : > { %v4943_v24 = vmul.f32 0.5, %v15206_v40  ;;  %9814 = vst [vmem:[%s15184_s27 + $0x10] sm:$0xff] %v15206_v40  ;;  %5328 = vmatpush.bf16.msra.mxu2 %v11366_v53 }
 0x5a8   : > { %v4848_v16 = vpop.f32.mrf.mxu2  ;;  %v4753_v17 = vpop.f32.mrf.mxu0 }
 0x5a9   : > { %v13383_v43 = vpop.eup %13382  ;;  %v4961_v12 = vmul.f32 1.442695, %v4943_v24  ;;  %v4802_v8 = vpop.f32.mrf.mxu1  ;;  %v4849_v21 = vadd.f32 %v4848_v16, %v4800_v39  ;;  %v4754_v13 = vadd.f32 %v15155_v0, %v4753_v17  ;;  %v12952_v16 = vld [vmem:[%s16383_s8 + $0x2c] sm:$0xf] }
 0x5aa   : > { %5007 = vrot.lane.b32.xlu0 %v13383_v43, %s13881_s5  ;;  %v11367_v43 = vld [vmem:[%s16383_s8 + $0x38] sm:$0xf0] }
 0x5ab   : > { %13384 = vpow2.f32 %v4961_v12  ;;  %v4803_v3 = vadd.f32 %v4802_v8, %v4754_v13  ;;  %v11370_v17 = vor.u32 %v12952_v16, %v11367_v43  ;;  %v11341_v16 = vld [vmem:[%s16383_s8] sm:$0xf] }
 0x5ac   : > { %v4892_v63 = vpop.f32.mrf.mxu3 }
 0x5ad   : > { %v15225_v1 = vadd.f32 %v4892_v63, %v4844_v19  ;;  %v11357_v19 = vld [vmem:[%s16383_s8 + $0x20] sm:$0xf]  ;;  %5377 = vmatpush.bf16.msra.mxu3 %v11370_v17 }
 0x5ae   : > { %v11358_v27 = vor.u32 %v12953_v37, %v11357_v19 }
 0x5af   : > { %v4944_v4 = vmul.f32 0.5, %v15225_v1  ;;  %9815 = vst [vmem:[%s15184_s27 + $0x18] sm:$0xff] %v15225_v1 }
 0x5b0   : > { %v4851_v2 = vpop.f32.mrf.mxu2  ;;  %v4755_v11 = vpop.f32.mrf.mxu0  ;;  %5230 = vmatpush.bf16.msra.mxu0 %v11358_v27 }
 0x5b1   : > { %v13385_v38 = vpop.eup %13384  ;;  %v4963_v62 = vmul.f32 1.442695, %v4944_v4  ;;  %v4804_v56 = vpop.f32.mrf.mxu1  ;;  %v4852_v25 = vadd.f32 %v4851_v2, %v4803_v3  ;;  %v4756_v28 = vadd.f32 %v15155_v0, %v4755_v11  ;;  %v12951_v2 = vld [vmem:[%s16383_s8 + $0x24] sm:$0xf] }
 0x5b2   : > { %5009 = vrot.lane.b32.xlu1 %v13385_v38, %s13881_s5  ;;  %v11359_v38 = vld [vmem:[%s16383_s8 + $0x30] sm:$0xf0] }
 0x5b3   : > { %13386 = vpow2.f32 %v4963_v62  ;;  %v4805_v61 = vadd.f32 %v4804_v56, %v4756_v28  ;;  %v11362_v62 = vor.u32 %v12951_v2, %v11359_v38  ;;  %v11343_v2 = vld [vmem:[%s16383_s8 + $0x10] sm:$0xf0] }
 0x5b4   : > { %v4895_v59 = vpop.f32.mrf.mxu3 }
 0x5b5   : > { %v15238_v5 = vadd.f32 %v4895_v59, %v4847_v18  ;;  %5279 = vmatpush.bf16.msra.mxu1 %v11362_v62 }
 0x5b7   : > { %v4945_v7 = vmul.f32 0.5, %v15238_v5  ;;  %9816 = vst [vmem:[%s15184_s27 + $0x20] sm:$0xff] %v15238_v5 }
 0x5b8   : > { %v4853_v50 = vpop.f32.mrf.mxu2  ;;  %v4758_v60 = vpop.f32.mrf.mxu0 }
 0x5b9   : > { %v13387_v55 = vpop.eup %13386  ;;  %v4965_v10 = vmul.f32 1.442695, %v4945_v7  ;;  %v4807_v6 = vpop.f32.mrf.mxu1  ;;  %v4854_v44 = vadd.f32 %v4853_v50, %v4805_v61  ;;  %v4759_v36 = vadd.f32 %v15155_v0, %v4758_v60 }
 0x5ba   : > { %5011 = vrot.lane.b32.xlu1 %v13387_v55, %s13881_s5 }
 0x5bb   : > { %13388 = vpow2.f32 %v4965_v10  ;;  %v4808_v8 = vadd.f32 %v4807_v6, %v4759_v36  ;;  %v11349_v6 = vld [vmem:[%s16383_s8 + $0x8] sm:$0xf] }
 0x5bc   : > { %v4897_v22 = vpop.f32.mrf.mxu3 }
 0x5bd   : > { %v15245_v58 = vadd.f32 %v4897_v22, %v4849_v21 }
 0x5bf   : > { %v4946_v47 = vmul.f32 0.5, %v15245_v58  ;;  %9817 = vst [vmem:[%s15184_s27 + $0x28] sm:$0xff] %v15245_v58 }
 0x5c0   : > { %v4856_v48 = vpop.f32.mrf.mxu2  ;;  %v4760_v33 = vpop.f32.mrf.mxu0 }
 0x5c1   : > { %v13389_v31 = vpop.eup %13388  ;;  %v4967_v57 = vmul.f32 1.442695, %v4946_v47  ;;  %v4809_v24 = vpop.f32.mrf.mxu1  ;;  %v4857_v4 = vadd.f32 %v4856_v48, %v4808_v8  ;;  %v4761_v11 = vadd.f32 %v15155_v0, %v4760_v33 }
 0x5c2   : > { %5013 = vrot.lane.b32.xlu2 %v13389_v31, %s13881_s5 }
 0x5c3   : > { %13390 = vpow2.f32 %v4967_v57  ;;  %v4810_v15 = vadd.f32 %v4809_v24, %v4761_v11  ;;  %v12950_v57 = vld [vmem:[%s16383_s8 + $0x14] sm:$0xf0]  ;;  %v11351_v24 = vld [vmem:[%s16383_s8 + $0x18] sm:$0xf0] }
 0x5c4   : > { %v4900_v46 = vpop.f32.mrf.mxu3 }
 0x5c5   : > { %v15258_v54 = vadd.f32 %v4900_v46, %v4852_v25  ;;  %v11350_v46 = vor.u32 %v12950_v57, %v11349_v6 }
 0x5c7   : > { %v4947_v14 = vmul.f32 0.5, %v15258_v54  ;;  %9818 = vst [vmem:[%s15184_s27 + $0x30] sm:$0xff] %v15258_v54  ;;  %5329 = vmatpush.bf16.msra.mxu2 %v11350_v46 }
 0x5c8   : > { %v4858_v34 = vpop.f32.mrf.mxu2  ;;  %v4763_v35 = vpop.f32.mrf.mxu0 }
 0x5c9   : > { %v13391_v30 = vpop.eup %13390  ;;  %v4969_v29 = vmul.f32 1.442695, %v4947_v14  ;;  %v4812_v18 = vpop.f32.mrf.mxu1  ;;  %v4859_v50 = vadd.f32 %v4858_v34, %v4810_v15  ;;  %v4764_v39 = vadd.f32 %v15155_v0, %v4763_v35 }
 0x5ca   : > { %5015 = vrot.lane.b32.xlu2 %v13391_v30, %s13881_s5 }
 0x5cb   : > { %13392 = vpow2.f32 %v4969_v29  ;;  %v4813_v47 = vadd.f32 %v4812_v18, %v4764_v39 }
 0x5cc   : > { %v4902_v12 = vpop.f32.mrf.mxu3 }
 0x5cd   : > { %v15277_v63 = vadd.f32 %v4902_v12, %v4854_v44  ;;  %v12948_v44 = vld [vmem:[%s16383_s8 + $0xc] sm:$0xf]  ;;  %v12949_v12 = vld [vmem:[%s16383_s8 + $0xc] sm:$0xf0] }
 0x5ce   : > { %v11354_v34 = vor.u32 %v12948_v44, %v11351_v24  ;;  %v11342_v37 = vor.u32 %v12949_v12, %v11341_v16  ;;  %v11605_v12 = vld [vmem:[#allocation13 + $0x150] sm:$0xf] }
 0x5cf   : > { %v4948_v20 = vmul.f32 0.5, %v15277_v63  ;;  %9819 = vst [vmem:[%s15184_s27 + $0x38] sm:$0xff] %v15277_v63 }
 0x5d0   : > { %v4861_v45 = vpop.f32.mrf.mxu2  ;;  %v4765_v7 = vpop.f32.mrf.mxu0  ;;  %5378 = vmatpush.bf16.msra.mxu3 %v11354_v34  ;;  %5231 = vmatpush.bf16.msra.mxu0 %v11342_v37  ;;  %v13104_v34 = vld [vmem:[#allocation13 + $0x464] sm:$0xf0] }
 0x5d1   : > { %v13393_v32 = vpop.eup %13392  ;;  %v4971_v9 = vmul.f32 1.442695, %v4948_v20  ;;  %v4814_v21 = vpop.f32.mrf.mxu1  ;;  %v4862_v3 = vadd.f32 %v4861_v45, %v4813_v47  ;;  %v4766_v23 = vadd.f32 %v15155_v0, %v4765_v7  ;;  %v13008_v37 = vld [vmem:[#allocation13 + $0x164] sm:$0xf0] }
 0x5d2   : > { %5017 = vrot.lane.b32.xlu0 %v13393_v32, %s13881_s5 }
 0x5d3   : > { %13394 = vpow2.f32 %v4971_v9  ;;  %v4815_v33 = vadd.f32 %v4814_v21, %v4766_v23 }
 0x5d4   : > { %v4905_v52 = vpop.f32.mrf.mxu3 }
 0x5d5   : > { %v15290_v26 = vadd.f32 %v4905_v52, %v4857_v4  ;;  %v12947_v4 = vld [vmem:[%s16383_s8 + $0x4] sm:$0xf] }
 0x5d6   : > { %v11346_v62 = vor.u32 %v12947_v4, %v11343_v2  ;;  %v4925_v4 = vld [vmem:[%s15373_s14] sm:$0xff] }
 0x5d7   : > { %v4949_v59 = vmul.f32 0.5, %v15290_v26  ;;  %9820 = vst [vmem:[%s15184_s27 + $0x40] sm:$0xff] %v15290_v26 }
 0x5d8   : > { %v4863_v22 = vpop.f32.mrf.mxu2  ;;  %v4768_v48 = vpop.f32.mrf.mxu0  ;;  %5280 = vmatpush.bf16.msra.mxu1 %v11346_v62 }
 0x5d9   : > { %v13395_v41 = vpop.eup %13394  ;;  %v4973_v56 = vmul.f32 1.442695, %v4949_v59  ;;  %v4817_v14 = vpop.f32.mrf.mxu1  ;;  %v4864_v29 = vadd.f32 %v4863_v22, %v4815_v33  ;;  %v4769_v17 = vadd.f32 %v15155_v0, %v4768_v48 }
 0x5da   : > { %5019 = vrot.lane.b32.xlu1 %v13395_v41, %s13881_s5 }
 0x5db   : > { %13396 = vpow2.f32 %v4973_v56  ;;  %v4818_v35 = vadd.f32 %v4817_v14, %v4769_v17 }
 0x5dc   : > { %v4907_v55 = vpop.f32.mrf.mxu3 }
 0x5dd   : > { %v15297_v10 = vadd.f32 %v4907_v55, %v4859_v50 }
 0x5df   : > { %v4950_v60 = vmul.f32 0.5, %v15297_v10  ;;  %9821 = vst [vmem:[%s15184_s27 + $0x48] sm:$0xff] %v15297_v10 }
 0x5e0   : > { %v4866_v61 = vpop.f32.mrf.mxu2  ;;  %v4770_v36 = vpop.f32.mrf.mxu0 }
 0x5e1   : > { %v13397_v13 = vpop.eup %13396  ;;  %v4975_v31 = vmul.f32 1.442695, %v4950_v60  ;;  %v4867_v8 = vadd.f32 %v4866_v61, %v4818_v35  ;;  %v4819_v9 = vpop.f32.mrf.mxu1  ;;  %v4771_v11 = vadd.f32 %v15155_v0, %v4770_v36  ;;  %v12181_v36 = vld [vmem:[#allocation13 + $0x5d0] sm:$0xf] }
 0x5e2   : > { %5021 = vrot.lane.b32.xlu2 %v13397_v13, %s13881_s5 }
 0x5e3   : > { %13398 = vpow2.f32 %v4975_v31  ;;  %v4820_v15 = vadd.f32 %v4819_v9, %v4771_v11 }
 0x5e4   : > { %v4910_v25 = vpop.f32.mrf.mxu3 }
 0x5e5   : > { %v15310_v51 = vadd.f32 %v4910_v25, %v4862_v3 }
 0x5e7   : > { %v4951_v28 = vmul.f32 0.5, %v15310_v51  ;;  %9822 = vst [vmem:[%s15184_s27 + $0x50] sm:$0xff] %v15310_v51 }
 0x5e8   : > { %v4868_v38 = vpop.f32.mrf.mxu2  ;;  %v4773_v59 = vpop.f32.mrf.mxu0 }
 0x5e9   : > { %v13399_v53 = vpop.eup %13398  ;;  %v4977_v30 = vmul.f32 1.442695, %v4951_v28  ;;  %v4869_v7 = vadd.f32 %v4868_v38, %v4820_v15  ;;  %v4774_v55 = vadd.f32 %v15155_v0, %v4773_v59  ;;  %v4822_v21 = vpop.f32.mrf.mxu1  ;;  %v4926_v38 = vld [vmem:[%s15373_s14 + $0x8] sm:$0xff] }
 0x5ea   : > { %5023 = vrot.lane.b32.xlu0 %v13399_v53, %s13881_s5 }
 0x5eb   : > { %13400 = vpow2.f32 %v4977_v30  ;;  %v4823_v47 = vadd.f32 %v4822_v21, %v4774_v55  ;;  %v11581_v55 = vld [vmem:[#allocation13 + $0x120] sm:$0xf] }
 0x5ec   : > { %v4912_v43 = vpop.f32.mrf.mxu3 }
 0x5ed   : > { %v15329_v19 = vadd.f32 %v4912_v43, %v4864_v29  ;;  %v11989_v43 = vld [vmem:[#allocation13 + $0x450] sm:$0xf] }
 0x5ee   : > { %v11990_v17 = vor.u32 %v13104_v34, %v11989_v43  ;;  %v12996_v43 = vld [vmem:[#allocation13 + $0x104] sm:$0xf0] }
 0x5ef   : > { %v4952_v27 = vmul.f32 0.5, %v15329_v19  ;;  %9823 = vst [vmem:[%s15184_s27 + $0x58] sm:$0xff] %v15329_v19  ;;  %v13140_v34 = vld [vmem:[#allocation13 + $0x584] sm:$0xf0] }
 0x5f0   : > { %v4871_v60 = vpop.f32.mrf.mxu2  ;;  %v4775_v3 = vpop.f32.mrf.mxu0  ;;  %6780 = vmatpush.bf16.msrb.mxu2 %v11990_v17 }
 0x5f1   : > { %v13401_v20 = vpop.eup %13400  ;;  %v4979_v32 = vmul.f32 1.442695, %v4952_v27  ;;  %v4872_v6 = vadd.f32 %v4871_v60, %v4823_v47  ;;  %v4776_v48 = vadd.f32 %v15155_v0, %v4775_v3  ;;  %v4824_v23 = vpop.f32.mrf.mxu1  ;;  %v13152_v27 = vld [vmem:[#allocation13 + $0x5e4] sm:$0xf0]  ;;  %v12157_v60 = vld [vmem:[#allocation13 + $0x5a0] sm:$0xf] }
 0x5f2   : > { %5025 = vrot.lane.b32.xlu1 %v13401_v20, %s13881_s5  ;;  %v11606_v20 = vor.u32 %v13008_v37, %v11605_v12  ;;  %v12182_v35 = vor.u32 %v13152_v27, %v12181_v36  ;;  %v11773_v47 = vld [vmem:[#allocation13 + $0x2a0] sm:$0xf]  ;;  %v4928_v3 = vld [vmem:[%s15373_s14 + $0x18] sm:$0xff] }
 0x5f3   : > { %13402 = vpow2.f32 %v4979_v32  ;;  %v4825_v33 = vadd.f32 %v4824_v23, %v4776_v48  ;;  %v11797_v32 = vld [vmem:[#allocation13 + $0x2d0] sm:$0xf]  ;;  %v13044_v36 = vld [vmem:[#allocation13 + $0x284] sm:$0xf0] }
 0x5f4   : > { %v4915_v52 = vpop.f32.mrf.mxu3  ;;  %6682 = vmatpush.bf16.msrb.mxu0 %v11606_v20  ;;  %6829 = vmatpush.bf16.msrb.mxu3 %v12182_v35  ;;  %v11749_v37 = vld [vmem:[#allocation13 + $0x270] sm:$0xf] }
 0x5f5   : > { %v15342_v18 = vadd.f32 %v4915_v52, %v4867_v8  ;;  %v13056_v8 = vld [vmem:[#allocation13 + $0x2e4] sm:$0xf0]  ;;  %v11750_v27 = vor.u32 %v13044_v36, %v11749_v37 }
 0x5f6   : > { %v11798_v9 = vor.u32 %v13056_v8, %v11797_v32 }
 0x5f7   : > { %v4953_v45 = vmul.f32 0.5, %v15342_v18  ;;  %9824 = vst [vmem:[%s15184_s27 + $0x60] sm:$0xff] %v15342_v18 }
 0x5f8   : > { %v4873_v28 = vpop.f32.mrf.mxu2  ;;  %6731 = vmatpush.bf16.msrb.mxu1 %v11798_v9  ;;  %v4931_v9 = vld [vmem:[%s15373_s14 + $0x30] sm:$0xff] }
 0x5f9   : > { %v13403_v41 = vpop.eup %13402  ;;  %v4981_v56 = vmul.f32 1.442695, %v4953_v45  ;;  %v4874_v30 = vadd.f32 %v4873_v28, %v4825_v33 }
 0x5fa   : > { %5027 = vrot.lane.b32.xlu2 %v13403_v41, %s13881_s5 }
 0x5fb   : > { %13404 = vpow2.f32 %v4981_v56  ;;  %v4927_v56 = vld [vmem:[%s15373_s14 + $0x10] sm:$0xff] }
 0x5fc   : > { %v4917_v50 = vpop.f32.mrf.mxu3 }
 0x5fd   : > { %v15349_v39 = vadd.f32 %v4917_v50, %v4869_v7  ;;  %v11965_v7 = vld [vmem:[#allocation13 + $0x420] sm:$0xf]  ;;  %v13098_v50 = vld [vmem:[#allocation13 + $0x434] sm:$0xf0] }
 0x5fe   : > { %v11966_v21 = vor.u32 %v13098_v50, %v11965_v7  ;;  %v13038_v7 = vld [vmem:[#allocation13 + $0x254] sm:$0xf0] }
 0x5ff   : > { %v4954_v22 = vmul.f32 0.5, %v15349_v39  ;;  %9825 = vst [vmem:[%s15184_s27 + $0x68] sm:$0xff] %v15349_v39 }
 0x600   : > { %6781 = vmatpush.bf16.msrb.mxu2 %v11966_v21 }
 0x601   : > { %v13405_v13 = vpop.eup %13404  ;;  %v4983_v31 = vmul.f32 1.442695, %v4954_v22 }
 0x602   : > { %5029 = vrot.lane.b32.xlu0 %v13405_v13, %s13881_s5 }
 0x603   : > { %13406 = vpow2.f32 %v4983_v31  ;;  %v13050_v31 = vld [vmem:[#allocation13 + $0x2b4] sm:$0xf0] }
 0x604   : > { %v4920_v57 = vpop.f32.mrf.mxu3 }
 0x605   : > { %v15356_v25 = vadd.f32 %v4920_v57, %v4872_v6  ;;  %v11774_v6 = vor.u32 %v13050_v31, %v11773_v47  ;;  %v13080_v47 = vld [vmem:[#allocation13 + $0x3a4] sm:$0xf0]  ;;  %v11509_v31 = vld [vmem:[#allocation13 + $0x90] sm:$0xf] }
 0x607   : > { %v4955_v46 = vmul.f32 0.5, %v15356_v25  ;;  %9826 = vst [vmem:[%s15184_s27 + $0x70] sm:$0xff] %v15356_v25  ;;  %6732 = vmatpush.bf16.msrb.mxu1 %v11774_v6 }
 0x609   : > { %v13407_v53 = vpop.eup %13406  ;;  %v4985_v14 = vmul.f32 1.442695, %v4955_v46 }
 0x60a   : > { %5031 = vrot.lane.b32.xlu1 %v13407_v53, %s13881_s5 }
 0x60b   : > { %13408 = vpow2.f32 %v4985_v14  ;;  %v4929_v14 = vld [vmem:[%s15373_s14 + $0x20] sm:$0xff]  ;;  %6733 = vmatpush.bf16.msrb.mxu1 %v11750_v27  ;;  %v11677_v27 = vld [vmem:[#allocation13 + $0x1e0] sm:$0xf] }
 0x60c   : > { %v4922_v61 = vpop.f32.mrf.mxu3 }
 0x60d   : > { %v15362_v29 = vadd.f32 %v4922_v61, %v4874_v30  ;;  %v4930_v30 = vld [vmem:[%s15373_s14 + $0x28] sm:$0xff] }
 0x60f   : > { %v4956_v0 = vmul.f32 0.5, %v15362_v29  ;;  %9827 = vst [vmem:[%s15184_s27 + $0x78] sm:$0xff] %v15362_v29  ;;  %s16590_s27 = sld [smem:[#allocation62_spill]] }
 0x611   : > { %v13409_v44 = vpop.eup %13408  ;;  %v4987_v24 = vmul.f32 1.442695, %v4956_v0  ;;  %v11941_v0 = vld [vmem:[#allocation13 + $0x3f0] sm:$0xf] }
 0x612   : > { %5033 = vrot.lane.b32.xlu2 %v13409_v44, %s13881_s5  ;;  %v13092_v44 = vld [vmem:[#allocation13 + $0x404] sm:$0xf0] }
 0x613   : > { %13410 = vpow2.f32 %v4987_v24  ;;  %v11557_v24 = vld [vmem:[#allocation13 + $0xf0] sm:$0xf] }
 0x614   : > { %v5006_v16 = vpop.permute.xlu0 %5005  ;;  %v11558_v12 = vor.u32 %v12996_v43, %v11557_v24  ;;  %v13074_v43 = vld [vmem:[#allocation13 + $0x374] sm:$0xf0] }
 0x615   : > { %v5053_v52 = vmul.f32 %v5006_v16, %v4925_v4  ;;  %v11942_v16 = vor.u32 %v13092_v44, %v11941_v0 }
 0x617   : > { %v5069_v45 = vadd.f32 %v5053_v52, %v15187_v42  ;;  %v13002_v42 = vld [vmem:[#allocation13 + $0x134] sm:$0xf0]  ;;  %6782 = vmatpush.bf16.msrb.mxu2 %v11942_v16  ;;  %v11869_v16 = vld [vmem:[#allocation13 + $0x360] sm:$0xf] }
 0x618   : > { %v11582_v22 = vor.u32 %v13002_v42, %v11581_v55  ;;  %v13086_v52 = vld [vmem:[#allocation13 + $0x3d4] sm:$0xf0] }
 0x619   : > { %v13411_v2 = vpop.eup %13410 }
 0x61a   : > { %5035 = vrot.lane.b32.xlu0 %v13411_v2, %s13881_s5  ;;  %6683 = vmatpush.bf16.msrb.mxu0 %v11582_v22  ;;  %v4932_v2 = vld [vmem:[%s15373_s14 + $0x38] sm:$0xff]  ;;  %v4933_v22 = vld [vmem:[%s15373_s14 + $0x40] sm:$0xff]  ;;  %s9849_s5 = sshll.u32 %s9846_s29, 4  ;;  %s9850_s5 = int_to_ptr.hbm [resolvable:$true] %s9849_s5 }
 0x61b   : > { %s13798_s22 = sshra.s32 %s9850_s5, 4  ;;  %s13799_s22 = int_to_ptr.hbm [resolvable:$true] %s13798_s22 }
 0x61c   : > { %v5008_v62 = vpop.permute.xlu0 %5007  ;;  %v5014_v48 = vpop.permute.xlu2 %5013  ;;  %s13800_s13 = scalar_lea.hbm %s13799_s22, 256  ;;  %p13805_p8 = scmp.lt.s32.totalorder %s13799_s22, %s16644_s17 }
 0x61d   : > { %v5054_v11 = vmul.f32 %v5008_v62, %v4926_v38  ;;  %v5057_v20 = vmul.f32 %v5014_v48, %v4929_v14  ;;  %v11917_v38 = vld [vmem:[#allocation13 + $0x3c0] sm:$0xf]  ;;  %v13128_v48 = vld [vmem:[#allocation13 + $0x524] sm:$0xf0]  ;;  %p13801_p3 = scmp.ne.s32.totalorder %s13799_s22, %s13800_s13 }
 0x61e   : > { %6684 = vmatpush.bf16.msrb.mxu0 %v11558_v12  ;;  %v11533_v62 = vld [vmem:[#allocation13 + $0xc0] sm:$0xf] }
 0x61f   : > { %v5070_v59 = vadd.f32 %v5054_v11, %v15193_v49  ;;  %v13146_v49 = vld [vmem:[#allocation13 + $0x5b4] sm:$0xf0]  ;;  %v5073_v32 = vadd.f32 %v5057_v20, %v15238_v5  ;;  %v11918_v11 = vor.u32 %v13086_v52, %v11917_v38  ;;  %v12061_v12 = vld [vmem:[#allocation13 + $0x4e0] sm:$0xf]  ;;  %p13802_p5 = pnand %p13801_p3, %p14069_p13 }
 0x620   : > { %v12158_v13 = vor.u32 %v13146_v49, %v12157_v60  ;;  %v13026_v20 = vld [vmem:[#allocation13 + $0x1f4] sm:$0xf0] }
 0x621   : > { %v5085_v41 = vpack.c.bf16 %v5070_v59, %v5069_v45  ;;  %v12990_v45 = vld [vmem:[#allocation13 + $0xd4] sm:$0xf0]  ;;  %6783 = vmatpush.bf16.msrb.mxu2 %v11918_v11  ;;  %v13068_v11 = vld [vmem:[#allocation13 + $0x344] sm:$0xf0]  ;;  %p13803_p12 = pneg %p13802_p5 }
 0x622   : > { %6830 = vmatpush.bf16.msrb.mxu3 %v12158_v13  ;;  %v13134_v59 = vld [vmem:[#allocation13 + $0x554] sm:$0xf0]  ;;  %v11893_v13 = vld [vmem:[#allocation13 + $0x390] sm:$0xf] }
 0x623   : > { %11403 = vmatmul.msk.bf16.vlgmr.msra.gmra.mxu0 %vm5199_vm0, %v5085_v41  ;;  %11411 = vmatmul.msk.bf16.vlgmr.msra.gmra.mxu1 %vm5199_vm0, %v5085_v41  ;;  %v11894_v6 = vor.u32 %v13080_v47, %v11893_v13 }
 0x624   : > { %11419 = vmatmul.msk.bf16.vlgmr.msra.gmra.mxu2 %vm5199_vm0, %v5085_v41  ;;  %11427 = vmatmul.msk.bf16.vlgmr.msra.gmra.mxu3 %vm5199_vm0, %v5085_v41  ;;  %v5010_v15 = vpop.permute.xlu1 %5009  ;;  %v5016_v61 = vpop.permute.xlu2 %5015  ;;  %v11534_v41 = vor.u32 %v12990_v45, %v11533_v62  ;;  %v11845_v62 = vld [vmem:[#allocation13 + $0x330] sm:$0xf] }
 0x625   : > { %v5055_v57 = vmul.f32 %v5010_v15, %v4927_v56  ;;  %v11725_v56 = vld [vmem:[#allocation13 + $0x240] sm:$0xf]  ;;  %6784 = vmatpush.bf16.msrb.mxu2 %v11894_v6  ;;  %v11461_v45 = vld [vmem:[#allocation13 + $0x30] sm:$0xf] }
 0x626   : > { %v11726_v55 = vor.u32 %v13038_v7, %v11725_v56  ;;  %6685 = vmatpush.bf16.msrb.mxu0 %v11534_v41  ;;  %v13020_v56 = vld [vmem:[#allocation13 + $0x1c4] sm:$0xf0] }
 0x627   : > { %v5071_v28 = vadd.f32 %v5055_v57, %v15206_v40  ;;  %v12133_v40 = vld [vmem:[#allocation13 + $0x570] sm:$0xf]  ;;  %v12984_v57 = vld [vmem:[#allocation13 + $0xa4] sm:$0xf0] }
 0x628   : > { %v12134_v17 = vor.u32 %v13140_v34, %v12133_v40  ;;  %6734 = vmatpush.bf16.msrb.mxu1 %v11726_v55  ;;  %v11485_v40 = vld [vmem:[#allocation13 + $0x60] sm:$0xf]  ;;  %v11870_v34 = vor.u32 %v13074_v43, %v11869_v16  ;;  %v13101_v43 = vld [vmem:[#allocation13 + $0x454] sm:$0xf] }
 0x62a   : > { %6831 = vmatpush.bf16.msrb.mxu3 %v12134_v17  ;;  %v13122_v17 = vld [vmem:[#allocation13 + $0x4f4] sm:$0xf0]  ;;  %6785 = vmatpush.bf16.msrb.mxu2 %v11870_v34 }
 0x62b   : > { %v12062_v36 = vor.u32 %v13122_v17, %v12061_v12  ;;  %v11607_v12 = vld [vmem:[#allocation13 + $0x168] sm:$0xf0]  ;;  %v13149_v17 = vld [vmem:[#allocation13 + $0x5d4] sm:$0xf] }
 0x62c   : > { %v5012_v46 = vpop.permute.xlu1 %5011 }
 0x62d   : > { %v5056_v23 = vmul.f32 %v5012_v46, %v4928_v3 }
 0x62f   : > { %v5072_v53 = vadd.f32 %v5056_v23, %v15225_v1  ;;  %v5058_v1 = vmul.f32 %v5016_v61, %v4930_v30  ;;  %v11701_v23 = vld [vmem:[#allocation13 + $0x210] sm:$0xf] }
 0x631   : > { %v5086_v33 = vpack.c.bf16 %v5072_v53, %v5071_v28  ;;  %v5074_v35 = vadd.f32 %v5058_v1, %v15245_v58  ;;  %v12109_v58 = vld [vmem:[#allocation13 + $0x540] sm:$0xf]  ;;  %v13032_v28 = vld [vmem:[#allocation13 + $0x224] sm:$0xf0]  ;;  %v12978_v1 = vld [vmem:[#allocation13 + $0x74] sm:$0xf0] }
 0x632   : > { %v12110_v15 = vor.u32 %v13134_v59, %v12109_v58  ;;  %v4934_v53 = vld [vmem:[%s15373_s14 + $0x48] sm:$0xff]  ;;  %v11846_v58 = vor.u32 %v13068_v11, %v11845_v62  ;;  %v12972_v59 = vld [vmem:[#allocation13 + $0x44] sm:$0xf0] }
 0x633   : > { %11404 = vmatmul.msk.bf16.gmra.mxu0 %vm5199_vm0, %v5086_v33  ;;  %11412 = vmatmul.msk.bf16.gmra.mxu1 %vm5199_vm0, %v5086_v33  ;;  %v5087_v8 = vpack.c.bf16 %v5074_v35, %v5073_v32  ;;  %v11678_v35 = vor.u32 %v13026_v20, %v11677_v27  ;;  %v4936_v32 = vld [vmem:[%s15373_s14 + $0x58] sm:$0xff]  ;;  %v11462_v41 = vor.u32 %v12972_v59, %v11461_v45  ;;  %v5109_v27 = vld [vmem:[#allocation11] sm:$0xf] }
 0x634   : > { %11420 = vmatmul.msk.bf16.gmra.mxu2 %vm5199_vm0, %v5086_v33  ;;  %11428 = vmatmul.msk.bf16.gmra.mxu3 %vm5199_vm0, %v5086_v33  ;;  %v11702_v33 = vor.u32 %v13032_v28, %v11701_v23  ;;  %v13110_v28 = vld [vmem:[#allocation13 + $0x494] sm:$0xf0]  ;;  %v15446_v59 = vperm.slane %v5109_v27, 2 }
 0x635   : > { %6832 = vmatpush.bf16.msrb.mxu3 %v12110_v15  ;;  %v11653_v15 = vld [vmem:[#allocation13 + $0x1b0] sm:$0xf]  ;;  %6786 = vmatpush.bf16.msrb.mxu2 %v11846_v58 }
 0x636   : > { %6735 = vmatpush.bf16.msrb.mxu1 %v11702_v33  ;;  %v11654_v7 = vor.u32 %v13020_v56, %v11653_v15  ;;  %v13014_v33 = vld [vmem:[#allocation13 + $0x194] sm:$0xf0]  ;;  %v12999_v56 = vld [vmem:[#allocation13 + $0x124] sm:$0xf] }
 0x63a   : > { %6736 = vmatpush.bf16.msrb.mxu1 %v11678_v35 }
 0x63c   : > { %v5022_v3 = vpop.permute.xlu2 %5021 }
 0x63d   : > { %v5061_v14 = vmul.f32 %v5022_v3, %v4933_v22  ;;  %v13062_v3 = vld [vmem:[#allocation13 + $0x314] sm:$0xf0] }
 0x63e   : > { %6737 = vmatpush.bf16.msrb.mxu1 %v11654_v7  ;;  %v11583_v7 = vld [vmem:[#allocation13 + $0x138] sm:$0xf0] }
 0x63f   : > { %v5077_v0 = vadd.f32 %v5061_v14, %v15290_v26  ;;  %v4935_v26 = vld [vmem:[%s15373_s14 + $0x50] sm:$0xff] }
 0x643   : > { %11405 = vmatmul.msk.bf16.gmra.mxu0 %vm5199_vm0, %v5087_v8  ;;  %11413 = vmatmul.msk.bf16.gmra.mxu1 %vm5199_vm0, %v5087_v8 }
 0x644   : > { %11421 = vmatmul.msk.bf16.gmra.mxu2 %vm5199_vm0, %v5087_v8  ;;  %11429 = vmatmul.msk.bf16.gmra.mxu3 %vm5199_vm0, %v5087_v8  ;;  %v5018_v4 = vpop.permute.xlu0 %5017 }
 0x645   : > { %v5059_v5 = vmul.f32 %v5018_v4, %v4931_v9 }
 0x647   : > { %v5075_v42 = vadd.f32 %v5059_v5, %v15258_v54  ;;  %v12085_v54 = vld [vmem:[#allocation13 + $0x510] sm:$0xf] }
 0x648   : > { %v12086_v46 = vor.u32 %v13128_v48, %v12085_v54  ;;  %v12037_v5 = vld [vmem:[#allocation13 + $0x4b0] sm:$0xf] }
 0x649   : > { %v4940_v48 = vld [vmem:[%s15373_s14 + $0x78] sm:$0xff] }
 0x64a   : > { %6833 = vmatpush.bf16.msrb.mxu3 %v12086_v46  ;;  %v12013_v46 = vld [vmem:[#allocation13 + $0x480] sm:$0xf] }
 0x64c   : > { %v5020_v50 = vpop.permute.xlu1 %5019 }
 0x64d   : > { %v5060_v21 = vmul.f32 %v5020_v50, %v4932_v2  ;;  %v4937_v50 = vld [vmem:[%s15373_s14 + $0x60] sm:$0xff] }
 0x64e   : > { %6834 = vmatpush.bf16.msrb.mxu3 %v12062_v36 }
 0x64f   : > { %v5076_v60 = vadd.f32 %v5060_v21, %v15277_v63  ;;  %v11510_v63 = vor.u32 %v12984_v57, %v11509_v31  ;;  %v4938_v21 = vld [vmem:[%s15373_s14 + $0x68] sm:$0xff]  ;;  %v4939_v57 = vld [vmem:[%s15373_s14 + $0x70] sm:$0xff] }
 0x650   : > { %v11821_v31 = vld [vmem:[#allocation13 + $0x300] sm:$0xf] }
 0x651   : > { %v5088_v49 = vpack.c.bf16 %v5076_v60, %v5075_v42  ;;  %6686 = vmatpush.bf16.msrb.mxu0 %v11510_v63  ;;  %v11822_v6 = vor.u32 %v13062_v3, %v11821_v31  ;;  %v11437_v63 = vld [vmem:[#allocation13] sm:$0xf]  ;;  %v11775_v31 = vld [vmem:[#allocation13 + $0x2b8] sm:$0xf0] }
 0x653   : > { %11406 = vmatmul.msk.bf16.gmra.mxu0 %vm5199_vm0, %v5088_v49  ;;  %11414 = vmatmul.msk.bf16.gmra.mxu1 %vm5199_vm0, %v5088_v49 }
 0x654   : > { %11422 = vmatmul.msk.bf16.gmra.mxu2 %vm5199_vm0, %v5088_v49  ;;  %11430 = vmatmul.msk.bf16.gmra.mxu3 %vm5199_vm0, %v5088_v49  ;;  %v5028_v8 = vpop.permute.xlu2 %5027 }
 0x655   : > { %v5064_v4 = vmul.f32 %v5028_v8, %v4936_v32  ;;  %6787 = vmatpush.bf16.msrb.mxu2 %v11822_v6  ;;  %v15440_v32 = vperm.slane %v5109_v27, 0  ;;  %v15442_v8 = vperm.slane %v5109_v27, 1 }
 0x657   : > { %v5080_v38 = vadd.f32 %v5064_v4, %v15329_v19 }
 0x65c   : > { %v5024_v30 = vpop.permute.xlu0 %5023 }
 0x65d   : > { %v5062_v61 = vmul.f32 %v5024_v30, %v4934_v53  ;;  %v11629_v53 = vld [vmem:[#allocation13 + $0x180] sm:$0xf]  ;;  %v12014_v30 = vor.u32 %v13110_v28, %v12013_v46 }
 0x65f   : > { %v5078_v44 = vadd.f32 %v5062_v61, %v15297_v10  ;;  %v11486_v10 = vor.u32 %v12978_v1, %v11485_v40  ;;  %v11630_v61 = vor.u32 %v13014_v33, %v11629_v53  ;;  %v11991_v40 = vld [vmem:[#allocation13 + $0x468] sm:$0xf0]  ;;  %v13005_v1 = vld [vmem:[#allocation13 + $0x154] sm:$0xf] }
 0x660   : > { %v11994_v34 = vor.u32 %v13101_v43, %v11991_v40 }
 0x661   : > { %v5089_v24 = vpack.c.bf16 %v5078_v44, %v5077_v0  ;;  %6687 = vmatpush.bf16.msrb.mxu0 %v11486_v10  ;;  %6738 = vmatpush.bf16.msrb.mxu1 %v11630_v61  ;;  %v11799_v10 = vld [vmem:[#allocation13 + $0x2e8] sm:$0xf0] }
 0x662   : > { %6976 = vmatpush.bf16.msra.mxu2 %v11994_v34 }
 0x663   : > { %11407 = vmatmul.msk.bf16.gmra.mxu0 %vm5199_vm0, %v5089_v24  ;;  %11415 = vmatmul.msk.bf16.gmra.mxu1 %vm5199_vm0, %v5089_v24 }
 0x664   : > { %11423 = vmatmul.msk.bf16.gmra.mxu2 %vm5199_vm0, %v5089_v24  ;;  %11431 = vmatmul.msk.bf16.gmra.mxu3 %vm5199_vm0, %v5089_v24  ;;  %v5026_v37 = vpop.permute.xlu1 %5025 }
 0x665   : > { %v5063_v9 = vmul.f32 %v5026_v37, %v4935_v26  ;;  %6688 = vmatpush.bf16.msrb.mxu0 %v11462_v41  ;;  %v11610_v26 = vor.u32 %v13005_v1, %v11607_v12 }
 0x667   : > { %v5079_v2 = vadd.f32 %v5063_v9, %v15310_v51  ;;  %v13116_v51 = vld [vmem:[#allocation13 + $0x4c4] sm:$0xf0] }
 0x668   : > { %v12038_v19 = vor.u32 %v13116_v51, %v12037_v5  ;;  %v15448_v5 = vperm.slane %v5109_v27, 3 }
 0x669   : > { %v5090_v52 = vpack.c.bf16 %v5080_v38, %v5079_v2  ;;  %v13095_v2 = vld [vmem:[#allocation13 + $0x424] sm:$0xf]  ;;  %v11967_v38 = vld [vmem:[#allocation13 + $0x438] sm:$0xf0] }
 0x66a   : > { %6835 = vmatpush.bf16.msrb.mxu3 %v12038_v19  ;;  %v11970_v11 = vor.u32 %v13095_v2, %v11967_v38  ;;  %v13041_v38 = vld [vmem:[#allocation13 + $0x274] sm:$0xf] }
 0x66c   : > { %v5034_v54 = vpop.permute.xlu2 %5033  ;;  %6977 = vmatpush.bf16.msra.mxu2 %v11970_v11 }
 0x66e   : > { %6836 = vmatpush.bf16.msrb.mxu3 %v12014_v30 }
 0x673   : > { %11408 = vmatmul.msk.bf16.gmra.mxu0 %vm5199_vm0, %v5090_v52  ;;  %11416 = vmatmul.msk.bf16.gmra.mxu1 %vm5199_vm0, %v5090_v52 }
 0x674   : > { %11424 = vmatmul.msk.bf16.gmra.mxu2 %vm5199_vm0, %v5090_v52  ;;  %11432 = vmatmul.msk.bf16.gmra.mxu3 %vm5199_vm0, %v5090_v52  ;;  %v5030_v55 = vpop.permute.xlu0 %5029 }
 0x675   : > { %v5065_v42 = vmul.f32 %v5030_v55, %v4937_v50 }
 0x677   : > { %v5081_v22 = vadd.f32 %v5065_v42, %v15342_v18  ;;  %v12966_v18 = vld [vmem:[#allocation13 + $0x14] sm:$0xf0]  ;;  %v13143_v42 = vld [vmem:[#allocation13 + $0x5a4] sm:$0xf] }
 0x678   : > { %v11438_v23 = vor.u32 %v12966_v18, %v11437_v63 }
 0x67a   : > { %6689 = vmatpush.bf16.msrb.mxu0 %v11438_v23 }
 0x67c   : > { %v5032_v60 = vpop.permute.xlu1 %5031 }
 0x67d   : > { %v5066_v49 = vmul.f32 %v5032_v60, %v4938_v21  ;;  %v11586_v21 = vor.u32 %v12999_v56, %v11583_v7  ;;  %v12159_v60 = vld [vmem:[#allocation13 + $0x5b8] sm:$0xf0] }
 0x67e   : > { %6878 = vmatpush.bf16.msra.mxu0 %v11610_v26 }
 0x67f   : > { %v5082_v13 = vadd.f32 %v5066_v49, %v15349_v39  ;;  %v5067_v39 = vmul.f32 %v5034_v54, %v4939_v57  ;;  %v12162_v49 = vor.u32 %v13143_v42, %v12159_v60 }
 0x681   : > { %v5091_v47 = vpack.c.bf16 %v5082_v13, %v5081_v22  ;;  %v5083_v44 = vadd.f32 %v5067_v39, %v15356_v25  ;;  %v12183_v25 = vld [vmem:[#allocation13 + $0x5e8] sm:$0xf0] }
 0x682   : > { %v12186_v37 = vor.u32 %v13149_v17, %v12183_v25  ;;  %6879 = vmatpush.bf16.msra.mxu0 %v11586_v21 }
 0x683   : > { %11409 = vmatmul.msk.bf16.gmra.mxu0 %vm5199_vm0, %v5091_v47  ;;  %11417 = vmatmul.msk.bf16.gmra.mxu1 %vm5199_vm0, %v5091_v47 }
 0x684   : > { %11425 = vmatmul.msk.bf16.gmra.mxu2 %vm5199_vm0, %v5091_v47  ;;  %11433 = vmatmul.msk.bf16.gmra.mxu3 %vm5199_vm0, %v5091_v47  ;;  %v13047_v47 = vld [vmem:[#allocation13 + $0x2a4] sm:$0xf] }
 0x685   : > { %7025 = vmatpush.bf16.msra.mxu3 %v12186_v37  ;;  %v11778_v57 = vor.u32 %v13047_v47, %v11775_v31  ;;  %v12993_v37 = vld [vmem:[#allocation13 + $0xf4] sm:$0xf]  ;;  %v13083_v31 = vld [vmem:[#allocation13 + $0x3c4] sm:$0xf] }
 0x689   : > { %7026 = vmatpush.bf16.msra.mxu3 %v12162_v49 }
 0x68c   : > { %v5036_v14 = vpop.permute.xlu0 %5035 }
 0x68d   : > { %v5068_v0 = vmul.f32 %v5036_v14, %v4940_v48 }
 0x68f   : > { %v5084_v24 = vadd.f32 %v5068_v0, %v15362_v29  ;;  %v13053_v29 = vld [vmem:[#allocation13 + $0x2d4] sm:$0xf] }
 0x690   : > { %v11802_v36 = vor.u32 %v13053_v29, %v11799_v10  ;;  %v11559_v29 = vld [vmem:[#allocation13 + $0x108] sm:$0xf0] }
 0x691   : > { %v5092_v16 = vpack.c.bf16 %v5084_v24, %v5083_v44  ;;  %v13089_v44 = vld [vmem:[#allocation13 + $0x3f4] sm:$0xf]  ;;  %v11943_v24 = vld [vmem:[#allocation13 + $0x408] sm:$0xf0]  ;;  %v11562_v27 = vor.u32 %v12993_v37, %v11559_v29 }
 0x692   : > { %6927 = vmatpush.bf16.msra.mxu1 %v11802_v36  ;;  %v11946_v40 = vor.u32 %v13089_v44, %v11943_v24  ;;  %v13131_v44 = vld [vmem:[#allocation13 + $0x544] sm:$0xf]  ;;  %v12111_v24 = vld [vmem:[#allocation13 + $0x558] sm:$0xf0] }
 0x693   : > { %11410 = vmatmul.msk.bf16.gmra.mxu0 %vm5199_vm0, %v5092_v16  ;;  %11418 = vmatmul.msk.bf16.gmra.mxu1 %vm5199_vm0, %v5092_v16 }
 0x694   : > { %11426 = vmatmul.msk.bf16.gmra.mxu2 %vm5199_vm0, %v5092_v16  ;;  %11434 = vmatmul.msk.bf16.gmra.mxu3 %vm5199_vm0, %v5092_v16 }
 0x695   : > { %6978 = vmatpush.bf16.msra.mxu2 %v11946_v40  ;;  %6880 = vmatpush.bf16.msra.mxu0 %v11562_v27 }
 0x696   : > { %6928 = vmatpush.bf16.msra.mxu1 %v11778_v57 }
 0x6a0   : > { %v5233_v20 = vpop.f32.mrf.mxu0  ;;  %v5282_v35 = vpop.f32.mrf.mxu1 }
 0x6a1   : > { %v5234_v9 = vadd.f32 %v5233_v20, %v15440_v32  ;;  %v5283_v4 = vadd.f32 %v5282_v35, %v15442_v8  ;;  %v13137_v20 = vld [vmem:[#allocation13 + $0x574] sm:$0xf]  ;;  %v12135_v35 = vld [vmem:[#allocation13 + $0x588] sm:$0xf0] }
 0x6a3   : > { %v5420_v19 = vmax.f32 %v5234_v9, 0.0  ;;  %v5421_v15 = vmax.f32 %v5283_v4, 0.0  ;;  %v12138_v9 = vor.u32 %v13137_v20, %v12135_v35 }
 0x6a5   : > { %7027 = vmatpush.bf16.msra.mxu3 %v12138_v9 }
 0x6a7   : > { %v5331_v52 = vpop.f32.mrf.mxu2  ;;  %v5380_v62 = vpop.f32.mrf.mxu3 }
 0x6a8   : > { %v5235_v45 = vpop.f32.mrf.mxu0  ;;  %v5284_v58 = vpop.f32.mrf.mxu1  ;;  %v5332_v3 = vadd.f32 %v5331_v52, %v15446_v59  ;;  %v5381_v6 = vadd.f32 %v5380_v62, %v15448_v5  ;;  %v11751_v52 = vld [vmem:[#allocation13 + $0x288] sm:$0xf0] }
 0x6a9   : > { %v5236_v51 = vadd.f32 %v5235_v45, %v15440_v32  ;;  %v5285_v41 = vadd.f32 %v5284_v58, %v15442_v8  ;;  %v11754_v45 = vor.u32 %v13041_v38, %v11751_v52 }
 0x6aa   : > { %v5422_v23 = vmax.f32 %v5332_v3, 0.0  ;;  %v5423_v28 = vmax.f32 %v5381_v6, 0.0  ;;  %v11919_v3 = vld [vmem:[#allocation13 + $0x3d8] sm:$0xf0] }
 0x6ab   : > { %v5424_v50 = vmax.f32 %v5236_v51, 0.0  ;;  %v5425_v55 = vmax.f32 %v5285_v41, 0.0  ;;  %6929 = vmatpush.bf16.msra.mxu1 %v11754_v45 }
 0x6ad   : > { %v15452_v22 = vpack.c.bf16 %v5424_v50, %v5420_v19  ;;  %v15454_v13 = vpack.c.bf16 %v5425_v55, %v5421_v15 }
 0x6af   : > { %v5333_v54 = vpop.f32.mrf.mxu2  ;;  %v5382_v48 = vpop.f32.mrf.mxu3  ;;  %6690 = vmatmul.bf16.vlgmr.msrb.gmra.mxu0 %v15452_v22  ;;  %6739 = vmatmul.bf16.vlgmr.msrb.gmra.mxu1 %v15454_v13 }
 0x6b0   : > { %v5334_v63 = vadd.f32 %v5333_v54, %v15446_v59  ;;  %v5383_v18 = vadd.f32 %v5382_v48, %v15448_v5  ;;  %v5238_v46 = vpop.f32.mrf.mxu0  ;;  %v5287_v39 = vpop.f32.mrf.mxu1  ;;  %v11922_v54 = vor.u32 %v13083_v31, %v11919_v3  ;;  %v11511_v31 = vld [vmem:[#allocation13 + $0xa8] sm:$0xf0] }
 0x6b1   : > { %v5239_v61 = vadd.f32 %v5238_v46, %v15440_v32  ;;  %v5288_v0 = vadd.f32 %v5287_v39, %v15442_v8 }
 0x6b2   : > { %v5426_v53 = vmax.f32 %v5334_v63, 0.0  ;;  %v5427_v33 = vmax.f32 %v5383_v18, 0.0  ;;  %6979 = vmatpush.bf16.msra.mxu2 %v11922_v54  ;;  %v13125_v54 = vld [vmem:[#allocation13 + $0x514] sm:$0xf] }
 0x6b3   : > { %v5428_v26 = vmax.f32 %v5239_v61, 0.0  ;;  %v5429_v25 = vmax.f32 %v5288_v0, 0.0 }
 0x6b4   : > { %v15462_v14 = vpack.c.bf16 %v5426_v53, %v5422_v23  ;;  %v15464_v30 = vpack.c.bf16 %v5427_v33, %v5423_v28  ;;  %v12987_v28 = vld [vmem:[#allocation13 + $0xc4] sm:$0xf]  ;;  %v11535_v53 = vld [vmem:[#allocation13 + $0xd8] sm:$0xf0] }
 0x6b5   : > { %v11538_v0 = vor.u32 %v12987_v28, %v11535_v53 }
 0x6b6   : > { %6788 = vmatmul.bf16.vlgmr.msrb.gmra.mxu2 %v15462_v14  ;;  %6837 = vmatmul.bf16.vlgmr.msrb.gmra.mxu3 %v15464_v30 }
 0x6b7   : > { %v5336_v16 = vpop.f32.mrf.mxu2  ;;  %v5385_v43 = vpop.f32.mrf.mxu3  ;;  %6881 = vmatpush.bf16.msra.mxu0 %v11538_v0 }
 0x6b8   : > { %v5240_v34 = vpop.f32.mrf.mxu0  ;;  %v5289_v1 = vpop.f32.mrf.mxu1  ;;  %v5337_v62 = vadd.f32 %v5336_v16, %v15446_v59  ;;  %v5386_v11 = vadd.f32 %v5385_v43, %v15448_v5  ;;  %v12114_v16 = vor.u32 %v13131_v44, %v12111_v24 }
 0x6b9   : > { %v5241_v12 = vadd.f32 %v5240_v34, %v15440_v32  ;;  %v5290_v17 = vadd.f32 %v5289_v1, %v15442_v8  ;;  %v13035_v34 = vld [vmem:[#allocation13 + $0x244] sm:$0xf]  ;;  %v11727_v1 = vld [vmem:[#allocation13 + $0x258] sm:$0xf0] }
 0x6ba   : > { %v5430_v7 = vmax.f32 %v5337_v62, 0.0  ;;  %v5431_v50 = vmax.f32 %v5386_v11, 0.0  ;;  %7028 = vmatpush.bf16.msra.mxu3 %v12114_v16 }
 0x6bb   : > { %v5432_v10 = vmax.f32 %v5241_v12, 0.0  ;;  %v5433_v36 = vmax.f32 %v5290_v17, 0.0 }
 0x6bd   : > { %v15472_v4 = vpack.c.bf16 %v5432_v10, %v5428_v26  ;;  %v15474_v2 = vpack.c.bf16 %v5433_v36, %v5429_v25  ;;  %v11730_v26 = vor.u32 %v13035_v34, %v11727_v1 }
 0x6bf   : > { %v5338_v58 = vpop.f32.mrf.mxu2  ;;  %v5387_v51 = vpop.f32.mrf.mxu3  ;;  %6695 = vmatmul.bf16.gmra.mxu0 %v15472_v4  ;;  %6744 = vmatmul.bf16.gmra.mxu1 %v15474_v2 }
 0x6c0   : > { %v5339_v41 = vadd.f32 %v5338_v58, %v15446_v59  ;;  %v5388_v19 = vadd.f32 %v5387_v51, %v15448_v5  ;;  %v5243_v15 = vpop.f32.mrf.mxu0  ;;  %v5292_v56 = vpop.f32.mrf.mxu1  ;;  %6930 = vmatpush.bf16.msra.mxu1 %v11730_v26  ;;  %v13077_v58 = vld [vmem:[#allocation13 + $0x394] sm:$0xf]  ;;  %v11895_v51 = vld [vmem:[#allocation13 + $0x3a8] sm:$0xf0] }
 0x6c1   : > { %v5244_v49 = vadd.f32 %v5243_v15, %v15440_v32  ;;  %v5293_v47 = vadd.f32 %v5292_v56, %v15442_v8  ;;  %v11898_v15 = vor.u32 %v13077_v58, %v11895_v51 }
 0x6c2   : > { %v5434_v55 = vmax.f32 %v5339_v41, 0.0  ;;  %v5435_v21 = vmax.f32 %v5388_v19, 0.0 }
 0x6c3   : > { %v5436_v39 = vmax.f32 %v5244_v49, 0.0  ;;  %v5437_v23 = vmax.f32 %v5293_v47, 0.0  ;;  %6980 = vmatpush.bf16.msra.mxu2 %v11898_v15  ;;  %v12981_v47 = vld [vmem:[#allocation13 + $0x94] sm:$0xf]  ;;  %v11487_v15 = vld [vmem:[#allocation13 + $0x78] sm:$0xf0] }
 0x6c4   : > { %v15482_v42 = vpack.c.bf16 %v5434_v55, %v5430_v7  ;;  %v15484_v60 = vpack.c.bf16 %v5435_v21, %v5431_v50 }
 0x6c6   : > { %6793 = vmatmul.bf16.gmra.mxu2 %v15482_v42  ;;  %6842 = vmatmul.bf16.gmra.mxu3 %v15484_v60 }
 0x6c7   : > { %v5341_v6 = vpop.f32.mrf.mxu2  ;;  %v5390_v57 = vpop.f32.mrf.mxu3 }
 0x6c8   : > { %v5245_v48 = vpop.f32.mrf.mxu0  ;;  %v5294_v63 = vpop.f32.mrf.mxu1  ;;  %v5342_v12 = vadd.f32 %v5341_v6, %v15446_v59  ;;  %v5391_v17 = vadd.f32 %v5390_v57, %v15448_v5  ;;  %v11514_v57 = vor.u32 %v12981_v47, %v11511_v31 }
 0x6c9   : > { %v5246_v18 = vadd.f32 %v5245_v48, %v15440_v32  ;;  %v5295_v46 = vadd.f32 %v5294_v63, %v15442_v8  ;;  %v12087_v48 = vld [vmem:[#allocation13 + $0x528] sm:$0xf0] }
 0x6ca   : > { %v5438_v20 = vmax.f32 %v5342_v12, 0.0  ;;  %v5439_v35 = vmax.f32 %v5391_v17, 0.0  ;;  %v12090_v63 = vor.u32 %v13125_v54, %v12087_v48  ;;  %6882 = vmatpush.bf16.msra.mxu0 %v11514_v57 }
 0x6cb   : > { %v5440_v33 = vmax.f32 %v5246_v18, 0.0  ;;  %v5441_v61 = vmax.f32 %v5295_v46, 0.0 }
 0x6cc   : > { %7029 = vmatpush.bf16.msra.mxu3 %v12090_v63 }
 0x6cd   : > { %v15492_v43 = vpack.c.bf16 %v5440_v33, %v5436_v39  ;;  %v15494_v40 = vpack.c.bf16 %v5441_v61, %v5437_v23  ;;  %v13029_v39 = vld [vmem:[#allocation13 + $0x214] sm:$0xf]  ;;  %v11703_v23 = vld [vmem:[#allocation13 + $0x228] sm:$0xf0] }
 0x6ce   : > { %v11706_v33 = vor.u32 %v13029_v39, %v11703_v23 }
 0x6cf   : > { %v5343_v25 = vpop.f32.mrf.mxu2  ;;  %v5392_v37 = vpop.f32.mrf.mxu3  ;;  %6700 = vmatmul.bf16.gmra.mxu0 %v15492_v43  ;;  %6749 = vmatmul.bf16.gmra.mxu1 %v15494_v40 }
 0x6d0   : > { %v5344_v29 = vadd.f32 %v5343_v25, %v15446_v59  ;;  %v5393_v10 = vadd.f32 %v5392_v37, %v15448_v5  ;;  %v5248_v36 = vpop.f32.mrf.mxu0  ;;  %v5297_v27 = vpop.f32.mrf.mxu1  ;;  %6931 = vmatpush.bf16.msra.mxu1 %v11706_v33 }
 0x6d1   : > { %v5249_v11 = vadd.f32 %v5248_v36, %v15440_v32  ;;  %v5298_v45 = vadd.f32 %v5297_v27, %v15442_v8  ;;  %v13071_v36 = vld [vmem:[#allocation13 + $0x364] sm:$0xf]  ;;  %v11871_v27 = vld [vmem:[#allocation13 + $0x378] sm:$0xf0] }
 0x6d2   : > { %v5442_v9 = vmax.f32 %v5344_v29, 0.0  ;;  %v5443_v38 = vmax.f32 %v5393_v10, 0.0 }
 0x6d3   : > { %v5444_v21 = vmax.f32 %v5249_v11, 0.0  ;;  %v5445_v49 = vmax.f32 %v5298_v45, 0.0 }
 0x6d4   : > { %v15502_v52 = vpack.c.bf16 %v5442_v9, %v5438_v20  ;;  %v15504_v62 = vpack.c.bf16 %v5443_v38, %v5439_v35  ;;  %v11874_v9 = vor.u32 %v13071_v36, %v11871_v27 }
 0x6d6   : > { %6798 = vmatmul.bf16.gmra.mxu2 %v15502_v52  ;;  %6847 = vmatmul.bf16.gmra.mxu3 %v15504_v62 }
 0x6d7   : > { %v5346_v41 = vpop.f32.mrf.mxu2  ;;  %v5395_v19 = vpop.f32.mrf.mxu3  ;;  %6981 = vmatpush.bf16.msra.mxu2 %v11874_v9 }
 0x6d8   : > { %v5250_v56 = vpop.f32.mrf.mxu0  ;;  %v5299_v7 = vpop.f32.mrf.mxu1  ;;  %v5347_v28 = vadd.f32 %v5346_v41, %v15446_v59  ;;  %v5396_v53 = vadd.f32 %v5395_v19, %v15448_v5  ;;  %v12975_v19 = vld [vmem:[#allocation13 + $0x64] sm:$0xf] }
 0x6d9   : > { %v5251_v50 = vadd.f32 %v5250_v56, %v15440_v32  ;;  %v5300_v55 = vadd.f32 %v5299_v7, %v15442_v8 }
 0x6da   : > { %v5446_v1 = vmax.f32 %v5347_v28, 0.0  ;;  %v5447_v12 = vmax.f32 %v5396_v53, 0.0 }
 0x6db   : > { %v5448_v3 = vmax.f32 %v5251_v50, 0.0  ;;  %v5449_v6 = vmax.f32 %v5300_v55, 0.0  ;;  %v11490_v50 = vor.u32 %v12975_v19, %v11487_v15  ;;  %v13119_v55 = vld [vmem:[#allocation13 + $0x4e4] sm:$0xf]  ;;  %v13113_v15 = vld [vmem:[#allocation13 + $0x4b4] sm:$0xf] }
 0x6dd   : > { %v15512_v18 = vpack.c.bf16 %v5448_v3, %v5444_v21  ;;  %v15514_v46 = vpack.c.bf16 %v5449_v6, %v5445_v49  ;;  %v12063_v21 = vld [vmem:[#allocation13 + $0x4f8] sm:$0xf0]  ;;  %6883 = vmatpush.bf16.msra.mxu0 %v11490_v50  ;;  %v13023_v3 = vld [vmem:[#allocation13 + $0x1e4] sm:$0xf] }
 0x6de   : > { %v12066_v49 = vor.u32 %v13119_v55, %v12063_v21  ;;  %v11679_v6 = vld [vmem:[#allocation13 + $0x1f8] sm:$0xf0]  ;;  %v13017_v21 = vld [vmem:[#allocation13 + $0x1b4] sm:$0xf] }
 0x6df   : > { %v5348_v61 = vpop.f32.mrf.mxu2  ;;  %v5397_v0 = vpop.f32.mrf.mxu3  ;;  %6705 = vmatmul.bf16.gmra.mxu0 %v15512_v18  ;;  %6754 = vmatmul.bf16.gmra.mxu1 %v15514_v46  ;;  %v11682_v48 = vor.u32 %v13023_v3, %v11679_v6 }
 0x6e0   : > { %v5349_v44 = vadd.f32 %v5348_v61, %v15446_v59  ;;  %v5398_v24 = vadd.f32 %v5397_v0, %v15448_v5  ;;  %v5253_v16 = vpop.f32.mrf.mxu0  ;;  %v5302_v34 = vpop.f32.mrf.mxu1  ;;  %7030 = vmatpush.bf16.msra.mxu3 %v12066_v49  ;;  %v11655_v49 = vld [vmem:[#allocation13 + $0x1c8] sm:$0xf0] }
 0x6e1   : > { %v5254_v29 = vadd.f32 %v5253_v16, %v15440_v32  ;;  %v5303_v10 = vadd.f32 %v5302_v34, %v15442_v8  ;;  %6932 = vmatpush.bf16.msra.mxu1 %v11682_v48 }
 0x6e2   : > { %v5450_v17 = vmax.f32 %v5349_v44, 0.0  ;;  %v5451_v26 = vmax.f32 %v5398_v24, 0.0 }
 0x6e3   : > { %v5452_v51 = vmax.f32 %v5254_v29, 0.0  ;;  %v5453_v41 = vmax.f32 %v5303_v10, 0.0 }
 0x6e4   : > { %v15522_v25 = vpack.c.bf16 %v5450_v17, %v5446_v1  ;;  %v15524_v37 = vpack.c.bf16 %v5451_v26, %v5447_v12  ;;  %v13065_v17 = vld [vmem:[#allocation13 + $0x334] sm:$0xf]  ;;  %v11847_v26 = vld [vmem:[#allocation13 + $0x348] sm:$0xf0] }
 0x6e5   : > { %v11850_v36 = vor.u32 %v13065_v17, %v11847_v26  ;;  %v12963_v17 = vld [vmem:[#allocation13 + $0x4] sm:$0xf] }
 0x6e6   : > { %6803 = vmatmul.bf16.gmra.mxu2 %v15522_v25  ;;  %6852 = vmatmul.bf16.gmra.mxu3 %v15524_v37 }
 0x6e7   : > { %v5351_v20 = vpop.f32.mrf.mxu2  ;;  %v5400_v35 = vpop.f32.mrf.mxu3  ;;  %6982 = vmatpush.bf16.msra.mxu2 %v11850_v36 }
 0x6e8   : > { %v5255_v38 = vpop.f32.mrf.mxu0  ;;  %v5304_v11 = vpop.f32.mrf.mxu1  ;;  %v5352_v57 = vadd.f32 %v5351_v20, %v15446_v59  ;;  %v5401_v54 = vadd.f32 %v5400_v35, %v15448_v5 }
 0x6e9   : > { %v5256_v45 = vadd.f32 %v5255_v38, %v15440_v32  ;;  %v5305_v58 = vadd.f32 %v5304_v11, %v15442_v8 }
 0x6ea   : > { %v5454_v61 = vmax.f32 %v5352_v57, 0.0  ;;  %v5455_v0 = vmax.f32 %v5401_v54, 0.0  ;;  %v11658_v57 = vor.u32 %v13017_v21, %v11655_v49 }
 0x6eb   : > { %v5456_v56 = vmax.f32 %v5256_v45, 0.0  ;;  %v5457_v7 = vmax.f32 %v5305_v58, 0.0  ;;  %v12969_v45 = vld [vmem:[#allocation13 + $0x34] sm:$0xf]  ;;  %v11463_v58 = vld [vmem:[#allocation13 + $0x48] sm:$0xf0] }
 0x6ec   : > { %v11466_v19 = vor.u32 %v12969_v45, %v11463_v58  ;;  %6933 = vmatpush.bf16.msra.mxu1 %v11658_v57 }
 0x6ed   : > { %v15532_v47 = vpack.c.bf16 %v5456_v56, %v5452_v51  ;;  %v15534_v31 = vpack.c.bf16 %v5457_v7, %v5453_v41  ;;  %v12039_v56 = vld [vmem:[#allocation13 + $0x4c8] sm:$0xf0] }
 0x6ee   : > { %v12042_v7 = vor.u32 %v13113_v15, %v12039_v56  ;;  %6884 = vmatpush.bf16.msra.mxu0 %v11466_v19 }
 0x6ef   : > { %v5353_v63 = vpop.f32.mrf.mxu2  ;;  %v5402_v39 = vpop.f32.mrf.mxu3  ;;  %6710 = vmatmul.bf16.gmra.mxu0 %v15532_v47  ;;  %6759 = vmatmul.bf16.gmra.mxu1 %v15534_v31 }
 0x6f0   : > { %v5354_v23 = vadd.f32 %v5353_v63, %v15446_v59  ;;  %v5403_v28 = vadd.f32 %v5402_v39, %v15448_v5  ;;  %v5258_v53 = vpop.f32.mrf.mxu0  ;;  %v5307_v33 = vpop.f32.mrf.mxu1  ;;  %7031 = vmatpush.bf16.msra.mxu3 %v12042_v7 }
 0x6f1   : > { %v5259_v1 = vadd.f32 %v5258_v53, %v15440_v32  ;;  %v5308_v12 = vadd.f32 %v5307_v33, %v15442_v8 }
 0x6f2   : > { %v5458_v44 = vmax.f32 %v5354_v23, 0.0  ;;  %v5459_v24 = vmax.f32 %v5403_v28, 0.0 }
 0x6f3   : > { %v5460_v38 = vmax.f32 %v5259_v1, 0.0  ;;  %v5461_v11 = vmax.f32 %v5308_v12, 0.0  ;;  %v13059_v1 = vld [vmem:[#allocation13 + $0x304] sm:$0xf]  ;;  %v11823_v12 = vld [vmem:[#allocation13 + $0x318] sm:$0xf0] }
 0x6f4   : > { %v15542_v16 = vpack.c.bf16 %v5458_v44, %v5454_v61  ;;  %v15544_v34 = vpack.c.bf16 %v5459_v24, %v5455_v0 }
 0x6f6   : > { %6808 = vmatmul.bf16.gmra.mxu2 %v15542_v16  ;;  %6857 = vmatmul.bf16.gmra.mxu3 %v15544_v34 }
 0x6f7   : > { %v5356_v29 = vpop.f32.mrf.mxu2  ;;  %v5405_v10 = vpop.f32.mrf.mxu3 }
 0x6f8   : > { %v5260_v27 = vpop.f32.mrf.mxu0  ;;  %v5309_v20 = vpop.f32.mrf.mxu1  ;;  %v5357_v3 = vadd.f32 %v5356_v29, %v15446_v59  ;;  %v5406_v6 = vadd.f32 %v5405_v10, %v15448_v5 }
 0x6f9   : > { %v5261_v35 = vadd.f32 %v5260_v27, %v15440_v32  ;;  %v5310_v9 = vadd.f32 %v5309_v20, %v15442_v8  ;;  %v11826_v27 = vor.u32 %v13059_v1, %v11823_v12  ;;  %v11439_v20 = vld [vmem:[#allocation13 + $0x18] sm:$0xf0] }
 0x6fa   : > { %v5462_v53 = vmax.f32 %v5357_v3, 0.0  ;;  %v5463_v33 = vmax.f32 %v5406_v6, 0.0  ;;  %v11442_v45 = vor.u32 %v12963_v17, %v11439_v20  ;;  %v11997_v20 = vld [vmem:[#allocation13 + $0x458] sm:$0xf] }
 0x6fb   : > { %v5464_v51 = vmax.f32 %v5261_v35, 0.0  ;;  %v5465_v41 = vmax.f32 %v5310_v9, 0.0  ;;  %v13107_v35 = vld [vmem:[#allocation13 + $0x484] sm:$0xf]  ;;  %v12015_v9 = vld [vmem:[#allocation13 + $0x498] sm:$0xf0]  ;;  %6983 = vmatpush.bf16.msra.mxu2 %v11826_v27 }
 0x6fc   : > { %v12018_v58 = vor.u32 %v13107_v35, %v12015_v9  ;;  %6885 = vmatpush.bf16.msra.mxu0 %v11442_v45  ;;  %v13105_v35 = vld [vmem:[#allocation13 + $0x46c] sm:$0xf0]  ;;  %v11613_v9 = vld [vmem:[#allocation13 + $0x158] sm:$0xf] }
 0x6fd   : > { %v15552_v50 = vpack.c.bf16 %v5464_v51, %v5460_v38  ;;  %v15554_v55 = vpack.c.bf16 %v5465_v41, %v5461_v11  ;;  %v13011_v51 = vld [vmem:[#allocation13 + $0x184] sm:$0xf]  ;;  %v11631_v41 = vld [vmem:[#allocation13 + $0x198] sm:$0xf0]  ;;  %v11998_v45 = vor.u32 %v13105_v35, %v11997_v20  ;;  %v15609_v20 = vld [vmem:[%s16590_s27] sm:$0x3f] }
 0x6fe   : > { %v11634_v56 = vor.u32 %v13011_v51, %v11631_v41  ;;  %7032 = vmatpush.bf16.msra.mxu3 %v12018_v58  ;;  %v13009_v58 = vld [vmem:[#allocation13 + $0x16c] sm:$0xf0]  ;;  %v12189_v51 = vld [vmem:[#allocation13 + $0x5d8] sm:$0xf]  ;;  %v13099_v35 = vld [vmem:[#allocation13 + $0x43c] sm:$0xf0] }
 0x6ff   : > { %v5358_v54 = vpop.f32.mrf.mxu2  ;;  %v5407_v48 = vpop.f32.mrf.mxu3  ;;  %6715 = vmatmul.bf16.gmra.mxu0 %v15552_v50  ;;  %6764 = vmatmul.bf16.gmra.mxu1 %v15554_v55  ;;  %v13153_v41 = vld [vmem:[#allocation13 + $0x5ec] sm:$0xf0] }
 0x700   : > { %v5359_v63 = vadd.f32 %v5358_v54, %v15446_v59  ;;  %v5408_v39 = vadd.f32 %v5407_v48, %v15448_v5  ;;  %v5263_v23 = vpop.f32.mrf.mxu0  ;;  %v5312_v28 = vpop.f32.mrf.mxu1  ;;  %6934 = vmatpush.bf16.msra.mxu1 %v11634_v56  ;;  %v11614_v56 = vor.u32 %v13009_v58, %v11613_v9  ;;  %7172 = vmatpush.bf16.msrb.mxu2 %v11998_v45  ;;  %v11589_v9 = vld [vmem:[#allocation13 + $0x128] sm:$0xf]  ;;  %v13147_v58 = vld [vmem:[#allocation13 + $0x5bc] sm:$0xf0] }
 0x701   : > { %v5264_v26 = vadd.f32 %v5263_v23, %v15440_v32  ;;  %v5313_v29 = vadd.f32 %v5312_v28, %v15442_v8  ;;  %v12165_v45 = vld [vmem:[#allocation13 + $0x5a8] sm:$0xf] }
 0x702   : > { %v5466_v61 = vmax.f32 %v5359_v63, 0.0  ;;  %v5467_v0 = vmax.f32 %v5408_v39, 0.0  ;;  %7074 = vmatpush.bf16.msrb.mxu0 %v11614_v56 }
 0x703   : > { %v5468_v7 = vmax.f32 %v5264_v26, 0.0  ;;  %v5469_v21 = vmax.f32 %v5313_v29, 0.0 }
 0x704   : > { %v15562_v44 = vpack.c.bf16 %v5466_v61, %v5462_v53  ;;  %v15564_v24 = vpack.c.bf16 %v5467_v0, %v5463_v33 }
 0x706   : > { %6813 = vmatmul.bf16.gmra.mxu2 %v15562_v44  ;;  %6862 = vmatmul.bf16.gmra.mxu3 %v15564_v24 }
 0x707   : > { %v5361_v10 = vpop.f32.mrf.mxu2  ;;  %v5410_v36 = vpop.f32.mrf.mxu3 }
 0x708   : > { %v5265_v38 = vpop.f32.mrf.mxu0  ;;  %v5314_v11 = vpop.f32.mrf.mxu1  ;;  %v5362_v54 = vadd.f32 %v5361_v10, %v15446_v59  ;;  %v5411_v48 = vadd.f32 %v5410_v36, %v15448_v5 }
 0x709   : > { %v5266_v19 = vadd.f32 %v5265_v38, %v15440_v32  ;;  %v5315_v15 = vadd.f32 %v5314_v11, %v15442_v8 }
 0x70a   : > { %v5470_v61 = vmax.f32 %v5362_v54, 0.0  ;;  %v5471_v0 = vmax.f32 %v5411_v48, 0.0 }
 0x70b   : > { %v5472_v49 = vmax.f32 %v5266_v19, 0.0  ;;  %v5473_v3 = vmax.f32 %v5315_v15, 0.0 }
 0x70d   : > { %v15572_v6 = vpack.c.bf16 %v5472_v49, %v5468_v7  ;;  %v15574_v57 = vpack.c.bf16 %v5473_v3, %v5469_v21  ;;  %v12190_v7 = vor.u32 %v13153_v41, %v12189_v51  ;;  %v12166_v41 = vor.u32 %v13147_v58, %v12165_v45  ;;  %v11757_v58 = vld [vmem:[#allocation13 + $0x278] sm:$0xf] }
 0x70f   : > { %v5363_v63 = vpop.f32.mrf.mxu2  ;;  %v5412_v39 = vpop.f32.mrf.mxu3  ;;  %6720 = vmatmul.bf16.gmra.mxu0 %v15572_v6  ;;  %6769 = vmatmul.bf16.gmra.mxu1 %v15574_v57 }
 0x710   : > { %v5364_v23 = vadd.f32 %v5363_v63, %v15446_v59  ;;  %v5413_v28 = vadd.f32 %v5412_v39, %v15448_v5  ;;  %v5268_v53 = vpop.f32.mrf.mxu0  ;;  %v5317_v33 = vpop.f32.mrf.mxu1  ;;  %7221 = vmatpush.bf16.msrb.mxu3 %v12190_v7  ;;  %v11781_v7 = vld [vmem:[#allocation13 + $0x2a8] sm:$0xf] }
 0x711   : > { %v5269_v29 = vadd.f32 %v5268_v53, %v15440_v32  ;;  %v5318_v10 = vadd.f32 %v5317_v33, %v15442_v8 }
 0x712   : > { %v5474_v1 = vmax.f32 %v5364_v23, 0.0  ;;  %v5475_v12 = vmax.f32 %v5413_v28, 0.0  ;;  %v13057_v28 = vld [vmem:[#allocation13 + $0x2ec] sm:$0xf0] }
 0x713   : > { %v5476_v21 = vmax.f32 %v5269_v29, 0.0  ;;  %v5477_v49 = vmax.f32 %v5318_v10, 0.0 }
 0x714   : > { %v15582_v17 = vpack.c.bf16 %v5474_v1, %v5470_v61  ;;  %v15584_v26 = vpack.c.bf16 %v5475_v12, %v5471_v0  ;;  %7222 = vmatpush.bf16.msrb.mxu3 %v12166_v41 }
 0x716   : > { %6818 = vmatmul.bf16.gmra.mxu2 %v15582_v17  ;;  %6867 = vmatmul.bf16.gmra.mxu3 %v15584_v26 }
 0x717   : > { %v5366_v36 = vpop.f32.mrf.mxu2  ;;  %v5415_v27 = vpop.f32.mrf.mxu3 }
 0x718   : > { %v5270_v38 = vpop.f32.mrf.mxu0  ;;  %v5319_v11 = vpop.f32.mrf.mxu1  ;;  %v5367_v39 = vadd.f32 %v5366_v36, %v15446_v59  ;;  %v5416_v23 = vadd.f32 %v5415_v27, %v15448_v5 }
 0x719   : > { %v5271_v19 = vadd.f32 %v5270_v38, %v15440_v32  ;;  %v5320_v15 = vadd.f32 %v5319_v11, %v15442_v8  ;;  %v11805_v32 = vld [vmem:[#allocation13 + $0x2d8] sm:$0xf]  ;;  %v13003_v11 = vld [vmem:[#allocation13 + $0x13c] sm:$0xf0] }
 0x71a   : > { %v11806_v33 = vor.u32 %v13057_v28, %v11805_v32  ;;  %v5478_v1 = vmax.f32 %v5367_v39, 0.0  ;;  %v5479_v12 = vmax.f32 %v5416_v23, 0.0  ;;  %v11590_v51 = vor.u32 %v13003_v11, %v11589_v9  ;;  %v11949_v28 = vld [vmem:[#allocation13 + $0x3f8] sm:$0xf] }
 0x71b   : > { %v5480_v3 = vmax.f32 %v5271_v19, 0.0  ;;  %v5481_v54 = vmax.f32 %v5320_v15, 0.0 }
 0x71c   : > { %7123 = vmatpush.bf16.msrb.mxu1 %v11806_v33  ;;  %7075 = vmatpush.bf16.msrb.mxu0 %v11590_v51  ;;  %v13045_v51 = vld [vmem:[#allocation13 + $0x28c] sm:$0xf0] }
 0x71d   : > { %v15592_v48 = vpack.c.bf16 %v5480_v3, %v5476_v21  ;;  %v15594_v63 = vpack.c.bf16 %v5481_v54, %v5477_v49  ;;  %v13051_v21 = vld [vmem:[#allocation13 + $0x2bc] sm:$0xf0] }
 0x71e   : > { %v11782_v3 = vor.u32 %v13051_v21, %v11781_v7 }
 0x71f   : > { %v5368_v8 = vpop.f32.mrf.mxu2  ;;  %v5417_v53 = vpop.f32.mrf.mxu3  ;;  %6725 = vmatmul.bf16.gmra.mxu0 %v15592_v48  ;;  %6774 = vmatmul.bf16.gmra.mxu1 %v15594_v63 }
 0x720   : > { %v5369_v61 = vadd.f32 %v5368_v8, %v15446_v59  ;;  %v5418_v0 = vadd.f32 %v5417_v53, %v15448_v5  ;;  %v15614_v59 = vperm.slane %v15609_v20, 0  ;;  %v11973_v5 = vld [vmem:[#allocation13 + $0x428] sm:$0xf]  ;;  %7124 = vmatpush.bf16.msrb.mxu1 %v11782_v3  ;;  %v13093_v8 = vld [vmem:[#allocation13 + $0x40c] sm:$0xf0] }
 0x721   : > { %v11974_v38 = vor.u32 %v13099_v35, %v11973_v5  ;;  %v11565_v53 = vld [vmem:[#allocation13 + $0xf8] sm:$0xf]  ;;  %v11950_v33 = vor.u32 %v13093_v8, %v11949_v28  ;;  %v11925_v8 = vld [vmem:[#allocation13 + $0x3c8] sm:$0xf] }
 0x722   : > { %v5482_v29 = vmax.f32 %v5369_v61, 0.0  ;;  %v5483_v10 = vmax.f32 %v5418_v0, 0.0  ;;  %v12997_v61 = vld [vmem:[#allocation13 + $0x10c] sm:$0xf0]  ;;  %v12141_v0 = vld [vmem:[#allocation13 + $0x578] sm:$0xf] }
 0x723   : > { %7173 = vmatpush.bf16.msrb.mxu2 %v11974_v38 }
 0x724   : > { %v15602_v36 = vpack.c.bf16 %v5482_v29, %v5478_v1  ;;  %v15604_v27 = vpack.c.bf16 %v5483_v10, %v5479_v12  ;;  %v13141_v1 = vld [vmem:[#allocation13 + $0x58c] sm:$0xf0]  ;;  %v11566_v10 = vor.u32 %v12997_v61, %v11565_v53  ;;  %v13087_v53 = vld [vmem:[#allocation13 + $0x3dc] sm:$0xf0] }
 0x725   : > { %v12142_v5 = vor.u32 %v13141_v1, %v12141_v0  ;;  %v11926_v0 = vor.u32 %v13087_v53, %v11925_v8  ;;  %v12991_v1 = vld [vmem:[#allocation13 + $0xdc] sm:$0xf0] }
 0x726   : > { %6823 = vmatmul.bf16.gmra.mxu2 %v15602_v36  ;;  %6872 = vmatmul.bf16.gmra.mxu3 %v15604_v27 }
 0x727   : > { %7174 = vmatpush.bf16.msrb.mxu2 %v11950_v33  ;;  %7076 = vmatpush.bf16.msrb.mxu0 %v11566_v10  ;;  %v11541_v33 = vld [vmem:[#allocation13 + $0xc8] sm:$0xf] }
 0x728   : > { %7223 = vmatpush.bf16.msrb.mxu3 %v12142_v5  ;;  %v11542_v5 = vor.u32 %v12991_v1, %v11541_v33  ;;  %v11901_v33 = vld [vmem:[#allocation13 + $0x398] sm:$0xf] }
 0x729   : > { %v11517_v1 = vld [vmem:[#allocation13 + $0x98] sm:$0xf] }
 0x72b   : > { %7175 = vmatpush.bf16.msrb.mxu2 %v11926_v0  ;;  %7077 = vmatpush.bf16.msrb.mxu0 %v11542_v5  ;;  %v13081_v0 = vld [vmem:[#allocation13 + $0x3ac] sm:$0xf0] }
 0x72c   : > { %v6691_v19 = vpop.f32.mrf.mxu0  ;;  %v6740_v15 = vpop.f32.mrf.mxu1 }
 0x72d   : > { %v6692_v56 = vadd.f32 %v6691_v19, %v15614_v59  ;;  %v11758_v19 = vor.u32 %v13045_v51, %v11757_v58  ;;  %v11733_v51 = vld [vmem:[#allocation13 + $0x248] sm:$0xf] }
 0x72f   : > { %v6741_v49 = vadd.f32 %v6740_v15, %v6692_v56  ;;  %6886 = vmatmul.bf16.vlgmr.msra.gmra.mxu0 %v15452_v22  ;;  %6935 = vmatmul.bf16.vlgmr.msra.gmra.mxu1 %v15454_v13 }
 0x730   : > { %7125 = vmatpush.bf16.msrb.mxu1 %v11758_v19  ;;  %v13039_v19 = vld [vmem:[#allocation13 + $0x25c] sm:$0xf0] }
 0x734   : > { %v6693_v54 = vpop.f32.mrf.mxu0  ;;  %v6742_v39 = vpop.f32.mrf.mxu1 }
 0x735   : > { %v6694_v23 = vadd.f32 %v6693_v54, %v15614_v59 }
 0x736   : > { %6984 = vmatmul.bf16.vlgmr.msra.gmra.mxu2 %v15462_v14  ;;  %7033 = vmatmul.bf16.vlgmr.msra.gmra.mxu3 %v15464_v30 }
 0x737   : > { %v6743_v32 = vadd.f32 %v6742_v39, %v6694_v23 }
 0x739   : > { %v6789_v12 = vpop.f32.mrf.mxu2  ;;  %v6838_v29 = vpop.f32.mrf.mxu3 }
 0x73a   : > { %v6790_v35 = vadd.f32 %v6789_v12, %v6741_v49  ;;  %v13135_v12 = vld [vmem:[#allocation13 + $0x55c] sm:$0xf0] }
 0x73c   : > { %v6839_v9 = vadd.f32 %v6838_v29, %v6790_v35  ;;  %v6696_v38 = vpop.f32.mrf.mxu0  ;;  %v6745_v11 = vpop.f32.mrf.mxu1 }
 0x73d   : > { %v6697_v45 = vadd.f32 %v6696_v38, %v15614_v59 }
 0x73e   : > { %v7858_v39 = vmax.f32 %v6839_v9, 0.0 }
 0x73f   : > { %v6746_v41 = vadd.f32 %v6745_v11, %v6697_v45  ;;  %6891 = vmatmul.bf16.gmra.mxu0 %v15472_v4  ;;  %6940 = vmatmul.bf16.gmra.mxu1 %v15474_v2 }
 0x741   : > { %v6791_v15 = vpop.f32.mrf.mxu2  ;;  %v6840_v56 = vpop.f32.mrf.mxu3 }
 0x742   : > { %v6792_v7 = vadd.f32 %v6791_v15, %v6743_v32  ;;  %v12117_v32 = vld [vmem:[#allocation13 + $0x548] sm:$0xf] }
 0x743   : > { %v12118_v35 = vor.u32 %v13135_v12, %v12117_v32  ;;  %v11902_v32 = vor.u32 %v13081_v0, %v11901_v33  ;;  %v12985_v12 = vld [vmem:[#allocation13 + $0xac] sm:$0xf0] }
 0x744   : > { %v6841_v21 = vadd.f32 %v6840_v56, %v6792_v7  ;;  %v6698_v49 = vpop.f32.mrf.mxu0  ;;  %v6747_v3 = vpop.f32.mrf.mxu1  ;;  %v11734_v56 = vor.u32 %v13039_v19, %v11733_v51 }
 0x745   : > { %v6699_v54 = vadd.f32 %v6698_v49, %v15614_v59  ;;  %7224 = vmatpush.bf16.msrb.mxu3 %v12118_v35  ;;  %7176 = vmatpush.bf16.msrb.mxu2 %v11902_v32  ;;  %v11877_v32 = vld [vmem:[#allocation13 + $0x368] sm:$0xf] }
 0x746   : > { %v7864_v23 = vmax.f32 %v6841_v21, 0.0  ;;  %6989 = vmatmul.bf16.gmra.mxu2 %v15482_v42  ;;  %7038 = vmatmul.bf16.gmra.mxu3 %v15484_v60 }
 0x747   : > { %v6748_v28 = vadd.f32 %v6747_v3, %v6699_v54  ;;  %7126 = vmatpush.bf16.msrb.mxu1 %v11734_v56  ;;  %v11709_v56 = vld [vmem:[#allocation13 + $0x218] sm:$0xf] }
 0x748   : > { %v15628_v61 = vpack.c.bf16 %v7864_v23, %v7858_v39 }
 0x749   : > { %v6794_v29 = vpop.f32.mrf.mxu2  ;;  %v6843_v10 = vpop.f32.mrf.mxu3 }
 0x74a   : > { %v6795_v9 = vadd.f32 %v6794_v29, %v6746_v41  ;;  %v12093_v29 = vld [vmem:[#allocation13 + $0x518] sm:$0xf] }
 0x74c   : > { %v6844_v38 = vadd.f32 %v6843_v10, %v6795_v9  ;;  %v6701_v11 = vpop.f32.mrf.mxu0  ;;  %v6750_v45 = vpop.f32.mrf.mxu1  ;;  %v13129_v10 = vld [vmem:[#allocation13 + $0x52c] sm:$0xf0]  ;;  %v11518_v9 = vor.u32 %v12985_v12, %v11517_v1  ;;  %v13075_v12 = vld [vmem:[#allocation13 + $0x37c] sm:$0xf0] }
 0x74d   : > { %v6702_v58 = vadd.f32 %v6701_v11, %v15614_v59  ;;  %v12094_v11 = vor.u32 %v13129_v10, %v12093_v29  ;;  %v11493_v29 = vld [vmem:[#allocation13 + $0x68] sm:$0xf]  ;;  %v11878_v10 = vor.u32 %v13075_v12, %v11877_v32 }
 0x74e   : > { %v7870_v23 = vmax.f32 %v6844_v38, 0.0  ;;  %7078 = vmatpush.bf16.msrb.mxu0 %v11518_v9  ;;  %v13123_v9 = vld [vmem:[#allocation13 + $0x4fc] sm:$0xf0] }
 0x74f   : > { %v6751_v15 = vadd.f32 %v6750_v45, %v6702_v58  ;;  %6896 = vmatmul.bf16.gmra.mxu0 %v15492_v43  ;;  %6945 = vmatmul.bf16.gmra.mxu1 %v15494_v40 }
 0x750   : > { %7225 = vmatpush.bf16.msrb.mxu3 %v12094_v11  ;;  %7177 = vmatpush.bf16.msrb.mxu2 %v11878_v10 }
 0x751   : > { %v6796_v7 = vpop.f32.mrf.mxu2  ;;  %v6845_v21 = vpop.f32.mrf.mxu3 }
 0x752   : > { %v6797_v41 = vadd.f32 %v6796_v7, %v6748_v28  ;;  %v13033_v7 = vld [vmem:[#allocation13 + $0x22c] sm:$0xf0] }
 0x754   : > { %v6846_v49 = vadd.f32 %v6845_v21, %v6797_v41  ;;  %v6703_v3 = vpop.f32.mrf.mxu0  ;;  %v6752_v54 = vpop.f32.mrf.mxu1  ;;  %v11710_v41 = vor.u32 %v13033_v7, %v11709_v56 }
 0x755   : > { %v6704_v39 = vadd.f32 %v6703_v3, %v15614_v59 }
 0x756   : > { %v7876_v8 = vmax.f32 %v6846_v49, 0.0  ;;  %6994 = vmatmul.bf16.gmra.mxu2 %v15502_v52  ;;  %7043 = vmatmul.bf16.gmra.mxu3 %v15504_v62 }
 0x757   : > { %v6753_v53 = vadd.f32 %v6752_v54, %v6704_v39  ;;  %7127 = vmatpush.bf16.msrb.mxu1 %v11710_v41 }
 0x758   : > { %v15636_v28 = vpack.c.bf16 %v7876_v8, %v7870_v23 }
 0x759   : > { %v6799_v5 = vpop.f32.mrf.mxu2  ;;  %v6848_v35 = vpop.f32.mrf.mxu3 }
 0x75a   : > { %v6800_v38 = vadd.f32 %v6799_v5, %v6751_v15  ;;  %v12979_v5 = vld [vmem:[#allocation13 + $0x7c] sm:$0xf0] }
 0x75c   : > { %v6849_v45 = vadd.f32 %v6848_v35, %v6800_v38  ;;  %v6706_v58 = vpop.f32.mrf.mxu0  ;;  %v6755_v51 = vpop.f32.mrf.mxu1  ;;  %v12069_v35 = vld [vmem:[#allocation13 + $0x4e8] sm:$0xf] }
 0x75d   : > { %v6707_v19 = vadd.f32 %v6706_v58, %v15614_v59  ;;  %v11494_v58 = vor.u32 %v12979_v5, %v11493_v29  ;;  %v11853_v5 = vld [vmem:[#allocation13 + $0x338] sm:$0xf] }
 0x75e   : > { %v7882_v33 = vmax.f32 %v6849_v45, 0.0 }
 0x75f   : > { %v6756_v21 = vadd.f32 %v6755_v51, %v6707_v19  ;;  %6901 = vmatmul.bf16.gmra.mxu0 %v15512_v18  ;;  %6950 = vmatmul.bf16.gmra.mxu1 %v15514_v46  ;;  %v12070_v51 = vor.u32 %v13123_v9, %v12069_v35  ;;  %v13069_v35 = vld [vmem:[#allocation13 + $0x34c] sm:$0xf0]  ;;  %v11469_v9 = vld [vmem:[#allocation13 + $0x38] sm:$0xf] }
 0x760   : > { %7079 = vmatpush.bf16.msrb.mxu0 %v11494_v58  ;;  %v12045_v58 = vld [vmem:[#allocation13 + $0x4b8] sm:$0xf] }
 0x761   : > { %v6801_v49 = vpop.f32.mrf.mxu2  ;;  %v6850_v3 = vpop.f32.mrf.mxu3  ;;  %7226 = vmatpush.bf16.msrb.mxu3 %v12070_v51  ;;  %v13117_v51 = vld [vmem:[#allocation13 + $0x4cc] sm:$0xf0] }
 0x762   : > { %v6802_v15 = vadd.f32 %v6801_v49, %v6753_v53  ;;  %v11685_v49 = vld [vmem:[#allocation13 + $0x1e8] sm:$0xf] }
 0x764   : > { %v6851_v54 = vadd.f32 %v6850_v3, %v6802_v15  ;;  %v6708_v39 = vpop.f32.mrf.mxu0  ;;  %v6757_v23 = vpop.f32.mrf.mxu1  ;;  %v13027_v3 = vld [vmem:[#allocation13 + $0x1fc] sm:$0xf0] }
 0x765   : > { %v6709_v8 = vadd.f32 %v6708_v39, %v15614_v59 }
 0x766   : > { %v7888_v0 = vmax.f32 %v6851_v54, 0.0  ;;  %6999 = vmatmul.bf16.gmra.mxu2 %v15522_v25  ;;  %7048 = vmatmul.bf16.gmra.mxu3 %v15524_v37  ;;  %v11686_v54 = vor.u32 %v13027_v3, %v11685_v49 }
 0x767   : > { %v6758_v1 = vadd.f32 %v6757_v23, %v6709_v8 }
 0x768   : > { %v15644_v53 = vpack.c.bf16 %v7888_v0, %v7882_v33  ;;  %7128 = vmatpush.bf16.msrb.mxu1 %v11686_v54 }
 0x769   : > { %v6804_v11 = vpop.f32.mrf.mxu2  ;;  %v6853_v38 = vpop.f32.mrf.mxu3 }
 0x76a   : > { %16591 = vst [vmem:[#allocation28_spill] sm:$0xff] %v15644_v53  ;;  %v6805_v45 = vadd.f32 %v6804_v11, %v6756_v21  ;;  %v11854_v11 = vor.u32 %v13069_v35, %v11853_v5 }
 0x76c   : > { %v6854_v19 = vadd.f32 %v6853_v38, %v6805_v45  ;;  %v6711_v56 = vpop.f32.mrf.mxu0  ;;  %v6760_v7 = vpop.f32.mrf.mxu1  ;;  %v12973_v38 = vld [vmem:[#allocation13 + $0x4c] sm:$0xf0]  ;;  %7178 = vmatpush.bf16.msrb.mxu2 %v11854_v11 }
 0x76d   : > { %v6712_v41 = vadd.f32 %v6711_v56, %v15614_v59 }
 0x76e   : > { %v7894_v12 = vmax.f32 %v6854_v19, 0.0 }
 0x76f   : > { %v6761_v15 = vadd.f32 %v6760_v7, %v6712_v41  ;;  %6906 = vmatmul.bf16.gmra.mxu0 %v15532_v47  ;;  %6955 = vmatmul.bf16.gmra.mxu1 %v15534_v31  ;;  %v11470_v7 = vor.u32 %v12973_v38, %v11469_v9  ;;  %v12046_v41 = vor.u32 %v13117_v51, %v12045_v58  ;;  %v11829_v58 = vld [vmem:[#allocation13 + $0x308] sm:$0xf]  ;;  %v13063_v51 = vld [vmem:[#allocation13 + $0x31c] sm:$0xf0] }
 0x771   : > { %v6806_v39 = vpop.f32.mrf.mxu2  ;;  %v6855_v23 = vpop.f32.mrf.mxu3  ;;  %7080 = vmatpush.bf16.msrb.mxu0 %v11470_v7  ;;  %7227 = vmatpush.bf16.msrb.mxu3 %v12046_v41  ;;  %v12967_v7 = vld [vmem:[#allocation13 + $0x1c] sm:$0xf0]  ;;  %v12021_v41 = vld [vmem:[#allocation13 + $0x488] sm:$0xf] }
 0x772   : > { %v6807_v21 = vadd.f32 %v6806_v39, %v6758_v1 }
 0x774   : > { %v6856_v8 = vadd.f32 %v6855_v23, %v6807_v21  ;;  %v6713_v33 = vpop.f32.mrf.mxu0  ;;  %v6762_v0 = vpop.f32.mrf.mxu1  ;;  %v11661_v23 = vld [vmem:[#allocation13 + $0x1b8] sm:$0xf]  ;;  %v13021_v21 = vld [vmem:[#allocation13 + $0x1cc] sm:$0xf0] }
 0x775   : > { %v6714_v32 = vadd.f32 %v6713_v33, %v15614_v59  ;;  %v11662_v33 = vor.u32 %v13021_v21, %v11661_v23  ;;  %v11637_v21 = vld [vmem:[#allocation13 + $0x188] sm:$0xf] }
 0x776   : > { %v7900_v29 = vmax.f32 %v6856_v8, 0.0  ;;  %7004 = vmatmul.bf16.gmra.mxu2 %v15542_v16  ;;  %7053 = vmatmul.bf16.gmra.mxu3 %v15544_v34 }
 0x777   : > { %v6763_v10 = vadd.f32 %v6762_v0, %v6714_v32  ;;  %7129 = vmatpush.bf16.msrb.mxu1 %v11662_v33  ;;  %v13015_v33 = vld [vmem:[#allocation13 + $0x19c] sm:$0xf0] }
 0x778   : > { %v15652_v1 = vpack.c.bf16 %v7900_v29, %v7894_v12 }
 0x779   : > { %v6809_v45 = vpop.f32.mrf.mxu2  ;;  %v6858_v56 = vpop.f32.mrf.mxu3 }
 0x77a   : > { %16592 = vst [vmem:[#allocation29_spill] sm:$0xff] %v15652_v1  ;;  %v6810_v19 = vadd.f32 %v6809_v45, %v6761_v15  ;;  %v11445_v45 = vld [vmem:[#allocation13 + $0x8] sm:$0xf]  ;;  %v11693_v1 = vld [vmem:[#allocation13 + $0x1f0] sm:$0xf] }
 0x77c   : > { %v6859_v49 = vadd.f32 %v6858_v56, %v6810_v19  ;;  %v6716_v3 = vpop.f32.mrf.mxu0  ;;  %v6765_v54 = vpop.f32.mrf.mxu1  ;;  %v11830_v56 = vor.u32 %v13063_v51, %v11829_v58  ;;  %v13111_v19 = vld [vmem:[#allocation13 + $0x49c] sm:$0xf0] }
 0x77d   : > { %v6717_v39 = vadd.f32 %v6716_v3, %v15614_v59  ;;  %v12022_v23 = vor.u32 %v13111_v19, %v12021_v41  ;;  %v13102_v19 = vld [vmem:[#allocation13 + $0x45c] sm:$0xf] }
 0x77e   : > { %v7906_v9 = vmax.f32 %v6859_v49, 0.0  ;;  %7179 = vmatpush.bf16.msrb.mxu2 %v11830_v56 }
 0x77f   : > { %v6766_v8 = vadd.f32 %v6765_v54, %v6717_v39  ;;  %6911 = vmatmul.bf16.gmra.mxu0 %v15552_v50  ;;  %6960 = vmatmul.bf16.gmra.mxu1 %v15554_v55  ;;  %v11446_v39 = vor.u32 %v12967_v7, %v11445_v45 }
 0x780   : > { %7228 = vmatpush.bf16.msrb.mxu3 %v12022_v23  ;;  %v11615_v23 = vld [vmem:[#allocation13 + $0x170] sm:$0xf0] }
 0x781   : > { %v6811_v0 = vpop.f32.mrf.mxu2  ;;  %v6860_v32 = vpop.f32.mrf.mxu3  ;;  %7081 = vmatpush.bf16.msrb.mxu0 %v11446_v39 }
 0x782   : > { %v6812_v15 = vadd.f32 %v6811_v0, %v6763_v10  ;;  %v11638_v0 = vor.u32 %v13015_v33, %v11637_v21  ;;  %v12191_v21 = vld [vmem:[#allocation13 + $0x5f0] sm:$0xf0] }
 0x784   : > { %v6861_v12 = vadd.f32 %v6860_v32, %v6812_v15  ;;  %v6718_v29 = vpop.f32.mrf.mxu0  ;;  %v6767_v5 = vpop.f32.mrf.mxu1  ;;  %7130 = vmatpush.bf16.msrb.mxu1 %v11638_v0 }
 0x785   : > { %v6719_v35 = vadd.f32 %v6718_v29, %v15614_v59 }
 0x786   : > { %v7912_v11 = vmax.f32 %v6861_v12, 0.0  ;;  %7009 = vmatmul.bf16.gmra.mxu2 %v15562_v44  ;;  %7058 = vmatmul.bf16.gmra.mxu3 %v15564_v24 }
 0x787   : > { %v6768_v38 = vadd.f32 %v6767_v5, %v6719_v35 }
 0x788   : > { %v15660_v10 = vpack.c.bf16 %v7912_v11, %v7906_v9 }
 0x789   : > { %v6814_v3 = vpop.f32.mrf.mxu2  ;;  %v6863_v54 = vpop.f32.mrf.mxu3 }
 0x78a   : > { %16593 = vst [vmem:[#allocation30_spill] sm:$0xff] %v15660_v10  ;;  %v6815_v49 = vadd.f32 %v6814_v3, %v6766_v8  ;;  %v11999_v3 = vld [vmem:[#allocation13 + $0x470] sm:$0xf0] }
 0x78b   : > { %v12002_v39 = vor.u32 %v13102_v19, %v11999_v3 }
 0x78c   : > { %v6864_v32 = vadd.f32 %v6863_v54, %v6815_v49  ;;  %v6721_v15 = vpop.f32.mrf.mxu0  ;;  %v6770_v12 = vpop.f32.mrf.mxu1  ;;  %v13006_v54 = vld [vmem:[#allocation13 + $0x15c] sm:$0xf] }
 0x78d   : > { %v6722_v29 = vadd.f32 %v6721_v15, %v15614_v59  ;;  %v13150_v49 = vld [vmem:[#allocation13 + $0x5dc] sm:$0xf]  ;;  %v11618_v15 = vor.u32 %v13006_v54, %v11615_v23  ;;  %7368 = vmatpush.bf16.msra.mxu2 %v12002_v39 }
 0x78e   : > { %v7918_v56 = vmax.f32 %v6864_v32, 0.0 }
 0x78f   : > { %v6771_v5 = vadd.f32 %v6770_v12, %v6722_v29  ;;  %6916 = vmatmul.bf16.gmra.mxu0 %v15572_v6  ;;  %6965 = vmatmul.bf16.gmra.mxu1 %v15574_v57  ;;  %v12194_v12 = vor.u32 %v13150_v49, %v12191_v21 }
 0x790   : > { %7270 = vmatpush.bf16.msra.mxu0 %v11618_v15  ;;  %v11975_v15 = vld [vmem:[#allocation13 + $0x440] sm:$0xf0] }
 0x791   : > { %v6816_v35 = vpop.f32.mrf.mxu2  ;;  %v6865_v9 = vpop.f32.mrf.mxu3  ;;  %7417 = vmatpush.bf16.msra.mxu3 %v12194_v12  ;;  %v13000_v12 = vld [vmem:[#allocation13 + $0x12c] sm:$0xf] }
 0x792   : > { %v6817_v8 = vadd.f32 %v6816_v35, %v6768_v38 }
 0x794   : > { %v6866_v11 = vadd.f32 %v6865_v9, %v6817_v8  ;;  %v6723_v58 = vpop.f32.mrf.mxu0  ;;  %v6772_v51 = vpop.f32.mrf.mxu1 }
 0x795   : > { %v6724_v45 = vadd.f32 %v6723_v58, %v15614_v59  ;;  %v11807_v58 = vld [vmem:[#allocation13 + $0x2f0] sm:$0xf0] }
 0x796   : > { %v7924_v7 = vmax.f32 %v6866_v11, 0.0  ;;  %7014 = vmatmul.bf16.gmra.mxu2 %v15582_v17  ;;  %7063 = vmatmul.bf16.gmra.mxu3 %v15584_v26  ;;  %v13054_v11 = vld [vmem:[#allocation13 + $0x2dc] sm:$0xf] }
 0x797   : > { %v6773_v41 = vadd.f32 %v6772_v51, %v6724_v45  ;;  %v11810_v45 = vor.u32 %v13054_v11, %v11807_v58 }
 0x798   : > { %v15668_v38 = vpack.c.bf16 %v7924_v7, %v7918_v56 }
 0x799   : > { %v6819_v33 = vpop.f32.mrf.mxu2  ;;  %v6868_v0 = vpop.f32.mrf.mxu3  ;;  %7319 = vmatpush.bf16.msra.mxu1 %v11810_v45 }
 0x79a   : > { %16594 = vst [vmem:[#allocation31_spill] sm:$0xff] %v15668_v38  ;;  %v6820_v32 = vadd.f32 %v6819_v33, %v6771_v5  ;;  %v15677_v33 = vperm.slane %v15609_v20, 1 }
 0x79c   : > { %v6869_v29 = vadd.f32 %v6868_v0, %v6820_v32  ;;  %v6726_v35 = vpop.f32.mrf.mxu0  ;;  %v6775_v9 = vpop.f32.mrf.mxu1  ;;  %v13096_v0 = vld [vmem:[#allocation13 + $0x42c] sm:$0xf] }
 0x79d   : > { %v6727_v8 = vadd.f32 %v6726_v35, %v15614_v59 }
 0x79e   : > { %v7930_v23 = vmax.f32 %v6869_v29, 0.0  ;;  %v12167_v29 = vld [vmem:[#allocation13 + $0x5c0] sm:$0xf0] }
 0x79f   : > { %v6776_v51 = vadd.f32 %v6775_v9, %v6727_v8  ;;  %6921 = vmatmul.bf16.gmra.mxu0 %v15592_v48  ;;  %6970 = vmatmul.bf16.gmra.mxu1 %v15594_v63  ;;  %v11978_v9 = vor.u32 %v13096_v0, %v11975_v15  ;;  %v11591_v8 = vld [vmem:[#allocation13 + $0x140] sm:$0xf0] }
 0x7a0   : > { %v11594_v58 = vor.u32 %v13000_v12, %v11591_v8 }
 0x7a1   : > { %v6821_v56 = vpop.f32.mrf.mxu2  ;;  %v6870_v7 = vpop.f32.mrf.mxu3  ;;  %7369 = vmatpush.bf16.msra.mxu2 %v11978_v9 }
 0x7a2   : > { %v6822_v5 = vadd.f32 %v6821_v56, %v6773_v41  ;;  %7271 = vmatpush.bf16.msra.mxu0 %v11594_v58 }
 0x7a4   : > { %v6871_v19 = vadd.f32 %v6870_v7, %v6822_v5  ;;  %v6728_v3 = vpop.f32.mrf.mxu0  ;;  %v6777_v54 = vpop.f32.mrf.mxu1 }
 0x7a5   : > { %v6729_v39 = vadd.f32 %v6728_v3, %v15614_v59  ;;  %v13144_v59 = vld [vmem:[#allocation13 + $0x5ac] sm:$0xf]  ;;  %v11783_v3 = vld [vmem:[#allocation13 + $0x2c0] sm:$0xf0] }
 0x7a6   : > { %v7936_v49 = vmax.f32 %v6871_v19, 0.0  ;;  %7019 = vmatmul.bf16.gmra.mxu2 %v15602_v36  ;;  %7068 = vmatmul.bf16.gmra.mxu3 %v15604_v27  ;;  %v12170_v45 = vor.u32 %v13144_v59, %v12167_v29  ;;  %v13048_v19 = vld [vmem:[#allocation13 + $0x2ac] sm:$0xf]  ;;  %v13090_v59 = vld [vmem:[#allocation13 + $0x3fc] sm:$0xf] }
 0x7a7   : > { %v6778_v21 = vadd.f32 %v6777_v54, %v6729_v39  ;;  %v11786_v39 = vor.u32 %v13048_v19, %v11783_v3  ;;  %v11951_v29 = vld [vmem:[#allocation13 + $0x410] sm:$0xf0] }
 0x7a8   : > { %v15679_v32 = vpack.c.bf16 %v7936_v49, %v7930_v23  ;;  %7418 = vmatpush.bf16.msra.mxu3 %v12170_v45  ;;  %v11954_v58 = vor.u32 %v13090_v59, %v11951_v29  ;;  %v11567_v45 = vld [vmem:[#allocation13 + $0x110] sm:$0xf0] }
 0x7a9   : > { %v6824_v41 = vpop.f32.mrf.mxu2  ;;  %v6873_v35 = vpop.f32.mrf.mxu3  ;;  %7320 = vmatpush.bf16.msra.mxu1 %v11786_v39 }
 0x7aa   : > { %16595 = vst [vmem:[#allocation32_spill] sm:$0xff] %v15679_v32  ;;  %v6825_v11 = vadd.f32 %v6824_v41, %v6776_v51  ;;  %7370 = vmatpush.bf16.msra.mxu2 %v11954_v58  ;;  %v13018_v32 = vld [vmem:[#allocation13 + $0x1bc] sm:$0xf] }
 0x7ac   : > { %v6874_v56 = vadd.f32 %v6873_v35, %v6825_v11  ;;  %v6887_v7 = vpop.f32.mrf.mxu0  ;;  %v6936_v5 = vpop.f32.mrf.mxu1  ;;  %v12994_v11 = vld [vmem:[#allocation13 + $0xfc] sm:$0xf] }
 0x7ad   : > { %v6888_v20 = vadd.f32 %v6887_v7, %v15677_v33  ;;  %v13138_v7 = vld [vmem:[#allocation13 + $0x57c] sm:$0xf]  ;;  %v11570_v3 = vor.u32 %v12994_v11, %v11567_v45 }
 0x7ae   : > { %v7942_v35 = vmax.f32 %v6874_v56, 0.0 }
 0x7af   : > { %v6937_v54 = vadd.f32 %v6936_v5, %v6888_v20  ;;  %7082 = vmatmul.bf16.vlgmr.msrb.gmra.mxu0 %v15452_v22  ;;  %7131 = vmatmul.bf16.vlgmr.msrb.gmra.mxu1 %v15454_v13  ;;  %v12143_v5 = vld [vmem:[#allocation13 + $0x590] sm:$0xf0] }
 0x7b0   : > { %v12146_v39 = vor.u32 %v13138_v7, %v12143_v5  ;;  %7272 = vmatpush.bf16.msra.mxu0 %v11570_v3  ;;  %v11927_v3 = vld [vmem:[#allocation13 + $0x3e0] sm:$0xf0] }
 0x7b1   : > { %v6826_v23 = vpop.f32.mrf.mxu2  ;;  %v6875_v51 = vpop.f32.mrf.mxu3 }
 0x7b2   : > { %v6827_v49 = vadd.f32 %v6826_v23, %v6778_v21  ;;  %7419 = vmatpush.bf16.msra.mxu3 %v12146_v39  ;;  %v12988_v39 = vld [vmem:[#allocation13 + $0xcc] sm:$0xf] }
 0x7b4   : > { %v6876_v0 = vadd.f32 %v6875_v51, %v6827_v49  ;;  %v6889_v15 = vpop.f32.mrf.mxu0  ;;  %v6938_v12 = vpop.f32.mrf.mxu1 }
 0x7b5   : > { %v6890_v41 = vadd.f32 %v6889_v15, %v15677_v33  ;;  %v13042_v15 = vld [vmem:[#allocation13 + $0x27c] sm:$0xf] }
 0x7b6   : > { %v7948_v9 = vmax.f32 %v6876_v0, 0.0  ;;  %7180 = vmatmul.bf16.vlgmr.msrb.gmra.mxu2 %v15462_v14  ;;  %7229 = vmatmul.bf16.vlgmr.msrb.gmra.mxu3 %v15464_v30 }
 0x7b7   : > { %v6939_v8 = vadd.f32 %v6938_v12, %v6890_v41  ;;  %v11759_v12 = vld [vmem:[#allocation13 + $0x290] sm:$0xf0] }
 0x7b8   : > { %v15687_v21 = vpack.c.bf16 %v7948_v9, %v7942_v35  ;;  %v11762_v35 = vor.u32 %v13042_v15, %v11759_v12 }
 0x7b9   : > { %v6985_v20 = vpop.f32.mrf.mxu2  ;;  %v7034_v19 = vpop.f32.mrf.mxu3 }
 0x7ba   : > { %16596 = vst [vmem:[#allocation33_spill] sm:$0xff] %v15687_v21  ;;  %v6986_v56 = vadd.f32 %v6985_v20, %v6937_v54  ;;  %7321 = vmatpush.bf16.msra.mxu1 %v11762_v35  ;;  %v13024_v21 = vld [vmem:[#allocation13 + $0x1ec] sm:$0xf] }
 0x7bc   : > { %v7035_v23 = vadd.f32 %v7034_v19, %v6986_v56  ;;  %v6892_v51 = vpop.f32.mrf.mxu0  ;;  %v6941_v49 = vpop.f32.mrf.mxu1  ;;  %v13084_v19 = vld [vmem:[#allocation13 + $0x3cc] sm:$0xf] }
 0x7bd   : > { %v6893_v0 = vadd.f32 %v6892_v51, %v15677_v33  ;;  %v11930_v51 = vor.u32 %v13084_v19, %v11927_v3 }
 0x7be   : > { %v7859_v7 = vmax.f32 %v7035_v23, 0.0 }
 0x7bf   : > { %v6942_v41 = vadd.f32 %v6941_v49, %v6893_v0  ;;  %7087 = vmatmul.bf16.gmra.mxu0 %v15472_v4  ;;  %7136 = vmatmul.bf16.gmra.mxu1 %v15474_v2  ;;  %v11543_v49 = vld [vmem:[#allocation13 + $0xe0] sm:$0xf0] }
 0x7c0   : > { %v12119_v0 = vld [vmem:[#allocation13 + $0x560] sm:$0xf0]  ;;  %v11546_v35 = vor.u32 %v12988_v39, %v11543_v49  ;;  %7371 = vmatpush.bf16.msra.mxu2 %v11930_v51 }
 0x7c1   : > { %v6987_v9 = vpop.f32.mrf.mxu2  ;;  %v7036_v59 = vpop.f32.mrf.mxu3 }
 0x7c2   : > { %v6988_v54 = vadd.f32 %v6987_v9, %v6939_v8  ;;  %v13132_v8 = vld [vmem:[#allocation13 + $0x54c] sm:$0xf]  ;;  %7273 = vmatpush.bf16.msra.mxu0 %v11546_v35  ;;  %v13078_v35 = vld [vmem:[#allocation13 + $0x39c] sm:$0xf] }
 0x7c3   : > { %v12122_v9 = vor.u32 %v13132_v8, %v12119_v0 }
 0x7c4   : > { %v7037_v29 = vadd.f32 %v7036_v59, %v6988_v54  ;;  %v6894_v11 = vpop.f32.mrf.mxu0  ;;  %v6943_v58 = vpop.f32.mrf.mxu1 }
 0x7c5   : > { %v6895_v45 = vadd.f32 %v6894_v11, %v15677_v33  ;;  %7420 = vmatpush.bf16.msra.mxu3 %v12122_v9  ;;  %v11903_v9 = vld [vmem:[#allocation13 + $0x3b0] sm:$0xf0] }
 0x7c6   : > { %v7865_v5 = vmax.f32 %v7037_v29, 0.0  ;;  %7185 = vmatmul.bf16.gmra.mxu2 %v15482_v42  ;;  %7234 = vmatmul.bf16.gmra.mxu3 %v15484_v60 }
 0x7c7   : > { %v6944_v20 = vadd.f32 %v6943_v58, %v6895_v45  ;;  %v13036_v58 = vld [vmem:[#allocation13 + $0x24c] sm:$0xf]  ;;  %v11735_v45 = vld [vmem:[#allocation13 + $0x260] sm:$0xf0] }
 0x7c8   : > { %v15695_v56 = vpack.c.bf16 %v7865_v5, %v7859_v7  ;;  %v11738_v5 = vor.u32 %v13036_v58, %v11735_v45  ;;  %v12095_v58 = vld [vmem:[#allocation13 + $0x530] sm:$0xf0] }
 0x7c9   : > { %v6990_v15 = vpop.f32.mrf.mxu2  ;;  %v7039_v12 = vpop.f32.mrf.mxu3 }
 0x7ca   : > { %v6991_v23 = vadd.f32 %v6990_v15, %v6942_v41  ;;  %7322 = vmatpush.bf16.msra.mxu1 %v11738_v5 }
 0x7cc   : > { %v7040_v59 = vadd.f32 %v7039_v12, %v6991_v23  ;;  %v6897_v54 = vpop.f32.mrf.mxu0  ;;  %v6946_v29 = vpop.f32.mrf.mxu1  ;;  %v12982_v23 = vld [vmem:[#allocation13 + $0x9c] sm:$0xf] }
 0x7cd   : > { %v6898_v11 = vadd.f32 %v6897_v54, %v15677_v33  ;;  %v11906_v54 = vor.u32 %v13078_v35, %v11903_v9  ;;  %v11711_v35 = vld [vmem:[#allocation13 + $0x230] sm:$0xf0] }
 0x7ce   : > { %v7871_v0 = vmax.f32 %v7040_v59, 0.0 }
 0x7cf   : > { %v6947_v7 = vadd.f32 %v6946_v29, %v6898_v11  ;;  %7092 = vmatmul.bf16.gmra.mxu0 %v15492_v43  ;;  %7141 = vmatmul.bf16.gmra.mxu1 %v15494_v40  ;;  %v11519_v29 = vld [vmem:[#allocation13 + $0xb0] sm:$0xf0]  ;;  %v13126_v11 = vld [vmem:[#allocation13 + $0x51c] sm:$0xf] }
 0x7d0   : > { %7372 = vmatpush.bf16.msra.mxu2 %v11906_v54 }
 0x7d1   : > { %v6992_v19 = vpop.f32.mrf.mxu2  ;;  %v7041_v3 = vpop.f32.mrf.mxu3 }
 0x7d2   : > { %v6993_v41 = vadd.f32 %v6992_v19, %v6944_v20  ;;  %v11522_v19 = vor.u32 %v12982_v23, %v11519_v29 }
 0x7d4   : > { %v7042_v39 = vadd.f32 %v7041_v3, %v6993_v41  ;;  %v6899_v51 = vpop.f32.mrf.mxu0  ;;  %v6948_v49 = vpop.f32.mrf.mxu1  ;;  %v12098_v3 = vor.u32 %v13126_v11, %v12095_v58  ;;  %7274 = vmatpush.bf16.msra.mxu0 %v11522_v19 }
 0x7d5   : > { %v6900_v8 = vadd.f32 %v6899_v51, %v15677_v33 }
 0x7d6   : > { %v7877_v15 = vmax.f32 %v7042_v39, 0.0  ;;  %7190 = vmatmul.bf16.gmra.mxu2 %v15502_v52  ;;  %7239 = vmatmul.bf16.gmra.mxu3 %v15504_v62 }
 0x7d7   : > { %v6949_v12 = vadd.f32 %v6948_v49, %v6900_v8  ;;  %7421 = vmatpush.bf16.msra.mxu3 %v12098_v3  ;;  %v13030_v8 = vld [vmem:[#allocation13 + $0x21c] sm:$0xf]  ;;  %v13072_v3 = vld [vmem:[#allocation13 + $0x36c] sm:$0xf] }
 0x7d8   : > { %v15703_v20 = vpack.c.bf16 %v7877_v15, %v7871_v0  ;;  %v11714_v0 = vor.u32 %v13030_v8, %v11711_v35  ;;  %v13120_v8 = vld [vmem:[#allocation13 + $0x4ec] sm:$0xf]  ;;  %v12071_v35 = vld [vmem:[#allocation13 + $0x500] sm:$0xf0] }
 0x7d9   : > { %v6995_v45 = vpop.f32.mrf.mxu2  ;;  %v7044_v5 = vpop.f32.mrf.mxu3 }
 0x7da   : > { %v6996_v59 = vadd.f32 %v6995_v45, %v6947_v7  ;;  %7323 = vmatpush.bf16.msra.mxu1 %v11714_v0 }
 0x7dc   : > { %v7045_v41 = vadd.f32 %v7044_v5, %v6996_v59  ;;  %v6902_v39 = vpop.f32.mrf.mxu0  ;;  %v6951_v51 = vpop.f32.mrf.mxu1  ;;  %v11879_v59 = vld [vmem:[#allocation13 + $0x380] sm:$0xf0] }
 0x7dd   : > { %v6903_v49 = vadd.f32 %v6902_v39, %v15677_v33  ;;  %v12976_v39 = vld [vmem:[#allocation13 + $0x6c] sm:$0xf] }
 0x7de   : > { %v7883_v45 = vmax.f32 %v7045_v41, 0.0 }
 0x7df   : > { %v6952_v9 = vadd.f32 %v6951_v51, %v6903_v49  ;;  %7097 = vmatmul.bf16.gmra.mxu0 %v15512_v18  ;;  %7146 = vmatmul.bf16.gmra.mxu1 %v15514_v46  ;;  %v11882_v51 = vor.u32 %v13072_v3, %v11879_v59  ;;  %v11495_v49 = vld [vmem:[#allocation13 + $0x80] sm:$0xf0] }
 0x7e0   : > { %v11687_v3 = vld [vmem:[#allocation13 + $0x200] sm:$0xf0] }
 0x7e1   : > { %v6997_v15 = vpop.f32.mrf.mxu2  ;;  %v7046_v23 = vpop.f32.mrf.mxu3  ;;  %7373 = vmatpush.bf16.msra.mxu2 %v11882_v51 }
 0x7e2   : > { %v6998_v7 = vadd.f32 %v6997_v15, %v6949_v12 }
 0x7e4   : > { %v7047_v54 = vadd.f32 %v7046_v23, %v6998_v7  ;;  %v6904_v29 = vpop.f32.mrf.mxu0  ;;  %v6953_v11 = vpop.f32.mrf.mxu1  ;;  %v11498_v23 = vor.u32 %v12976_v39, %v11495_v49  ;;  %v12074_v7 = vor.u32 %v13120_v8, %v12071_v35 }
 0x7e5   : > { %v6905_v58 = vadd.f32 %v6904_v29, %v15677_v33 }
 0x7e6   : > { %v7889_v5 = vmax.f32 %v7047_v54, 0.0  ;;  %7195 = vmatmul.bf16.gmra.mxu2 %v15522_v25  ;;  %7244 = vmatmul.bf16.gmra.mxu3 %v15524_v37 }
 0x7e7   : > { %v6954_v19 = vadd.f32 %v6953_v11, %v6905_v58  ;;  %7275 = vmatpush.bf16.msra.mxu0 %v11498_v23  ;;  %7422 = vmatpush.bf16.msra.mxu3 %v12074_v7  ;;  %v13066_v7 = vld [vmem:[#allocation13 + $0x33c] sm:$0xf] }
 0x7e8   : > { %v15711_v12 = vpack.c.bf16 %v7889_v5, %v7883_v45  ;;  %v11690_v45 = vor.u32 %v13024_v21, %v11687_v3  ;;  %v12047_v3 = vld [vmem:[#allocation13 + $0x4d0] sm:$0xf0] }
 0x7e9   : > { %v7000_v0 = vpop.f32.mrf.mxu2  ;;  %v7049_v15 = vpop.f32.mrf.mxu3 }
 0x7ea   : > { %16597 = vst [vmem:[#allocation34_spill] sm:$0xff] %v15711_v12  ;;  %v7001_v41 = vadd.f32 %v7000_v0, %v6952_v9  ;;  %7324 = vmatpush.bf16.msra.mxu1 %v11690_v45 }
 0x7ec   : > { %v7050_v54 = vadd.f32 %v7049_v15, %v7001_v41  ;;  %v6907_v29 = vpop.f32.mrf.mxu0  ;;  %v6956_v11 = vpop.f32.mrf.mxu1  ;;  %v11855_v41 = vld [vmem:[#allocation13 + $0x350] sm:$0xf0] }
 0x7ed   : > { %v6908_v58 = vadd.f32 %v6907_v29, %v15677_v33  ;;  %v12970_v29 = vld [vmem:[#allocation13 + $0x3c] sm:$0xf]  ;;  %v11858_v21 = vor.u32 %v13066_v7, %v11855_v41  ;;  %v11663_v7 = vld [vmem:[#allocation13 + $0x1d0] sm:$0xf0] }
 0x7ee   : > { %v7895_v0 = vmax.f32 %v7050_v54, 0.0 }
 0x7ef   : > { %v6957_v59 = vadd.f32 %v6956_v11, %v6908_v58  ;;  %7102 = vmatmul.bf16.gmra.mxu0 %v15532_v47  ;;  %7151 = vmatmul.bf16.gmra.mxu1 %v15534_v31  ;;  %v11471_v11 = vld [vmem:[#allocation13 + $0x50] sm:$0xf0]  ;;  %v13114_v58 = vld [vmem:[#allocation13 + $0x4bc] sm:$0xf] }
 0x7f0   : > { %7374 = vmatpush.bf16.msra.mxu2 %v11858_v21 }
 0x7f1   : > { %v7002_v5 = vpop.f32.mrf.mxu2  ;;  %v7051_v39 = vpop.f32.mrf.mxu3 }
 0x7f2   : > { %v7003_v9 = vadd.f32 %v7002_v5, %v6954_v19 }
 0x7f4   : > { %v7052_v51 = vadd.f32 %v7051_v39, %v7003_v9  ;;  %v6909_v49 = vpop.f32.mrf.mxu0  ;;  %v6958_v8 = vpop.f32.mrf.mxu1  ;;  %v11474_v39 = vor.u32 %v12970_v29, %v11471_v11  ;;  %v12050_v9 = vor.u32 %v13114_v58, %v12047_v3 }
 0x7f5   : > { %v6910_v35 = vadd.f32 %v6909_v49, %v15677_v33 }
 0x7f6   : > { %v7901_v15 = vmax.f32 %v7052_v51, 0.0  ;;  %7200 = vmatmul.bf16.gmra.mxu2 %v15542_v16  ;;  %7249 = vmatmul.bf16.gmra.mxu3 %v15544_v34 }
 0x7f7   : > { %v6959_v23 = vadd.f32 %v6958_v8, %v6910_v35  ;;  %7276 = vmatpush.bf16.msra.mxu0 %v11474_v39  ;;  %7423 = vmatpush.bf16.msra.mxu3 %v12050_v9  ;;  %v13060_v9 = vld [vmem:[#allocation13 + $0x30c] sm:$0xf] }
 0x7f8   : > { %v15719_v19 = vpack.c.bf16 %v7901_v15, %v7895_v0  ;;  %v11666_v0 = vor.u32 %v13018_v32, %v11663_v7  ;;  %v12023_v7 = vld [vmem:[#allocation13 + $0x4a0] sm:$0xf0] }
 0x7f9   : > { %v7005_v45 = vpop.f32.mrf.mxu2  ;;  %v7054_v5 = vpop.f32.mrf.mxu3 }
 0x7fa   : > { %16598 = vst [vmem:[#allocation35_spill] sm:$0xff] %v15719_v19  ;;  %v7006_v54 = vadd.f32 %v7005_v45, %v6957_v59  ;;  %7325 = vmatpush.bf16.msra.mxu1 %v11666_v0  ;;  %v11717_v19 = vld [vmem:[#allocation13 + $0x220] sm:$0xf] }
 0x7fc   : > { %v7055_v51 = vadd.f32 %v7054_v5, %v7006_v54  ;;  %v6912_v49 = vpop.f32.mrf.mxu0  ;;  %v6961_v8 = vpop.f32.mrf.mxu1  ;;  %v11831_v54 = vld [vmem:[#allocation13 + $0x320] sm:$0xf0] }
 0x7fd   : > { %v6913_v35 = vadd.f32 %v6912_v49, %v15677_v33  ;;  %v12964_v49 = vld [vmem:[#allocation13 + $0xc] sm:$0xf]  ;;  %v11834_v32 = vor.u32 %v13060_v9, %v11831_v54 }
 0x7fe   : > { %v7907_v45 = vmax.f32 %v7055_v51, 0.0 }
 0x7ff   : > { %v6962_v41 = vadd.f32 %v6961_v8, %v6913_v35  ;;  %7107 = vmatmul.bf16.gmra.mxu0 %v15552_v50  ;;  %7156 = vmatmul.bf16.gmra.mxu1 %v15554_v55  ;;  %v11447_v8 = vld [vmem:[#allocation13 + $0x20] sm:$0xf0]  ;;  %v13108_v35 = vld [vmem:[#allocation13 + $0x48c] sm:$0xf] }
 0x800   : > { %7375 = vmatpush.bf16.msra.mxu2 %v11834_v32 }
 0x801   : > { %v7007_v15 = vpop.f32.mrf.mxu2  ;;  %v7056_v29 = vpop.f32.mrf.mxu3 }
 0x802   : > { %v7008_v59 = vadd.f32 %v7007_v15, %v6959_v23 }
 0x804   : > { %v7057_v21 = vadd.f32 %v7056_v29, %v7008_v59  ;;  %v6914_v11 = vpop.f32.mrf.mxu0  ;;  %v6963_v58 = vpop.f32.mrf.mxu1  ;;  %v11450_v29 = vor.u32 %v12964_v49, %v11447_v8  ;;  %v12026_v59 = vor.u32 %v13108_v35, %v12023_v7 }
 0x805   : > { %v6915_v3 = vadd.f32 %v6914_v11, %v15677_v33  ;;  %v11639_v11 = vld [vmem:[#allocation13 + $0x1a0] sm:$0xf0] }
 0x806   : > { %v7913_v5 = vmax.f32 %v7057_v21, 0.0  ;;  %7205 = vmatmul.bf16.gmra.mxu2 %v15562_v44  ;;  %7254 = vmatmul.bf16.gmra.mxu3 %v15564_v24  ;;  %v13012_v21 = vld [vmem:[#allocation13 + $0x18c] sm:$0xf] }
 0x807   : > { %v6964_v39 = vadd.f32 %v6963_v58, %v6915_v3  ;;  %7277 = vmatpush.bf16.msra.mxu0 %v11450_v29  ;;  %7424 = vmatpush.bf16.msra.mxu3 %v12026_v59  ;;  %v11642_v58 = vor.u32 %v13012_v21, %v11639_v11  ;;  %v11621_v29 = vld [vmem:[#allocation13 + $0x160] sm:$0xf]  ;;  %v13154_v11 = vld [vmem:[#allocation13 + $0x5f4] sm:$0xf0] }
 0x808   : > { %v15727_v23 = vpack.c.bf16 %v7913_v5, %v7907_v45  ;;  %v12197_v21 = vld [vmem:[#allocation13 + $0x5e0] sm:$0xf] }
 0x809   : > { %v7010_v0 = vpop.f32.mrf.mxu2  ;;  %v7059_v15 = vpop.f32.mrf.mxu3  ;;  %7326 = vmatpush.bf16.msra.mxu1 %v11642_v58 }
 0x80a   : > { %16599 = vst [vmem:[#allocation36_spill] sm:$0xff] %v15727_v23  ;;  %v7011_v51 = vadd.f32 %v7010_v0, %v6962_v41  ;;  %v11789_v23 = vld [vmem:[#allocation13 + $0x2b0] sm:$0xf] }
 0x80c   : > { %v7060_v3 = vadd.f32 %v7059_v15, %v7011_v51  ;;  %v6917_v38 = vpop.f32.mrf.mxu0  ;;  %v6966_v10 = vpop.f32.mrf.mxu1  ;;  %v13106_v15 = vld [vmem:[#allocation13 + $0x474] sm:$0xf0] }
 0x80d   : > { %v6918_v9 = vadd.f32 %v6917_v38, %v15677_v33  ;;  %v13010_v51 = vld [vmem:[#allocation13 + $0x174] sm:$0xf0] }
 0x80e   : > { %v7919_v7 = vmax.f32 %v7060_v3, 0.0 }
 0x80f   : > { %v6967_v54 = vadd.f32 %v6966_v10, %v6918_v9  ;;  %7112 = vmatmul.bf16.gmra.mxu0 %v15572_v6  ;;  %7161 = vmatmul.bf16.gmra.mxu1 %v15574_v57  ;;  %v12005_v10 = vld [vmem:[#allocation13 + $0x460] sm:$0xf] }
 0x810   : > { %v12006_v59 = vor.u32 %v13106_v15, %v12005_v10  ;;  %v13058_v10 = vld [vmem:[#allocation13 + $0x2f4] sm:$0xf0] }
 0x811   : > { %v7012_v45 = vpop.f32.mrf.mxu2  ;;  %v7061_v5 = vpop.f32.mrf.mxu3 }
 0x812   : > { %v7013_v41 = vadd.f32 %v7012_v45, %v6964_v39  ;;  %v11622_v45 = vor.u32 %v13010_v51, %v11621_v29  ;;  %7564 = vmatpush.bf16.msrb.mxu2 %v12006_v59 }
 0x814   : > { %v7062_v49 = vadd.f32 %v7061_v5, %v7013_v41  ;;  %v6919_v32 = vpop.f32.mrf.mxu0  ;;  %v6968_v8 = vpop.f32.mrf.mxu1  ;;  %v12198_v5 = vor.u32 %v13154_v11, %v12197_v21  ;;  %7466 = vmatpush.bf16.msrb.mxu0 %v11622_v45 }
 0x815   : > { %v6920_v35 = vadd.f32 %v6919_v32, %v15677_v33 }
 0x816   : > { %v7925_v0 = vmax.f32 %v7062_v49, 0.0  ;;  %7210 = vmatmul.bf16.gmra.mxu2 %v15582_v17  ;;  %7259 = vmatmul.bf16.gmra.mxu3 %v15584_v26 }
 0x817   : > { %v6969_v38 = vadd.f32 %v6968_v8, %v6920_v35  ;;  %7613 = vmatpush.bf16.msrb.mxu3 %v12198_v5  ;;  %v11813_v35 = vld [vmem:[#allocation13 + $0x2e0] sm:$0xf]  ;;  %v15746_v5 = vld [vmem:[%s16590_s27] sm:$0x3f] }
 0x818   : > { %v15735_v39 = vpack.c.bf16 %v7925_v0, %v7919_v7  ;;  %v11814_v7 = vor.u32 %v13058_v10, %v11813_v35  ;;  %v13004_v10 = vld [vmem:[#allocation13 + $0x144] sm:$0xf0] }
 0x819   : > { %v7015_v58 = vpop.f32.mrf.mxu2  ;;  %v7064_v9 = vpop.f32.mrf.mxu3 }
 0x81a   : > { %16600 = vst [vmem:[#allocation37_spill] sm:$0xff] %v15735_v39  ;;  %v7016_v3 = vadd.f32 %v7015_v58, %v6967_v54  ;;  %7515 = vmatpush.bf16.msrb.mxu1 %v11814_v7  ;;  %v12173_v7 = vld [vmem:[#allocation13 + $0x5b0] sm:$0xf] }
 0x81c   : > { %v7065_v41 = vadd.f32 %v7064_v9, %v7016_v3  ;;  %v6922_v49 = vpop.f32.mrf.mxu0  ;;  %v6971_v32 = vpop.f32.mrf.mxu1  ;;  %v15749_v3 = vperm.slane %v15746_v5, 2 }
 0x81d   : > { %v6923_v8 = vadd.f32 %v6922_v49, %v15677_v33  ;;  %v13100_v49 = vld [vmem:[#allocation13 + $0x444] sm:$0xf0] }
 0x81e   : > { %v7931_v58 = vmax.f32 %v7065_v41, 0.0 }
 0x81f   : > { %v6972_v15 = vadd.f32 %v6971_v32, %v6923_v8  ;;  %7117 = vmatmul.bf16.gmra.mxu0 %v15592_v48  ;;  %7166 = vmatmul.bf16.gmra.mxu1 %v15594_v63  ;;  %v11597_v32 = vld [vmem:[#allocation13 + $0x130] sm:$0xf] }
 0x821   : > { %v7017_v0 = vpop.f32.mrf.mxu2  ;;  %v7066_v29 = vpop.f32.mrf.mxu3 }
 0x822   : > { %v7018_v54 = vadd.f32 %v7017_v0, %v6969_v38  ;;  %v11981_v38 = vld [vmem:[#allocation13 + $0x430] sm:$0xf]  ;;  %v13148_v0 = vld [vmem:[#allocation13 + $0x5c4] sm:$0xf0] }
 0x823   : > { %v11982_v35 = vor.u32 %v13100_v49, %v11981_v38 }
 0x824   : > { %v7067_v59 = vadd.f32 %v7066_v29, %v7018_v54  ;;  %v6924_v51 = vpop.f32.mrf.mxu0  ;;  %v6973_v21 = vpop.f32.mrf.mxu1  ;;  %v11598_v54 = vor.u32 %v13004_v10, %v11597_v32 }
 0x825   : > { %v6925_v11 = vadd.f32 %v6924_v51, %v15677_v33  ;;  %7565 = vmatpush.bf16.msrb.mxu2 %v11982_v35 }
 0x826   : > { %v7937_v9 = vmax.f32 %v7067_v59, 0.0  ;;  %7215 = vmatmul.bf16.gmra.mxu2 %v15602_v36  ;;  %7264 = vmatmul.bf16.gmra.mxu3 %v15604_v27  ;;  %v12174_v59 = vor.u32 %v13148_v0, %v12173_v7 }
 0x827   : > { %v6974_v45 = vadd.f32 %v6973_v21, %v6925_v11  ;;  %7467 = vmatpush.bf16.msrb.mxu0 %v11598_v54  ;;  %v13094_v54 = vld [vmem:[#allocation13 + $0x414] sm:$0xf0] }
 0x828   : > { %v15751_v8 = vpack.c.bf16 %v7937_v9, %v7931_v58  ;;  %7614 = vmatpush.bf16.msrb.mxu3 %v12174_v59  ;;  %v13052_v58 = vld [vmem:[#allocation13 + $0x2c4] sm:$0xf0]  ;;  %v11573_v59 = vld [vmem:[#allocation13 + $0x100] sm:$0xf] }
 0x829   : > { %v7020_v33 = vpop.f32.mrf.mxu2  ;;  %v7069_v41 = vpop.f32.mrf.mxu3  ;;  %v11790_v38 = vor.u32 %v13052_v58, %v11789_v23  ;;  %v13142_v58 = vld [vmem:[#allocation13 + $0x594] sm:$0xf0] }
 0x82a   : > { %16601 = vst [vmem:[#allocation38_spill] sm:$0xff] %v15751_v8  ;;  %v7021_v29 = vadd.f32 %v7020_v33, %v6972_v15  ;;  %v11765_v8 = vld [vmem:[#allocation13 + $0x280] sm:$0xf] }
 0x82b   : > { %7516 = vmatpush.bf16.msrb.mxu1 %v11790_v38 }
 0x82c   : > { %v7070_v51 = vadd.f32 %v7069_v41, %v7021_v29  ;;  %v7083_v21 = vpop.f32.mrf.mxu0  ;;  %v7132_v11 = vpop.f32.mrf.mxu1  ;;  %v11957_v29 = vld [vmem:[#allocation13 + $0x400] sm:$0xf] }
 0x82d   : > { %v7084_v39 = vadd.f32 %v7083_v21, %v15749_v3  ;;  %v11958_v23 = vor.u32 %v13094_v54, %v11957_v29  ;;  %v12998_v21 = vld [vmem:[#allocation13 + $0x114] sm:$0xf0] }
 0x82e   : > { %v7943_v7 = vmax.f32 %v7070_v51, 0.0  ;;  %v13046_v29 = vld [vmem:[#allocation13 + $0x294] sm:$0xf0] }
 0x82f   : > { %v7133_v9 = vadd.f32 %v7132_v11, %v7084_v39  ;;  %7278 = vmatmul.bf16.vlgmr.msra.gmra.mxu0 %v15452_v22  ;;  %7327 = vmatmul.bf16.vlgmr.msra.gmra.mxu1 %v15454_v13  ;;  %v12149_v11 = vld [vmem:[#allocation13 + $0x580] sm:$0xf] }
 0x830   : > { %7566 = vmatpush.bf16.msrb.mxu2 %v11958_v23 }
 0x831   : > { %v7022_v49 = vpop.f32.mrf.mxu2  ;;  %v7071_v15 = vpop.f32.mrf.mxu3 }
 0x832   : > { %v7023_v32 = vadd.f32 %v7022_v49, %v6974_v45 }
 0x834   : > { %v7072_v33 = vadd.f32 %v7071_v15, %v7023_v32  ;;  %v7085_v41 = vpop.f32.mrf.mxu0  ;;  %v7134_v35 = vpop.f32.mrf.mxu1  ;;  %v11574_v15 = vor.u32 %v12998_v21, %v11573_v59  ;;  %v12150_v32 = vor.u32 %v13142_v58, %v12149_v11 }
 0x835   : > { %v7086_v10 = vadd.f32 %v7085_v41, %v15749_v3 }
 0x836   : > { %v7949_v0 = vmax.f32 %v7072_v33, 0.0  ;;  %7376 = vmatmul.bf16.vlgmr.msra.gmra.mxu2 %v15462_v14  ;;  %7425 = vmatmul.bf16.vlgmr.msra.gmra.mxu3 %v15464_v30 }
 0x837   : > { %v7135_v39 = vadd.f32 %v7134_v35, %v7086_v10  ;;  %7468 = vmatpush.bf16.msrb.mxu0 %v11574_v15  ;;  %7615 = vmatpush.bf16.msrb.mxu3 %v12150_v32  ;;  %v11933_v32 = vld [vmem:[#allocation13 + $0x3d0] sm:$0xf] }
 0x838   : > { %v15759_v45 = vpack.c.bf16 %v7949_v0, %v7943_v7  ;;  %v11766_v7 = vor.u32 %v13046_v29, %v11765_v8  ;;  %v13136_v29 = vld [vmem:[#allocation13 + $0x564] sm:$0xf0] }
 0x839   : > { %v7181_v38 = vpop.f32.mrf.mxu2  ;;  %v7230_v49 = vpop.f32.mrf.mxu3 }
 0x83a   : > { %16602 = vst [vmem:[#allocation46_spill] sm:$0xff] %v15759_v45  ;;  %v7182_v51 = vadd.f32 %v7181_v38, %v7133_v9  ;;  %7517 = vmatpush.bf16.msrb.mxu1 %v11766_v7  ;;  %v11741_v45 = vld [vmem:[#allocation13 + $0x250] sm:$0xf] }
 0x83c   : > { %v7231_v33 = vadd.f32 %v7230_v49, %v7182_v51  ;;  %v7088_v41 = vpop.f32.mrf.mxu0  ;;  %v7137_v35 = vpop.f32.mrf.mxu1  ;;  %v13088_v51 = vld [vmem:[#allocation13 + $0x3e4] sm:$0xf0] }
 0x83d   : > { %v7089_v10 = vadd.f32 %v7088_v41, %v15749_v3  ;;  %v11549_v41 = vld [vmem:[#allocation13 + $0xd0] sm:$0xf] }
 0x83e   : > { %v7860_v38 = vmax.f32 %v7231_v33, 0.0 }
 0x83f   : > { %v7138_v54 = vadd.f32 %v7137_v35, %v7089_v10  ;;  %7283 = vmatmul.bf16.gmra.mxu0 %v15472_v4  ;;  %7332 = vmatmul.bf16.gmra.mxu1 %v15474_v2  ;;  %v11934_v35 = vor.u32 %v13088_v51, %v11933_v32  ;;  %v12992_v10 = vld [vmem:[#allocation13 + $0xe4] sm:$0xf0] }
 0x841   : > { %v7183_v0 = vpop.f32.mrf.mxu2  ;;  %v7232_v59 = vpop.f32.mrf.mxu3  ;;  %7567 = vmatpush.bf16.msrb.mxu2 %v11934_v35 }
 0x842   : > { %v7184_v9 = vadd.f32 %v7183_v0, %v7135_v39  ;;  %v12125_v39 = vld [vmem:[#allocation13 + $0x550] sm:$0xf] }
 0x844   : > { %v7233_v23 = vadd.f32 %v7232_v59, %v7184_v9  ;;  %v7090_v21 = vpop.f32.mrf.mxu0  ;;  %v7139_v11 = vpop.f32.mrf.mxu1  ;;  %v11550_v59 = vor.u32 %v12992_v10, %v11549_v41  ;;  %v12126_v9 = vor.u32 %v13136_v29, %v12125_v39 }
 0x845   : > { %v7091_v58 = vadd.f32 %v7090_v21, %v15749_v3 }
 0x846   : > { %v7866_v49 = vmax.f32 %v7233_v23, 0.0  ;;  %7381 = vmatmul.bf16.gmra.mxu2 %v15482_v42  ;;  %7430 = vmatmul.bf16.gmra.mxu3 %v15484_v60 }
 0x847   : > { %v7140_v15 = vadd.f32 %v7139_v11, %v7091_v58  ;;  %7469 = vmatpush.bf16.msrb.mxu0 %v11550_v59  ;;  %7616 = vmatpush.bf16.msrb.mxu3 %v12126_v9  ;;  %v11909_v9 = vld [vmem:[#allocation13 + $0x3a0] sm:$0xf] }
 0x848   : > { %v15767_v8 = vpack.c.bf16 %v7866_v49, %v7860_v38  ;;  %v13040_v38 = vld [vmem:[#allocation13 + $0x264] sm:$0xf0] }
 0x849   : > { %v7186_v7 = vpop.f32.mrf.mxu2  ;;  %v7235_v0 = vpop.f32.mrf.mxu3  ;;  %v11742_v32 = vor.u32 %v13040_v38, %v11741_v45  ;;  %v13130_v38 = vld [vmem:[#allocation13 + $0x534] sm:$0xf0] }
 0x84a   : > { %v7187_v33 = vadd.f32 %v7186_v7, %v7138_v54 }
 0x84b   : > { %7518 = vmatpush.bf16.msrb.mxu1 %v11742_v32 }
 0x84c   : > { %v7236_v23 = vadd.f32 %v7235_v0, %v7187_v33  ;;  %v7093_v21 = vpop.f32.mrf.mxu0  ;;  %v7142_v11 = vpop.f32.mrf.mxu1  ;;  %v13082_v33 = vld [vmem:[#allocation13 + $0x3b4] sm:$0xf0] }
 0x84d   : > { %v7094_v58 = vadd.f32 %v7093_v21, %v15749_v3  ;;  %v11525_v21 = vld [vmem:[#allocation13 + $0xa0] sm:$0xf]  ;;  %v11910_v45 = vor.u32 %v13082_v33, %v11909_v9  ;;  %v13034_v9 = vld [vmem:[#allocation13 + $0x234] sm:$0xf0] }
 0x84e   : > { %v7872_v7 = vmax.f32 %v7236_v23, 0.0 }
 0x84f   : > { %v7143_v49 = vadd.f32 %v7142_v11, %v7094_v58  ;;  %7288 = vmatmul.bf16.gmra.mxu0 %v15492_v43  ;;  %7337 = vmatmul.bf16.gmra.mxu1 %v15494_v40  ;;  %v12986_v11 = vld [vmem:[#allocation13 + $0xb4] sm:$0xf0]  ;;  %v12101_v58 = vld [vmem:[#allocation13 + $0x520] sm:$0xf] }
 0x850   : > { %7568 = vmatpush.bf16.msrb.mxu2 %v11910_v45 }
 0x851   : > { %v7188_v51 = vpop.f32.mrf.mxu2  ;;  %v7237_v41 = vpop.f32.mrf.mxu3 }
 0x852   : > { %v7189_v54 = vadd.f32 %v7188_v51, %v7140_v15 }
 0x854   : > { %v7238_v35 = vadd.f32 %v7237_v41, %v7189_v54  ;;  %v7095_v10 = vpop.f32.mrf.mxu0  ;;  %v7144_v39 = vpop.f32.mrf.mxu1  ;;  %v11526_v41 = vor.u32 %v12986_v11, %v11525_v21  ;;  %v12102_v54 = vor.u32 %v13130_v38, %v12101_v58 }
 0x855   : > { %v7096_v29 = vadd.f32 %v7095_v10, %v15749_v3 }
 0x856   : > { %v7878_v0 = vmax.f32 %v7238_v35, 0.0  ;;  %7386 = vmatmul.bf16.gmra.mxu2 %v15502_v52  ;;  %7435 = vmatmul.bf16.gmra.mxu3 %v15504_v62 }
 0x857   : > { %v7145_v59 = vadd.f32 %v7144_v39, %v7096_v29  ;;  %7470 = vmatpush.bf16.msrb.mxu0 %v11526_v41  ;;  %7617 = vmatpush.bf16.msrb.mxu3 %v12102_v54  ;;  %v11885_v54 = vld [vmem:[#allocation13 + $0x370] sm:$0xf] }
 0x858   : > { %v15775_v15 = vpack.c.bf16 %v7878_v0, %v7872_v7  ;;  %v11718_v7 = vor.u32 %v13034_v9, %v11717_v19  ;;  %v13124_v9 = vld [vmem:[#allocation13 + $0x504] sm:$0xf0] }
 0x859   : > { %v7191_v32 = vpop.f32.mrf.mxu2  ;;  %v7240_v51 = vpop.f32.mrf.mxu3 }
 0x85a   : > { %v7192_v23 = vadd.f32 %v7191_v32, %v7143_v49  ;;  %7519 = vmatpush.bf16.msrb.mxu1 %v11718_v7 }
 0x85c   : > { %v7241_v35 = vadd.f32 %v7240_v51, %v7192_v23  ;;  %v7098_v10 = vpop.f32.mrf.mxu0  ;;  %v7147_v39 = vpop.f32.mrf.mxu1  ;;  %v13076_v23 = vld [vmem:[#allocation13 + $0x384] sm:$0xf0] }
 0x85d   : > { %v7099_v29 = vadd.f32 %v7098_v10, %v15749_v3  ;;  %v11501_v10 = vld [vmem:[#allocation13 + $0x70] sm:$0xf]  ;;  %v11886_v19 = vor.u32 %v13076_v23, %v11885_v54  ;;  %v13028_v54 = vld [vmem:[#allocation13 + $0x204] sm:$0xf0] }
 0x85e   : > { %v7884_v32 = vmax.f32 %v7241_v35, 0.0 }
 0x85f   : > { %v7148_v33 = vadd.f32 %v7147_v39, %v7099_v29  ;;  %7293 = vmatmul.bf16.gmra.mxu0 %v15512_v18  ;;  %7342 = vmatmul.bf16.gmra.mxu1 %v15514_v46  ;;  %v12980_v39 = vld [vmem:[#allocation13 + $0x84] sm:$0xf0]  ;;  %v12077_v29 = vld [vmem:[#allocation13 + $0x4f0] sm:$0xf] }
 0x860   : > { %7569 = vmatpush.bf16.msrb.mxu2 %v11886_v19 }
 0x861   : > { %v7193_v0 = vpop.f32.mrf.mxu2  ;;  %v7242_v21 = vpop.f32.mrf.mxu3 }
 0x862   : > { %v7194_v49 = vadd.f32 %v7193_v0, %v7145_v59 }
 0x864   : > { %v7243_v45 = vadd.f32 %v7242_v21, %v7194_v49  ;;  %v7100_v11 = vpop.f32.mrf.mxu0  ;;  %v7149_v58 = vpop.f32.mrf.mxu1  ;;  %v11502_v21 = vor.u32 %v12980_v39, %v11501_v10  ;;  %v12078_v49 = vor.u32 %v13124_v9, %v12077_v29 }
 0x865   : > { %v7101_v38 = vadd.f32 %v7100_v11, %v15749_v3 }
 0x866   : > { %v7890_v51 = vmax.f32 %v7243_v45, 0.0  ;;  %7391 = vmatmul.bf16.gmra.mxu2 %v15522_v25  ;;  %7440 = vmatmul.bf16.gmra.mxu3 %v15524_v37 }
 0x867   : > { %v7150_v41 = vadd.f32 %v7149_v58, %v7101_v38  ;;  %7471 = vmatpush.bf16.msrb.mxu0 %v11502_v21  ;;  %7618 = vmatpush.bf16.msrb.mxu3 %v12078_v49  ;;  %v11861_v49 = vld [vmem:[#allocation13 + $0x340] sm:$0xf] }
 0x868   : > { %v15783_v59 = vpack.c.bf16 %v7890_v51, %v7884_v32  ;;  %v11694_v32 = vor.u32 %v13028_v54, %v11693_v1  ;;  %v13118_v54 = vld [vmem:[#allocation13 + $0x4d4] sm:$0xf0] }
 0x869   : > { %v7196_v7 = vpop.f32.mrf.mxu2  ;;  %v7245_v0 = vpop.f32.mrf.mxu3 }
 0x86a   : > { %16603 = vst [vmem:[#allocation47_spill] sm:$0xff] %v15783_v59  ;;  %v7197_v35 = vadd.f32 %v7196_v7, %v7148_v33  ;;  %7520 = vmatpush.bf16.msrb.mxu1 %v11694_v32  ;;  %v11669_v59 = vld [vmem:[#allocation13 + $0x1c0] sm:$0xf] }
 0x86c   : > { %v7246_v45 = vadd.f32 %v7245_v0, %v7197_v35  ;;  %v7103_v11 = vpop.f32.mrf.mxu0  ;;  %v7152_v58 = vpop.f32.mrf.mxu1  ;;  %v13070_v35 = vld [vmem:[#allocation13 + $0x354] sm:$0xf0] }
 0x86d   : > { %v7104_v38 = vadd.f32 %v7103_v11, %v15749_v3  ;;  %v11477_v11 = vld [vmem:[#allocation13 + $0x40] sm:$0xf]  ;;  %v11862_v1 = vor.u32 %v13070_v35, %v11861_v49  ;;  %v13022_v49 = vld [vmem:[#allocation13 + $0x1d4] sm:$0xf0] }
 0x86e   : > { %v7896_v7 = vmax.f32 %v7246_v45, 0.0 }
 0x86f   : > { %v7153_v23 = vadd.f32 %v7152_v58, %v7104_v38  ;;  %7298 = vmatmul.bf16.gmra.mxu0 %v15532_v47  ;;  %7347 = vmatmul.bf16.gmra.mxu1 %v15534_v31  ;;  %v12974_v58 = vld [vmem:[#allocation13 + $0x54] sm:$0xf0]  ;;  %v12053_v38 = vld [vmem:[#allocation13 + $0x4c0] sm:$0xf] }
 0x870   : > { %7570 = vmatpush.bf16.msrb.mxu2 %v11862_v1 }
 0x871   : > { %v7198_v51 = vpop.f32.mrf.mxu2  ;;  %v7247_v10 = vpop.f32.mrf.mxu3 }
 0x872   : > { %v7199_v33 = vadd.f32 %v7198_v51, %v7150_v41 }
 0x874   : > { %v7248_v19 = vadd.f32 %v7247_v10, %v7199_v33  ;;  %v7105_v39 = vpop.f32.mrf.mxu0  ;;  %v7154_v29 = vpop.f32.mrf.mxu1  ;;  %v11478_v10 = vor.u32 %v12974_v58, %v11477_v11  ;;  %v12054_v33 = vor.u32 %v13118_v54, %v12053_v38 }
 0x875   : > { %v7106_v9 = vadd.f32 %v7105_v39, %v15749_v3 }
 0x876   : > { %v7902_v0 = vmax.f32 %v7248_v19, 0.0  ;;  %7396 = vmatmul.bf16.gmra.mxu2 %v15542_v16  ;;  %7445 = vmatmul.bf16.gmra.mxu3 %v15544_v34 }
 0x877   : > { %v7155_v21 = vadd.f32 %v7154_v29, %v7106_v9  ;;  %7472 = vmatpush.bf16.msrb.mxu0 %v11478_v10  ;;  %7619 = vmatpush.bf16.msrb.mxu3 %v12054_v33  ;;  %v11837_v33 = vld [vmem:[#allocation13 + $0x310] sm:$0xf] }
 0x878   : > { %v15791_v41 = vpack.c.bf16 %v7902_v0, %v7896_v7  ;;  %v11670_v7 = vor.u32 %v13022_v49, %v11669_v59  ;;  %v13112_v49 = vld [vmem:[#allocation13 + $0x4a4] sm:$0xf0] }
 0x879   : > { %v7201_v32 = vpop.f32.mrf.mxu2  ;;  %v7250_v51 = vpop.f32.mrf.mxu3 }
 0x87a   : > { %16604 = vst [vmem:[#allocation48_spill] sm:$0xff] %v15791_v41  ;;  %v7202_v45 = vadd.f32 %v7201_v32, %v7153_v23  ;;  %7521 = vmatpush.bf16.msrb.mxu1 %v11670_v7 }
 0x87c   : > { %v7251_v19 = vadd.f32 %v7250_v51, %v7202_v45  ;;  %v7108_v39 = vpop.f32.mrf.mxu0  ;;  %v7157_v29 = vpop.f32.mrf.mxu1  ;;  %v13064_v45 = vld [vmem:[#allocation13 + $0x324] sm:$0xf0] }
 0x87d   : > { %v7109_v9 = vadd.f32 %v7108_v39, %v15749_v3  ;;  %v11453_v39 = vld [vmem:[#allocation13 + $0x10] sm:$0xf]  ;;  %v11838_v59 = vor.u32 %v13064_v45, %v11837_v33 }
 0x87e   : > { %v7908_v32 = vmax.f32 %v7251_v19, 0.0 }
 0x87f   : > { %v7158_v35 = vadd.f32 %v7157_v29, %v7109_v9  ;;  %7303 = vmatmul.bf16.gmra.mxu0 %v15552_v50  ;;  %7352 = vmatmul.bf16.gmra.mxu1 %v15554_v55  ;;  %v12968_v29 = vld [vmem:[#allocation13 + $0x24] sm:$0xf0]  ;;  %v12029_v9 = vld [vmem:[#allocation13 + $0x490] sm:$0xf] }
 0x880   : > { %7571 = vmatpush.bf16.msrb.mxu2 %v11838_v59 }
 0x881   : > { %v7203_v0 = vpop.f32.mrf.mxu2  ;;  %v7252_v11 = vpop.f32.mrf.mxu3 }
 0x882   : > { %v7204_v23 = vadd.f32 %v7203_v0, %v7155_v21 }
 0x884   : > { %v7253_v1 = vadd.f32 %v7252_v11, %v7204_v23  ;;  %v7110_v58 = vpop.f32.mrf.mxu0  ;;  %v7159_v38 = vpop.f32.mrf.mxu1  ;;  %v11454_v11 = vor.u32 %v12968_v29, %v11453_v39  ;;  %v12030_v23 = vor.u32 %v13112_v49, %v12029_v9 }
 0x885   : > { %v7111_v54 = vadd.f32 %v7110_v58, %v15749_v3  ;;  %v13016_v58 = vld [vmem:[#allocation13 + $0x1a4] sm:$0xf0] }
 0x886   : > { %v7914_v51 = vmax.f32 %v7253_v1, 0.0  ;;  %7401 = vmatmul.bf16.gmra.mxu2 %v15562_v44  ;;  %7450 = vmatmul.bf16.gmra.mxu3 %v15564_v24  ;;  %v11645_v1 = vld [vmem:[#allocation13 + $0x190] sm:$0xf] }
 0x887   : > { %v7160_v10 = vadd.f32 %v7159_v38, %v7111_v54  ;;  %7473 = vmatpush.bf16.msrb.mxu0 %v11454_v11  ;;  %7620 = vmatpush.bf16.msrb.mxu3 %v12030_v23  ;;  %v11646_v38 = vor.u32 %v13016_v58, %v11645_v1  ;;  %v13007_v11 = vld [vmem:[#allocation13 + $0x164] sm:$0xf]  ;;  %v12199_v58 = vld [vmem:[#allocation13 + $0x5f8] sm:$0xf0] }
 0x888   : > { %v15799_v21 = vpack.c.bf16 %v7914_v51, %v7908_v32  ;;  %v13151_v1 = vld [vmem:[#allocation13 + $0x5e4] sm:$0xf] }
 0x889   : > { %v7206_v7 = vpop.f32.mrf.mxu2  ;;  %v7255_v0 = vpop.f32.mrf.mxu3  ;;  %7522 = vmatpush.bf16.msrb.mxu1 %v11646_v38 }
 0x88a   : > { %16605 = vst [vmem:[#allocation49_spill] sm:$0xff] %v15799_v21  ;;  %v7207_v19 = vadd.f32 %v7206_v7, %v7158_v35  ;;  %v13025_v21 = vld [vmem:[#allocation13 + $0x1f4] sm:$0xf] }
 0x88c   : > { %v7256_v54 = vadd.f32 %v7255_v0, %v7207_v19  ;;  %v7113_v41 = vpop.f32.mrf.mxu0  ;;  %v7162_v12 = vpop.f32.mrf.mxu1  ;;  %v12007_v0 = vld [vmem:[#allocation13 + $0x478] sm:$0xf0] }
 0x88d   : > { %v7114_v33 = vadd.f32 %v7113_v41, %v15749_v3  ;;  %v11623_v19 = vld [vmem:[#allocation13 + $0x178] sm:$0xf0] }
 0x88e   : > { %v7920_v49 = vmax.f32 %v7256_v54, 0.0 }
 0x88f   : > { %v7163_v45 = vadd.f32 %v7162_v12, %v7114_v33  ;;  %7308 = vmatmul.bf16.gmra.mxu0 %v15572_v6  ;;  %7357 = vmatmul.bf16.gmra.mxu1 %v15574_v57  ;;  %v13103_v12 = vld [vmem:[#allocation13 + $0x464] sm:$0xf] }
 0x890   : > { %v12010_v23 = vor.u32 %v13103_v12, %v12007_v0  ;;  %v11815_v12 = vld [vmem:[#allocation13 + $0x2f8] sm:$0xf0] }
 0x891   : > { %v7208_v32 = vpop.f32.mrf.mxu2  ;;  %v7257_v51 = vpop.f32.mrf.mxu3 }
 0x892   : > { %v7209_v35 = vadd.f32 %v7208_v32, %v7160_v10  ;;  %v11626_v32 = vor.u32 %v13007_v11, %v11623_v19  ;;  %7760 = vmatpush.bf16.msra.mxu2 %v12010_v23 }
 0x894   : > { %v7258_v39 = vadd.f32 %v7257_v51, %v7209_v35  ;;  %v7115_v59 = vpop.f32.mrf.mxu0  ;;  %v7164_v29 = vpop.f32.mrf.mxu1  ;;  %v12202_v51 = vor.u32 %v13151_v1, %v12199_v58  ;;  %7662 = vmatpush.bf16.msra.mxu0 %v11626_v32 }
 0x895   : > { %v7116_v9 = vadd.f32 %v7115_v59, %v15749_v3 }
 0x896   : > { %v7926_v7 = vmax.f32 %v7258_v39, 0.0  ;;  %7406 = vmatmul.bf16.gmra.mxu2 %v15582_v17  ;;  %7455 = vmatmul.bf16.gmra.mxu3 %v15584_v26 }
 0x897   : > { %v7165_v41 = vadd.f32 %v7164_v29, %v7116_v9  ;;  %7809 = vmatpush.bf16.msra.mxu3 %v12202_v51  ;;  %v13055_v9 = vld [vmem:[#allocation13 + $0x2e4] sm:$0xf]  ;;  %v15816_v51 = vperm.slane %v15746_v5, 3 }
 0x898   : > { %v15807_v10 = vpack.c.bf16 %v7926_v7, %v7920_v49  ;;  %v11818_v49 = vor.u32 %v13055_v9, %v11815_v12 }
 0x899   : > { %v7211_v38 = vpop.f32.mrf.mxu2  ;;  %v7260_v33 = vpop.f32.mrf.mxu3 }
 0x89a   : > { %16606 = vst [vmem:[#allocation50_spill] sm:$0xff] %v15807_v10  ;;  %v7212_v54 = vadd.f32 %v7211_v38, %v7163_v45  ;;  %7711 = vmatpush.bf16.msra.mxu1 %v11818_v49  ;;  %v11599_v49 = vld [vmem:[#allocation13 + $0x148] sm:$0xf0]  ;;  %v13031_v10 = vld [vmem:[#allocation13 + $0x224] sm:$0xf] }
 0x89c   : > { %v7261_v35 = vadd.f32 %v7260_v33, %v7212_v54  ;;  %v7118_v39 = vpop.f32.mrf.mxu0  ;;  %v7167_v59 = vpop.f32.mrf.mxu1  ;;  %v13097_v54 = vld [vmem:[#allocation13 + $0x434] sm:$0xf] }
 0x89d   : > { %v7119_v29 = vadd.f32 %v7118_v39, %v15749_v3  ;;  %v11983_v39 = vld [vmem:[#allocation13 + $0x448] sm:$0xf0] }
 0x89e   : > { %v7932_v38 = vmax.f32 %v7261_v35, 0.0  ;;  %v11986_v12 = vor.u32 %v13097_v54, %v11983_v39  ;;  %v12175_v35 = vld [vmem:[#allocation13 + $0x5c8] sm:$0xf0] }
 0x89f   : > { %v7168_v0 = vadd.f32 %v7167_v59, %v7119_v29  ;;  %7313 = vmatmul.bf16.gmra.mxu0 %v15592_v48  ;;  %7362 = vmatmul.bf16.gmra.mxu1 %v15594_v63  ;;  %v13001_v59 = vld [vmem:[#allocation13 + $0x134] sm:$0xf] }
 0x8a0   : > { %7761 = vmatpush.bf16.msra.mxu2 %v11986_v12 }
 0x8a1   : > { %v7213_v7 = vpop.f32.mrf.mxu2  ;;  %v7262_v11 = vpop.f32.mrf.mxu3 }
 0x8a2   : > { %v7214_v45 = vadd.f32 %v7213_v7, %v7165_v41 }
 0x8a4   : > { %v7263_v23 = vadd.f32 %v7262_v11, %v7214_v45  ;;  %v7120_v19 = vpop.f32.mrf.mxu0  ;;  %v7169_v1 = vpop.f32.mrf.mxu1  ;;  %v11602_v11 = vor.u32 %v13001_v59, %v11599_v49 }
 0x8a5   : > { %v7121_v58 = vadd.f32 %v7120_v19, %v15749_v3  ;;  %v13145_v3 = vld [vmem:[#allocation13 + $0x5b4] sm:$0xf] }
 0x8a6   : > { %v7938_v33 = vmax.f32 %v7263_v23, 0.0  ;;  %7411 = vmatmul.bf16.gmra.mxu2 %v15602_v36  ;;  %7460 = vmatmul.bf16.gmra.mxu3 %v15604_v27  ;;  %v12178_v45 = vor.u32 %v13145_v3, %v12175_v35 }
 0x8a7   : > { %v7170_v32 = vadd.f32 %v7169_v1, %v7121_v58  ;;  %7663 = vmatpush.bf16.msra.mxu0 %v11602_v11  ;;  %v13049_v58 = vld [vmem:[#allocation13 + $0x2b4] sm:$0xf]  ;;  %v13091_v11 = vld [vmem:[#allocation13 + $0x404] sm:$0xf] }
 0x8a8   : > { %v15818_v29 = vpack.c.bf16 %v7938_v33, %v7932_v38  ;;  %7810 = vmatpush.bf16.msra.mxu3 %v12178_v45  ;;  %v11791_v38 = vld [vmem:[#allocation13 + $0x2c8] sm:$0xf0]  ;;  %v11959_v45 = vld [vmem:[#allocation13 + $0x418] sm:$0xf0] }
 0x8a9   : > { %v7216_v41 = vpop.f32.mrf.mxu2  ;;  %v7265_v9 = vpop.f32.mrf.mxu3  ;;  %v11794_v54 = vor.u32 %v13049_v58, %v11791_v38  ;;  %v13139_v58 = vld [vmem:[#allocation13 + $0x584] sm:$0xf]  ;;  %v12151_v38 = vld [vmem:[#allocation13 + $0x598] sm:$0xf0] }
 0x8aa   : > { %16607 = vst [vmem:[#allocation51_spill] sm:$0xff] %v15818_v29  ;;  %v7217_v7 = vadd.f32 %v7216_v41, %v7168_v0  ;;  %v13043_v29 = vld [vmem:[#allocation13 + $0x284] sm:$0xf] }
 0x8ab   : > { %7712 = vmatpush.bf16.msra.mxu1 %v11794_v54 }
 0x8ac   : > { %v7266_v23 = vadd.f32 %v7265_v9, %v7217_v7  ;;  %v7279_v19 = vpop.f32.mrf.mxu0  ;;  %v7328_v1 = vpop.f32.mrf.mxu1 }
 0x8ad   : > { %v7280_v5 = vadd.f32 %v7279_v19, %v15816_v51  ;;  %v12995_v19 = vld [vmem:[#allocation13 + $0x104] sm:$0xf] }
 0x8ae   : > { %v7944_v3 = vmax.f32 %v7266_v23, 0.0 }
 0x8af   : > { %v7329_v33 = vadd.f32 %v7328_v1, %v7280_v5  ;;  %7474 = vmatmul.bf16.vlgmr.msrb.gmra.mxu0 %v15452_v22  ;;  %7523 = vmatmul.bf16.vlgmr.msrb.gmra.mxu1 %v15454_v13  ;;  %v11962_v1 = vor.u32 %v13091_v11, %v11959_v45  ;;  %v11575_v5 = vld [vmem:[#allocation13 + $0x118] sm:$0xf0] }
 0x8b0   : > { %v11767_v11 = vld [vmem:[#allocation13 + $0x298] sm:$0xf0] }
 0x8b1   : > { %v7218_v39 = vpop.f32.mrf.mxu2  ;;  %v7267_v0 = vpop.f32.mrf.mxu3  ;;  %7762 = vmatpush.bf16.msra.mxu2 %v11962_v1 }
 0x8b2   : > { %v7219_v59 = vadd.f32 %v7218_v39, %v7170_v32 }
 0x8b4   : > { %v7268_v41 = vadd.f32 %v7267_v0, %v7219_v59  ;;  %v7281_v9 = vpop.f32.mrf.mxu0  ;;  %v7330_v12 = vpop.f32.mrf.mxu1  ;;  %v11578_v0 = vor.u32 %v12995_v19, %v11575_v5  ;;  %v12154_v59 = vor.u32 %v13139_v58, %v12151_v38 }
 0x8b5   : > { %v7282_v49 = vadd.f32 %v7281_v9, %v15816_v51 }
 0x8b6   : > { %v7950_v35 = vmax.f32 %v7268_v41, 0.0  ;;  %7572 = vmatmul.bf16.vlgmr.msrb.gmra.mxu2 %v15462_v14  ;;  %7621 = vmatmul.bf16.vlgmr.msrb.gmra.mxu3 %v15464_v30 }
 0x8b7   : > { %v7331_v7 = vadd.f32 %v7330_v12, %v7282_v49  ;;  %7664 = vmatpush.bf16.msra.mxu0 %v11578_v0  ;;  %7811 = vmatpush.bf16.msra.mxu3 %v12154_v59  ;;  %v13085_v59 = vld [vmem:[#allocation13 + $0x3d4] sm:$0xf] }
 0x8b8   : > { %v15826_v32 = vpack.c.bf16 %v7950_v35, %v7944_v3  ;;  %v11770_v3 = vor.u32 %v13043_v29, %v11767_v11  ;;  %v12127_v11 = vld [vmem:[#allocation13 + $0x568] sm:$0xf0] }
 0x8b9   : > { %v7377_v54 = vpop.f32.mrf.mxu2  ;;  %v7426_v39 = vpop.f32.mrf.mxu3 }
 0x8ba   : > { %16608 = vst [vmem:[#allocation39_spill] sm:$0xff] %v15826_v32  ;;  %v7378_v23 = vadd.f32 %v7377_v54, %v7329_v33  ;;  %7713 = vmatpush.bf16.msra.mxu1 %v11770_v3  ;;  %v13037_v32 = vld [vmem:[#allocation13 + $0x254] sm:$0xf] }
 0x8bc   : > { %v7427_v41 = vadd.f32 %v7426_v39, %v7378_v23  ;;  %v7284_v9 = vpop.f32.mrf.mxu0  ;;  %v7333_v12 = vpop.f32.mrf.mxu1  ;;  %v11935_v23 = vld [vmem:[#allocation13 + $0x3e8] sm:$0xf0] }
 0x8bd   : > { %v7285_v49 = vadd.f32 %v7284_v9, %v15816_v51  ;;  %v12989_v9 = vld [vmem:[#allocation13 + $0xd4] sm:$0xf] }
 0x8be   : > { %v7861_v54 = vmax.f32 %v7427_v41, 0.0 }
 0x8bf   : > { %v7334_v45 = vadd.f32 %v7333_v12, %v7285_v49  ;;  %7479 = vmatmul.bf16.gmra.mxu0 %v15472_v4  ;;  %7528 = vmatmul.bf16.gmra.mxu1 %v15474_v2  ;;  %v11938_v12 = vor.u32 %v13085_v59, %v11935_v23  ;;  %v11551_v49 = vld [vmem:[#allocation13 + $0xe8] sm:$0xf0] }
 0x8c1   : > { %v7379_v35 = vpop.f32.mrf.mxu2  ;;  %v7428_v19 = vpop.f32.mrf.mxu3  ;;  %7763 = vmatpush.bf16.msra.mxu2 %v11938_v12 }
 0x8c2   : > { %v7380_v33 = vadd.f32 %v7379_v35, %v7331_v7  ;;  %v13133_v7 = vld [vmem:[#allocation13 + $0x554] sm:$0xf] }
 0x8c4   : > { %v7429_v1 = vadd.f32 %v7428_v19, %v7380_v33  ;;  %v7286_v5 = vpop.f32.mrf.mxu0  ;;  %v7335_v58 = vpop.f32.mrf.mxu1  ;;  %v11554_v19 = vor.u32 %v12989_v9, %v11551_v49  ;;  %v12130_v33 = vor.u32 %v13133_v7, %v12127_v11 }
 0x8c5   : > { %v7287_v38 = vadd.f32 %v7286_v5, %v15816_v51 }
 0x8c6   : > { %v7867_v39 = vmax.f32 %v7429_v1, 0.0  ;;  %7577 = vmatmul.bf16.gmra.mxu2 %v15482_v42  ;;  %7626 = vmatmul.bf16.gmra.mxu3 %v15484_v60 }
 0x8c7   : > { %v7336_v0 = vadd.f32 %v7335_v58, %v7287_v38  ;;  %7665 = vmatpush.bf16.msra.mxu0 %v11554_v19  ;;  %7812 = vmatpush.bf16.msra.mxu3 %v12130_v33  ;;  %v13079_v33 = vld [vmem:[#allocation13 + $0x3a4] sm:$0xf] }
 0x8c8   : > { %v15834_v29 = vpack.c.bf16 %v7867_v39, %v7861_v54  ;;  %v11743_v54 = vld [vmem:[#allocation13 + $0x268] sm:$0xf0] }
 0x8c9   : > { %v7382_v3 = vpop.f32.mrf.mxu2  ;;  %v7431_v35 = vpop.f32.mrf.mxu3  ;;  %v11746_v59 = vor.u32 %v13037_v32, %v11743_v54  ;;  %v12103_v54 = vld [vmem:[#allocation13 + $0x538] sm:$0xf0] }
 0x8ca   : > { %v7383_v41 = vadd.f32 %v7382_v3, %v7334_v45 }
 0x8cb   : > { %7714 = vmatpush.bf16.msra.mxu1 %v11746_v59 }
 0x8cc   : > { %v7432_v1 = vadd.f32 %v7431_v35, %v7383_v41  ;;  %v7289_v5 = vpop.f32.mrf.mxu0  ;;  %v7338_v58 = vpop.f32.mrf.mxu1  ;;  %v11911_v41 = vld [vmem:[#allocation13 + $0x3b8] sm:$0xf0] }
 0x8cd   : > { %v7290_v38 = vadd.f32 %v7289_v5, %v15816_v51  ;;  %v12983_v5 = vld [vmem:[#allocation13 + $0xa4] sm:$0xf]  ;;  %v11914_v32 = vor.u32 %v13079_v33, %v11911_v41  ;;  %v11719_v33 = vld [vmem:[#allocation13 + $0x238] sm:$0xf0] }
 0x8ce   : > { %v7873_v3 = vmax.f32 %v7432_v1, 0.0 }
 0x8cf   : > { %v7339_v39 = vadd.f32 %v7338_v58, %v7290_v38  ;;  %7484 = vmatmul.bf16.gmra.mxu0 %v15492_v43  ;;  %7533 = vmatmul.bf16.gmra.mxu1 %v15494_v40  ;;  %v11527_v58 = vld [vmem:[#allocation13 + $0xb8] sm:$0xf0]  ;;  %v13127_v38 = vld [vmem:[#allocation13 + $0x524] sm:$0xf] }
 0x8d0   : > { %7764 = vmatpush.bf16.msra.mxu2 %v11914_v32 }
 0x8d1   : > { %v7384_v23 = vpop.f32.mrf.mxu2  ;;  %v7433_v9 = vpop.f32.mrf.mxu3 }
 0x8d2   : > { %v7385_v45 = vadd.f32 %v7384_v23, %v7336_v0 }
 0x8d4   : > { %v7434_v12 = vadd.f32 %v7433_v9, %v7385_v45  ;;  %v7291_v49 = vpop.f32.mrf.mxu0  ;;  %v7340_v7 = vpop.f32.mrf.mxu1  ;;  %v11530_v9 = vor.u32 %v12983_v5, %v11527_v58  ;;  %v12106_v45 = vor.u32 %v13127_v38, %v12103_v54 }
 0x8d5   : > { %v7292_v11 = vadd.f32 %v7291_v49, %v15816_v51 }
 0x8d6   : > { %v7879_v35 = vmax.f32 %v7434_v12, 0.0  ;;  %7582 = vmatmul.bf16.gmra.mxu2 %v15502_v52  ;;  %7631 = vmatmul.bf16.gmra.mxu3 %v15504_v62 }
 0x8d7   : > { %v7341_v19 = vadd.f32 %v7340_v7, %v7292_v11  ;;  %7666 = vmatpush.bf16.msra.mxu0 %v11530_v9  ;;  %7813 = vmatpush.bf16.msra.mxu3 %v12106_v45  ;;  %v13073_v45 = vld [vmem:[#allocation13 + $0x374] sm:$0xf] }
 0x8d8   : > { %v15842_v0 = vpack.c.bf16 %v7879_v35, %v7873_v3  ;;  %v11722_v3 = vor.u32 %v13031_v10, %v11719_v33  ;;  %v12079_v33 = vld [vmem:[#allocation13 + $0x508] sm:$0xf0] }
 0x8d9   : > { %v7387_v59 = vpop.f32.mrf.mxu2  ;;  %v7436_v23 = vpop.f32.mrf.mxu3 }
 0x8da   : > { %v7388_v1 = vadd.f32 %v7387_v59, %v7339_v39  ;;  %7715 = vmatpush.bf16.msra.mxu1 %v11722_v3 }
 0x8dc   : > { %v7437_v12 = vadd.f32 %v7436_v23, %v7388_v1  ;;  %v7294_v49 = vpop.f32.mrf.mxu0  ;;  %v7343_v7 = vpop.f32.mrf.mxu1  ;;  %v11887_v1 = vld [vmem:[#allocation13 + $0x388] sm:$0xf0] }
 0x8dd   : > { %v7295_v11 = vadd.f32 %v7294_v49, %v15816_v51  ;;  %v12977_v49 = vld [vmem:[#allocation13 + $0x74] sm:$0xf]  ;;  %v11890_v10 = vor.u32 %v13073_v45, %v11887_v1  ;;  %v11695_v45 = vld [vmem:[#allocation13 + $0x208] sm:$0xf0] }
 0x8de   : > { %v7885_v59 = vmax.f32 %v7437_v12, 0.0 }
 0x8df   : > { %v7344_v41 = vadd.f32 %v7343_v7, %v7295_v11  ;;  %7489 = vmatmul.bf16.gmra.mxu0 %v15512_v18  ;;  %7538 = vmatmul.bf16.gmra.mxu1 %v15514_v46  ;;  %v11503_v7 = vld [vmem:[#allocation13 + $0x88] sm:$0xf0]  ;;  %v13121_v11 = vld [vmem:[#allocation13 + $0x4f4] sm:$0xf] }
 0x8e0   : > { %7765 = vmatpush.bf16.msra.mxu2 %v11890_v10 }
 0x8e1   : > { %v7389_v35 = vpop.f32.mrf.mxu2  ;;  %v7438_v5 = vpop.f32.mrf.mxu3 }
 0x8e2   : > { %v7390_v39 = vadd.f32 %v7389_v35, %v7341_v19 }
 0x8e4   : > { %v7439_v32 = vadd.f32 %v7438_v5, %v7390_v39  ;;  %v7296_v58 = vpop.f32.mrf.mxu0  ;;  %v7345_v38 = vpop.f32.mrf.mxu1  ;;  %v11506_v5 = vor.u32 %v12977_v49, %v11503_v7  ;;  %v12082_v39 = vor.u32 %v13121_v11, %v12079_v33 }
 0x8e5   : > { %v7297_v54 = vadd.f32 %v7296_v58, %v15816_v51 }
 0x8e6   : > { %v7891_v23 = vmax.f32 %v7439_v32, 0.0  ;;  %7587 = vmatmul.bf16.gmra.mxu2 %v15522_v25  ;;  %7636 = vmatmul.bf16.gmra.mxu3 %v15524_v37 }
 0x8e7   : > { %v7346_v9 = vadd.f32 %v7345_v38, %v7297_v54  ;;  %7667 = vmatpush.bf16.msra.mxu0 %v11506_v5  ;;  %7814 = vmatpush.bf16.msra.mxu3 %v12082_v39  ;;  %v13067_v39 = vld [vmem:[#allocation13 + $0x344] sm:$0xf] }
 0x8e8   : > { %v15850_v19 = vpack.c.bf16 %v7891_v23, %v7885_v59  ;;  %v11698_v59 = vor.u32 %v13025_v21, %v11695_v45  ;;  %v12055_v45 = vld [vmem:[#allocation13 + $0x4d8] sm:$0xf0] }
 0x8e9   : > { %v7392_v3 = vpop.f32.mrf.mxu2  ;;  %v7441_v35 = vpop.f32.mrf.mxu3 }
 0x8ea   : > { %16609 = vst [vmem:[#allocation40_spill] sm:$0xff] %v15850_v19  ;;  %v7393_v12 = vadd.f32 %v7392_v3, %v7344_v41  ;;  %7716 = vmatpush.bf16.msra.mxu1 %v11698_v59  ;;  %v13019_v19 = vld [vmem:[#allocation13 + $0x1c4] sm:$0xf] }
 0x8ec   : > { %v7442_v32 = vadd.f32 %v7441_v35, %v7393_v12  ;;  %v7299_v58 = vpop.f32.mrf.mxu0  ;;  %v7348_v38 = vpop.f32.mrf.mxu1  ;;  %v11863_v12 = vld [vmem:[#allocation13 + $0x358] sm:$0xf0] }
 0x8ed   : > { %v7300_v54 = vadd.f32 %v7299_v58, %v15816_v51  ;;  %v12971_v58 = vld [vmem:[#allocation13 + $0x44] sm:$0xf]  ;;  %v11866_v21 = vor.u32 %v13067_v39, %v11863_v12  ;;  %v11671_v39 = vld [vmem:[#allocation13 + $0x1d8] sm:$0xf0] }
 0x8ee   : > { %v7897_v3 = vmax.f32 %v7442_v32, 0.0 }
 0x8ef   : > { %v7349_v1 = vadd.f32 %v7348_v38, %v7300_v54  ;;  %7494 = vmatmul.bf16.gmra.mxu0 %v15532_v47  ;;  %7543 = vmatmul.bf16.gmra.mxu1 %v15534_v31  ;;  %v11479_v38 = vld [vmem:[#allocation13 + $0x58] sm:$0xf0]  ;;  %v13115_v54 = vld [vmem:[#allocation13 + $0x4c4] sm:$0xf] }
 0x8f0   : > { %7766 = vmatpush.bf16.msra.mxu2 %v11866_v21 }
 0x8f1   : > { %v7394_v23 = vpop.f32.mrf.mxu2  ;;  %v7443_v49 = vpop.f32.mrf.mxu3 }
 0x8f2   : > { %v7395_v41 = vadd.f32 %v7394_v23, %v7346_v9 }
 0x8f4   : > { %v7444_v10 = vadd.f32 %v7443_v49, %v7395_v41  ;;  %v7301_v7 = vpop.f32.mrf.mxu0  ;;  %v7350_v11 = vpop.f32.mrf.mxu1  ;;  %v11482_v49 = vor.u32 %v12971_v58, %v11479_v38  ;;  %v12058_v41 = vor.u32 %v13115_v54, %v12055_v45 }
 0x8f5   : > { %v7302_v33 = vadd.f32 %v7301_v7, %v15816_v51 }
 0x8f6   : > { %v7903_v35 = vmax.f32 %v7444_v10, 0.0  ;;  %7592 = vmatmul.bf16.gmra.mxu2 %v15542_v16  ;;  %7641 = vmatmul.bf16.gmra.mxu3 %v15544_v34 }
 0x8f7   : > { %v7351_v5 = vadd.f32 %v7350_v11, %v7302_v33  ;;  %7668 = vmatpush.bf16.msra.mxu0 %v11482_v49  ;;  %7815 = vmatpush.bf16.msra.mxu3 %v12058_v41  ;;  %v13061_v41 = vld [vmem:[#allocation13 + $0x314] sm:$0xf] }
 0x8f8   : > { %v15858_v9 = vpack.c.bf16 %v7903_v35, %v7897_v3  ;;  %v11674_v3 = vor.u32 %v13019_v19, %v11671_v39  ;;  %v12031_v39 = vld [vmem:[#allocation13 + $0x4a8] sm:$0xf0] }
 0x8f9   : > { %v7397_v59 = vpop.f32.mrf.mxu2  ;;  %v7446_v23 = vpop.f32.mrf.mxu3 }
 0x8fa   : > { %16610 = vst [vmem:[#allocation52_spill] sm:$0xff] %v15858_v9  ;;  %v7398_v32 = vadd.f32 %v7397_v59, %v7349_v1  ;;  %7717 = vmatpush.bf16.msra.mxu1 %v11674_v3 }
 0x8fc   : > { %v7447_v10 = vadd.f32 %v7446_v23, %v7398_v32  ;;  %v7304_v7 = vpop.f32.mrf.mxu0  ;;  %v7353_v11 = vpop.f32.mrf.mxu1  ;;  %v11839_v32 = vld [vmem:[#allocation13 + $0x328] sm:$0xf0] }
 0x8fd   : > { %v7305_v33 = vadd.f32 %v7304_v7, %v15816_v51  ;;  %v12965_v7 = vld [vmem:[#allocation13 + $0x14] sm:$0xf]  ;;  %v11842_v19 = vor.u32 %v13061_v41, %v11839_v32 }
 0x8fe   : > { %v7909_v59 = vmax.f32 %v7447_v10, 0.0 }
 0x8ff   : > { %v7354_v12 = vadd.f32 %v7353_v11, %v7305_v33  ;;  %7499 = vmatmul.bf16.gmra.mxu0 %v15552_v50  ;;  %7548 = vmatmul.bf16.gmra.mxu1 %v15554_v55  ;;  %v11455_v11 = vld [vmem:[#allocation13 + $0x28] sm:$0xf0]  ;;  %v13109_v33 = vld [vmem:[#allocation13 + $0x494] sm:$0xf] }
 0x900   : > { %7767 = vmatpush.bf16.msra.mxu2 %v11842_v19 }
 0x901   : > { %v7399_v35 = vpop.f32.mrf.mxu2  ;;  %v7448_v58 = vpop.f32.mrf.mxu3 }
 0x902   : > { %v7400_v1 = vadd.f32 %v7399_v35, %v7351_v5 }
 0x904   : > { %v7449_v21 = vadd.f32 %v7448_v58, %v7400_v1  ;;  %v7306_v38 = vpop.f32.mrf.mxu0  ;;  %v7355_v54 = vpop.f32.mrf.mxu1  ;;  %v11458_v58 = vor.u32 %v12965_v7, %v11455_v11  ;;  %v12034_v1 = vor.u32 %v13109_v33, %v12031_v39 }
 0x905   : > { %v7307_v45 = vadd.f32 %v7306_v38, %v15816_v51  ;;  %v11647_v38 = vld [vmem:[#allocation13 + $0x1a8] sm:$0xf0] }
 0x906   : > { %v7915_v23 = vmax.f32 %v7449_v21, 0.0  ;;  %7597 = vmatmul.bf16.gmra.mxu2 %v15562_v44  ;;  %7646 = vmatmul.bf16.gmra.mxu3 %v15564_v24  ;;  %v13013_v21 = vld [vmem:[#allocation13 + $0x194] sm:$0xf] }
 0x907   : > { %v7356_v49 = vadd.f32 %v7355_v54, %v7307_v45  ;;  %7669 = vmatpush.bf16.msra.mxu0 %v11458_v58  ;;  %7816 = vmatpush.bf16.msra.mxu3 %v12034_v1  ;;  %v11650_v54 = vor.u32 %v13013_v21, %v11647_v38  ;;  %v12261_v58 = vld [vmem:[#allocation14 + $0x70] sm:$0xf]  ;;  %v13218_v38 = vld [vmem:[#allocation14 + $0x1f4] sm:$0xf0] }
 0x908   : > { %v15866_v5 = vpack.c.bf16 %v7915_v23, %v7909_v59  ;;  %v12453_v21 = vld [vmem:[#allocation14 + $0x1f0] sm:$0xf] }
 0x909   : > { %v7402_v3 = vpop.f32.mrf.mxu2  ;;  %v7451_v35 = vpop.f32.mrf.mxu3  ;;  %7718 = vmatpush.bf16.msra.mxu1 %v11650_v54 }
 0x90a   : > { %16611 = vst [vmem:[#allocation44_spill] sm:$0xff] %v15866_v5  ;;  %v7403_v10 = vadd.f32 %v7402_v3, %v7354_v12  ;;  %v12317_v5 = vld [vmem:[#allocation14 + $0xe0] sm:$0xf] }
 0x90c   : > { %v7452_v45 = vadd.f32 %v7451_v35, %v7403_v10  ;;  %v7309_v9 = vpop.f32.mrf.mxu0  ;;  %v7358_v53 = vpop.f32.mrf.mxu1  ;;  %v13202_v35 = vld [vmem:[#allocation14 + $0x174] sm:$0xf0] }
 0x90d   : > { %v7310_v41 = vadd.f32 %v7309_v9, %v15816_v51  ;;  %v13170_v10 = vld [vmem:[#allocation14 + $0x74] sm:$0xf0] }
 0x90e   : > { %v7921_v39 = vmax.f32 %v7452_v45, 0.0 }
 0x90f   : > { %v7359_v32 = vadd.f32 %v7358_v53, %v7310_v41  ;;  %7504 = vmatmul.bf16.gmra.mxu0 %v15572_v6  ;;  %7553 = vmatmul.bf16.gmra.mxu1 %v15574_v57  ;;  %v12389_v53 = vld [vmem:[#allocation14 + $0x170] sm:$0xf] }
 0x910   : > { %v12390_v1 = vor.u32 %v13202_v35, %v12389_v53  ;;  %v13186_v53 = vld [vmem:[#allocation14 + $0xf4] sm:$0xf0] }
 0x911   : > { %v7404_v59 = vpop.f32.mrf.mxu2  ;;  %v7453_v23 = vpop.f32.mrf.mxu3 }
 0x912   : > { %v7405_v12 = vadd.f32 %v7404_v59, %v7356_v49  ;;  %v12262_v59 = vor.u32 %v13170_v10, %v12261_v58  ;;  %8682 = vmatpush.bf16.msrb.mxu2 %v12390_v1 }
 0x914   : > { %v7454_v7 = vadd.f32 %v7453_v23, %v7405_v12  ;;  %v7311_v19 = vpop.f32.mrf.mxu0  ;;  %v7360_v11 = vpop.f32.mrf.mxu1  ;;  %v12454_v23 = vor.u32 %v13218_v38, %v12453_v21  ;;  %8584 = vmatpush.bf16.msrb.mxu0 %v12262_v59 }
 0x915   : > { %v7312_v33 = vadd.f32 %v7311_v19, %v15816_v51 }
 0x916   : > { %v7927_v3 = vmax.f32 %v7454_v7, 0.0  ;;  %7602 = vmatmul.bf16.gmra.mxu2 %v15582_v17  ;;  %7651 = vmatmul.bf16.gmra.mxu3 %v15584_v26 }
 0x917   : > { %v7361_v9 = vadd.f32 %v7360_v11, %v7312_v33  ;;  %8731 = vmatpush.bf16.msrb.mxu3 %v12454_v23  ;;  %v12325_v33 = vld [vmem:[#allocation14 + $0xf0] sm:$0xf] }
 0x918   : > { %v15874_v49 = vpack.c.bf16 %v7927_v3, %v7921_v39  ;;  %v12326_v39 = vor.u32 %v13186_v53, %v12325_v33  ;;  %v15885_v23 = vld [vmem:[%s16590_s27] sm:$0x3f]  ;;  %v13168_v53 = vld [vmem:[#allocation14 + $0x64] sm:$0xf0] }
 0x919   : > { %v7407_v54 = vpop.f32.mrf.mxu2  ;;  %v7456_v41 = vpop.f32.mrf.mxu3 }
 0x91a   : > { %16612 = vst [vmem:[#allocation53_spill] sm:$0xff] %v15874_v49  ;;  %v7408_v45 = vadd.f32 %v7407_v54, %v7359_v32  ;;  %8633 = vmatpush.bf16.msrb.mxu1 %v12326_v39  ;;  %v12445_v39 = vld [vmem:[#allocation14 + $0x1e0] sm:$0xf] }
 0x91c   : > { %v7457_v12 = vadd.f32 %v7456_v41, %v7408_v45  ;;  %v7314_v7 = vpop.f32.mrf.mxu0  ;;  %v7363_v19 = vpop.f32.mrf.mxu1  ;;  %v15888_v45 = vperm.slane %v15885_v23, 4 }
 0x91d   : > { %v7315_v11 = vadd.f32 %v7314_v7, %v15816_v51  ;;  %v13200_v7 = vld [vmem:[#allocation14 + $0x164] sm:$0xf0] }
 0x91e   : > { %v7933_v54 = vmax.f32 %v7457_v12, 0.0 }
 0x91f   : > { %v7364_v35 = vadd.f32 %v7363_v19, %v7315_v11  ;;  %7509 = vmatmul.bf16.gmra.mxu0 %v15592_v48  ;;  %7558 = vmatmul.bf16.gmra.mxu1 %v15594_v63  ;;  %v12253_v19 = vld [vmem:[#allocation14 + $0x60] sm:$0xf] }
 0x921   : > { %v7409_v3 = vpop.f32.mrf.mxu2  ;;  %v7458_v58 = vpop.f32.mrf.mxu3 }
 0x922   : > { %v7410_v32 = vadd.f32 %v7409_v3, %v7361_v9  ;;  %v12381_v9 = vld [vmem:[#allocation14 + $0x160] sm:$0xf]  ;;  %v13216_v3 = vld [vmem:[#allocation14 + $0x1e4] sm:$0xf0] }
 0x923   : > { %v12382_v33 = vor.u32 %v13200_v7, %v12381_v9 }
 0x924   : > { %v7459_v1 = vadd.f32 %v7458_v58, %v7410_v32  ;;  %v7316_v10 = vpop.f32.mrf.mxu0  ;;  %v7365_v21 = vpop.f32.mrf.mxu1  ;;  %v12254_v32 = vor.u32 %v13168_v53, %v12253_v19 }
 0x925   : > { %v7317_v38 = vadd.f32 %v7316_v10, %v15816_v51  ;;  %8683 = vmatpush.bf16.msrb.mxu2 %v12382_v33 }
 0x926   : > { %v7939_v41 = vmax.f32 %v7459_v1, 0.0  ;;  %7607 = vmatmul.bf16.gmra.mxu2 %v15602_v36  ;;  %7656 = vmatmul.bf16.gmra.mxu3 %v15604_v27  ;;  %v12446_v1 = vor.u32 %v13216_v3, %v12445_v39 }
 0x927   : > { %v7366_v59 = vadd.f32 %v7365_v21, %v7317_v38  ;;  %8585 = vmatpush.bf16.msrb.mxu0 %v12254_v32  ;;  %v13166_v32 = vld [vmem:[#allocation14 + $0x54] sm:$0xf0] }
 0x928   : > { %v15890_v11 = vpack.c.bf16 %v7939_v41, %v7933_v54  ;;  %8732 = vmatpush.bf16.msrb.mxu3 %v12446_v1  ;;  %v13184_v54 = vld [vmem:[#allocation14 + $0xe4] sm:$0xf0]  ;;  %v12437_v1 = vld [vmem:[#allocation14 + $0x1d0] sm:$0xf] }
 0x929   : > { %v7412_v51 = vpop.f32.mrf.mxu2  ;;  %v7461_v12 = vpop.f32.mrf.mxu3  ;;  %v12318_v9 = vor.u32 %v13184_v54, %v12317_v5 }
 0x92a   : > { %16613 = vst [vmem:[#allocation45_spill] sm:$0xff] %v15890_v11  ;;  %v7413_v58 = vadd.f32 %v7412_v51, %v7364_v35 }
 0x92b   : > { %8634 = vmatpush.bf16.msrb.mxu1 %v12318_v9 }
 0x92c   : > { %v7462_v10 = vadd.f32 %v7461_v12, %v7413_v58  ;;  %v7475_v21 = vpop.f32.mrf.mxu0  ;;  %v7524_v38 = vpop.f32.mrf.mxu1  ;;  %v13198_v58 = vld [vmem:[#allocation14 + $0x154] sm:$0xf0] }
 0x92d   : > { %v7476_v49 = vadd.f32 %v7475_v21, %v15888_v45  ;;  %v13214_v21 = vld [vmem:[#allocation14 + $0x1d4] sm:$0xf0] }
 0x92e   : > { %v7945_v39 = vmax.f32 %v7462_v10, 0.0 }
 0x92f   : > { %v7525_v41 = vadd.f32 %v7524_v38, %v7476_v49  ;;  %7670 = vmatmul.bf16.vlgmr.msra.gmra.mxu0 %v15452_v22  ;;  %7719 = vmatmul.bf16.vlgmr.msra.gmra.mxu1 %v15454_v13  ;;  %v12373_v22 = vld [vmem:[#allocation14 + $0x150] sm:$0xf] }
 0x930   : > { %v12245_v13 = vld [vmem:[#allocation14 + $0x50] sm:$0xf]  ;;  %v12374_v5 = vor.u32 %v13198_v58, %v12373_v22 }
 0x931   : > { %v7414_v7 = vpop.f32.mrf.mxu2  ;;  %v7463_v35 = vpop.f32.mrf.mxu3  ;;  %v12246_v9 = vor.u32 %v13166_v32, %v12245_v13 }
 0x932   : > { %v7415_v19 = vadd.f32 %v7414_v7, %v7366_v59  ;;  %v12438_v7 = vor.u32 %v13214_v21, %v12437_v1  ;;  %8684 = vmatpush.bf16.msrb.mxu2 %v12374_v5 }
 0x933   : > { %8586 = vmatpush.bf16.msrb.mxu0 %v12246_v9 }
 0x934   : > { %v7464_v51 = vadd.f32 %v7463_v35, %v7415_v19  ;;  %v7477_v12 = vpop.f32.mrf.mxu0  ;;  %v7526_v33 = vpop.f32.mrf.mxu1  ;;  %8733 = vmatpush.bf16.msrb.mxu3 %v12438_v7  ;;  %v13164_v7 = vld [vmem:[#allocation14 + $0x44] sm:$0xf0] }
 0x935   : > { %v7478_v53 = vadd.f32 %v7477_v12, %v15888_v45  ;;  %v13182_v12 = vld [vmem:[#allocation14 + $0xd4] sm:$0xf0] }
 0x936   : > { %v7951_v3 = vmax.f32 %v7464_v51, 0.0  ;;  %7768 = vmatmul.bf16.vlgmr.msra.gmra.mxu2 %v15462_v14  ;;  %7817 = vmatmul.bf16.vlgmr.msra.gmra.mxu3 %v15464_v30  ;;  %v12309_v51 = vld [vmem:[#allocation14 + $0xd0] sm:$0xf] }
 0x937   : > { %v7527_v49 = vadd.f32 %v7526_v33, %v7478_v53  ;;  %v12310_v53 = vor.u32 %v13182_v12, %v12309_v51 }
 0x938   : > { %v15898_v59 = vpack.c.bf16 %v7951_v3, %v7945_v39 }
 0x939   : > { %v7573_v38 = vpop.f32.mrf.mxu2  ;;  %v7622_v54 = vpop.f32.mrf.mxu3  ;;  %8635 = vmatpush.bf16.msrb.mxu1 %v12310_v53 }
 0x93a   : > { %16614 = vst [vmem:[#allocation54_spill] sm:$0xff] %v15898_v59  ;;  %v7574_v10 = vadd.f32 %v7573_v38, %v7525_v41  ;;  %v13196_v38 = vld [vmem:[#allocation14 + $0x144] sm:$0xf0] }
 0x93c   : > { %v7623_v14 = vadd.f32 %v7622_v54, %v7574_v10  ;;  %v7480_v30 = vpop.f32.mrf.mxu0  ;;  %v7529_v35 = vpop.f32.mrf.mxu1  ;;  %v13212_v10 = vld [vmem:[#allocation14 + $0x1c4] sm:$0xf0] }
 0x93d   : > { %v7481_v19 = vadd.f32 %v7480_v30, %v15888_v45 }
 0x93e   : > { %v7862_v32 = vmax.f32 %v7623_v14, 0.0 }
 0x93f   : > { %v7530_v33 = vadd.f32 %v7529_v35, %v7481_v19  ;;  %7675 = vmatmul.bf16.gmra.mxu0 %v15472_v4  ;;  %7724 = vmatmul.bf16.gmra.mxu1 %v15474_v2  ;;  %v12365_v4 = vld [vmem:[#allocation14 + $0x140] sm:$0xf] }
 0x940   : > { %v12237_v2 = vld [vmem:[#allocation14 + $0x40] sm:$0xf]  ;;  %v12366_v9 = vor.u32 %v13196_v38, %v12365_v4 }
 0x941   : > { %v7575_v39 = vpop.f32.mrf.mxu2  ;;  %v7624_v3 = vpop.f32.mrf.mxu3  ;;  %v12238_v19 = vor.u32 %v13164_v7, %v12237_v2  ;;  %v13194_v7 = vld [vmem:[#allocation14 + $0x134] sm:$0xf0] }
 0x942   : > { %v7576_v41 = vadd.f32 %v7575_v39, %v7527_v49  ;;  %v12429_v49 = vld [vmem:[#allocation14 + $0x1c0] sm:$0xf]  ;;  %8685 = vmatpush.bf16.msrb.mxu2 %v12366_v9 }
 0x943   : > { %v12430_v51 = vor.u32 %v13212_v10, %v12429_v49  ;;  %8587 = vmatpush.bf16.msrb.mxu0 %v12238_v19  ;;  %v12301_v39 = vld [vmem:[#allocation14 + $0xc0] sm:$0xf]  ;;  %v13162_v10 = vld [vmem:[#allocation14 + $0x34] sm:$0xf0] }
 0x944   : > { %v7625_v22 = vadd.f32 %v7624_v3, %v7576_v41  ;;  %v7482_v58 = vpop.f32.mrf.mxu0  ;;  %v7531_v13 = vpop.f32.mrf.mxu1  ;;  %v13180_v3 = vld [vmem:[#allocation14 + $0xc4] sm:$0xf0] }
 0x945   : > { %v7483_v5 = vadd.f32 %v7482_v58, %v15888_v45  ;;  %8734 = vmatpush.bf16.msrb.mxu3 %v12430_v51 }
 0x946   : > { %v7868_v1 = vmax.f32 %v7625_v22, 0.0  ;;  %7773 = vmatmul.bf16.gmra.mxu2 %v15482_v42  ;;  %7822 = vmatmul.bf16.gmra.mxu3 %v15484_v60  ;;  %v12302_v22 = vor.u32 %v13180_v3, %v12301_v39  ;;  %v12293_v39 = vld [vmem:[#allocation14 + $0xb0] sm:$0xf]  ;;  %v13178_v3 = vld [vmem:[#allocation14 + $0xb4] sm:$0xf0] }
 0x947   : > { %v7532_v21 = vadd.f32 %v7531_v13, %v7483_v5 }
 0x948   : > { %v15906_v54 = vpack.c.bf16 %v7868_v1, %v7862_v32  ;;  %8636 = vmatpush.bf16.msrb.mxu1 %v12302_v22 }
 0x949   : > { %v7578_v30 = vpop.f32.mrf.mxu2  ;;  %v7627_v35 = vpop.f32.mrf.mxu3 }
 0x94a   : > { %v7579_v14 = vadd.f32 %v7578_v30, %v7530_v33  ;;  %v12421_v30 = vld [vmem:[#allocation14 + $0x1b0] sm:$0xf] }
 0x94c   : > { %v7628_v42 = vadd.f32 %v7627_v35, %v7579_v14  ;;  %v7485_v60 = vpop.f32.mrf.mxu0  ;;  %v7534_v12 = vpop.f32.mrf.mxu1  ;;  %v13210_v35 = vld [vmem:[#allocation14 + $0x1b4] sm:$0xf0] }
 0x94d   : > { %v7486_v53 = vadd.f32 %v7485_v60, %v15888_v45  ;;  %v12422_v60 = vor.u32 %v13210_v35, %v12421_v30  ;;  %v13208_v30 = vld [vmem:[#allocation14 + $0x1a4] sm:$0xf0] }
 0x94e   : > { %v7874_v38 = vmax.f32 %v7628_v42, 0.0 }
 0x94f   : > { %v7535_v41 = vadd.f32 %v7534_v12, %v7486_v53  ;;  %7680 = vmatmul.bf16.gmra.mxu0 %v15492_v43  ;;  %7729 = vmatmul.bf16.gmra.mxu1 %v15494_v40  ;;  %v12357_v43 = vld [vmem:[#allocation14 + $0x130] sm:$0xf] }
 0x950   : > { %v12229_v40 = vld [vmem:[#allocation14 + $0x30] sm:$0xf]  ;;  %v12358_v49 = vor.u32 %v13194_v7, %v12357_v43  ;;  %8735 = vmatpush.bf16.msrb.mxu3 %v12422_v60  ;;  %v13192_v7 = vld [vmem:[#allocation14 + $0x124] sm:$0xf0] }
 0x951   : > { %v7580_v58 = vpop.f32.mrf.mxu2  ;;  %v7629_v13 = vpop.f32.mrf.mxu3  ;;  %v12230_v14 = vor.u32 %v13162_v10, %v12229_v40  ;;  %v12413_v10 = vld [vmem:[#allocation14 + $0x1a0] sm:$0xf] }
 0x952   : > { %v7581_v33 = vadd.f32 %v7580_v58, %v7532_v21  ;;  %8686 = vmatpush.bf16.msrb.mxu2 %v12358_v49  ;;  %v12294_v58 = vor.u32 %v13178_v3, %v12293_v39  ;;  %v13160_v49 = vld [vmem:[#allocation14 + $0x24] sm:$0xf0] }
 0x953   : > { %8588 = vmatpush.bf16.msrb.mxu0 %v12230_v14  ;;  %v12414_v14 = vor.u32 %v13208_v30, %v12413_v10 }
 0x954   : > { %v7630_v5 = vadd.f32 %v7629_v13, %v7581_v33  ;;  %v7487_v32 = vpop.f32.mrf.mxu0  ;;  %v7536_v1 = vpop.f32.mrf.mxu1  ;;  %8637 = vmatpush.bf16.msrb.mxu1 %v12294_v58 }
 0x955   : > { %v7488_v4 = vadd.f32 %v7487_v32, %v15888_v45  ;;  %8736 = vmatpush.bf16.msrb.mxu3 %v12414_v14  ;;  %v12277_v14 = vld [vmem:[#allocation14 + $0x90] sm:$0xf] }
 0x956   : > { %v7880_v2 = vmax.f32 %v7630_v5, 0.0  ;;  %7778 = vmatmul.bf16.gmra.mxu2 %v15502_v52  ;;  %7827 = vmatmul.bf16.gmra.mxu3 %v15504_v62 }
 0x957   : > { %v7537_v9 = vadd.f32 %v7536_v1, %v7488_v4 }
 0x958   : > { %v15914_v21 = vpack.c.bf16 %v7880_v2, %v7874_v38 }
 0x959   : > { %v7583_v19 = vpop.f32.mrf.mxu2  ;;  %v7632_v51 = vpop.f32.mrf.mxu3 }
 0x95a   : > { %v7584_v42 = vadd.f32 %v7583_v19, %v7535_v41 }
 0x95c   : > { %v7633_v52 = vadd.f32 %v7632_v51, %v7584_v42  ;;  %v7490_v62 = vpop.f32.mrf.mxu0  ;;  %v7539_v12 = vpop.f32.mrf.mxu1 }
 0x95d   : > { %v7491_v53 = vadd.f32 %v7490_v62, %v15888_v45  ;;  %v12285_v62 = vld [vmem:[#allocation14 + $0xa0] sm:$0xf] }
 0x95e   : > { %v7886_v38 = vmax.f32 %v7633_v52, 0.0 }
 0x95f   : > { %v7540_v22 = vadd.f32 %v7539_v12, %v7491_v53  ;;  %7685 = vmatmul.bf16.gmra.mxu0 %v15512_v18  ;;  %7734 = vmatmul.bf16.gmra.mxu1 %v15514_v46  ;;  %v12349_v18 = vld [vmem:[#allocation14 + $0x120] sm:$0xf]  ;;  %v13176_v12 = vld [vmem:[#allocation14 + $0xa4] sm:$0xf0] }
 0x960   : > { %v12221_v46 = vld [vmem:[#allocation14 + $0x20] sm:$0xf]  ;;  %v12350_v40 = vor.u32 %v13192_v7, %v12349_v18  ;;  %v12286_v39 = vor.u32 %v13176_v12, %v12285_v62  ;;  %v13158_v18 = vld [vmem:[#allocation14 + $0x14] sm:$0xf0]  ;;  %v12405_v7 = vld [vmem:[#allocation14 + $0x190] sm:$0xf] }
 0x961   : > { %v7585_v13 = vpop.f32.mrf.mxu2  ;;  %v7634_v33 = vpop.f32.mrf.mxu3  ;;  %v12222_v51 = vor.u32 %v13160_v49, %v12221_v46  ;;  %v13206_v46 = vld [vmem:[#allocation14 + $0x194] sm:$0xf0] }
 0x962   : > { %v7586_v41 = vadd.f32 %v7585_v13, %v7537_v9  ;;  %8687 = vmatpush.bf16.msrb.mxu2 %v12350_v40  ;;  %8638 = vmatpush.bf16.msrb.mxu1 %v12286_v39  ;;  %v12406_v30 = vor.u32 %v13206_v46, %v12405_v7  ;;  %v12269_v7 = vld [vmem:[#allocation14 + $0x80] sm:$0xf] }
 0x963   : > { %8589 = vmatpush.bf16.msrb.mxu0 %v12222_v51 }
 0x964   : > { %v7635_v5 = vadd.f32 %v7634_v33, %v7586_v41  ;;  %v7492_v32 = vpop.f32.mrf.mxu0  ;;  %v7541_v1 = vpop.f32.mrf.mxu1  ;;  %8737 = vmatpush.bf16.msrb.mxu3 %v12406_v30 }
 0x965   : > { %v7493_v4 = vadd.f32 %v7492_v32, %v15888_v45 }
 0x966   : > { %v7892_v2 = vmax.f32 %v7635_v5, 0.0  ;;  %7783 = vmatmul.bf16.gmra.mxu2 %v15522_v25  ;;  %7832 = vmatmul.bf16.gmra.mxu3 %v15524_v37 }
 0x967   : > { %v7542_v43 = vadd.f32 %v7541_v1, %v7493_v4 }
 0x968   : > { %v15922_v9 = vpack.c.bf16 %v7892_v2, %v7886_v38  ;;  %v13190_v38 = vld [vmem:[#allocation14 + $0x114] sm:$0xf0] }
 0x969   : > { %v7588_v35 = vpop.f32.mrf.mxu2  ;;  %v7637_v19 = vpop.f32.mrf.mxu3 }
 0x96a   : > { %v7589_v60 = vadd.f32 %v7588_v35, %v7540_v22 }
 0x96c   : > { %v7638_v25 = vadd.f32 %v7637_v19, %v7589_v60  ;;  %v7495_v37 = vpop.f32.mrf.mxu0  ;;  %v7544_v42 = vpop.f32.mrf.mxu1  ;;  %v13174_v60 = vld [vmem:[#allocation14 + $0x94] sm:$0xf0] }
 0x96d   : > { %v7496_v52 = vadd.f32 %v7495_v37, %v15888_v45  ;;  %v12278_v37 = vor.u32 %v13174_v60, %v12277_v14 }
 0x96e   : > { %v7898_v32 = vmax.f32 %v7638_v25, 0.0 }
 0x96f   : > { %v7545_v53 = vadd.f32 %v7544_v42, %v7496_v52  ;;  %7690 = vmatmul.bf16.gmra.mxu0 %v15532_v47  ;;  %7739 = vmatmul.bf16.gmra.mxu1 %v15534_v31  ;;  %v12341_v47 = vld [vmem:[#allocation14 + $0x110] sm:$0xf] }
 0x970   : > { %v12213_v31 = vld [vmem:[#allocation14 + $0x10] sm:$0xf]  ;;  %v12342_v2 = vor.u32 %v13190_v38, %v12341_v47  ;;  %8639 = vmatpush.bf16.msrb.mxu1 %v12278_v37 }
 0x971   : > { %v7590_v3 = vpop.f32.mrf.mxu2  ;;  %v7639_v58 = vpop.f32.mrf.mxu3  ;;  %v12214_v10 = vor.u32 %v13158_v18, %v12213_v31 }
 0x972   : > { %v7591_v22 = vadd.f32 %v7590_v3, %v7542_v43  ;;  %8688 = vmatpush.bf16.msrb.mxu2 %v12342_v2 }
 0x973   : > { %8590 = vmatpush.bf16.msrb.mxu0 %v12214_v10 }
 0x974   : > { %v7640_v13 = vadd.f32 %v7639_v58, %v7591_v22  ;;  %v7497_v33 = vpop.f32.mrf.mxu0  ;;  %v7546_v41 = vpop.f32.mrf.mxu1 }
 0x975   : > { %v7498_v5 = vadd.f32 %v7497_v33, %v15888_v45  ;;  %v13188_v33 = vld [vmem:[#allocation14 + $0x104] sm:$0xf0] }
 0x976   : > { %v7904_v1 = vmax.f32 %v7640_v13, 0.0  ;;  %7788 = vmatmul.bf16.gmra.mxu2 %v15542_v16  ;;  %7837 = vmatmul.bf16.gmra.mxu3 %v15544_v34 }
 0x977   : > { %v7547_v4 = vadd.f32 %v7546_v41, %v7498_v5  ;;  %v13156_v5 = vld [vmem:[#allocation14 + $0x4] sm:$0xf0] }
 0x978   : > { %v15930_v43 = vpack.c.bf16 %v7904_v1, %v7898_v32  ;;  %v12397_v32 = vld [vmem:[#allocation14 + $0x180] sm:$0xf]  ;;  %v13204_v1 = vld [vmem:[#allocation14 + $0x184] sm:$0xf0] }
 0x979   : > { %v7593_v40 = vpop.f32.mrf.mxu2  ;;  %v7642_v49 = vpop.f32.mrf.mxu3  ;;  %v12398_v2 = vor.u32 %v13204_v1, %v12397_v32  ;;  %v13250_v32 = vld [vmem:[#allocation14 + $0x2f4] sm:$0xf0] }
 0x97a   : > { %v7594_v35 = vadd.f32 %v7593_v40, %v7545_v53 }
 0x97b   : > { %8738 = vmatpush.bf16.msrb.mxu3 %v12398_v2 }
 0x97c   : > { %v7643_v16 = vadd.f32 %v7642_v49, %v7594_v35  ;;  %v7500_v34 = vpop.f32.mrf.mxu0  ;;  %v7549_v19 = vpop.f32.mrf.mxu1 }
 0x97d   : > { %v7501_v51 = vadd.f32 %v7500_v34, %v15888_v45 }
 0x97e   : > { %v7910_v58 = vmax.f32 %v7643_v16, 0.0 }
 0x97f   : > { %v7550_v25 = vadd.f32 %v7549_v19, %v7501_v51  ;;  %7695 = vmatmul.bf16.gmra.mxu0 %v15552_v50  ;;  %7744 = vmatmul.bf16.gmra.mxu1 %v15554_v55  ;;  %v12333_v50 = vld [vmem:[#allocation14 + $0x100] sm:$0xf] }
 0x980   : > { %v12205_v55 = vld [vmem:[#allocation14] sm:$0xf]  ;;  %v12334_v41 = vor.u32 %v13188_v33, %v12333_v50 }
 0x981   : > { %v7595_v42 = vpop.f32.mrf.mxu2  ;;  %v7644_v52 = vpop.f32.mrf.mxu3  ;;  %v12206_v31 = vor.u32 %v13156_v5, %v12205_v55  ;;  %v12581_v5 = vld [vmem:[#allocation14 + $0x2f0] sm:$0xf] }
 0x982   : > { %v7596_v62 = vadd.f32 %v7595_v42, %v7547_v4  ;;  %8689 = vmatpush.bf16.msrb.mxu2 %v12334_v41 }
 0x983   : > { %8591 = vmatpush.bf16.msrb.mxu0 %v12206_v31 }
 0x984   : > { %v7645_v12 = vadd.f32 %v7644_v52, %v7596_v62  ;;  %v7502_v53 = vpop.f32.mrf.mxu0  ;;  %v7551_v39 = vpop.f32.mrf.mxu1  ;;  %v13169_v52 = vld [vmem:[#allocation14 + $0x74] sm:$0xf]  ;;  %v12263_v62 = vld [vmem:[#allocation14 + $0x78] sm:$0xf0] }
 0x985   : > { %v7503_v3 = vadd.f32 %v7502_v53, %v15888_v45  ;;  %v13185_v53 = vld [vmem:[#allocation14 + $0xf4] sm:$0xf] }
 0x986   : > { %v7916_v22 = vmax.f32 %v7645_v12, 0.0  ;;  %7793 = vmatmul.bf16.gmra.mxu2 %v15562_v44  ;;  %7842 = vmatmul.bf16.gmra.mxu3 %v15564_v24  ;;  %v13172_v44 = vld [vmem:[#allocation14 + $0x84] sm:$0xf0]  ;;  %v12266_v12 = vor.u32 %v13169_v52, %v12263_v62  ;;  %v12573_v52 = vld [vmem:[#allocation14 + $0x2e0] sm:$0xf] }
 0x987   : > { %v7552_v13 = vadd.f32 %v7551_v39, %v7503_v3  ;;  %v12270_v24 = vor.u32 %v13172_v44, %v12269_v7  ;;  %v12327_v39 = vld [vmem:[#allocation14 + $0xf8] sm:$0xf0]  ;;  %v13248_v62 = vld [vmem:[#allocation14 + $0x2e4] sm:$0xf0] }
 0x988   : > { %v15938_v4 = vpack.c.bf16 %v7916_v22, %v7910_v58  ;;  %v12330_v50 = vor.u32 %v13185_v53, %v12327_v39  ;;  %8878 = vmatpush.bf16.msra.mxu2 %v12266_v12  ;;  %v12574_v12 = vor.u32 %v13248_v62, %v12573_v52  ;;  %v12239_v52 = vld [vmem:[#allocation14 + $0x48] sm:$0xf0]  ;;  %v12493_v62 = vld [vmem:[#allocation14 + $0x240] sm:$0xf] }
 0x989   : > { %v7598_v47 = vpop.f32.mrf.mxu2  ;;  %v7647_v38 = vpop.f32.mrf.mxu3  ;;  %8640 = vmatpush.bf16.msrb.mxu1 %v12270_v24 }
 0x98a   : > { %v7599_v18 = vadd.f32 %v7598_v47, %v7550_v25  ;;  %8927 = vmatpush.bf16.msra.mxu3 %v12330_v50  ;;  %v12582_v47 = vor.u32 %v13250_v32, %v12581_v5  ;;  %v12501_v5 = vld [vmem:[#allocation14 + $0x250] sm:$0xf] }
 0x98c   : > { %v7648_v46 = vadd.f32 %v7647_v38, %v7599_v18  ;;  %v7505_v40 = vpop.f32.mrf.mxu0  ;;  %v7554_v49 = vpop.f32.mrf.mxu1 }
 0x98d   : > { %v7506_v10 = vadd.f32 %v7505_v40, %v15888_v45  ;;  %8829 = vmatpush.bf16.msra.mxu1 %v12582_v47  ;;  %v13181_v47 = vld [vmem:[#allocation14 + $0xd4] sm:$0xf] }
 0x98e   : > { %v7922_v25 = vmax.f32 %v7648_v46, 0.0 }
 0x98f   : > { %v7555_v30 = vadd.f32 %v7554_v49, %v7506_v10  ;;  %7700 = vmatmul.bf16.gmra.mxu0 %v15572_v6  ;;  %7749 = vmatmul.bf16.gmra.mxu1 %v15574_v57  ;;  %v12517_v6 = vld [vmem:[#allocation14 + $0x270] sm:$0xf]  ;;  %v13234_v57 = vld [vmem:[#allocation14 + $0x274] sm:$0xf0]  ;;  %v12255_v10 = vld [vmem:[#allocation14 + $0x68] sm:$0xf0] }
 0x991   : > { %v7600_v35 = vpop.f32.mrf.mxu2  ;;  %v7649_v16 = vpop.f32.mrf.mxu3  ;;  %8830 = vmatpush.bf16.msra.mxu1 %v12574_v12 }
 0x992   : > { %v7601_v34 = vadd.f32 %v7600_v35, %v7552_v13  ;;  %v12518_v13 = vor.u32 %v13234_v57, %v12517_v6 }
 0x994   : > { %v7650_v19 = vadd.f32 %v7649_v16, %v7601_v34  ;;  %v7507_v51 = vpop.f32.mrf.mxu0  ;;  %v7556_v14 = vpop.f32.mrf.mxu1  ;;  %8780 = vmatpush.bf16.msra.mxu0 %v12518_v13 }
 0x995   : > { %v7508_v60 = vadd.f32 %v7507_v51, %v15888_v45  ;;  %v13232_v51 = vld [vmem:[#allocation14 + $0x264] sm:$0xf0] }
 0x996   : > { %v7928_v37 = vmax.f32 %v7650_v19, 0.0  ;;  %7798 = vmatmul.bf16.gmra.mxu2 %v15582_v17  ;;  %7847 = vmatmul.bf16.gmra.mxu3 %v15584_v26 }
 0x997   : > { %v7557_v42 = vadd.f32 %v7556_v14, %v7508_v60  ;;  %v12319_v14 = vld [vmem:[#allocation14 + $0xe8] sm:$0xf0] }
 0x998   : > { %v15946_v3 = vpack.c.bf16 %v7928_v37, %v7922_v25 }
 0x999   : > { %v7603_v58 = vpop.f32.mrf.mxu2  ;;  %v7652_v22 = vpop.f32.mrf.mxu3 }
 0x99a   : > { %v7604_v33 = vadd.f32 %v7603_v58, %v7555_v30  ;;  %v12509_v30 = vld [vmem:[#allocation14 + $0x260] sm:$0xf] }
 0x99b   : > { %v12510_v25 = vor.u32 %v13232_v51, %v12509_v30  ;;  %v13246_v30 = vld [vmem:[#allocation14 + $0x2d4] sm:$0xf0] }
 0x99c   : > { %v7653_v17 = vadd.f32 %v7652_v22, %v7604_v33  ;;  %v7510_v26 = vpop.f32.mrf.mxu0  ;;  %v7559_v55 = vpop.f32.mrf.mxu1 }
 0x99d   : > { %v7511_v41 = vadd.f32 %v7510_v26, %v15888_v45  ;;  %8781 = vmatpush.bf16.msra.mxu0 %v12510_v25 }
 0x99e   : > { %v7934_v46 = vmax.f32 %v7653_v17, 0.0 }
 0x99f   : > { %v7560_v1 = vadd.f32 %v7559_v55, %v7511_v41  ;;  %7705 = vmatmul.bf16.gmra.mxu0 %v15592_v48  ;;  %7754 = vmatmul.bf16.gmra.mxu1 %v15594_v63  ;;  %v15955_v48 = vperm.slane %v15885_v23, 5  ;;  %v13167_v63 = vld [vmem:[#allocation14 + $0x64] sm:$0xf]  ;;  %v13165_v55 = vld [vmem:[#allocation14 + $0x54] sm:$0xf] }
 0x9a0   : > { %v12258_v19 = vor.u32 %v13167_v63, %v12255_v10  ;;  %v12247_v41 = vld [vmem:[#allocation14 + $0x58] sm:$0xf0]  ;;  %v12565_v10 = vld [vmem:[#allocation14 + $0x2d0] sm:$0xf] }
 0x9a1   : > { %v7605_v38 = vpop.f32.mrf.mxu2  ;;  %v7654_v31 = vpop.f32.mrf.mxu3  ;;  %v12250_v32 = vor.u32 %v13165_v55, %v12247_v41 }
 0x9a2   : > { %v7606_v2 = vadd.f32 %v7605_v38, %v7557_v42  ;;  %8879 = vmatpush.bf16.msra.mxu2 %v12258_v19  ;;  %v12311_v38 = vld [vmem:[#allocation14 + $0xd8] sm:$0xf0] }
 0x9a4   : > { %v7655_v18 = vadd.f32 %v7654_v31, %v7606_v2  ;;  %v7512_v7 = vpop.f32.mrf.mxu0  ;;  %v7561_v44 = vpop.f32.mrf.mxu1 }
 0x9a5   : > { %v7513_v24 = vadd.f32 %v7512_v7, %v15888_v45  ;;  %v13183_v45 = vld [vmem:[#allocation14 + $0xe4] sm:$0xf] }
 0x9a6   : > { %v7940_v40 = vmax.f32 %v7655_v18, 0.0  ;;  %7803 = vmatmul.bf16.gmra.mxu2 %v15602_v36  ;;  %7852 = vmatmul.bf16.gmra.mxu3 %v15604_v27  ;;  %v12322_v36 = vor.u32 %v13183_v45, %v12319_v14 }
 0x9a7   : > { %v7562_v49 = vadd.f32 %v7561_v44, %v7513_v24  ;;  %v12314_v44 = vor.u32 %v13181_v47, %v12311_v38  ;;  %8880 = vmatpush.bf16.msra.mxu2 %v12250_v32  ;;  %v13244_v32 = vld [vmem:[#allocation14 + $0x2c4] sm:$0xf0]  ;;  %v16616_v38 = vld [vmem:[#allocation34_spill] sm:$0xff] }
 0x9a8   : > { %v15957_v35 = vpack.c.bf16 %v7940_v40, %v7934_v46  ;;  %8928 = vmatpush.bf16.msra.mxu3 %v12322_v36  ;;  %v16615_v47 = vld [vmem:[#allocation28_spill] sm:$0xff] }
 0x9a9   : > { %v7608_v16 = vpop.f32.mrf.mxu2  ;;  %v7657_v34 = vpop.f32.mrf.mxu3 }
 0x9aa   : > { %v7609_v60 = vadd.f32 %v7608_v16, %v7560_v1  ;;  %v13230_v1 = vld [vmem:[#allocation14 + $0x254] sm:$0xf0] }
 0x9ab   : > { %v12502_v7 = vor.u32 %v13230_v1, %v12501_v5  ;;  %v12557_v5 = vld [vmem:[#allocation14 + $0x2c0] sm:$0xf] }
 0x9ac   : > { %v7658_v27 = vadd.f32 %v7657_v34, %v7609_v60  ;;  %v7671_v37 = vpop.f32.mrf.mxu0  ;;  %v7720_v42 = vpop.f32.mrf.mxu1  ;;  %8929 = vmatpush.bf16.msra.mxu3 %v12314_v44  ;;  %v12566_v34 = vor.u32 %v13246_v30, %v12565_v10  ;;  %v16617_v30 = vld [vmem:[#allocation47_spill] sm:$0xff] }
 0x9ad   : > { %v7672_v23 = vadd.f32 %v7671_v37, %v15955_v48  ;;  %8782 = vmatpush.bf16.msra.mxu0 %v12502_v7 }
 0x9ae   : > { %v7946_v33 = vmax.f32 %v7658_v27, 0.0  ;;  %8831 = vmatpush.bf16.msra.mxu1 %v12566_v34 }
 0x9af   : > { %v7721_v6 = vadd.f32 %v7720_v42, %v7672_v23  ;;  %8592 = vmatmul.bf16.vlgmr.msrb.gmra.mxu0 %v15628_v61  ;;  %8641 = vmatmul.bf16.vlgmr.msrb.gmra.mxu1 %v15695_v56  ;;  %v13163_v23 = vld [vmem:[#allocation14 + $0x44] sm:$0xf] }
 0x9b0   : > { %v12242_v12 = vor.u32 %v13163_v23, %v12239_v52 }
 0x9b1   : > { %v7610_v57 = vpop.f32.mrf.mxu2  ;;  %v7659_v53 = vpop.f32.mrf.mxu3 }
 0x9b2   : > { %v7611_v39 = vadd.f32 %v7610_v57, %v7562_v49  ;;  %v13228_v57 = vld [vmem:[#allocation14 + $0x244] sm:$0xf0]  ;;  %8881 = vmatpush.bf16.msra.mxu2 %v12242_v12 }
 0x9b4   : > { %v7660_v58 = vadd.f32 %v7659_v53, %v7611_v39  ;;  %v7673_v22 = vpop.f32.mrf.mxu0  ;;  %v7722_v13 = vpop.f32.mrf.mxu1  ;;  %v13179_v53 = vld [vmem:[#allocation14 + $0xc4] sm:$0xf]  ;;  %v12303_v39 = vld [vmem:[#allocation14 + $0xc8] sm:$0xf0] }
 0x9b5   : > { %v7674_v50 = vadd.f32 %v7673_v22, %v15955_v48 }
 0x9b6   : > { %v7952_v17 = vmax.f32 %v7660_v58, 0.0  ;;  %8690 = vmatmul.bf16.vlgmr.msrb.gmra.mxu2 %v15767_v8  ;;  %8739 = vmatmul.bf16.vlgmr.msrb.gmra.mxu3 %v15834_v29 }
 0x9b7   : > { %v7723_v26 = vadd.f32 %v7722_v13, %v7674_v50  ;;  %v12494_v13 = vor.u32 %v13228_v57, %v12493_v62  ;;  %v12306_v50 = vor.u32 %v13179_v53, %v12303_v39 }
 0x9b8   : > { %v15965_v31 = vpack.c.bf16 %v7952_v17, %v7946_v33 }
 0x9b9   : > { %v7769_v2 = vpop.f32.mrf.mxu2  ;;  %v7818_v18 = vpop.f32.mrf.mxu3  ;;  %8783 = vmatpush.bf16.msra.mxu0 %v12494_v13  ;;  %8930 = vmatpush.bf16.msra.mxu3 %v12306_v50  ;;  %v16619_v50 = vld [vmem:[#allocation29_spill] sm:$0xff] }
 0x9ba   : > { %v7770_v24 = vadd.f32 %v7769_v2, %v7721_v6  ;;  %v12558_v2 = vor.u32 %v13244_v32, %v12557_v5 }
 0x9bc   : > { %v7819_v46 = vadd.f32 %v7818_v18, %v7770_v24  ;;  %v7676_v40 = vpop.f32.mrf.mxu0  ;;  %v7725_v49 = vpop.f32.mrf.mxu1  ;;  %8832 = vmatpush.bf16.msra.mxu1 %v12558_v2 }
 0x9bd   : > { %v7677_v63 = vadd.f32 %v7676_v40, %v15955_v48 }
 0x9be   : > { %v7863_v27 = vmax.f32 %v7819_v46, 0.0 }
 0x9bf   : > { %v7726_v16 = vadd.f32 %v7725_v49, %v7677_v63  ;;  %8597 = vmatmul.bf16.gmra.mxu0 %v15636_v28  ;;  %8646 = vmatmul.bf16.gmra.mxu1 %v15703_v20 }
 0x9c1   : > { %v7771_v19 = vpop.f32.mrf.mxu2  ;;  %v7820_v51 = vpop.f32.mrf.mxu3 }
 0x9c2   : > { %v7772_v45 = vadd.f32 %v7771_v19, %v7723_v26  ;;  %v13161_v19 = vld [vmem:[#allocation14 + $0x34] sm:$0xf] }
 0x9c4   : > { %v7821_v14 = vadd.f32 %v7820_v51, %v7772_v45  ;;  %v7678_v60 = vpop.f32.mrf.mxu0  ;;  %v7727_v25 = vpop.f32.mrf.mxu1  ;;  %v12231_v51 = vld [vmem:[#allocation14 + $0x38] sm:$0xf0]  ;;  %v12485_v45 = vld [vmem:[#allocation14 + $0x230] sm:$0xf] }
 0x9c5   : > { %v7679_v36 = vadd.f32 %v7678_v60, %v15955_v48  ;;  %v13226_v60 = vld [vmem:[#allocation14 + $0x234] sm:$0xf0] }
 0x9c6   : > { %v7869_v37 = vmax.f32 %v7821_v14, 0.0  ;;  %8695 = vmatmul.bf16.gmra.mxu2 %v15775_v15  ;;  %8744 = vmatmul.bf16.gmra.mxu3 %v15842_v0  ;;  %v12234_v14 = vor.u32 %v13161_v19, %v12231_v51  ;;  %v12486_v23 = vor.u32 %v13226_v60, %v12485_v45  ;;  %v13224_v19 = vld [vmem:[#allocation14 + $0x224] sm:$0xf0]  ;;  %v13175_v51 = vld [vmem:[#allocation14 + $0xa4] sm:$0xf] }
 0x9c7   : > { %v7728_v42 = vadd.f32 %v7727_v25, %v7679_v36  ;;  %v13177_v25 = vld [vmem:[#allocation14 + $0xb4] sm:$0xf]  ;;  %v12295_v36 = vld [vmem:[#allocation14 + $0xb8] sm:$0xf0]  ;;  %v12287_v45 = vld [vmem:[#allocation14 + $0xa8] sm:$0xf0] }
 0x9c8   : > { %v15973_v6 = vpack.c.bf16 %v7869_v37, %v7863_v27  ;;  %v12298_v52 = vor.u32 %v13177_v25, %v12295_v36  ;;  %8882 = vmatpush.bf16.msra.mxu2 %v12234_v14  ;;  %8784 = vmatpush.bf16.msra.mxu0 %v12486_v23  ;;  %v12290_v36 = vor.u32 %v13175_v51, %v12287_v45  ;;  %v13222_v51 = vld [vmem:[#allocation14 + $0x214] sm:$0xf0]  ;;  %v13173_v45 = vld [vmem:[#allocation14 + $0x94] sm:$0xf] }
 0x9c9   : > { %v7774_v58 = vpop.f32.mrf.mxu2  ;;  %v7823_v22 = vpop.f32.mrf.mxu3 }
 0x9ca   : > { %v7775_v33 = vadd.f32 %v7774_v58, %v7726_v16  ;;  %v16618_v16 = vld [vmem:[#allocation40_spill] sm:$0xff]  ;;  %8931 = vmatpush.bf16.msra.mxu3 %v12298_v52  ;;  %v12549_v58 = vld [vmem:[#allocation14 + $0x2b0] sm:$0xf] }
 0x9cc   : > { %v7824_v17 = vadd.f32 %v7823_v22, %v7775_v33  ;;  %v7681_v26 = vpop.f32.mrf.mxu0  ;;  %v7730_v55 = vpop.f32.mrf.mxu1  ;;  %v13242_v22 = vld [vmem:[#allocation14 + $0x2b4] sm:$0xf0]  ;;  %v16620_v33 = vld [vmem:[#allocation35_spill] sm:$0xff] }
 0x9cd   : > { %v7682_v41 = vadd.f32 %v7681_v26, %v15955_v48 }
 0x9ce   : > { %v7875_v63 = vmax.f32 %v7824_v17, 0.0  ;;  %v12550_v17 = vor.u32 %v13242_v22, %v12549_v58  ;;  %8932 = vmatpush.bf16.msra.mxu3 %v12290_v36  ;;  %v16624_v58 = vld [vmem:[#allocation36_spill] sm:$0xff] }
 0x9cf   : > { %v7731_v1 = vadd.f32 %v7730_v55, %v7682_v41  ;;  %8602 = vmatmul.bf16.gmra.mxu0 %v16615_v47  ;;  %8651 = vmatmul.bf16.gmra.mxu1 %v16616_v38 }
 0x9d0   : > { %8833 = vmatpush.bf16.msra.mxu1 %v12550_v17 }
 0x9d1   : > { %v7776_v18 = vpop.f32.mrf.mxu2  ;;  %v7825_v7 = vpop.f32.mrf.mxu3 }
 0x9d2   : > { %v7777_v44 = vadd.f32 %v7776_v18, %v7728_v42 }
 0x9d4   : > { %v7826_v24 = vadd.f32 %v7825_v7, %v7777_v44  ;;  %v7683_v46 = vpop.f32.mrf.mxu0  ;;  %v7732_v40 = vpop.f32.mrf.mxu1  ;;  %v16621_v44 = vld [vmem:[#allocation48_spill] sm:$0xff] }
 0x9d5   : > { %v7684_v49 = vadd.f32 %v7683_v46, %v15955_v48 }
 0x9d6   : > { %v7881_v10 = vmax.f32 %v7826_v24, 0.0  ;;  %8700 = vmatmul.bf16.gmra.mxu2 %v16617_v30  ;;  %8749 = vmatmul.bf16.gmra.mxu3 %v16618_v16  ;;  %v16622_v24 = vld [vmem:[#allocation52_spill] sm:$0xff] }
 0x9d7   : > { %v7733_v34 = vadd.f32 %v7732_v40, %v7684_v49  ;;  %v13159_v40 = vld [vmem:[#allocation14 + $0x24] sm:$0xf]  ;;  %v12223_v49 = vld [vmem:[#allocation14 + $0x28] sm:$0xf0] }
 0x9d8   : > { %v15981_v27 = vpack.c.bf16 %v7881_v10, %v7875_v63  ;;  %v12477_v63 = vld [vmem:[#allocation14 + $0x220] sm:$0xf]  ;;  %v12226_v10 = vor.u32 %v13159_v40, %v12223_v49  ;;  %v13157_v49 = vld [vmem:[#allocation14 + $0x14] sm:$0xf] }
 0x9d9   : > { %v7779_v37 = vpop.f32.mrf.mxu2  ;;  %v7828_v42 = vpop.f32.mrf.mxu3  ;;  %v12478_v25 = vor.u32 %v13224_v19, %v12477_v63  ;;  %v12215_v63 = vld [vmem:[#allocation14 + $0x18] sm:$0xf0] }
 0x9da   : > { %v7780_v62 = vadd.f32 %v7779_v37, %v7731_v1  ;;  %8883 = vmatpush.bf16.msra.mxu2 %v12226_v10  ;;  %v12469_v10 = vld [vmem:[#allocation14 + $0x210] sm:$0xf]  ;;  %v12218_v19 = vor.u32 %v13157_v49, %v12215_v63 }
 0x9db   : > { %8785 = vmatpush.bf16.msra.mxu0 %v12478_v25  ;;  %v12470_v36 = vor.u32 %v13222_v51, %v12469_v10  ;;  %v16630_v51 = vld [vmem:[#allocation53_spill] sm:$0xff] }
 0x9dc   : > { %v7829_v12 = vadd.f32 %v7828_v42, %v7780_v62  ;;  %v7686_v57 = vpop.f32.mrf.mxu0  ;;  %v7735_v53 = vpop.f32.mrf.mxu1 }
 0x9dd   : > { %v7687_v39 = vadd.f32 %v7686_v57, %v15955_v48  ;;  %v13240_v57 = vld [vmem:[#allocation14 + $0x2a4] sm:$0xf0] }
 0x9de   : > { %v7887_v18 = vmax.f32 %v7829_v12, 0.0  ;;  %v12541_v12 = vld [vmem:[#allocation14 + $0x2a0] sm:$0xf]  ;;  %8884 = vmatpush.bf16.msra.mxu2 %v12218_v19  ;;  %v16629_v19 = vld [vmem:[#allocation50_spill] sm:$0xff] }
 0x9df   : > { %v7736_v13 = vadd.f32 %v7735_v53, %v7687_v39  ;;  %8607 = vmatmul.bf16.gmra.mxu0 %v16619_v50  ;;  %8656 = vmatmul.bf16.gmra.mxu1 %v16620_v33  ;;  %v16623_v39 = vld [vmem:[#allocation30_spill] sm:$0xff]  ;;  %v12542_v22 = vor.u32 %v13240_v57, %v12541_v12  ;;  %v12533_v57 = vld [vmem:[#allocation14 + $0x290] sm:$0xf] }
 0x9e0   : > { %8786 = vmatpush.bf16.msra.mxu0 %v12470_v36 }
 0x9e1   : > { %v7781_v26 = vpop.f32.mrf.mxu2  ;;  %v7830_v55 = vpop.f32.mrf.mxu3  ;;  %8834 = vmatpush.bf16.msra.mxu1 %v12542_v22  ;;  %v13238_v22 = vld [vmem:[#allocation14 + $0x294] sm:$0xf0] }
 0x9e2   : > { %v7782_v41 = vadd.f32 %v7781_v26, %v7733_v34 }
 0x9e4   : > { %v7831_v5 = vadd.f32 %v7830_v55, %v7782_v41  ;;  %v7688_v32 = vpop.f32.mrf.mxu0  ;;  %v7737_v1 = vpop.f32.mrf.mxu1 }
 0x9e5   : > { %v7689_v2 = vadd.f32 %v7688_v32, %v15955_v48 }
 0x9e6   : > { %v7893_v7 = vmax.f32 %v7831_v5, 0.0  ;;  %8705 = vmatmul.bf16.gmra.mxu2 %v16621_v44  ;;  %8754 = vmatmul.bf16.gmra.mxu3 %v16622_v24 }
 0x9e7   : > { %v7738_v46 = vadd.f32 %v7737_v1, %v7689_v2 }
 0x9e8   : > { %v15989_v34 = vpack.c.bf16 %v7893_v7, %v7887_v18  ;;  %v16625_v18 = vld [vmem:[#allocation49_spill] sm:$0xff]  ;;  %v16626_v7 = vld [vmem:[#allocation44_spill] sm:$0xff] }
 0x9e9   : > { %v7784_v14 = vpop.f32.mrf.mxu2  ;;  %v7833_v60 = vpop.f32.mrf.mxu3 }
 0x9ea   : > { %v7785_v37 = vadd.f32 %v7784_v14, %v7736_v13  ;;  %v12279_v14 = vld [vmem:[#allocation14 + $0x98] sm:$0xf0] }
 0x9ec   : > { %v7834_v42 = vadd.f32 %v7833_v60, %v7785_v37  ;;  %v7691_v23 = vpop.f32.mrf.mxu0  ;;  %v7740_v52 = vpop.f32.mrf.mxu1  ;;  %v12282_v37 = vor.u32 %v13173_v45, %v12279_v14  ;;  %v13155_v14 = vld [vmem:[#allocation14 + $0x4] sm:$0xf] }
 0x9ed   : > { %v7692_v62 = vadd.f32 %v7691_v23, %v15955_v48 }
 0x9ee   : > { %v7899_v1 = vmax.f32 %v7834_v42, 0.0  ;;  %8933 = vmatpush.bf16.msra.mxu3 %v12282_v37  ;;  %v13220_v37 = vld [vmem:[#allocation14 + $0x204] sm:$0xf0] }
 0x9ef   : > { %v7741_v53 = vadd.f32 %v7740_v52, %v7692_v62  ;;  %8612 = vmatmul.bf16.gmra.mxu0 %v16623_v39  ;;  %8661 = vmatmul.bf16.gmra.mxu1 %v16624_v58 }
 0x9f1   : > { %v7786_v17 = vpop.f32.mrf.mxu2  ;;  %v7835_v26 = vpop.f32.mrf.mxu3 }
 0x9f2   : > { %v7787_v13 = vadd.f32 %v7786_v17, %v7738_v46 }
 0x9f4   : > { %v7836_v55 = vadd.f32 %v7835_v26, %v7787_v13  ;;  %v7693_v41 = vpop.f32.mrf.mxu0  ;;  %v7742_v5 = vpop.f32.mrf.mxu1  ;;  %v16627_v26 = vld [vmem:[#allocation31_spill] sm:$0xff]  ;;  %v16628_v13 = vld [vmem:[#allocation37_spill] sm:$0xff] }
 0x9f5   : > { %v7694_v32 = vadd.f32 %v7693_v41, %v15955_v48 }
 0x9f6   : > { %v7905_v2 = vmax.f32 %v7836_v55, 0.0  ;;  %8710 = vmatmul.bf16.gmra.mxu2 %v16625_v18  ;;  %8759 = vmatmul.bf16.gmra.mxu3 %v16626_v7  ;;  %v12534_v55 = vor.u32 %v13238_v22, %v12533_v57 }
 0x9f7   : > { %v7743_v40 = vadd.f32 %v7742_v5, %v7694_v32 }
 0x9f8   : > { %v15997_v46 = vpack.c.bf16 %v7905_v2, %v7899_v1  ;;  %8835 = vmatpush.bf16.msra.mxu1 %v12534_v55  ;;  %v12525_v55 = vld [vmem:[#allocation14 + $0x280] sm:$0xf] }
 0x9f9   : > { %v7789_v60 = vpop.f32.mrf.mxu2  ;;  %v7838_v25 = vpop.f32.mrf.mxu3 }
 0x9fa   : > { %v7790_v42 = vadd.f32 %v7789_v60, %v7741_v53  ;;  %v12207_v60 = vld [vmem:[#allocation14 + $0x8] sm:$0xf0] }
 0x9fb   : > { %v12210_v36 = vor.u32 %v13155_v14, %v12207_v60 }
 0x9fc   : > { %v7839_v23 = vadd.f32 %v7838_v25, %v7790_v42  ;;  %v7696_v52 = vpop.f32.mrf.mxu0  ;;  %v7745_v62 = vpop.f32.mrf.mxu1  ;;  %v12461_v25 = vld [vmem:[#allocation14 + $0x200] sm:$0xf]  ;;  %v13171_v42 = vld [vmem:[#allocation14 + $0x84] sm:$0xf] }
 0x9fd   : > { %v7697_v12 = vadd.f32 %v7696_v52, %v15955_v48  ;;  %v12271_v52 = vld [vmem:[#allocation14 + $0x88] sm:$0xf0]  ;;  %v12462_v57 = vor.u32 %v13220_v37, %v12461_v25  ;;  %8885 = vmatpush.bf16.msra.mxu2 %v12210_v36 }
 0x9fe   : > { %v7911_v63 = vmax.f32 %v7839_v23, 0.0  ;;  %v12274_v22 = vor.u32 %v13171_v42, %v12271_v52 }
 0x9ff   : > { %v7746_v17 = vadd.f32 %v7745_v62, %v7697_v12  ;;  %8617 = vmatmul.bf16.gmra.mxu0 %v16627_v26  ;;  %8666 = vmatmul.bf16.gmra.mxu1 %v16628_v13 }
 0xa00   : > { %8787 = vmatpush.bf16.msra.mxu0 %v12462_v57  ;;  %8934 = vmatpush.bf16.msra.mxu3 %v12274_v22  ;;  %v13233_v22 = vld [vmem:[#allocation14 + $0x274] sm:$0xf] }
 0xa01   : > { %v7791_v41 = vpop.f32.mrf.mxu2  ;;  %v7840_v5 = vpop.f32.mrf.mxu3 }
 0xa02   : > { %v7792_v53 = vadd.f32 %v7791_v41, %v7743_v40  ;;  %v13236_v41 = vld [vmem:[#allocation14 + $0x284] sm:$0xf0] }
 0xa04   : > { %v7841_v32 = vadd.f32 %v7840_v5, %v7792_v53  ;;  %v7698_v1 = vpop.f32.mrf.mxu0  ;;  %v7747_v2 = vpop.f32.mrf.mxu1  ;;  %v12526_v5 = vor.u32 %v13236_v41, %v12525_v55  ;;  %v13201_v55 = vld [vmem:[#allocation14 + $0x174] sm:$0xf] }
 0xa05   : > { %v7699_v49 = vadd.f32 %v7698_v1, %v15955_v48 }
 0xa06   : > { %v7917_v10 = vmax.f32 %v7841_v32, 0.0  ;;  %8715 = vmatmul.bf16.gmra.mxu2 %v16629_v19  ;;  %8764 = vmatmul.bf16.gmra.mxu3 %v16630_v51  ;;  %v16634_v51 = vld [vmem:[#allocation33_spill] sm:$0xff] }
 0xa07   : > { %v7748_v45 = vadd.f32 %v7747_v2, %v7699_v49  ;;  %8836 = vmatpush.bf16.msra.mxu1 %v12526_v5  ;;  %v12391_v5 = vld [vmem:[#allocation14 + $0x178] sm:$0xf0] }
 0xa08   : > { %v16005_v40 = vpack.c.bf16 %v7917_v10, %v7911_v63  ;;  %v16631_v63 = vld [vmem:[#allocation32_spill] sm:$0xff]  ;;  %v16632_v10 = vld [vmem:[#allocation38_spill] sm:$0xff] }
 0xa09   : > { %v7794_v62 = vpop.f32.mrf.mxu2  ;;  %v7843_v12 = vpop.f32.mrf.mxu3 }
 0xa0a   : > { %v7795_v23 = vadd.f32 %v7794_v62, %v7746_v17 }
 0xa0c   : > { %v7844_v53 = vadd.f32 %v7843_v12, %v7795_v23  ;;  %v7701_v32 = vpop.f32.mrf.mxu0  ;;  %v7750_v1 = vpop.f32.mrf.mxu1  ;;  %v16633_v12 = vld [vmem:[#allocation51_spill] sm:$0xff]  ;;  %v12519_v23 = vld [vmem:[#allocation14 + $0x278] sm:$0xf0] }
 0xa0d   : > { %v7702_v2 = vadd.f32 %v7701_v32, %v15955_v48  ;;  %v12522_v41 = vor.u32 %v13233_v22, %v12519_v23  ;;  %v13249_v32 = vld [vmem:[#allocation14 + $0x2f4] sm:$0xf] }
 0xa0e   : > { %v7923_v52 = vmax.f32 %v7844_v53, 0.0 }
 0xa0f   : > { %v7751_v49 = vadd.f32 %v7750_v1, %v7702_v2  ;;  %8622 = vmatmul.bf16.gmra.mxu0 %v16631_v63  ;;  %8671 = vmatmul.bf16.gmra.mxu1 %v16632_v10  ;;  %v12583_v1 = vld [vmem:[#allocation14 + $0x2f8] sm:$0xf0] }
 0xa10   : > { %9074 = vmatpush.bf16.msrb.mxu2 %v12522_v41 }
 0xa11   : > { %v7796_v14 = vpop.f32.mrf.mxu2  ;;  %v7845_v60 = vpop.f32.mrf.mxu3 }
 0xa12   : > { %v7797_v17 = vadd.f32 %v7796_v14, %v7748_v45 }
 0xa14   : > { %v7846_v25 = vadd.f32 %v7845_v60, %v7797_v17  ;;  %v7703_v36 = vpop.f32.mrf.mxu0  ;;  %v7752_v37 = vpop.f32.mrf.mxu1  ;;  %v12394_v60 = vor.u32 %v13201_v55, %v12391_v5  ;;  %v12586_v17 = vor.u32 %v13249_v32, %v12583_v1 }
 0xa15   : > { %v7704_v42 = vadd.f32 %v7703_v36, %v15955_v48 }
 0xa16   : > { %v7929_v62 = vmax.f32 %v7846_v25, 0.0  ;;  %8720 = vmatmul.bf16.gmra.mxu2 %v16633_v12  ;;  %8769 = vmatmul.bf16.gmra.mxu3 %v15890_v11  ;;  %v12455_v11 = vld [vmem:[#allocation14 + $0x1f8] sm:$0xf0] }
 0xa17   : > { %v7753_v57 = vadd.f32 %v7752_v37, %v7704_v42  ;;  %8976 = vmatpush.bf16.msrb.mxu0 %v12394_v60  ;;  %9123 = vmatpush.bf16.msrb.mxu3 %v12586_v17  ;;  %v13217_v42 = vld [vmem:[#allocation14 + $0x1f4] sm:$0xf]  ;;  %v16636_v60 = vld [vmem:[#allocation39_spill] sm:$0xff] }
 0xa18   : > { %v16013_v45 = vpack.c.bf16 %v7929_v62, %v7923_v52  ;;  %v12458_v23 = vor.u32 %v13217_v42, %v12455_v11  ;;  %v16635_v52 = vld [vmem:[#allocation46_spill] sm:$0xff]  ;;  %v16024_v11 = vld [vmem:[%s16637_s2] sm:$0x3]  ;;  %v12383_v42 = vld [vmem:[#allocation14 + $0x168] sm:$0xf0]  ;;  %s13804_s2 = scalar_lea.hbm %s16644_s17, 512 }
 0xa19   : > { %v7799_v2 = vpop.f32.mrf.mxu2  ;;  %v7848_v14 = vpop.f32.mrf.mxu3  ;;  %p13806_p7 = scmp.lt.s32.totalorder %s13804_s2, %s13800_s13 }
 0xa1a   : > { %v7800_v53 = vadd.f32 %v7799_v2, %v7751_v49  ;;  %9025 = vmatpush.bf16.msrb.mxu1 %v12458_v23  ;;  %v12575_v23 = vld [vmem:[#allocation14 + $0x2e8] sm:$0xf0] }
 0xa1b   : > { %p13807_p9 = por %p13806_p7, %p13805_p8 }
 0xa1c   : > { %v7849_v25 = vadd.f32 %v7848_v14, %v7800_v53  ;;  %v7706_v36 = vpop.f32.mrf.mxu0  ;;  %v7755_v37 = vpop.f32.mrf.mxu1  ;;  %v13231_v53 = vld [vmem:[#allocation14 + $0x264] sm:$0xf] }
 0xa1d   : > { %v7707_v22 = vadd.f32 %v7706_v36, %v15955_v48  ;;  %v12511_v36 = vld [vmem:[#allocation14 + $0x268] sm:$0xf0]  ;;  %p13808_p10 = pnand %p13807_p9, %p13803_p12 }
 0xa1e   : > { %v7935_v2 = vmax.f32 %v7849_v25, 0.0 }
 0xa1f   : > { %v7756_v12 = vadd.f32 %v7755_v37, %v7707_v22  ;;  %8627 = vmatmul.bf16.gmra.mxu0 %v16634_v51  ;;  %8676 = vmatmul.bf16.gmra.mxu1 %v16635_v52  ;;  %v12514_v37 = vor.u32 %v13231_v53, %v12511_v36  ;;  %v13247_v22 = vld [vmem:[#allocation14 + $0x2e4] sm:$0xf]  ;;  %v12447_v36 = vld [vmem:[#allocation14 + $0x1e8] sm:$0xf0] }
 0xa20   : > { %v13215_v53 = vld [vmem:[#allocation14 + $0x1e4] sm:$0xf] }
 0xa21   : > { %v7801_v62 = vpop.f32.mrf.mxu2  ;;  %v7850_v55 = vpop.f32.mrf.mxu3  ;;  %9075 = vmatpush.bf16.msrb.mxu2 %v12514_v37 }
 0xa22   : > { %v7802_v49 = vadd.f32 %v7801_v62, %v7753_v57  ;;  %v13199_v57 = vld [vmem:[#allocation14 + $0x164] sm:$0xf] }
 0xa24   : > { %v7851_v41 = vadd.f32 %v7850_v55, %v7802_v49  ;;  %v7708_v5 = vpop.f32.mrf.mxu0  ;;  %v7757_v32 = vpop.f32.mrf.mxu1  ;;  %v16029_v55 = vperm.slane %v16024_v11, 0  ;;  %v12386_v49 = vor.u32 %v13199_v57, %v12383_v42 }
 0xa25   : > { %v7709_v1 = vadd.f32 %v7708_v5, %v15955_v48 }
 0xa26   : > { %v7941_v14 = vmax.f32 %v7851_v41, 0.0  ;;  %8725 = vmatmul.bf16.gmra.mxu2 %v16636_v60  ;;  %8774 = vmatmul.bf16.gmra.mxu3 %v15898_v59  ;;  %v12578_v41 = vor.u32 %v13247_v22, %v12575_v23 }
 0xa27   : > { %v7758_v17 = vadd.f32 %v7757_v32, %v7709_v1  ;;  %8977 = vmatpush.bf16.msrb.mxu0 %v12386_v49 }
 0xa28   : > { %v16026_v48 = vpack.c.bf16 %v7941_v14, %v7935_v2  ;;  %9124 = vmatpush.bf16.msrb.mxu3 %v12578_v41  ;;  %v12450_v2 = vor.u32 %v13215_v53, %v12447_v36  ;;  %v12503_v41 = vld [vmem:[#allocation14 + $0x258] sm:$0xf0]  ;;  %v13245_v36 = vld [vmem:[#allocation14 + $0x2d4] sm:$0xf] }
 0xa29   : > { %v7804_v25 = vpop.f32.mrf.mxu2  ;;  %v7853_v62 = vpop.f32.mrf.mxu3  ;;  %v12375_v53 = vld [vmem:[#allocation14 + $0x158] sm:$0xf0] }
 0xa2a   : > { %v7805_v5 = vadd.f32 %v7804_v25, %v7756_v12  ;;  %9026 = vmatpush.bf16.msrb.mxu1 %v12450_v2  ;;  %v12567_v2 = vld [vmem:[#allocation14 + $0x2d8] sm:$0xf0] }
 0xa2c   : > { %v7854_v32 = vadd.f32 %v7853_v62, %v7805_v5  ;;  %v8593_v1 = vpop.f32.mrf.mxu0  ;;  %v8642_v59 = vpop.f32.mrf.mxu1  ;;  %v13197_v5 = vld [vmem:[#allocation14 + $0x154] sm:$0xf] }
 0xa2d   : > { %v8594_v60 = vadd.f32 %v8593_v1, %v16029_v55 }
 0xa2e   : > { %v7947_v62 = vmax.f32 %v7854_v32, 0.0 }
 0xa2f   : > { %v8643_v14 = vadd.f32 %v8642_v59, %v8594_v60  ;;  %8788 = vmatmul.bf16.vlgmr.msra.gmra.mxu0 %v15906_v54  ;;  %8837 = vmatmul.bf16.vlgmr.msra.gmra.mxu1 %v15973_v6  ;;  %v13229_v60 = vld [vmem:[#allocation14 + $0x254] sm:$0xf] }
 0xa30   : > { %v12506_v1 = vor.u32 %v13229_v60, %v12503_v41 }
 0xa31   : > { %v7806_v57 = vpop.f32.mrf.mxu2  ;;  %v7855_v42 = vpop.f32.mrf.mxu3 }
 0xa32   : > { %v7807_v12 = vadd.f32 %v7806_v57, %v7758_v17  ;;  %9076 = vmatpush.bf16.msrb.mxu2 %v12506_v1 }
 0xa34   : > { %v7856_v37 = vadd.f32 %v7855_v42, %v7807_v12  ;;  %v8595_v22 = vpop.f32.mrf.mxu0  ;;  %v8644_v23 = vpop.f32.mrf.mxu1  ;;  %v12378_v12 = vor.u32 %v13197_v5, %v12375_v53 }
 0xa35   : > { %v8596_v25 = vadd.f32 %v8595_v22, %v16029_v55  ;;  %v12570_v22 = vor.u32 %v13245_v36, %v12567_v2 }
 0xa36   : > { %v7953_v49 = vmax.f32 %v7856_v37, 0.0  ;;  %8886 = vmatmul.bf16.vlgmr.msra.gmra.mxu2 %v15628_v61  ;;  %8935 = vmatmul.bf16.vlgmr.msra.gmra.mxu3 %v15695_v56 }
 0xa37   : > { %v8645_v59 = vadd.f32 %v8644_v23, %v8596_v25  ;;  %8978 = vmatpush.bf16.msrb.mxu0 %v12378_v12  ;;  %9125 = vmatpush.bf16.msrb.mxu3 %v12570_v22  ;;  %v13213_v23 = vld [vmem:[#allocation14 + $0x1d4] sm:$0xf]  ;;  %v12439_v25 = vld [vmem:[#allocation14 + $0x1d8] sm:$0xf0]  ;;  %v13195_v12 = vld [vmem:[#allocation14 + $0x144] sm:$0xf] }
 0xa38   : > { %v16037_v17 = vpack.c.bf16 %v7953_v49, %v7947_v62  ;;  %v12442_v41 = vor.u32 %v13213_v23, %v12439_v25 }
 0xa39   : > { %v8691_v57 = vpop.f32.mrf.mxu2  ;;  %v8740_v42 = vpop.f32.mrf.mxu3 }
 0xa3a   : > { %v8692_v32 = vadd.f32 %v8691_v57, %v8643_v14  ;;  %9027 = vmatpush.bf16.msrb.mxu1 %v12442_v41  ;;  %v13227_v57 = vld [vmem:[#allocation14 + $0x244] sm:$0xf] }
 0xa3c   : > { %v16039_v61 = vadd.f32 %v8740_v42, %v8692_v32  ;;  %v8598_v56 = vpop.f32.mrf.mxu0  ;;  %v8647_v37 = vpop.f32.mrf.mxu1  ;;  %v12495_v42 = vld [vmem:[#allocation14 + $0x248] sm:$0xf0] }
 0xa3d   : > { %v8599_v60 = vadd.f32 %v8598_v56, %v16029_v55  ;;  %v12498_v22 = vor.u32 %v13227_v57, %v12495_v42  ;;  %v12367_v32 = vld [vmem:[#allocation14 + $0x148] sm:$0xf0]  ;;  %v13243_v56 = vld [vmem:[#allocation14 + $0x2c4] sm:$0xf] }
 0xa3e   : > { %v12370_v25 = vor.u32 %v13195_v12, %v12367_v32 }
 0xa3f   : > { %v8648_v19 = vadd.f32 %v8647_v37, %v8599_v60  ;;  %8793 = vmatmul.bf16.gmra.mxu0 %v15914_v21  ;;  %8842 = vmatmul.bf16.gmra.mxu1 %v15981_v27  ;;  %v12559_v37 = vld [vmem:[#allocation14 + $0x2c8] sm:$0xf0] }
 0xa40   : > { %v12562_v60 = vor.u32 %v13243_v56, %v12559_v37  ;;  %9077 = vmatpush.bf16.msrb.mxu2 %v12498_v22  ;;  %8979 = vmatpush.bf16.msrb.mxu0 %v12370_v25  ;;  %v13193_v25 = vld [vmem:[#allocation14 + $0x134] sm:$0xf] }
 0xa41   : > { %v8693_v62 = vpop.f32.mrf.mxu2  ;;  %v8742_v14 = vpop.f32.mrf.mxu3 }
 0xa42   : > { %v8694_v49 = vadd.f32 %v8693_v62, %v8645_v59  ;;  %9126 = vmatpush.bf16.msrb.mxu3 %v12562_v60 }
 0xa44   : > { %v16044_v5 = vadd.f32 %v8742_v14, %v8694_v49  ;;  %v8600_v1 = vpop.f32.mrf.mxu0  ;;  %v8649_v53 = vpop.f32.mrf.mxu1  ;;  %v13211_v14 = vld [vmem:[#allocation14 + $0x1c4] sm:$0xf]  ;;  %v12431_v49 = vld [vmem:[#allocation14 + $0x1c8] sm:$0xf0] }
 0xa45   : > { %v8601_v36 = vadd.f32 %v8600_v1, %v16029_v55 }
 0xa46   : > { %8891 = vmatmul.bf16.gmra.mxu2 %v15636_v28  ;;  %8940 = vmatmul.bf16.gmra.mxu3 %v15703_v20 }
 0xa47   : > { %v8650_v2 = vadd.f32 %v8649_v53, %v8601_v36  ;;  %v12434_v53 = vor.u32 %v13211_v14, %v12431_v49 }
 0xa49   : > { %v8696_v23 = vpop.f32.mrf.mxu2  ;;  %v8745_v59 = vpop.f32.mrf.mxu3  ;;  %9028 = vmatpush.bf16.msrb.mxu1 %v12434_v53 }
 0xa4a   : > { %v8697_v41 = vadd.f32 %v8696_v23, %v8648_v19  ;;  %v13225_v23 = vld [vmem:[#allocation14 + $0x234] sm:$0xf] }
 0xa4c   : > { %v16049_v62 = vadd.f32 %v8745_v59, %v8697_v41  ;;  %v8603_v28 = vpop.f32.mrf.mxu0  ;;  %v8652_v20 = vpop.f32.mrf.mxu1  ;;  %v12487_v59 = vld [vmem:[#allocation14 + $0x238] sm:$0xf0] }
 0xa4d   : > { %v8604_v1 = vadd.f32 %v8603_v28, %v16029_v55  ;;  %v12490_v60 = vor.u32 %v13225_v23, %v12487_v59  ;;  %v12359_v41 = vld [vmem:[#allocation14 + $0x138] sm:$0xf0]  ;;  %v13241_v28 = vld [vmem:[#allocation14 + $0x2b4] sm:$0xf] }
 0xa4e   : > { %v12362_v49 = vor.u32 %v13193_v25, %v12359_v41 }
 0xa4f   : > { %v8653_v36 = vadd.f32 %v8652_v20, %v8604_v1  ;;  %8798 = vmatmul.bf16.gmra.mxu0 %v15922_v9  ;;  %8847 = vmatmul.bf16.gmra.mxu1 %v15989_v34  ;;  %v12551_v20 = vld [vmem:[#allocation14 + $0x2b8] sm:$0xf0] }
 0xa50   : > { %v12554_v1 = vor.u32 %v13241_v28, %v12551_v20  ;;  %9078 = vmatpush.bf16.msrb.mxu2 %v12490_v60  ;;  %8980 = vmatpush.bf16.msrb.mxu0 %v12362_v49  ;;  %v13191_v49 = vld [vmem:[#allocation14 + $0x124] sm:$0xf] }
 0xa51   : > { %v8698_v57 = vpop.f32.mrf.mxu2  ;;  %v8747_v19 = vpop.f32.mrf.mxu3 }
 0xa52   : > { %v8699_v42 = vadd.f32 %v8698_v57, %v8650_v2  ;;  %9127 = vmatpush.bf16.msrb.mxu3 %v12554_v1 }
 0xa54   : > { %v16054_v12 = vadd.f32 %v8747_v19, %v8699_v42  ;;  %v8605_v22 = vpop.f32.mrf.mxu0  ;;  %v8654_v32 = vpop.f32.mrf.mxu1  ;;  %v13209_v19 = vld [vmem:[#allocation14 + $0x1b4] sm:$0xf]  ;;  %v12423_v42 = vld [vmem:[#allocation14 + $0x1b8] sm:$0xf0] }
 0xa55   : > { %v8606_v56 = vadd.f32 %v8605_v22, %v16029_v55 }
 0xa56   : > { %8896 = vmatmul.bf16.gmra.mxu2 %v16615_v47  ;;  %8945 = vmatmul.bf16.gmra.mxu3 %v16616_v38 }
 0xa57   : > { %v8655_v37 = vadd.f32 %v8654_v32, %v8606_v56  ;;  %v12426_v32 = vor.u32 %v13209_v19, %v12423_v42 }
 0xa59   : > { %v8701_v14 = vpop.f32.mrf.mxu2  ;;  %v8750_v2 = vpop.f32.mrf.mxu3  ;;  %9029 = vmatpush.bf16.msrb.mxu1 %v12426_v32 }
 0xa5a   : > { %v8702_v53 = vadd.f32 %v8701_v14, %v8653_v36  ;;  %v13223_v14 = vld [vmem:[#allocation14 + $0x224] sm:$0xf] }
 0xa5c   : > { %v16059_v57 = vadd.f32 %v8750_v2, %v8702_v53  ;;  %v8608_v47 = vpop.f32.mrf.mxu0  ;;  %v8657_v38 = vpop.f32.mrf.mxu1  ;;  %v12479_v2 = vld [vmem:[#allocation14 + $0x228] sm:$0xf0] }
 0xa5d   : > { %v8609_v22 = vadd.f32 %v8608_v47, %v16029_v55  ;;  %v12482_v1 = vor.u32 %v13223_v14, %v12479_v2  ;;  %v12351_v53 = vld [vmem:[#allocation14 + $0x128] sm:$0xf0]  ;;  %v13239_v47 = vld [vmem:[#allocation14 + $0x2a4] sm:$0xf] }
 0xa5e   : > { %v12354_v42 = vor.u32 %v13191_v49, %v12351_v53 }
 0xa5f   : > { %v8658_v56 = vadd.f32 %v8657_v38, %v8609_v22  ;;  %8803 = vmatmul.bf16.gmra.mxu0 %v15930_v43  ;;  %8852 = vmatmul.bf16.gmra.mxu1 %v15997_v46  ;;  %v12543_v38 = vld [vmem:[#allocation14 + $0x2a8] sm:$0xf0] }
 0xa60   : > { %v12546_v22 = vor.u32 %v13239_v47, %v12543_v38  ;;  %9079 = vmatpush.bf16.msrb.mxu2 %v12482_v1  ;;  %8981 = vmatpush.bf16.msrb.mxu0 %v12354_v42  ;;  %v13189_v42 = vld [vmem:[#allocation14 + $0x114] sm:$0xf] }
 0xa61   : > { %v8703_v23 = vpop.f32.mrf.mxu2  ;;  %v8752_v36 = vpop.f32.mrf.mxu3 }
 0xa62   : > { %v8704_v59 = vadd.f32 %v8703_v23, %v8655_v37  ;;  %9128 = vmatpush.bf16.msrb.mxu3 %v12546_v22 }
 0xa64   : > { %v16064_v25 = vadd.f32 %v8752_v36, %v8704_v59  ;;  %v8610_v60 = vpop.f32.mrf.mxu0  ;;  %v8659_v41 = vpop.f32.mrf.mxu1  ;;  %v13207_v36 = vld [vmem:[#allocation14 + $0x1a4] sm:$0xf]  ;;  %v12415_v59 = vld [vmem:[#allocation14 + $0x1a8] sm:$0xf0] }
 0xa65   : > { %v8611_v28 = vadd.f32 %v8610_v60, %v16029_v55 }
 0xa66   : > { %8901 = vmatmul.bf16.gmra.mxu2 %v16619_v50  ;;  %8950 = vmatmul.bf16.gmra.mxu3 %v16620_v33 }
 0xa67   : > { %v8660_v20 = vadd.f32 %v8659_v41, %v8611_v28  ;;  %v12418_v41 = vor.u32 %v13207_v36, %v12415_v59 }
 0xa69   : > { %v8706_v19 = vpop.f32.mrf.mxu2  ;;  %v8755_v37 = vpop.f32.mrf.mxu3  ;;  %9030 = vmatpush.bf16.msrb.mxu1 %v12418_v41 }
 0xa6a   : > { %v8707_v32 = vadd.f32 %v8706_v19, %v8658_v56  ;;  %v13221_v19 = vld [vmem:[#allocation14 + $0x214] sm:$0xf] }
 0xa6c   : > { %v16069_v23 = vadd.f32 %v8755_v37, %v8707_v32  ;;  %v8613_v50 = vpop.f32.mrf.mxu0  ;;  %v8662_v33 = vpop.f32.mrf.mxu1  ;;  %v12471_v37 = vld [vmem:[#allocation14 + $0x218] sm:$0xf0] }
 0xa6d   : > { %v8614_v60 = vadd.f32 %v8613_v50, %v16029_v55  ;;  %v12474_v22 = vor.u32 %v13221_v19, %v12471_v37  ;;  %v12343_v32 = vld [vmem:[#allocation14 + $0x118] sm:$0xf0]  ;;  %v13237_v50 = vld [vmem:[#allocation14 + $0x294] sm:$0xf] }
 0xa6e   : > { %v12346_v59 = vor.u32 %v13189_v42, %v12343_v32 }
 0xa6f   : > { %v8663_v28 = vadd.f32 %v8662_v33, %v8614_v60  ;;  %8808 = vmatmul.bf16.gmra.mxu0 %v15938_v4  ;;  %8857 = vmatmul.bf16.gmra.mxu1 %v16005_v40  ;;  %v12535_v33 = vld [vmem:[#allocation14 + $0x298] sm:$0xf0] }
 0xa70   : > { %v12538_v60 = vor.u32 %v13237_v50, %v12535_v33  ;;  %9080 = vmatpush.bf16.msrb.mxu2 %v12474_v22  ;;  %8982 = vmatpush.bf16.msrb.mxu0 %v12346_v59  ;;  %v13187_v59 = vld [vmem:[#allocation14 + $0x104] sm:$0xf] }
 0xa71   : > { %v8708_v14 = vpop.f32.mrf.mxu2  ;;  %v8757_v56 = vpop.f32.mrf.mxu3 }
 0xa72   : > { %v8709_v2 = vadd.f32 %v8708_v14, %v8660_v20  ;;  %9129 = vmatpush.bf16.msrb.mxu3 %v12538_v60 }
 0xa74   : > { %v16074_v49 = vadd.f32 %v8757_v56, %v8709_v2  ;;  %v8615_v1 = vpop.f32.mrf.mxu0  ;;  %v8664_v53 = vpop.f32.mrf.mxu1  ;;  %v13205_v56 = vld [vmem:[#allocation14 + $0x194] sm:$0xf]  ;;  %v12407_v2 = vld [vmem:[#allocation14 + $0x198] sm:$0xf0] }
 0xa75   : > { %v8616_v47 = vadd.f32 %v8615_v1, %v16029_v55 }
 0xa76   : > { %8906 = vmatmul.bf16.gmra.mxu2 %v16623_v39  ;;  %8955 = vmatmul.bf16.gmra.mxu3 %v16624_v58 }
 0xa77   : > { %v8665_v38 = vadd.f32 %v8664_v53, %v8616_v47  ;;  %v12410_v53 = vor.u32 %v13205_v56, %v12407_v2 }
 0xa79   : > { %v8711_v36 = vpop.f32.mrf.mxu2  ;;  %v8760_v20 = vpop.f32.mrf.mxu3  ;;  %9031 = vmatpush.bf16.msrb.mxu1 %v12410_v53 }
 0xa7a   : > { %v8712_v41 = vadd.f32 %v8711_v36, %v8663_v28  ;;  %v13219_v36 = vld [vmem:[#allocation14 + $0x204] sm:$0xf] }
 0xa7c   : > { %v16079_v14 = vadd.f32 %v8760_v20, %v8712_v41  ;;  %v8618_v39 = vpop.f32.mrf.mxu0  ;;  %v8667_v58 = vpop.f32.mrf.mxu1  ;;  %v12463_v20 = vld [vmem:[#allocation14 + $0x208] sm:$0xf0] }
 0xa7d   : > { %v8619_v1 = vadd.f32 %v8618_v39, %v16029_v55  ;;  %v12466_v60 = vor.u32 %v13219_v36, %v12463_v20  ;;  %v12335_v41 = vld [vmem:[#allocation14 + $0x108] sm:$0xf0]  ;;  %v13235_v39 = vld [vmem:[#allocation14 + $0x284] sm:$0xf] }
 0xa7e   : > { %v12338_v2 = vor.u32 %v13187_v59, %v12335_v41 }
 0xa7f   : > { %v8668_v47 = vadd.f32 %v8667_v58, %v8619_v1  ;;  %8813 = vmatmul.bf16.gmra.mxu0 %v15946_v3  ;;  %8862 = vmatmul.bf16.gmra.mxu1 %v16013_v45  ;;  %v12527_v58 = vld [vmem:[#allocation14 + $0x288] sm:$0xf0] }
 0xa80   : > { %v12530_v1 = vor.u32 %v13235_v39, %v12527_v58  ;;  %9081 = vmatpush.bf16.msrb.mxu2 %v12466_v60  ;;  %8983 = vmatpush.bf16.msrb.mxu0 %v12338_v2 }
 0xa81   : > { %v8713_v19 = vpop.f32.mrf.mxu2  ;;  %v8762_v28 = vpop.f32.mrf.mxu3 }
 0xa82   : > { %v8714_v37 = vadd.f32 %v8713_v19, %v8665_v38  ;;  %v13203_v19 = vld [vmem:[#allocation14 + $0x184] sm:$0xf]  ;;  %9130 = vmatpush.bf16.msrb.mxu3 %v12530_v1 }
 0xa84   : > { %v16084_v42 = vadd.f32 %v8762_v28, %v8714_v37  ;;  %v8620_v22 = vpop.f32.mrf.mxu0  ;;  %v8669_v32 = vpop.f32.mrf.mxu1  ;;  %v12399_v28 = vld [vmem:[#allocation14 + $0x188] sm:$0xf0] }
 0xa85   : > { %v8621_v50 = vadd.f32 %v8620_v22, %v16029_v55 }
 0xa86   : > { %8911 = vmatmul.bf16.gmra.mxu2 %v16627_v26  ;;  %8960 = vmatmul.bf16.gmra.mxu3 %v16628_v13  ;;  %v12402_v26 = vor.u32 %v13203_v19, %v12399_v28 }
 0xa87   : > { %v8670_v33 = vadd.f32 %v8669_v32, %v8621_v50 }
 0xa88   : > { %9032 = vmatpush.bf16.msrb.mxu1 %v12402_v26 }
 0xa89   : > { %v8716_v56 = vpop.f32.mrf.mxu2  ;;  %v8765_v38 = vpop.f32.mrf.mxu3 }
 0xa8a   : > { %v8717_v53 = vadd.f32 %v8716_v56, %v8668_v47 }
 0xa8c   : > { %v16089_v13 = vadd.f32 %v8765_v38, %v8717_v53  ;;  %v8623_v37 = vpop.f32.mrf.mxu0  ;;  %v8672_v22 = vpop.f32.mrf.mxu1 }
 0xa8d   : > { %v8624_v32 = vadd.f32 %v8623_v37, %v16029_v55 }
 0xa8f   : > { %v8673_v50 = vadd.f32 %v8672_v22, %v8624_v32  ;;  %8818 = vmatmul.bf16.gmra.mxu0 %v15957_v35  ;;  %8867 = vmatmul.bf16.gmra.mxu1 %v16026_v48 }
 0xa91   : > { %v8718_v36 = vpop.f32.mrf.mxu2  ;;  %v8767_v47 = vpop.f32.mrf.mxu3 }
 0xa92   : > { %v8719_v20 = vadd.f32 %v8718_v36, %v8670_v33 }
 0xa94   : > { %v16094_v59 = vadd.f32 %v8767_v47, %v8719_v20  ;;  %v8625_v60 = vpop.f32.mrf.mxu0  ;;  %v8674_v41 = vpop.f32.mrf.mxu1 }
 0xa95   : > { %v8626_v39 = vadd.f32 %v8625_v60, %v16029_v55 }
 0xa96   : > { %8916 = vmatmul.bf16.gmra.mxu2 %v16631_v63  ;;  %8965 = vmatmul.bf16.gmra.mxu3 %v16632_v10 }
 0xa97   : > { %v8675_v58 = vadd.f32 %v8674_v41, %v8626_v39 }
 0xa99   : > { %v8721_v56 = vpop.f32.mrf.mxu2  ;;  %v8770_v38 = vpop.f32.mrf.mxu3 }
 0xa9a   : > { %v8722_v2 = vadd.f32 %v8721_v56, %v8673_v50 }
 0xa9c   : > { %v16099_v1 = vadd.f32 %v8770_v38, %v8722_v2  ;;  %v8628_v53 = vpop.f32.mrf.mxu0  ;;  %v8677_v19 = vpop.f32.mrf.mxu1 }
 0xa9d   : > { %v8629_v33 = vadd.f32 %v8628_v53, %v16029_v55 }
 0xa9f   : > { %v8678_v28 = vadd.f32 %v8677_v19, %v8629_v33  ;;  %8823 = vmatmul.bf16.gmra.mxu0 %v15965_v31  ;;  %8872 = vmatmul.bf16.gmra.mxu1 %v16037_v17 }
 0xaa1   : > { %v8723_v26 = vpop.f32.mrf.mxu2  ;;  %v8772_v37 = vpop.f32.mrf.mxu3 }
 0xaa2   : > { %v8724_v63 = vadd.f32 %v8723_v26, %v8675_v58 }
 0xaa4   : > { %v16104_v22 = vadd.f32 %v8772_v37, %v8724_v63  ;;  %v8630_v10 = vpop.f32.mrf.mxu0  ;;  %v8679_v32 = vpop.f32.mrf.mxu1 }
 0xaa5   : > { %v8631_v50 = vadd.f32 %v8630_v10, %v16029_v55 }
 0xaa6   : > { %8921 = vmatmul.bf16.gmra.mxu2 %v16634_v51  ;;  %8970 = vmatmul.bf16.gmra.mxu3 %v16635_v52 }
 0xaa7   : > { %v8680_v36 = vadd.f32 %v8679_v32, %v8631_v50 }
 0xaa9   : > { %v8726_v47 = vpop.f32.mrf.mxu2  ;;  %v8775_v20 = vpop.f32.mrf.mxu3 }
 0xaaa   : > { %v8727_v60 = vadd.f32 %v8726_v47, %v8678_v28 }
 0xaac   : > { %v16109_v41 = vadd.f32 %v8775_v20, %v8727_v60  ;;  %v8789_v39 = vpop.f32.mrf.mxu0  ;;  %v8838_v56 = vpop.f32.mrf.mxu1 }
 0xaad   : > { %v8790_v58 = vadd.f32 %v8789_v39, %v16039_v61  ;;  %v16120_v61 = vperm.slane %v16024_v11, 1 }
 0xaaf   : > { %v8839_v38 = vadd.f32 %v8838_v56, %v8790_v58  ;;  %8984 = vmatmul.bf16.vlgmr.msrb.gmra.mxu0 %v15767_v8  ;;  %9033 = vmatmul.bf16.vlgmr.msrb.gmra.mxu1 %v15834_v29 }
 0xab1   : > { %v12587_v55 = vmul.f32 -1.442695, %v8839_v38  ;;  %v8728_v2 = vpop.f32.mrf.mxu2  ;;  %v8777_v51 = vpop.f32.mrf.mxu3 }
 0xab2   : > { %v8729_v53 = vadd.f32 %v8728_v2, %v8680_v36 }
 0xab3   : > { %13412 = vpow2.f32 %v12587_v55 }
 0xab4   : > { %v16114_v52 = vadd.f32 %v8777_v51, %v8729_v53  ;;  %v8791_v19 = vpop.f32.mrf.mxu0  ;;  %v8840_v33 = vpop.f32.mrf.mxu1 }
 0xab5   : > { %v8792_v28 = vadd.f32 %v8791_v19, %v16044_v5 }
 0xab6   : > { %9082 = vmatmul.bf16.vlgmr.msrb.gmra.mxu2 %v15906_v54  ;;  %9131 = vmatmul.bf16.vlgmr.msrb.gmra.mxu3 %v15973_v6 }
 0xab7   : > { %v8841_v8 = vadd.f32 %v8840_v33, %v8792_v28 }
 0xab9   : > { %v13413_v29 = vpop.eup %13412  ;;  %v12589_v26 = vmul.f32 -1.442695, %v8841_v8  ;;  %v8887_v37 = vpop.f32.mrf.mxu2 }
 0xaba   : > { %v8936_v63 = vpop.f32.mrf.mxu3  ;;  %v9268_v10 = vadd.f32 1.0, %v13413_v29  ;;  %v8888_v32 = vadd.f32 %v8887_v37, %v16120_v61 }
 0xabb   : > { %13414 = vpow2.f32 %v12589_v26 }
 0xabc   : > { %13416 = vrcp.f32 %v9268_v10  ;;  %v8794_v50 = vpop.f32.mrf.mxu0  ;;  %v8843_v36 = vpop.f32.mrf.mxu1  ;;  %v16123_v5 = vadd.f32 %v8936_v63, %v8888_v32  ;;  %v9311_v53 = vand.u32 2147483648, %v9268_v10  ;;  %v9309_v19 = vand.u32 2147483647, %v9268_v10 }
 0xabd   : > { %v8795_v54 = vadd.f32 %v8794_v50, %v16049_v62  ;;  %vm9305_vm2 = vweird.f32 %v9268_v10 }
 0xabe   : > { %v9312_v32 = vor.u32 1.1754944e-38, %v9311_v53  ;;  %vm9310_vm4 = vcmp.eq.f32.partialorder %v9309_v19, 8.507059e+37 }
 0xabf   : > { %v8844_v6 = vadd.f32 %v8843_v36, %v8795_v54  ;;  %8989 = vmatmul.bf16.gmra.mxu0 %v15775_v15  ;;  %9038 = vmatmul.bf16.gmra.mxu1 %v15842_v0 }
 0xac1   : > { %v13415_v11 = vpop.eup %13414  ;;  %v12591_v47 = vmul.f32 -1.442695, %v8844_v6  ;;  %v8889_v20 = vpop.f32.mrf.mxu2 }
 0xac2   : > { %v8938_v60 = vpop.f32.mrf.mxu3  ;;  %v13417_v39 = vpop.eup %13416  ;;  %v9270_v56 = vadd.f32 1.0, %v13415_v11  ;;  %v8890_v58 = vadd.f32 %v8889_v20, %v16120_v61 }
 0xac3   : > { %v9301_v38 = vmul.f32 %v13417_v39, %v9268_v10  ;;  %13418 = vpow2.f32 %v12591_v47  ;;  %vm9306_vm1 = vweird.f32 %v13417_v39 }
 0xac4   : > { %13420 = vrcp.f32 %v9270_v56  ;;  %v8796_v55 = vpop.f32.mrf.mxu0  ;;  %v8845_v2 = vpop.f32.mrf.mxu1  ;;  %v16129_v62 = vadd.f32 %v8938_v60, %v8890_v58  ;;  %vm9307_vm3 = vmor %vm9305_vm2, %vm9306_vm1  ;;  %v9341_v20 = vand.u32 2147483648, %v9270_v56  ;;  %vm9335_vm6 = vweird.f32 %v9270_v56 }
 0xac5   : > { %v9302_v51 = vsub.f32 1.0, %v9301_v38  ;;  %v8797_v15 = vadd.f32 %v8796_v55, %v16054_v12 }
 0xac6   : > { %9087 = vmatmul.bf16.gmra.mxu2 %v15914_v21  ;;  %9136 = vmatmul.bf16.gmra.mxu3 %v15981_v27 }
 0xac7   : > { %v9303_v0 = vmul.f32 %v13417_v39, %v9302_v51  ;;  %v8846_v33 = vadd.f32 %v8845_v2, %v8797_v15 }
 0xac9   : > { %v13419_v28 = vpop.eup %13418  ;;  %v9304_v8 = vadd.f32 %v13417_v39, %v9303_v0  ;;  %v12593_v29 = vmul.f32 -1.442695, %v8846_v33  ;;  %v8892_v26 = vpop.f32.mrf.mxu2  ;;  %v9342_v0 = vor.u32 1.1754944e-38, %v9341_v20 }
 0xaca   : > { %v8941_v37 = vpop.f32.mrf.mxu3  ;;  %v13421_v63 = vpop.eup %13420  ;;  %v16134_v12 = vadd.f32 1.0, %v13419_v28  ;;  %v8893_v21 = vadd.f32 %v8892_v26, %v16120_v61 }
 0xacb   : > { %v9308_v50 = vsel %vm9307_vm3, %v13417_v39, %v9304_v8  ;;  %v9331_v27 = vmul.f32 %v13421_v63, %v9270_v56  ;;  %13422 = vpow2.f32 %v12593_v29  ;;  %vm9336_vm5 = vweird.f32 %v13421_v63 }
 0xacc   : > { %v9313_v36 = vsel %vm9310_vm4, %v9312_v32, %v9308_v50  ;;  %13424 = vrcp.f32 %v16134_v12  ;;  %v8799_v54 = vpop.f32.mrf.mxu0  ;;  %v8848_v10 = vpop.f32.mrf.mxu1  ;;  %v16143_v11 = vadd.f32 %v8941_v37, %v8893_v21  ;;  %v9339_v39 = vand.u32 2147483647, %v9270_v56  ;;  %vm9337_vm7 = vmor %vm9335_vm6, %vm9336_vm5 }
 0xacd   : > { %9780 = vst [vmem:[%s16140_s24] sm:$0xff] %v9313_v36  ;;  %v9332_v6 = vsub.f32 1.0, %v9331_v27  ;;  %v8800_v47 = vadd.f32 %v8799_v54, %v16059_v57  ;;  %v9371_v37 = vand.u32 2147483648, %v16134_v12  ;;  %v9369_v32 = vand.u32 2147483647, %v16134_v12 }
 0xace   : > { %vm9340_vm8 = vcmp.eq.f32.partialorder %v9339_v39, 8.507059e+37  ;;  %vm9365_vm10 = vweird.f32 %v16134_v12 }
 0xacf   : > { %v9333_v60 = vmul.f32 %v13421_v63, %v9332_v6  ;;  %v8849_v58 = vadd.f32 %v8848_v10, %v8800_v47  ;;  %8994 = vmatmul.bf16.gmra.mxu0 %v16617_v30  ;;  %9043 = vmatmul.bf16.gmra.mxu1 %v16618_v16  ;;  %v9372_v6 = vor.u32 1.1754944e-38, %v9371_v37  ;;  %vm9370_vm12 = vcmp.eq.f32.partialorder %v9369_v32, 8.507059e+37 }
 0xad1   : > { %v13423_v38 = vpop.eup %13422  ;;  %v9334_v55 = vadd.f32 %v13421_v63, %v9333_v60  ;;  %v12595_v2 = vmul.f32 -1.442695, %v8849_v58  ;;  %v8894_v51 = vpop.f32.mrf.mxu2 }
 0xad2   : > { %v8943_v15 = vpop.f32.mrf.mxu3  ;;  %v13425_v53 = vpop.eup %13424  ;;  %v16148_v57 = vadd.f32 1.0, %v13423_v38  ;;  %v8895_v19 = vadd.f32 %v8894_v51, %v16120_v61 }
 0xad3   : > { %v9338_v33 = vsel %vm9337_vm7, %v13421_v63, %v9334_v55  ;;  %v9361_v30 = vmul.f32 %v13425_v53, %v16134_v12  ;;  %13426 = vpow2.f32 %v12595_v2  ;;  %vm9366_vm9 = vweird.f32 %v13425_v53 }
 0xad4   : > { %v9343_v16 = vsel %vm9340_vm8, %v9342_v0, %v9338_v33  ;;  %13428 = vrcp.f32 %v16148_v57  ;;  %v8801_v56 = vpop.f32.mrf.mxu0  ;;  %v8850_v28 = vpop.f32.mrf.mxu1  ;;  %v16154_v29 = vadd.f32 %v8943_v15, %v8895_v19  ;;  %vm9367_vm11 = vmor %vm9365_vm10, %vm9366_vm9  ;;  %v9401_v2 = vand.u32 2147483648, %v16148_v57 }
 0xad5   : > { %9782 = vst [vmem:[%s16140_s24 + $0x10] sm:$0xff] %v9343_v16  ;;  %v9362_v8 = vsub.f32 1.0, %v9361_v30  ;;  %v8802_v26 = vadd.f32 %v8801_v56, %v16064_v25  ;;  %v9399_v15 = vand.u32 2147483647, %v16148_v57  ;;  %vm9395_vm14 = vweird.f32 %v16148_v57 }
 0xad6   : > { %9092 = vmatmul.bf16.gmra.mxu2 %v15922_v9  ;;  %9141 = vmatmul.bf16.gmra.mxu3 %v15989_v34  ;;  %v9402_v56 = vor.u32 1.1754944e-38, %v9401_v2 }
 0xad7   : > { %v9363_v63 = vmul.f32 %v13425_v53, %v9362_v8  ;;  %v8851_v21 = vadd.f32 %v8850_v28, %v8802_v26  ;;  %vm9400_vm0 = vcmp.eq.f32.partialorder %v9399_v15, 8.507059e+37 }
 0xad9   : > { %v13427_v50 = vpop.eup %13426  ;;  %v9364_v27 = vadd.f32 %v13425_v53, %v9363_v63  ;;  %v12597_v36 = vmul.f32 -1.442695, %v8851_v21  ;;  %v8897_v54 = vpop.f32.mrf.mxu2 }
 0xada   : > { %v8946_v10 = vpop.f32.mrf.mxu3  ;;  %v13429_v25 = vpop.eup %13428  ;;  %v16162_v47 = vadd.f32 1.0, %v13427_v50  ;;  %v8898_v9 = vadd.f32 %v8897_v54, %v16120_v61 }
 0xadb   : > { %v9368_v34 = vsel %vm9367_vm11, %v13425_v53, %v9364_v27  ;;  %v9391_v20 = vmul.f32 %v13429_v25, %v16148_v57  ;;  %13430 = vpow2.f32 %v12597_v36  ;;  %vm9396_vm13 = vweird.f32 %v13429_v25 }
 0xadc   : > { %v9373_v60 = vsel %vm9370_vm12, %v9372_v6, %v9368_v34  ;;  %13432 = vrcp.f32 %v16162_v47  ;;  %v8804_v12 = vpop.f32.mrf.mxu0  ;;  %v8853_v39 = vpop.f32.mrf.mxu1  ;;  %v16168_v38 = vadd.f32 %v8946_v10, %v8898_v9  ;;  %vm9397_vm15 = vmor %vm9395_vm14, %vm9396_vm13  ;;  %v9431_v50 = vand.u32 2147483648, %v16162_v47 }
 0xadd   : > { %9784 = vst [vmem:[%s16140_s24 + $0x20] sm:$0xff] %v9373_v60  ;;  %v9392_v58 = vsub.f32 1.0, %v9391_v20  ;;  %v8805_v55 = vadd.f32 %v8804_v12, %v16069_v23  ;;  %v9429_v36 = vand.u32 2147483647, %v16162_v47  ;;  %vm9425_vm2 = vweird.f32 %v16162_v47 }
 0xade   : > { %v9432_v20 = vor.u32 1.1754944e-38, %v9431_v50 }
 0xadf   : > { %v9393_v51 = vmul.f32 %v13429_v25, %v9392_v58  ;;  %v8854_v53 = vadd.f32 %v8853_v39, %v8805_v55  ;;  %8999 = vmatmul.bf16.gmra.mxu0 %v16621_v44  ;;  %9048 = vmatmul.bf16.gmra.mxu1 %v16622_v24  ;;  %vm9430_vm4 = vcmp.eq.f32.partialorder %v9429_v36, 8.507059e+37 }
 0xae1   : > { %v13431_v0 = vpop.eup %13430  ;;  %v9394_v19 = vadd.f32 %v13429_v25, %v9393_v51  ;;  %v12599_v33 = vmul.f32 -1.442695, %v8854_v53  ;;  %v8899_v30 = vpop.f32.mrf.mxu2 }
 0xae2   : > { %v8948_v16 = vpop.f32.mrf.mxu3  ;;  %v13433_v23 = vpop.eup %13432  ;;  %v16176_v28 = vadd.f32 1.0, %v13431_v0  ;;  %v8900_v8 = vadd.f32 %v8899_v30, %v16120_v61 }
 0xae3   : > { %v9398_v26 = vsel %vm9397_vm15, %v13429_v25, %v9394_v19  ;;  %v9421_v44 = vmul.f32 %v13433_v23, %v16162_v47  ;;  %13434 = vpow2.f32 %v12599_v33  ;;  %vm9426_vm1 = vweird.f32 %v13433_v23 }
 0xae4   : > { %v9403_v24 = vsel %vm9400_vm0, %v9402_v56, %v9398_v26  ;;  %13436 = vrcp.f32 %v16176_v28  ;;  %v8806_v57 = vpop.f32.mrf.mxu0  ;;  %v8855_v37 = vpop.f32.mrf.mxu1  ;;  %v16182_v32 = vadd.f32 %v8948_v16, %v8900_v8  ;;  %vm9427_vm3 = vmor %vm9425_vm2, %vm9426_vm1  ;;  %v9461_v15 = vand.u32 2147483648, %v16176_v28 }
 0xae5   : > { %9786 = vst [vmem:[%s16140_s24 + $0x30] sm:$0xff] %v9403_v24  ;;  %v9422_v63 = vsub.f32 1.0, %v9421_v44  ;;  %v8807_v21 = vadd.f32 %v8806_v57, %v16074_v49  ;;  %v9459_v0 = vand.u32 2147483647, %v16176_v28  ;;  %vm9455_vm6 = vweird.f32 %v16176_v28 }
 0xae6   : > { %9097 = vmatmul.bf16.gmra.mxu2 %v15930_v43  ;;  %9146 = vmatmul.bf16.gmra.mxu3 %v15997_v46  ;;  %v9462_v8 = vor.u32 1.1754944e-38, %v9461_v15 }
 0xae7   : > { %v9423_v27 = vmul.f32 %v13433_v23, %v9422_v63  ;;  %v8856_v54 = vadd.f32 %v8855_v37, %v8807_v21  ;;  %vm9460_vm8 = vcmp.eq.f32.partialorder %v9459_v0, 8.507059e+37  ;;  %v16638_v0 = vld [vmem:[#allocation50_spill] sm:$0xff] }
 0xae9   : > { %v13435_v10 = vpop.eup %13434  ;;  %v9424_v25 = vadd.f32 %v13433_v23, %v9423_v27  ;;  %v12601_v6 = vmul.f32 -1.442695, %v8856_v54  ;;  %v8902_v9 = vpop.f32.mrf.mxu2 }
 0xaea   : > { %v8951_v34 = vpop.f32.mrf.mxu3  ;;  %v13437_v49 = vpop.eup %13436  ;;  %v16190_v60 = vadd.f32 1.0, %v13435_v10  ;;  %v8903_v43 = vadd.f32 %v8902_v9, %v16120_v61 }
 0xaeb   : > { %v9428_v46 = vsel %vm9427_vm3, %v13433_v23, %v9424_v25  ;;  %v9451_v12 = vmul.f32 %v13437_v49, %v16176_v28  ;;  %13438 = vpow2.f32 %v12601_v6  ;;  %vm9456_vm5 = vweird.f32 %v13437_v49 }
 0xaec   : > { %v9433_v39 = vsel %vm9430_vm4, %v9432_v20, %v9428_v46  ;;  %13440 = vrcp.f32 %v16190_v60  ;;  %v8809_v47 = vpop.f32.mrf.mxu0  ;;  %v8858_v58 = vpop.f32.mrf.mxu1  ;;  %v16196_v2 = vadd.f32 %v8951_v34, %v8903_v43  ;;  %vm9457_vm7 = vmor %vm9455_vm6, %vm9456_vm5  ;;  %v9491_v50 = vand.u32 2147483648, %v16190_v60 }
 0xaed   : > { %9788 = vst [vmem:[%s16140_s24 + $0x40] sm:$0xff] %v9433_v39  ;;  %v9452_v55 = vsub.f32 1.0, %v9451_v12  ;;  %v8810_v51 = vadd.f32 %v8809_v47, %v16079_v14  ;;  %v9489_v36 = vand.u32 2147483647, %v16190_v60  ;;  %vm9485_vm10 = vweird.f32 %v16190_v60 }
 0xaef   : > { %v9453_v53 = vmul.f32 %v13437_v49, %v9452_v55  ;;  %v8859_v19 = vadd.f32 %v8858_v58, %v8810_v51  ;;  %9004 = vmatmul.bf16.gmra.mxu0 %v16625_v18  ;;  %9053 = vmatmul.bf16.gmra.mxu1 %v16626_v7  ;;  %vm9490_vm12 = vcmp.eq.f32.partialorder %v9489_v36, 8.507059e+37 }
 0xaf1   : > { %v13439_v33 = vpop.eup %13438  ;;  %v9454_v30 = vadd.f32 %v13437_v49, %v9453_v53  ;;  %v12603_v16 = vmul.f32 -1.442695, %v8859_v19  ;;  %v8904_v23 = vpop.f32.mrf.mxu2  ;;  %v16639_v19 = vld [vmem:[#allocation53_spill] sm:$0xff] }
 0xaf2   : > { %v8953_v56 = vpop.f32.mrf.mxu3  ;;  %v13441_v14 = vpop.eup %13440  ;;  %v16204_v26 = vadd.f32 1.0, %v13439_v33  ;;  %v8905_v44 = vadd.f32 %v8904_v23, %v16120_v61 }
 0xaf3   : > { %v9458_v24 = vsel %vm9457_vm7, %v13437_v49, %v9454_v30  ;;  %v9481_v18 = vmul.f32 %v13441_v14, %v16190_v60  ;;  %13442 = vpow2.f32 %v12603_v16  ;;  %vm9486_vm9 = vweird.f32 %v13441_v14 }
 0xaf4   : > { %v9463_v7 = vsel %vm9460_vm8, %v9462_v8, %v9458_v24  ;;  %13444 = vrcp.f32 %v16204_v26  ;;  %v8811_v28 = vpop.f32.mrf.mxu0  ;;  %v8860_v57 = vpop.f32.mrf.mxu1  ;;  %v16210_v63 = vadd.f32 %v8953_v56, %v8905_v44  ;;  %vm9487_vm11 = vmor %vm9485_vm10, %vm9486_vm9  ;;  %v9492_v49 = vor.u32 1.1754944e-38, %v9491_v50 }
 0xaf5   : > { %9790 = vst [vmem:[%s16140_s24 + $0x50] sm:$0xff] %v9463_v7  ;;  %v9482_v37 = vsub.f32 1.0, %v9481_v18  ;;  %v8812_v21 = vadd.f32 %v8811_v28, %v16084_v42  ;;  %v9521_v55 = vand.u32 2147483648, %v16204_v26  ;;  %v9519_v15 = vand.u32 2147483647, %v16204_v26 }
 0xaf6   : > { %9102 = vmatmul.bf16.gmra.mxu2 %v15938_v4  ;;  %9151 = vmatmul.bf16.gmra.mxu3 %v16005_v40  ;;  %vm9515_vm14 = vweird.f32 %v16204_v26 }
 0xaf7   : > { %v9483_v27 = vmul.f32 %v13441_v14, %v9482_v37  ;;  %v8861_v54 = vadd.f32 %v8860_v57, %v8812_v21  ;;  %vm9520_vm0 = vcmp.eq.f32.partialorder %v9519_v15, 8.507059e+37  ;;  %v16640_v15 = vld [vmem:[#allocation51_spill] sm:$0xff] }
 0xaf9   : > { %v13443_v10 = vpop.eup %13442  ;;  %v9484_v25 = vadd.f32 %v13441_v14, %v9483_v27  ;;  %v12605_v6 = vmul.f32 -1.442695, %v8861_v54  ;;  %v8907_v9 = vpop.f32.mrf.mxu2 }
 0xafa   : > { %v8956_v34 = vpop.f32.mrf.mxu3  ;;  %v13445_v42 = vpop.eup %13444  ;;  %v16218_v20 = vadd.f32 1.0, %v13443_v10  ;;  %v8908_v4 = vadd.f32 %v8907_v9, %v16120_v61 }
 0xafb   : > { %v9488_v40 = vsel %vm9487_vm11, %v13441_v14, %v9484_v25  ;;  %v9511_v43 = vmul.f32 %v13445_v42, %v16204_v26  ;;  %13446 = vpow2.f32 %v12605_v6  ;;  %vm9516_vm13 = vweird.f32 %v13445_v42 }
 0xafc   : > { %v9493_v46 = vsel %vm9490_vm12, %v9492_v49, %v9488_v40  ;;  %13448 = vrcp.f32 %v16218_v20  ;;  %v8814_v60 = vpop.f32.mrf.mxu0  ;;  %v8863_v12 = vpop.f32.mrf.mxu1  ;;  %v16224_v47 = vadd.f32 %v8956_v34, %v8908_v4  ;;  %vm9517_vm15 = vmor %vm9515_vm14, %vm9516_vm13  ;;  %v9522_v14 = vor.u32 1.1754944e-38, %v9521_v55 }
 0xafd   : > { %9792 = vst [vmem:[%s16140_s24 + $0x60] sm:$0xff] %v9493_v46  ;;  %v9512_v39 = vsub.f32 1.0, %v9511_v43  ;;  %v8815_v58 = vadd.f32 %v8814_v60, %v16089_v13  ;;  %v9551_v50 = vand.u32 2147483648, %v16218_v20  ;;  %v9549_v36 = vand.u32 2147483647, %v16218_v20 }
 0xafe   : > { %vm9545_vm2 = vweird.f32 %v16218_v20 }
 0xaff   : > { %v9513_v51 = vmul.f32 %v13445_v42, %v9512_v39  ;;  %v8864_v53 = vadd.f32 %v8863_v12, %v8815_v58  ;;  %9009 = vmatmul.bf16.gmra.mxu0 %v16638_v0  ;;  %9058 = vmatmul.bf16.gmra.mxu1 %v16639_v19  ;;  %vm9550_vm4 = vcmp.eq.f32.partialorder %v9549_v36, 8.507059e+37 }
 0xb01   : > { %v13447_v33 = vpop.eup %13446  ;;  %v9514_v30 = vadd.f32 %v13445_v42, %v9513_v51  ;;  %v12607_v16 = vmul.f32 -1.442695, %v8864_v53  ;;  %v8909_v23 = vpop.f32.mrf.mxu2  ;;  %v16641_v53 = vld [vmem:[#allocation45_spill] sm:$0xff] }
 0xb02   : > { %v8958_v56 = vpop.f32.mrf.mxu3  ;;  %v13449_v13 = vpop.eup %13448  ;;  %v16232_v8 = vadd.f32 1.0, %v13447_v33  ;;  %v8910_v44 = vadd.f32 %v8909_v23, %v16120_v61 }
 0xb03   : > { %v9518_v24 = vsel %vm9517_vm15, %v13445_v42, %v9514_v30  ;;  %v9541_v18 = vmul.f32 %v13449_v13, %v16218_v20  ;;  %13450 = vpow2.f32 %v12607_v16  ;;  %vm9546_vm1 = vweird.f32 %v13449_v13 }
 0xb04   : > { %v9523_v7 = vsel %vm9520_vm0, %v9522_v14, %v9518_v24  ;;  %13452 = vrcp.f32 %v16232_v8  ;;  %v8816_v26 = vpop.f32.mrf.mxu0  ;;  %v8865_v28 = vpop.f32.mrf.mxu1  ;;  %v16238_v37 = vadd.f32 %v8958_v56, %v8910_v44  ;;  %vm9547_vm3 = vmor %vm9545_vm2, %vm9546_vm1  ;;  %v9552_v42 = vor.u32 1.1754944e-38, %v9551_v50 }
 0xb05   : > { %9794 = vst [vmem:[%s16140_s24 + $0x70] sm:$0xff] %v9523_v7  ;;  %v9542_v57 = vsub.f32 1.0, %v9541_v18  ;;  %v8817_v21 = vadd.f32 %v8816_v26, %v16094_v59  ;;  %v9581_v39 = vand.u32 2147483648, %v16232_v8  ;;  %v9579_v55 = vand.u32 2147483647, %v16232_v8 }
 0xb06   : > { %9107 = vmatmul.bf16.gmra.mxu2 %v15946_v3  ;;  %9156 = vmatmul.bf16.gmra.mxu3 %v16013_v45  ;;  %vm9575_vm6 = vweird.f32 %v16232_v8 }
 0xb07   : > { %v9543_v27 = vmul.f32 %v13449_v13, %v9542_v57  ;;  %v8866_v54 = vadd.f32 %v8865_v28, %v8817_v21  ;;  %v9582_v23 = vor.u32 1.1754944e-38, %v9581_v39  ;;  %vm9580_vm8 = vcmp.eq.f32.partialorder %v9579_v55, 8.507059e+37  ;;  %v16642_v39 = vld [vmem:[#allocation39_spill] sm:$0xff] }
 0xb09   : > { %v13451_v10 = vpop.eup %13450  ;;  %v9544_v25 = vadd.f32 %v13449_v13, %v9543_v27  ;;  %v12609_v6 = vmul.f32 -1.442695, %v8866_v54  ;;  %v8912_v9 = vpop.f32.mrf.mxu2 }
 0xb0a   : > { %v8961_v34 = vpop.f32.mrf.mxu3  ;;  %v13453_v59 = vpop.eup %13452  ;;  %v16246_v49 = vadd.f32 1.0, %v13451_v10  ;;  %v8913_v3 = vadd.f32 %v8912_v9, %v16120_v61 }
 0xb0b   : > { %v9548_v45 = vsel %vm9547_vm3, %v13449_v13, %v9544_v25  ;;  %v9571_v4 = vmul.f32 %v13453_v59, %v16232_v8  ;;  %13454 = vpow2.f32 %v12609_v6  ;;  %vm9576_vm5 = vweird.f32 %v13453_v59 }
 0xb0c   : > { %v9553_v40 = vsel %vm9550_vm4, %v9552_v42, %v9548_v45  ;;  %13456 = vrcp.f32 %v16246_v49  ;;  %v8819_v20 = vpop.f32.mrf.mxu0  ;;  %v8868_v43 = vpop.f32.mrf.mxu1  ;;  %v16252_v60 = vadd.f32 %v8961_v34, %v8913_v3  ;;  %vm9577_vm7 = vmor %vm9575_vm6, %vm9576_vm5  ;;  %v9611_v57 = vand.u32 2147483648, %v16246_v49 }
 0xb0d   : > { %9796 = vst [vmem:[%s16140_s24 + $0x80] sm:$0xff] %v9553_v40  ;;  %v9572_v46 = vsub.f32 1.0, %v9571_v4  ;;  %v8820_v12 = vadd.f32 %v8819_v20, %v16099_v1  ;;  %v9609_v50 = vand.u32 2147483647, %v16246_v49  ;;  %vm9605_vm10 = vweird.f32 %v16246_v49 }
 0xb0e   : > { %v9612_v9 = vor.u32 1.1754944e-38, %v9611_v57 }
 0xb0f   : > { %v9573_v58 = vmul.f32 %v13453_v59, %v9572_v46  ;;  %v8869_v51 = vadd.f32 %v8868_v43, %v8820_v12  ;;  %9014 = vmatmul.bf16.gmra.mxu0 %v16640_v15  ;;  %9063 = vmatmul.bf16.gmra.mxu1 %v16641_v53  ;;  %vm9610_vm12 = vcmp.eq.f32.partialorder %v9609_v50, 8.507059e+37 }
 0xb11   : > { %v13455_v0 = vpop.eup %13454  ;;  %v9574_v19 = vadd.f32 %v13453_v59, %v9573_v58  ;;  %v12611_v33 = vmul.f32 -1.442695, %v8869_v51  ;;  %v8914_v30 = vpop.f32.mrf.mxu2  ;;  %v16643_v58 = vld [vmem:[#allocation54_spill] sm:$0xff] }
 0xb12   : > { %v8963_v16 = vpop.f32.mrf.mxu3  ;;  %v13457_v1 = vpop.eup %13456  ;;  %v16260_v56 = vadd.f32 1.0, %v13455_v0  ;;  %v8915_v13 = vadd.f32 %v8914_v30, %v16120_v61 }
 0xb13   : > { %v9578_v14 = vsel %vm9577_vm7, %v13453_v59, %v9574_v19  ;;  %v9601_v44 = vmul.f32 %v13457_v1, %v16246_v49  ;;  %13458 = vpow2.f32 %v12611_v33  ;;  %vm9606_vm9 = vweird.f32 %v13457_v1 }
 0xb14   : > { %v9583_v24 = vsel %vm9580_vm8, %v9582_v23, %v9578_v14  ;;  %13460 = vrcp.f32 %v16260_v56  ;;  %v8821_v8 = vpop.f32.mrf.mxu0  ;;  %v8870_v18 = vpop.f32.mrf.mxu1  ;;  %v16266_v26 = vadd.f32 %v8963_v16, %v8915_v13  ;;  %vm9607_vm11 = vmor %vm9605_vm10, %vm9606_vm9  ;;  %v9641_v20 = vand.u32 2147483648, %v16260_v56 }
 0xb15   : > { %9798 = vst [vmem:[%s16140_s24 + $0x90] sm:$0xff] %v9583_v24  ;;  %v9602_v7 = vsub.f32 1.0, %v9601_v44  ;;  %v8822_v28 = vadd.f32 %v8821_v8, %v16104_v22  ;;  %v9639_v46 = vand.u32 2147483647, %v16260_v56  ;;  %vm9635_vm14 = vweird.f32 %v16260_v56 }
 0xb16   : > { %9112 = vmatmul.bf16.gmra.mxu2 %v15957_v35  ;;  %9161 = vmatmul.bf16.gmra.mxu3 %v16026_v48  ;;  %v9642_v19 = vor.u32 1.1754944e-38, %v9641_v20 }
 0xb17   : > { %v9603_v21 = vmul.f32 %v13457_v1, %v9602_v7  ;;  %v8871_v27 = vadd.f32 %v8870_v18, %v8822_v28  ;;  %vm9640_vm0 = vcmp.eq.f32.partialorder %v9639_v46, 8.507059e+37 }
 0xb19   : > { %v13459_v36 = vpop.eup %13458  ;;  %v9604_v54 = vadd.f32 %v13457_v1, %v9603_v21  ;;  %v12613_v10 = vmul.f32 -1.442695, %v8871_v27  ;;  %v8917_v25 = vpop.f32.mrf.mxu2 }
 0xb1a   : > { %v8966_v6 = vpop.f32.mrf.mxu3  ;;  %v13461_v22 = vpop.eup %13460  ;;  %v16274_v34 = vadd.f32 1.0, %v13459_v36  ;;  %v8918_v35 = vadd.f32 %v8917_v25, %v16120_v61 }
 0xb1b   : > { %v9608_v48 = vsel %vm9607_vm11, %v13457_v1, %v9604_v54  ;;  %v9631_v59 = vmul.f32 %v13461_v22, %v16260_v56  ;;  %13462 = vpow2.f32 %v12613_v10  ;;  %vm9636_vm13 = vweird.f32 %v13461_v22 }
 0xb1c   : > { %v9613_v42 = vsel %vm9610_vm12, %v9612_v9, %v9608_v48  ;;  %13464 = vrcp.f32 %v16274_v34  ;;  %v8824_v49 = vpop.f32.mrf.mxu0  ;;  %v8873_v3 = vpop.f32.mrf.mxu1  ;;  %v16280_v4 = vadd.f32 %v8966_v6, %v8918_v35  ;;  %vm9637_vm15 = vmor %vm9635_vm14, %vm9636_vm13  ;;  %v9671_v8 = vand.u32 2147483648, %v16274_v34 }
 0xb1d   : > { %9800 = vst [vmem:[%s16140_s24 + $0xa0] sm:$0xff] %v9613_v42  ;;  %v9632_v45 = vsub.f32 1.0, %v9631_v59  ;;  %v8825_v40 = vadd.f32 %v8824_v49, %v16109_v41  ;;  %v9669_v7 = vand.u32 2147483647, %v16274_v34  ;;  %vm9665_vm2 = vweird.f32 %v16274_v34 }
 0xb1e   : > { %v9672_v54 = vor.u32 1.1754944e-38, %v9671_v8 }
 0xb1f   : > { %v9633_v43 = vmul.f32 %v13461_v22, %v9632_v45  ;;  %v8874_v12 = vadd.f32 %v8873_v3, %v8825_v40  ;;  %9019 = vmatmul.bf16.gmra.mxu0 %v16642_v39  ;;  %9068 = vmatmul.bf16.gmra.mxu1 %v16643_v58  ;;  %vm9670_vm4 = vcmp.eq.f32.partialorder %v9669_v7, 8.507059e+37 }
 0xb21   : > { %v13463_v55 = vpop.eup %13462  ;;  %v9634_v51 = vadd.f32 %v13461_v22, %v9633_v43  ;;  %v12615_v15 = vmul.f32 -1.442695, %v8874_v12  ;;  %v8919_v53 = vpop.f32.mrf.mxu2 }
 0xb22   : > { %v8968_v0 = vpop.f32.mrf.mxu3  ;;  %v13465_v41 = vpop.eup %13464  ;;  %v9294_v33 = vadd.f32 1.0, %v13463_v55  ;;  %v8920_v30 = vadd.f32 %v8919_v53, %v16120_v61 }
 0xb23   : > { %v9638_v16 = vsel %vm9637_vm15, %v13461_v22, %v9634_v51  ;;  %v9661_v1 = vmul.f32 %v13465_v41, %v16274_v34  ;;  %13466 = vpow2.f32 %v12615_v15  ;;  %vm9666_vm1 = vweird.f32 %v13465_v41 }
 0xb24   : > { %v9643_v23 = vsel %vm9640_vm0, %v9642_v19, %v9638_v16  ;;  %13468 = vrcp.f32 %v9294_v33  ;;  %v8826_v13 = vpop.f32.mrf.mxu0  ;;  %v8875_v14 = vpop.f32.mrf.mxu1  ;;  %v16291_v44 = vadd.f32 %v8968_v0, %v8920_v30  ;;  %vm9667_vm3 = vmor %vm9665_vm2, %vm9666_vm1  ;;  %v9701_v48 = vand.u32 2147483648, %v9294_v33 }
 0xb25   : > { %9802 = vst [vmem:[%s16140_s24 + $0xb0] sm:$0xff] %v9643_v23  ;;  %v9662_v56 = vsub.f32 1.0, %v9661_v1  ;;  %v8827_v24 = vadd.f32 %v8826_v13, %v16114_v52  ;;  %v9699_v42 = vand.u32 2147483647, %v9294_v33  ;;  %vm9695_vm6 = vweird.f32 %v9294_v33 }
 0xb26   : > { %9117 = vmatmul.bf16.gmra.mxu2 %v15965_v31  ;;  %9166 = vmatmul.bf16.gmra.mxu3 %v16037_v17  ;;  %v9702_v43 = vor.u32 1.1754944e-38, %v9701_v48 }
 0xb27   : > { %v9663_v18 = vmul.f32 %v13465_v41, %v9662_v56  ;;  %v8876_v28 = vadd.f32 %v8875_v14, %v8827_v24  ;;  %vm9700_vm8 = vcmp.eq.f32.partialorder %v9699_v42, 8.507059e+37 }
 0xb29   : > { %v13467_v57 = vpop.eup %13466  ;;  %v9664_v21 = vadd.f32 %v13465_v41, %v9663_v18  ;;  %v12617_v50 = vmul.f32 -1.442695, %v8876_v28  ;;  %v8922_v27 = vpop.f32.mrf.mxu2 }
 0xb2a   : > { %v8971_v36 = vpop.f32.mrf.mxu3  ;;  %v13469_v52 = vpop.eup %13468  ;;  %v9296_v10 = vadd.f32 1.0, %v13467_v57  ;;  %v8923_v31 = vadd.f32 %v8922_v27, %v16120_v61 }
 0xb2b   : > { %v9668_v17 = vsel %vm9667_vm3, %v13465_v41, %v9664_v21  ;;  %v9691_v25 = vmul.f32 %v13469_v52, %v9294_v33  ;;  %13470 = vpow2.f32 %v12617_v50  ;;  %vm9696_vm5 = vweird.f32 %v13469_v52 }
 0xb2c   : > { %v9673_v6 = vsel %vm9670_vm4, %v9672_v54, %v9668_v17  ;;  %13472 = vrcp.f32 %v9296_v10  ;;  %v8985_v22 = vpop.f32.mrf.mxu0  ;;  %v9034_v9 = vpop.f32.mrf.mxu1  ;;  %v16301_v35 = vadd.f32 %v8971_v36, %v8923_v31  ;;  %vm9697_vm7 = vmor %vm9695_vm6, %vm9696_vm5  ;;  %v9731_v19 = vand.u32 2147483648, %v9296_v10 }
 0xb2d   : > { %9804 = vst [vmem:[%s16140_s24 + $0xc0] sm:$0xff] %v9673_v6  ;;  %v9692_v34 = vsub.f32 1.0, %v9691_v25  ;;  %v8986_v51 = vadd.f32 %v8985_v22, %v16123_v5  ;;  %v9729_v30 = vand.u32 2147483647, %v9296_v10  ;;  %vm9725_vm10 = vweird.f32 %v9296_v10 }
 0xb2e   : > { %v9732_v14 = vor.u32 1.1754944e-38, %v9731_v19 }
 0xb2f   : > { %v9693_v59 = vmul.f32 %v13469_v52, %v9692_v34  ;;  %v9035_v16 = vadd.f32 %v9034_v9, %v8986_v51  ;;  %vm9730_vm12 = vcmp.eq.f32.partialorder %v9729_v30, 8.507059e+37 }
 0xb31   : > { %v13471_v49 = vpop.eup %13470  ;;  %v9694_v3 = vadd.f32 %v13469_v52, %v9693_v59  ;;  %v8924_v45 = vpop.f32.mrf.mxu2 }
 0xb32   : > { %v8973_v40 = vpop.f32.mrf.mxu3  ;;  %v13473_v20 = vpop.eup %13472  ;;  %v9298_v46 = vadd.f32 1.0, %v13471_v49  ;;  %v8925_v12 = vadd.f32 %v8924_v45, %v16120_v61 }
 0xb33   : > { %v9698_v39 = vsel %vm9697_vm7, %v13469_v52, %v9694_v3  ;;  %v9721_v58 = vmul.f32 %v13473_v20, %v9296_v10  ;;  %vm9726_vm9 = vweird.f32 %v13473_v20 }
 0xb34   : > { %v9703_v55 = vsel %vm9700_vm8, %v9702_v43, %v9698_v39  ;;  %13474 = vrcp.f32 %v9298_v46  ;;  %v8987_v15 = vpop.f32.mrf.mxu0  ;;  %v9036_v53 = vpop.f32.mrf.mxu1  ;;  %v16306_v41 = vadd.f32 %v8973_v40, %v8925_v12  ;;  %vm9727_vm11 = vmor %vm9725_vm10, %vm9726_vm9  ;;  %v9761_v50 = vand.u32 2147483648, %v9298_v46 }
 0xb35   : > { %9806 = vst [vmem:[%s16140_s24 + $0xd0] sm:$0xff] %v9703_v55  ;;  %v9722_v0 = vsub.f32 1.0, %v9721_v58  ;;  %v8988_v18 = vadd.f32 %v8987_v15, %v16129_v62  ;;  %v9759_v52 = vand.u32 2147483647, %v9298_v46  ;;  %vm9755_vm14 = vweird.f32 %v9298_v46 }
 0xb36   : > { %v9762_v25 = vor.u32 1.1754944e-38, %v9761_v50 }
 0xb37   : > { %v9723_v33 = vmul.f32 %v13473_v20, %v9722_v0  ;;  %v9037_v54 = vadd.f32 %v9036_v53, %v8988_v18  ;;  %vm9760_vm0 = vcmp.eq.f32.partialorder %v9759_v52, 8.507059e+37 }
 0xb39   : > { %v9724_v1 = vadd.f32 %v13473_v20, %v9723_v33  ;;  %v9083_v61 = vpop.f32.mrf.mxu2 }
 0xb3a   : > { %v9132_v23 = vpop.f32.mrf.mxu3  ;;  %v13475_v13 = vpop.eup %13474  ;;  %v9084_v5 = vadd.f32 %v9083_v61, %v9035_v16 }
 0xb3b   : > { %v9728_v56 = vsel %vm9727_vm11, %v13473_v20, %v9724_v1  ;;  %v9751_v24 = vmul.f32 %v13475_v13, %v9298_v46  ;;  %vm9756_vm13 = vweird.f32 %v13475_v13 }
 0xb3c   : > { %v9733_v8 = vsel %vm9730_vm12, %v9732_v14, %v9728_v56  ;;  %v9133_v7 = vadd.f32 %v9132_v23, %v9084_v5  ;;  %v8990_v28 = vpop.f32.mrf.mxu0  ;;  %v9039_v57 = vpop.f32.mrf.mxu1  ;;  %vm9757_vm15 = vmor %vm9755_vm14, %vm9756_vm13 }
 0xb3d   : > { %9808 = vst [vmem:[%s16140_s24 + $0xe0] sm:$0xff] %v9733_v8  ;;  %v9752_v21 = vsub.f32 1.0, %v9751_v24  ;;  %v8991_v9 = vadd.f32 %v8990_v28, %v16143_v11 }
 0xb3e   : > { %v12588_v27 = vmul.f32 -1.442695, %v9133_v7 }
 0xb3f   : > { %v9753_v36 = vmul.f32 %v13475_v13, %v9752_v21  ;;  %v9040_v45 = vadd.f32 %v9039_v57, %v8991_v9 }
 0xb40   : > { %13476 = vpow2.f32 %v12588_v27 }
 0xb41   : > { %v9754_v10 = vadd.f32 %v13475_v13, %v9753_v36  ;;  %v9085_v31 = vpop.f32.mrf.mxu2 }
 0xb42   : > { %v9134_v17 = vpop.f32.mrf.mxu3  ;;  %v9086_v62 = vadd.f32 %v9085_v31, %v9037_v54 }
 0xb43   : > { %v9758_v6 = vsel %vm9757_vm15, %v13475_v13, %v9754_v10 }
 0xb44   : > { %v9763_v22 = vsel %vm9760_vm0, %v9762_v25, %v9758_v6  ;;  %v9135_v34 = vadd.f32 %v9134_v17, %v9086_v62  ;;  %v8992_v48 = vpop.f32.mrf.mxu0  ;;  %v9041_v59 = vpop.f32.mrf.mxu1 }
 0xb45   : > { %9810 = vst [vmem:[%s16140_s24 + $0xf0] sm:$0xff] %v9763_v22  ;;  %v8993_v46 = vadd.f32 %v8992_v48, %v16154_v29 }
 0xb46   : > { %v13477_v42 = vpop.eup %13476  ;;  %v12590_v49 = vmul.f32 -1.442695, %v9135_v34 }
 0xb47   : > { %v9269_v3 = vadd.f32 1.0, %v13477_v42  ;;  %v9042_v0 = vadd.f32 %v9041_v59, %v8993_v46 }
 0xb48   : > { %13478 = vpow2.f32 %v12590_v49 }
 0xb49   : > { %13480 = vrcp.f32 %v9269_v3  ;;  %v9088_v40 = vpop.f32.mrf.mxu2  ;;  %v9324_v1 = vand.u32 2147483647, %v9269_v3  ;;  %v9326_v61 = vand.u32 2147483648, %v9269_v3  ;;  %vm9320_vm2 = vweird.f32 %v9269_v3 }
 0xb4a   : > { %v9137_v20 = vpop.f32.mrf.mxu3  ;;  %v9089_v43 = vadd.f32 %v9088_v40, %v9040_v45 }
 0xb4b   : > { %vm9325_vm4 = vcmp.eq.f32.partialorder %v9324_v1, 8.507059e+37  ;;  %v9327_v7 = vor.u32 1.1754944e-38, %v9326_v61 }
 0xb4c   : > { %v9138_v12 = vadd.f32 %v9137_v20, %v9089_v43  ;;  %v8995_v39 = vpop.f32.mrf.mxu0  ;;  %v9044_v58 = vpop.f32.mrf.mxu1 }
 0xb4d   : > { %v8996_v29 = vadd.f32 %v8995_v39, %v16168_v38 }
 0xb4e   : > { %v13479_v55 = vpop.eup %13478  ;;  %v12592_v11 = vmul.f32 -1.442695, %v9138_v12 }
 0xb4f   : > { %v13481_v51 = vpop.eup %13480  ;;  %v9271_v15 = vadd.f32 1.0, %v13479_v55  ;;  %v9045_v50 = vadd.f32 %v9044_v58, %v8996_v29 }
 0xb50   : > { %v9316_v53 = vmul.f32 %v13481_v51, %v9269_v3  ;;  %13482 = vpow2.f32 %v12592_v11  ;;  %vm9321_vm1 = vweird.f32 %v13481_v51 }
 0xb51   : > { %13484 = vrcp.f32 %v9271_v15  ;;  %v9090_v19 = vpop.f32.mrf.mxu2  ;;  %vm9322_vm3 = vmor %vm9320_vm2, %vm9321_vm1  ;;  %v9354_v10 = vand.u32 2147483647, %v9271_v15  ;;  %v9356_v31 = vand.u32 2147483648, %v9271_v15  ;;  %vm9350_vm6 = vweird.f32 %v9271_v15 }
 0xb52   : > { %v9139_v33 = vpop.f32.mrf.mxu3  ;;  %v9317_v30 = vsub.f32 1.0, %v9316_v53  ;;  %v9091_v16 = vadd.f32 %v9090_v19, %v9042_v0 }
 0xb53   : > { %vm9355_vm8 = vcmp.eq.f32.partialorder %v9354_v10, 8.507059e+37  ;;  %v9357_v42 = vor.u32 1.1754944e-38, %v9356_v31 }
 0xb54   : > { %v9318_v23 = vmul.f32 %v13481_v51, %v9317_v30  ;;  %v9140_v13 = vadd.f32 %v9139_v33, %v9091_v16  ;;  %v8997_v14 = vpop.f32.mrf.mxu0  ;;  %v9046_v5 = vpop.f32.mrf.mxu1 }
 0xb55   : > { %v8998_v25 = vadd.f32 %v8997_v14, %v16182_v32 }
 0xb56   : > { %v13483_v56 = vpop.eup %13482  ;;  %v9319_v24 = vadd.f32 %v13481_v51, %v9318_v23  ;;  %v12594_v8 = vmul.f32 -1.442695, %v9140_v13 }
 0xb57   : > { %v13485_v18 = vpop.eup %13484  ;;  %v9273_v28 = vadd.f32 1.0, %v13483_v56  ;;  %v9047_v40 = vadd.f32 %v9046_v5, %v8998_v25 }
 0xb58   : > { %v9323_v57 = vsel %vm9322_vm3, %v13481_v51, %v9319_v24  ;;  %v9346_v21 = vmul.f32 %v13485_v18, %v9271_v15  ;;  %13486 = vpow2.f32 %v12594_v8  ;;  %vm9351_vm5 = vweird.f32 %v13485_v18 }
 0xb59   : > { %v9328_v27 = vsel %vm9325_vm4, %v9327_v7, %v9323_v57  ;;  %13488 = vrcp.f32 %v9273_v28  ;;  %v9093_v38 = vpop.f32.mrf.mxu2  ;;  %vm9352_vm7 = vmor %vm9350_vm6, %vm9351_vm5  ;;  %v9384_v39 = vand.u32 2147483647, %v9273_v28  ;;  %v9386_v58 = vand.u32 2147483648, %v9273_v28 }
 0xb5a   : > { %v9142_v36 = vpop.f32.mrf.mxu3  ;;  %9781 = vst [vmem:[%s16140_s24 + $0x8] sm:$0xff] %v9328_v27  ;;  %v9347_v52 = vsub.f32 1.0, %v9346_v21  ;;  %v9094_v54 = vadd.f32 %v9093_v38, %v9045_v50  ;;  %vm9380_vm10 = vweird.f32 %v9273_v28 }
 0xb5b   : > { %vm9385_vm12 = vcmp.eq.f32.partialorder %v9384_v39, 8.507059e+37  ;;  %v9387_v16 = vor.u32 1.1754944e-38, %v9386_v58 }
 0xb5c   : > { %v9348_v17 = vmul.f32 %v13485_v18, %v9347_v52  ;;  %v9143_v62 = vadd.f32 %v9142_v36, %v9094_v54  ;;  %v9000_v6 = vpop.f32.mrf.mxu0  ;;  %v9049_v22 = vpop.f32.mrf.mxu1 }
 0xb5d   : > { %v9001_v11 = vadd.f32 %v9000_v6, %v16196_v2 }
 0xb5e   : > { %v13487_v9 = vpop.eup %13486  ;;  %v9349_v34 = vadd.f32 %v13485_v18, %v9348_v17  ;;  %v12596_v48 = vmul.f32 -1.442695, %v9143_v62 }
 0xb5f   : > { %v13489_v59 = vpop.eup %13488  ;;  %v9275_v49 = vadd.f32 1.0, %v13487_v9  ;;  %v9050_v29 = vadd.f32 %v9049_v22, %v9001_v11 }
 0xb60   : > { %v9353_v3 = vsel %vm9352_vm7, %v13485_v18, %v9349_v34  ;;  %v9376_v45 = vmul.f32 %v13489_v59, %v9273_v28  ;;  %13490 = vpow2.f32 %v12596_v48  ;;  %vm9381_vm9 = vweird.f32 %v13489_v59 }
 0xb61   : > { %v9358_v20 = vsel %vm9355_vm8, %v9357_v42, %v9353_v3  ;;  %13492 = vrcp.f32 %v9275_v49  ;;  %v9095_v32 = vpop.f32.mrf.mxu2  ;;  %vm9382_vm11 = vmor %vm9380_vm10, %vm9381_vm9  ;;  %v9414_v24 = vand.u32 2147483647, %v9275_v49  ;;  %v9416_v8 = vand.u32 2147483648, %v9275_v49 }
 0xb62   : > { %v9144_v43 = vpop.f32.mrf.mxu3  ;;  %9783 = vst [vmem:[%s16140_s24 + $0x18] sm:$0xff] %v9358_v20  ;;  %v9377_v46 = vsub.f32 1.0, %v9376_v45  ;;  %v9096_v12 = vadd.f32 %v9095_v32, %v9047_v40  ;;  %vm9410_vm14 = vweird.f32 %v9275_v49 }
 0xb63   : > { %vm9415_vm0 = vcmp.eq.f32.partialorder %v9414_v24, 8.507059e+37  ;;  %v9417_v52 = vor.u32 1.1754944e-38, %v9416_v8 }
 0xb64   : > { %v9378_v55 = vmul.f32 %v13489_v59, %v9377_v46  ;;  %v9145_v51 = vadd.f32 %v9144_v43, %v9096_v12  ;;  %v9002_v15 = vpop.f32.mrf.mxu0  ;;  %v9051_v53 = vpop.f32.mrf.mxu1 }
 0xb65   : > { %v9003_v7 = vadd.f32 %v9002_v15, %v16210_v63 }
 0xb66   : > { %v13491_v0 = vpop.eup %13490  ;;  %v9379_v19 = vadd.f32 %v13489_v59, %v9378_v55  ;;  %v12598_v33 = vmul.f32 -1.442695, %v9145_v51 }
 0xb67   : > { %v13493_v30 = vpop.eup %13492  ;;  %v9277_v1 = vadd.f32 1.0, %v13491_v0  ;;  %v9052_v17 = vadd.f32 %v9051_v53, %v9003_v7 }
 0xb68   : > { %v9383_v61 = vsel %vm9382_vm11, %v13489_v59, %v9379_v19  ;;  %v9406_v23 = vmul.f32 %v13493_v30, %v9275_v49  ;;  %13494 = vpow2.f32 %v12598_v33  ;;  %vm9411_vm13 = vweird.f32 %v13493_v30 }
 0xb69   : > { %v9388_v13 = vsel %vm9385_vm12, %v9387_v16, %v9383_v61  ;;  %13496 = vrcp.f32 %v9277_v1  ;;  %v9098_v2 = vpop.f32.mrf.mxu2  ;;  %vm9412_vm15 = vmor %vm9410_vm14, %vm9411_vm13  ;;  %v9444_v9 = vand.u32 2147483647, %v9277_v1  ;;  %v9446_v34 = vand.u32 2147483648, %v9277_v1 }
 0xb6a   : > { %v9147_v14 = vpop.f32.mrf.mxu3  ;;  %9785 = vst [vmem:[%s16140_s24 + $0x28] sm:$0xff] %v9388_v13  ;;  %v9407_v5 = vsub.f32 1.0, %v9406_v23  ;;  %v9099_v56 = vadd.f32 %v9098_v2, %v9050_v29  ;;  %vm9440_vm2 = vweird.f32 %v9277_v1 }
 0xb6b   : > { %vm9445_vm4 = vcmp.eq.f32.partialorder %v9444_v9, 8.507059e+37  ;;  %v9447_v43 = vor.u32 1.1754944e-38, %v9446_v34 }
 0xb6c   : > { %v9408_v18 = vmul.f32 %v13493_v30, %v9407_v5  ;;  %v9148_v28 = vadd.f32 %v9147_v14, %v9099_v56  ;;  %v9005_v57 = vpop.f32.mrf.mxu0  ;;  %v9054_v21 = vpop.f32.mrf.mxu1 }
 0xb6d   : > { %v9006_v59 = vadd.f32 %v9005_v57, %v16224_v47 }
 0xb6e   : > { %v13495_v50 = vpop.eup %13494  ;;  %v9409_v27 = vadd.f32 %v13493_v30, %v9408_v18  ;;  %v12600_v38 = vmul.f32 -1.442695, %v9148_v28 }
 0xb6f   : > { %v13497_v36 = vpop.eup %13496  ;;  %v9279_v54 = vadd.f32 1.0, %v13495_v50  ;;  %v9055_v58 = vadd.f32 %v9054_v21, %v9006_v59 }
 0xb70   : > { %v9413_v10 = vsel %vm9412_vm15, %v13493_v30, %v9409_v27  ;;  %v9436_v31 = vmul.f32 %v13497_v36, %v9277_v1  ;;  %13498 = vpow2.f32 %v12600_v38  ;;  %vm9441_vm1 = vweird.f32 %v13497_v36 }
 0xb71   : > { %v9418_v25 = vsel %vm9415_vm0, %v9417_v52, %v9413_v10  ;;  %13500 = vrcp.f32 %v9279_v54  ;;  %v9100_v63 = vpop.f32.mrf.mxu2  ;;  %vm9442_vm3 = vmor %vm9440_vm2, %vm9441_vm1  ;;  %v9474_v53 = vand.u32 2147483647, %v9279_v54  ;;  %v9476_v0 = vand.u32 2147483648, %v9279_v54 }
 0xb72   : > { %v9149_v62 = vpop.f32.mrf.mxu3  ;;  %9787 = vst [vmem:[%s16140_s24 + $0x38] sm:$0xff] %v9418_v25  ;;  %v9437_v6 = vsub.f32 1.0, %v9436_v31  ;;  %v9101_v22 = vadd.f32 %v9100_v63, %v9052_v17  ;;  %vm9470_vm6 = vweird.f32 %v9279_v54 }
 0xb73   : > { %vm9475_vm8 = vcmp.eq.f32.partialorder %v9474_v53, 8.507059e+37  ;;  %v9477_v2 = vor.u32 1.1754944e-38, %v9476_v0 }
 0xb74   : > { %v9438_v48 = vmul.f32 %v13497_v36, %v9437_v6  ;;  %v9150_v42 = vadd.f32 %v9149_v62, %v9101_v22  ;;  %v9007_v49 = vpop.f32.mrf.mxu0  ;;  %v9056_v3 = vpop.f32.mrf.mxu1 }
 0xb75   : > { %v9008_v33 = vadd.f32 %v9007_v49, %v16238_v37 }
 0xb76   : > { %v13499_v45 = vpop.eup %13498  ;;  %v9439_v40 = vadd.f32 %v13497_v36, %v9438_v48  ;;  %v12602_v20 = vmul.f32 -1.442695, %v9150_v42 }
 0xb77   : > { %v13501_v32 = vpop.eup %13500  ;;  %v9281_v46 = vadd.f32 1.0, %v13499_v45  ;;  %v9057_v24 = vadd.f32 %v9056_v3, %v9008_v33 }
 0xb78   : > { %v9443_v12 = vsel %vm9442_vm3, %v13497_v36, %v9439_v40  ;;  %v9466_v39 = vmul.f32 %v13501_v32, %v9279_v54  ;;  %13502 = vpow2.f32 %v12602_v20  ;;  %vm9471_vm5 = vweird.f32 %v13501_v32 }
 0xb79   : > { %v9448_v55 = vsel %vm9445_vm4, %v9447_v43, %v9443_v12  ;;  %13504 = vrcp.f32 %v9281_v46  ;;  %v9103_v47 = vpop.f32.mrf.mxu2  ;;  %vm9472_vm7 = vmor %vm9470_vm6, %vm9471_vm5  ;;  %v9504_v57 = vand.u32 2147483647, %v9281_v46  ;;  %v9506_v21 = vand.u32 2147483648, %v9281_v46 }
 0xb7a   : > { %v9152_v11 = vpop.f32.mrf.mxu3  ;;  %9789 = vst [vmem:[%s16140_s24 + $0x48] sm:$0xff] %v9448_v55  ;;  %v9467_v51 = vsub.f32 1.0, %v9466_v39  ;;  %v9104_v15 = vadd.f32 %v9103_v47, %v9055_v58  ;;  %vm9500_vm10 = vweird.f32 %v9281_v46 }
 0xb7b   : > { %vm9505_vm12 = vcmp.eq.f32.partialorder %v9504_v57, 8.507059e+37  ;;  %v9507_v25 = vor.u32 1.1754944e-38, %v9506_v21 }
 0xb7c   : > { %v9468_v19 = vmul.f32 %v13501_v32, %v9467_v51  ;;  %v9153_v30 = vadd.f32 %v9152_v11, %v9104_v15  ;;  %v9010_v16 = vpop.f32.mrf.mxu0  ;;  %v9059_v1 = vpop.f32.mrf.mxu1 }
 0xb7d   : > { %v9011_v27 = vadd.f32 %v9010_v16, %v16252_v60 }
 0xb7e   : > { %v13503_v61 = vpop.eup %13502  ;;  %v9469_v23 = vadd.f32 %v13501_v32, %v9468_v19  ;;  %v12604_v29 = vmul.f32 -1.442695, %v9153_v30 }
 0xb7f   : > { %v13505_v13 = vpop.eup %13504  ;;  %v9283_v14 = vadd.f32 1.0, %v13503_v61  ;;  %v9060_v22 = vadd.f32 %v9059_v1, %v9011_v27 }
 0xb80   : > { %v9473_v5 = vsel %vm9472_vm7, %v13501_v32, %v9469_v23  ;;  %v9496_v56 = vmul.f32 %v13505_v13, %v9281_v46  ;;  %13506 = vpow2.f32 %v12604_v29  ;;  %vm9501_vm9 = vweird.f32 %v13505_v13 }
 0xb81   : > { %v9478_v8 = vsel %vm9475_vm8, %v9477_v2, %v9473_v5  ;;  %13508 = vrcp.f32 %v9283_v14  ;;  %v9105_v37 = vpop.f32.mrf.mxu2  ;;  %vm9502_vm11 = vmor %vm9500_vm10, %vm9501_vm9  ;;  %v9534_v42 = vand.u32 2147483647, %v9283_v14  ;;  %v9536_v49 = vand.u32 2147483648, %v9283_v14 }
 0xb82   : > { %v9154_v18 = vpop.f32.mrf.mxu3  ;;  %9791 = vst [vmem:[%s16140_s24 + $0x58] sm:$0xff] %v9478_v8  ;;  %v9497_v7 = vsub.f32 1.0, %v9496_v56  ;;  %v9106_v28 = vadd.f32 %v9105_v37, %v9057_v24  ;;  %vm9530_vm14 = vweird.f32 %v9283_v14 }
 0xb83   : > { %vm9535_vm0 = vcmp.eq.f32.partialorder %v9534_v42, 8.507059e+37  ;;  %v9537_v39 = vor.u32 1.1754944e-38, %v9536_v49 }
 0xb84   : > { %v9498_v50 = vmul.f32 %v13505_v13, %v9497_v7  ;;  %v9155_v38 = vadd.f32 %v9154_v18, %v9106_v28  ;;  %v9012_v36 = vpop.f32.mrf.mxu0  ;;  %v9061_v31 = vpop.f32.mrf.mxu1 }
 0xb85   : > { %v9013_v45 = vadd.f32 %v9012_v36, %v16266_v26 }
 0xb86   : > { %v13507_v52 = vpop.eup %13506  ;;  %v9499_v54 = vadd.f32 %v13505_v13, %v9498_v50  ;;  %v12606_v10 = vmul.f32 -1.442695, %v9155_v38 }
 0xb87   : > { %v13509_v17 = vpop.eup %13508  ;;  %v9285_v63 = vadd.f32 1.0, %v13507_v52  ;;  %v9062_v11 = vadd.f32 %v9061_v31, %v9013_v45 }
 0xb88   : > { %v9503_v62 = vsel %vm9502_vm11, %v13505_v13, %v9499_v54  ;;  %v9526_v6 = vmul.f32 %v13509_v17, %v9283_v14  ;;  %13510 = vpow2.f32 %v12606_v10  ;;  %vm9531_vm13 = vweird.f32 %v13509_v17 }
 0xb89   : > { %v9508_v9 = vsel %vm9505_vm12, %v9507_v25, %v9503_v62  ;;  %13512 = vrcp.f32 %v9285_v63  ;;  %v9108_v60 = vpop.f32.mrf.mxu2  ;;  %vm9532_vm15 = vmor %vm9530_vm14, %vm9531_vm13  ;;  %v9564_v33 = vand.u32 2147483647, %v9285_v63  ;;  %v9566_v30 = vand.u32 2147483648, %v9285_v63 }
 0xb8a   : > { %v9157_v34 = vpop.f32.mrf.mxu3  ;;  %9793 = vst [vmem:[%s16140_s24 + $0x68] sm:$0xff] %v9508_v9  ;;  %v9527_v48 = vsub.f32 1.0, %v9526_v6  ;;  %v9109_v59 = vadd.f32 %v9108_v60, %v9060_v22  ;;  %vm9560_vm2 = vweird.f32 %v9285_v63 }
 0xb8b   : > { %vm9565_vm4 = vcmp.eq.f32.partialorder %v9564_v33, 8.507059e+37  ;;  %v9567_v5 = vor.u32 1.1754944e-38, %v9566_v30 }
 0xb8c   : > { %v9528_v3 = vmul.f32 %v13509_v17, %v9527_v48  ;;  %v9158_v40 = vadd.f32 %v9157_v34, %v9109_v59  ;;  %v9015_v20 = vpop.f32.mrf.mxu0  ;;  %v9064_v51 = vpop.f32.mrf.mxu1 }
 0xb8d   : > { %v9016_v1 = vadd.f32 %v9015_v20, %v16280_v4 }
 0xb8e   : > { %v13511_v32 = vpop.eup %13510  ;;  %v9529_v43 = vadd.f32 %v13509_v17, %v9528_v3  ;;  %v12608_v46 = vmul.f32 -1.442695, %v9158_v40 }
 0xb8f   : > { %v13513_v12 = vpop.eup %13512  ;;  %v9287_v58 = vadd.f32 1.0, %v13511_v32  ;;  %v9065_v37 = vadd.f32 %v9064_v51, %v9016_v1 }
 0xb90   : > { %v9533_v55 = vsel %vm9532_vm15, %v13509_v17, %v9529_v43  ;;  %v9556_v47 = vmul.f32 %v13513_v12, %v9285_v63  ;;  %13514 = vpow2.f32 %v12608_v46  ;;  %vm9561_vm1 = vweird.f32 %v13513_v12 }
 0xb91   : > { %v9538_v15 = vsel %vm9535_vm0, %v9537_v39, %v9533_v55  ;;  %13516 = vrcp.f32 %v9287_v58  ;;  %v9110_v26 = vpop.f32.mrf.mxu2  ;;  %vm9562_vm3 = vmor %vm9560_vm2, %vm9561_vm1  ;;  %v9594_v21 = vand.u32 2147483647, %v9287_v58  ;;  %v9596_v50 = vand.u32 2147483648, %v9287_v58 }
 0xb92   : > { %v9159_v53 = vpop.f32.mrf.mxu3  ;;  %9795 = vst [vmem:[%s16140_s24 + $0x78] sm:$0xff] %v9538_v15  ;;  %v9557_v0 = vsub.f32 1.0, %v9556_v47  ;;  %v9111_v19 = vadd.f32 %v9110_v26, %v9062_v11  ;;  %vm9590_vm6 = vweird.f32 %v9287_v58 }
 0xb93   : > { %vm9595_vm8 = vcmp.eq.f32.partialorder %v9594_v21, 8.507059e+37  ;;  %v9597_v63 = vor.u32 1.1754944e-38, %v9596_v50 }
 0xb94   : > { %v9558_v16 = vmul.f32 %v13513_v12, %v9557_v0  ;;  %v9160_v61 = vadd.f32 %v9159_v53, %v9111_v19  ;;  %v9017_v23 = vpop.f32.mrf.mxu0  ;;  %v9066_v27 = vpop.f32.mrf.mxu1 }
 0xb95   : > { %v9018_v36 = vadd.f32 %v9017_v23, %v16291_v44 }
 0xb96   : > { %v13515_v29 = vpop.eup %13514  ;;  %v9559_v13 = vadd.f32 %v13513_v12, %v9558_v16  ;;  %v12610_v2 = vmul.f32 -1.442695, %v9160_v61 }
 0xb97   : > { %v13517_v14 = vpop.eup %13516  ;;  %v9289_v56 = vadd.f32 1.0, %v13515_v29  ;;  %v9067_v9 = vadd.f32 %v9066_v27, %v9018_v36 }
 0xb98   : > { %v9563_v24 = vsel %vm9562_vm3, %v13513_v12, %v9559_v13  ;;  %v9586_v8 = vmul.f32 %v13517_v14, %v9287_v58  ;;  %13518 = vpow2.f32 %v12610_v2  ;;  %vm9591_vm5 = vweird.f32 %v13517_v14 }
 0xb99   : > { %v9568_v18 = vsel %vm9565_vm4, %v9567_v5, %v9563_v24  ;;  %13520 = vrcp.f32 %v9289_v56  ;;  %v9113_v7 = vpop.f32.mrf.mxu2  ;;  %vm9592_vm7 = vmor %vm9590_vm6, %vm9591_vm5  ;;  %v9624_v42 = vand.u32 2147483647, %v9289_v56  ;;  %v9626_v49 = vand.u32 2147483648, %v9289_v56 }
 0xb9a   : > { %v9162_v4 = vpop.f32.mrf.mxu3  ;;  %9797 = vst [vmem:[%s16140_s24 + $0x88] sm:$0xff] %v9568_v18  ;;  %v9587_v28 = vsub.f32 1.0, %v9586_v8  ;;  %v9114_v57 = vadd.f32 %v9113_v7, %v9065_v37  ;;  %vm9620_vm10 = vweird.f32 %v9289_v56 }
 0xb9b   : > { %vm9625_vm12 = vcmp.eq.f32.partialorder %v9624_v42, 8.507059e+37  ;;  %v9627_v39 = vor.u32 1.1754944e-38, %v9626_v49 }
 0xb9c   : > { %v9588_v38 = vmul.f32 %v13517_v14, %v9587_v28  ;;  %v9163_v52 = vadd.f32 %v9162_v4, %v9114_v57  ;;  %v9020_v17 = vpop.f32.mrf.mxu0  ;;  %v9069_v20 = vpop.f32.mrf.mxu1 }
 0xb9d   : > { %v9021_v45 = vadd.f32 %v9020_v17, %v16301_v35 }
 0xb9e   : > { %v13519_v54 = vpop.eup %13518  ;;  %v9589_v10 = vadd.f32 %v13517_v14, %v9588_v38  ;;  %v12612_v31 = vmul.f32 -1.442695, %v9163_v52 }
 0xb9f   : > { %v13521_v25 = vpop.eup %13520  ;;  %v9291_v62 = vadd.f32 1.0, %v13519_v54  ;;  %v9070_v11 = vadd.f32 %v9069_v20, %v9021_v45 }
 0xba0   : > { %v9593_v6 = vsel %vm9592_vm7, %v13517_v14, %v9589_v10  ;;  %v9616_v22 = vmul.f32 %v13521_v25, %v9289_v56  ;;  %13522 = vpow2.f32 %v12612_v31  ;;  %vm9621_vm9 = vweird.f32 %v13521_v25 }
 0xba1   : > { %v9598_v60 = vsel %vm9595_vm8, %v9597_v63, %v9593_v6  ;;  %13524 = vrcp.f32 %v9291_v62  ;;  %v9115_v34 = vpop.f32.mrf.mxu2  ;;  %vm9622_vm11 = vmor %vm9620_vm10, %vm9621_vm9  ;;  %v9654_v19 = vand.u32 2147483647, %v9291_v62  ;;  %v9656_v33 = vand.u32 2147483648, %v9291_v62 }
 0xba2   : > { %v9164_v44 = vpop.f32.mrf.mxu3  ;;  %9799 = vst [vmem:[%s16140_s24 + $0x98] sm:$0xff] %v9598_v60  ;;  %v9617_v48 = vsub.f32 1.0, %v9616_v22  ;;  %v9116_v59 = vadd.f32 %v9115_v34, %v9067_v9  ;;  %vm9650_vm14 = vweird.f32 %v9291_v62 }
 0xba3   : > { %vm9655_vm0 = vcmp.eq.f32.partialorder %v9654_v19, 8.507059e+37  ;;  %v9657_v2 = vor.u32 1.1754944e-38, %v9656_v33 }
 0xba4   : > { %v9618_v3 = vmul.f32 %v13521_v25, %v9617_v48  ;;  %v9165_v40 = vadd.f32 %v9164_v44, %v9116_v59  ;;  %v9022_v51 = vpop.f32.mrf.mxu0  ;;  %v9071_v5 = vpop.f32.mrf.mxu1 }
 0xba5   : > { %v9023_v16 = vadd.f32 %v9022_v51, %v16306_v41 }
 0xba6   : > { %v13523_v32 = vpop.eup %13522  ;;  %v9619_v43 = vadd.f32 %v13521_v25, %v9618_v3  ;;  %v12614_v46 = vmul.f32 -1.442695, %v9165_v40 }
 0xba7   : > { %v13525_v12 = vpop.eup %13524  ;;  %v9293_v58 = vadd.f32 1.0, %v13523_v32  ;;  %v9072_v8 = vadd.f32 %v9071_v5, %v9023_v16 }
 0xba8   : > { %v9623_v55 = vsel %vm9622_vm11, %v13521_v25, %v9619_v43  ;;  %v9646_v47 = vmul.f32 %v13525_v12, %v9291_v62  ;;  %13526 = vpow2.f32 %v12614_v46  ;;  %vm9651_vm13 = vweird.f32 %v13525_v12 }
 0xba9   : > { %v9628_v15 = vsel %vm9625_vm12, %v9627_v39, %v9623_v55  ;;  %13528 = vrcp.f32 %v9293_v58  ;;  %v9118_v35 = vpop.f32.mrf.mxu2  ;;  %vm9652_vm15 = vmor %vm9650_vm14, %vm9651_vm13  ;;  %v9686_v4 = vand.u32 2147483648, %v9293_v58  ;;  %v9684_v21 = vand.u32 2147483647, %v9293_v58 }
 0xbaa   : > { %v9167_v26 = vpop.f32.mrf.mxu3  ;;  %9801 = vst [vmem:[%s16140_s24 + $0xa8] sm:$0xff] %v9628_v15  ;;  %v9647_v53 = vsub.f32 1.0, %v9646_v47  ;;  %v9119_v0 = vadd.f32 %v9118_v35, %v9070_v11  ;;  %vm9680_vm2 = vweird.f32 %v9293_v58 }
 0xbab   : > { %v9687_v54 = vor.u32 1.1754944e-38, %v9686_v4  ;;  %vm9685_vm4 = vcmp.eq.f32.partialorder %v9684_v21, 8.507059e+37 }
 0xbac   : > { %v9648_v30 = vmul.f32 %v13525_v12, %v9647_v53  ;;  %v9168_v1 = vadd.f32 %v9167_v26, %v9119_v0 }
 0xbae   : > { %v13527_v61 = vpop.eup %13526  ;;  %v9649_v23 = vadd.f32 %v13525_v12, %v9648_v30  ;;  %v12616_v29 = vmul.f32 -1.442695, %v9168_v1 }
 0xbaf   : > { %v13529_v13 = vpop.eup %13528  ;;  %v9295_v14 = vadd.f32 1.0, %v13527_v61 }
 0xbb0   : > { %v9653_v56 = vsel %vm9652_vm15, %v13525_v12, %v9649_v23  ;;  %v9676_v24 = vmul.f32 %v13529_v13, %v9293_v58  ;;  %13530 = vpow2.f32 %v12616_v29  ;;  %vm9681_vm1 = vweird.f32 %v13529_v13 }
 0xbb1   : > { %v9658_v37 = vsel %vm9655_vm0, %v9657_v2, %v9653_v56  ;;  %13532 = vrcp.f32 %v9295_v14  ;;  %v9120_v18 = vpop.f32.mrf.mxu2  ;;  %vm9682_vm3 = vmor %vm9680_vm2, %vm9681_vm1  ;;  %v9716_v62 = vand.u32 2147483648, %v9295_v14  ;;  %v9714_v22 = vand.u32 2147483647, %v9295_v14 }
 0xbb2   : > { %9803 = vst [vmem:[%s16140_s24 + $0xb8] sm:$0xff] %v9658_v37  ;;  %v9677_v41 = vsub.f32 1.0, %v9676_v24  ;;  %v9121_v7 = vadd.f32 %v9120_v18, %v9072_v8  ;;  %v9169_v28 = vpop.f32.mrf.mxu3  ;;  %vm9710_vm6 = vweird.f32 %v9295_v14 }
 0xbb3   : > { %v9717_v44 = vor.u32 1.1754944e-38, %v9716_v62  ;;  %vm9715_vm8 = vcmp.eq.f32.partialorder %v9714_v22, 8.507059e+37 }
 0xbb4   : > { %v9678_v57 = vmul.f32 %v13529_v13, %v9677_v41  ;;  %v9170_v50 = vadd.f32 %v9169_v28, %v9121_v7 }
 0xbb6   : > { %v13531_v27 = vpop.eup %13530  ;;  %v9679_v38 = vadd.f32 %v13529_v13, %v9678_v57  ;;  %v12618_v36 = vmul.f32 -1.442695, %v9170_v50 }
 0xbb7   : > { %v13533_v52 = vpop.eup %13532  ;;  %v9297_v10 = vadd.f32 1.0, %v13531_v27 }
 0xbb8   : > { %v9683_v31 = vsel %vm9682_vm3, %v13529_v13, %v9679_v38  ;;  %v9706_v17 = vmul.f32 %v13533_v52, %v9295_v14  ;;  %13534 = vpow2.f32 %v12618_v36  ;;  %vm9711_vm5 = vweird.f32 %v13533_v52 }
 0xbb9   : > { %v9688_v25 = vsel %vm9685_vm4, %v9687_v54, %v9683_v31  ;;  %13536 = vrcp.f32 %v9297_v10  ;;  %vm9712_vm7 = vmor %vm9710_vm6, %vm9711_vm5  ;;  %v9746_v45 = vand.u32 2147483648, %v9297_v10  ;;  %v9744_v20 = vand.u32 2147483647, %v9297_v10 }
 0xbba   : > { %9805 = vst [vmem:[%s16140_s24 + $0xc8] sm:$0xff] %v9688_v25  ;;  %v9707_v63 = vsub.f32 1.0, %v9706_v17  ;;  %vm9740_vm10 = vweird.f32 %v9297_v10 }
 0xbbb   : > { %v9747_v46 = vor.u32 1.1754944e-38, %v9746_v45  ;;  %vm9745_vm12 = vcmp.eq.f32.partialorder %v9744_v20, 8.507059e+37 }
 0xbbc   : > { %v9708_v6 = vmul.f32 %v13533_v52, %v9707_v63 }
 0xbbe   : > { %v13535_v9 = vpop.eup %13534  ;;  %v9709_v60 = vadd.f32 %v13533_v52, %v9708_v6 }
 0xbbf   : > { %v13537_v34 = vpop.eup %13536  ;;  %v9299_v48 = vadd.f32 1.0, %v13535_v9 }
 0xbc0   : > { %v9713_v59 = vsel %vm9712_vm7, %v13533_v52, %v9709_v60  ;;  %v9736_v42 = vmul.f32 %v13537_v34, %v9297_v10  ;;  %vm9741_vm9 = vweird.f32 %v13537_v34 }
 0xbc1   : > { %v9718_v49 = vsel %vm9715_vm8, %v9717_v44, %v9713_v59  ;;  %13538 = vrcp.f32 %v9299_v48  ;;  %vm9742_vm11 = vmor %vm9740_vm10, %vm9741_vm9  ;;  %v9776_v47 = vand.u32 2147483648, %v9299_v48  ;;  %v9774_v51 = vand.u32 2147483647, %v9299_v48 }
 0xbc2   : > { %9807 = vst [vmem:[%s16140_s24 + $0xd8] sm:$0xff] %v9718_v49  ;;  %v9737_v3 = vsub.f32 1.0, %v9736_v42  ;;  %vm9770_vm14 = vweird.f32 %v9299_v48 }
 0xbc3   : > { %v9777_v35 = vor.u32 1.1754944e-38, %v9776_v47  ;;  %vm9775_vm0 = vcmp.eq.f32.partialorder %v9774_v51, 8.507059e+37 }
 0xbc4   : > { %v9738_v40 = vmul.f32 %v13537_v34, %v9737_v3 }
 0xbc6   : > { %v9739_v32 = vadd.f32 %v13537_v34, %v9738_v40 }
 0xbc7   : > { %v13539_v43 = vpop.eup %13538 }
 0xbc8   : > { %v9743_v12 = vsel %vm9742_vm11, %v13537_v34, %v9739_v32  ;;  %v9766_v39 = vmul.f32 %v13539_v43, %v9299_v48  ;;  %vm9771_vm13 = vweird.f32 %v13539_v43 }
 0xbc9   : > { %v9748_v58 = vsel %vm9745_vm12, %v9747_v46, %v9743_v12  ;;  %vm9772_vm15 = vmor %vm9770_vm14, %vm9771_vm13 }
 0xbca   : > { %9809 = vst [vmem:[%s16140_s24 + $0xe8] sm:$0xff] %v9748_v58  ;;  %v9767_v55 = vsub.f32 1.0, %v9766_v39 }
 0xbcc   : > { %v9768_v11 = vmul.f32 %v13539_v43, %v9767_v55 }
 0xbce   : > { %v9769_v15 = vadd.f32 %v13539_v43, %v9768_v11 }
 0xbd0   : > { %v9773_v26 = vsel %vm9772_vm15, %v13539_v43, %v9769_v15 }
 0xbd1   : > { %v9778_v53 = vsel %vm9775_vm0, %v9777_v35, %v9773_v26 }
 0xbd2   : > { %9811 = vst [vmem:[%s16140_s24 + $0xf8] sm:$0xff] %v9778_v53 }
 0xbd3   : > { %13811 = shalt.err (!%p13808_p10)
}
 0xbd4   : > { %s13882_s4 = smov 256   ;;  %s13883_s24 = smov 16  }
 0xbd5   : > { %13283 = dma.vmem_to_hbm [thread:$0]  (%p14069_p13), %s9848_s25, 4096, %s9850_s5, %s9829_s1, %s13882_s4, %s13882_s4, %s13883_s24  }
 0xbd6 PF: > { %s9868_s14 = sand.u32 1, %s13854_s18   ;;  %p16645_p11 = scmp.ge.s32.totalorder %s13866_s21, 2 }
 0xbd7   : > { %s9869_s29 = scalar_lea.sflag [#allocation4], %s9868_s14 }
 0xbd8   : > { %p13312_p0 = pnand %p16645_p11, %p14074_p4 }
 0xbda   : > { %p13313_p2 = pneg %p13312_p0 }
 0xbdc   : > { %13849 = dma.done.wait (%p13313_p2), %s9869_s29, 4096  }
 0xbdd   : > { %13851 = vsyncadd (%p13313_p2), %s9869_s29, 4294963200  ;;  %p33_p6 = scmp.ge.s32.totalorder %s14049_s11, 4   ;;  %s16646_s18 = smov %s13858_s19 }
 0xbde   : > { %s16647_s19 = smov %s13862_s20  ;;  %s16648_s20 = smov %s14061_s23 }
 0xbdf   : > { %s16649_s21 = smov %s14049_s11  ;;  %35 = sbr.rel (!%p33_p6) target bundleno = 19 (0x13), region = 164 }
 0xbe4   :  { %9883 = vsyncpa [#allocation3], 1 }
 0xbe5   :  { %9885 = vsyncpa [#allocation3 + $0x1], 1 }
 0xbe6   :  { %9886 = vsyncpa [#allocation6], 1 }
 0xbe7   :  { %9887 = vsyncpa [#allocation9], 1 }
 0xbe8   :  { %9888 = vsyncpa [#allocation12], 1 }
 0xbe9   :  { %9889 = vsyncpa [#allocation15], 1 }
 0xbea   :  { %9890 = vsyncpa [#allocation4], 1 }
 0xbeb   :  { %9892 = vsyncpa [#allocation4 + $0x1], 1 }

</bundles_post_ra>
